<compile_context>
chip_gen: v7x
topology: tpu7x:2x2x1
jax: 0.10.0
libtpu: 0.0.40
codegen_flags: <defaults>
</compile_context>

<pallas_src>
import jax
import jax.numpy as jnp
from jax.experimental import pallas as pl
from jax.experimental.pallas import tpu as pltpu


def make_fire(inplanes, squeeze_planes, expand1x1_planes, expand3x3_planes,
              H, W, pad_fire=2, batch_tile=None):
    assert pad_fire == 2, "concat only shape-checks for pad_fire=2 (module default)"
    Cin, Cs, C1, C3 = inplanes, squeeze_planes, expand1x1_planes, expand3x3_planes
    Co = C1 + C3
    Hs, Ws = H + 2 * pad_fire, W + 2 * pad_fire        # squeeze conv output spatial
    Ho, Wo = Hs + 2, Ws + 2                            # expand output spatial (both branches)
    Hb, Wb = Hs + 2 * pad_fire, Ws + 2 * pad_fire      # squeeze output zero-padded for the 3x3

    def dot_ch(x3d, w):
        # contract the channel (last) axis on the MXU: (m, w, ci) x (ci, co) -> (m, w, co)
        return jax.lax.dot_general(
            x3d, w, (((2,), (0,)), ((), ())),
            preferred_element_type=jnp.float32)

    def kernel(x_ref, ws_ref, bs_ref, wf_ref, bf_ref, out_ref, sbuf):
        bn = x_ref.shape[0]

        # ---- squeeze: 1x1 conv + ReLU on the UNPADDED interior -------------------
        # (the conv's zero padding is handled analytically below: padded rows/cols
        #  of the squeeze output are simply relu(bias))
        x3 = x_ref[...].reshape(bn * H, W, Cin)                      # leading-dim collapse only
        s = jnp.maximum(dot_ch(x3, ws_ref[...]) + bs_ref[...], 0.0)  # (bn*H, W, Cs)

        # ---- padded squeeze activation in VMEM scratch ----------------------------
        #  outer pad_fire ring     : 0         (zero padding for the 3x3 expand conv)
        #  squeeze conv pad border : relu(bs)  (zero input rows -> bias -> ReLU)
        #  interior                : computed squeeze activation
        # (single grid step -> this zero fill happens once, not per batch element)
        sbuf[...] = jnp.zeros(sbuf.shape, sbuf.dtype)
        sbuf[:, pad_fire:pad_fire + Hs, pad_fire:pad_fire + Ws, :] = jnp.broadcast_to(
            jnp.maximum(bs_ref[...], 0.0), (bn, Hs, Ws, Cs))
        p2 = 2 * pad_fire
        sbuf[:, p2:p2 + H, p2:p2 + W, :] = s.reshape(bn, H, W, Cs)

        # ---- fused expand: im2col (9 taps) + ONE matmul ---------------------------
        # wf already encodes both branches, so a single dot yields the
        # channel-concatenated [expand1x1 | expand3x3] result directly.
        taps = [sbuf[:, dy:dy + Ho, dx:dx + Wo, :]
                for dy in range(3) for dx in range(3)]               # 9 x (bn, Ho, Wo, Cs)
        patches = jnp.concatenate(taps, axis=-1)                     # (bn, Ho, Wo, 9*Cs)
        e = jnp.maximum(
            dot_ch(patches.reshape(bn * Ho, Wo, 9 * Cs), wf_ref[...]) + bf_ref[...],
            0.0)                                                     # (bn*Ho, Wo, C1+C3)

        # ---- single full-block store of the concatenated output ------------------
        out_ref[...] = e.reshape(bn, Ho, Wo, Co).astype(out_ref.dtype)

    def fire(x_nhwc, ws, bs, w1, b1, w3, b3):
        N = x_nhwc.shape[0]
        bn = N if batch_tile is None else batch_tile
        assert N % bn == 0

        # fused expand weight/bias (one-time parameter prep, outside the kernel):
        #   rows [t*Cs:(t+1)*Cs] of wf correspond to im2col tap t = dy*3 + dx
        #   cols [:C1]  -> expand1x1 (only the center tap t=4 is nonzero)
        #   cols [C1:]  -> expand3x3
        wf = jnp.zeros((9, Cs, Co), jnp.float32)
        wf = wf.at[:, :, C1:].set(w3.reshape(9, Cs, C3))
        wf = wf.at[4, :, :C1].set(w1)
        wf = wf.reshape(9 * Cs, Co)
        bf = jnp.concatenate([b1, b3]).reshape(1, Co)
        bs2 = bs.reshape(1, Cs)

        return pl.pallas_call(
            kernel,
            out_shape=jax.ShapeDtypeStruct((N, Ho, Wo, Co), jnp.float32),
            grid_spec=pltpu.PrefetchScalarGridSpec(
                num_scalar_prefetch=0,
                grid=(N // bn,),
                in_specs=[
                    pl.BlockSpec((bn, H, W, Cin), lambda n: (n, 0, 0, 0)),
                    pl.BlockSpec((Cin, Cs), lambda n: (0, 0)),
                    pl.BlockSpec((1, Cs), lambda n: (0, 0)),
                    pl.BlockSpec((9 * Cs, Co), lambda n: (0, 0)),
                    pl.BlockSpec((1, Co), lambda n: (0, 0)),
                ],
                out_specs=pl.BlockSpec((bn, Ho, Wo, Co), lambda n: (n, 0, 0, 0)),
                scratch_shapes=[pltpu.VMEM((bn, Hb, Wb, Cs), jnp.float32)],
            ),
            compiler_params=pltpu.CompilerParams(
                dimension_semantics=("parallel",)),
        )(x_nhwc, ws, bs2, wf, bf)

    return fire


def fire_ref(x_nchw, ws, bs, w1, b1, w3, b3, pad_fire=2):
    # Pure-JAX reference in PyTorch's NCHW convention.
    def conv(x, w_oihw, b, pad):
        y = jax.lax.conv_general_dilated(
            x, w_oihw, (1, 1), [(pad, pad), (pad, pad)],
            dimension_numbers=('NCHW', 'OIHW', 'NCHW'))
        return y + b.reshape(1, -1, 1, 1)
    s = jax.nn.relu(conv(x_nchw, jnp.transpose(ws, (1, 0))[:, :, None, None], bs, pad_fire))
    e1 = jax.nn.relu(conv(s, jnp.transpose(w1, (1, 0))[:, :, None, None], b1, 1))
    e3 = jax.nn.relu(conv(s, jnp.transpose(w3, (3, 2, 0, 1)), b3, pad_fire))
    return jnp.concatenate([e1, e3], axis=1)


if __name__ == "__main__":
    # small Fire(inplanes=8, squeeze=4, expand1x1=8, expand3x3=8), input 2x8x10x12 (NCHW)
    N, Cin, H, W = 2, 8, 10, 12
    Cs, C1, C3 = 4, 8, 8
    pad_fire = 2

    key = jax.random.PRNGKey(0)
    kx, k1, k2, k3, k4, k5, k6 = jax.random.split(key, 7)
    x_nchw = jax.random.normal(kx, (N, Cin, H, W), dtype=jnp.float32)

    # kernel-friendly parameter layouts: [Cin, Cout] for 1x1, [kh, kw, Cin, Cout] for 3x3
    ws = 0.1 * jax.random.normal(k1, (Cin, Cs), dtype=jnp.float32)
    bs = 0.1 * jax.random.normal(k2, (Cs,), dtype=jnp.float32)
    w1 = 0.1 * jax.random.normal(k3, (Cs, C1), dtype=jnp.float32)
    b1 = 0.1 * jax.random.normal(k4, (C1,), dtype=jnp.float32)
    w3 = 0.1 * jax.random.normal(k5, (3, 3, Cs, C3), dtype=jnp.float32)
    b3 = 0.1 * jax.random.normal(k6, (C3,), dtype=jnp.float32)

    fire = make_fire(Cin, Cs, C1, C3, H, W, pad_fire)
    x_nhwc = jnp.transpose(x_nchw, (0, 2, 3, 1))
    out_nhwc = jax.block_until_ready(fire(x_nhwc, ws, bs, w1, b1, w3, b3))

    ref_nchw = fire_ref(x_nchw, ws, bs, w1, b1, w3, b3, pad_fire)
    ref_nhwc = jnp.transpose(ref_nchw, (0, 2, 3, 1))

    assert out_nhwc.shape == (N, H + 2 * pad_fire + 2, W + 2 * pad_fire + 2, C1 + C3), out_nhwc.shape
    assert jnp.allclose(out_nhwc, ref_nhwc, atol=2e-2, rtol=2e-2), \
        float(jnp.max(jnp.abs(out_nhwc - ref_nhwc)))
    print("KERNEL_OK")
</pallas_src>

<mosaic_0001>
module attributes {stable_mosaic.version = 11 : i64} {
  func.func @kernel(%arg0: i32, %arg1: memref<2x10x12x8xf32, #tpu.memory_space<vmem>>, %arg2: memref<8x4xf32, #tpu.memory_space<vmem>>, %arg3: memref<1x4xf32, #tpu.memory_space<vmem>>, %arg4: memref<36x16xf32, #tpu.memory_space<vmem>>, %arg5: memref<1x16xf32, #tpu.memory_space<vmem>>, %arg6: memref<2x16x18x16xf32, #tpu.memory_space<vmem>>, %arg7: memref<2x18x20x4xf32, #tpu.memory_space<vmem>>) attributes {dimension_semantics = [#tpu.dimension_semantics<parallel>], iteration_bounds = array<i64: 1>, scalar_prefetch = 0 : i64, scratch_operands = 1 : i64, tpu.core_type = #tpu.core_type<tc>, window_params = [{transform_indices = @transform_0, window_bounds = array<i64: 2, 10, 12, 8>}, {pipeline_mode = #tpu.pipeline_mode<synchronous>, transform_indices = @transform_1, window_bounds = array<i64: 8, 4>}, {pipeline_mode = #tpu.pipeline_mode<synchronous>, transform_indices = @transform_2, window_bounds = array<i64: 1, 4>}, {pipeline_mode = #tpu.pipeline_mode<synchronous>, transform_indices = @transform_3, window_bounds = array<i64: 36, 16>}, {pipeline_mode = #tpu.pipeline_mode<synchronous>, transform_indices = @transform_4, window_bounds = array<i64: 1, 16>}, {transform_indices = @transform_5, window_bounds = array<i64: 2, 16, 18, 16>}]} {
    %c0 = arith.constant 0 : index
    %c0_0 = arith.constant 0 : index
    %c0_1 = arith.constant 0 : index
    %c0_2 = arith.constant 0 : index
    %0 = vector.load %arg1[%c0, %c0_0, %c0_1, %c0_2] : memref<2x10x12x8xf32, #tpu.memory_space<vmem>>, vector<2x10x12x8xf32>
    %1 = vector.shape_cast %0 : vector<2x10x12x8xf32> to vector<20x12x8xf32>
    %c0_3 = arith.constant 0 : index
    %c0_4 = arith.constant 0 : index
    %2 = vector.load %arg2[%c0_3, %c0_4] : memref<8x4xf32, #tpu.memory_space<vmem>>, vector<8x4xf32>
    %cst = arith.constant dense<0.000000e+00> : vector<20x12x4xf32>
    %3 = tpu.matmul %1, %2, %cst {dimension_numbers = #tpu.dot_dimension_numbers<[2], [0], [0, 1], [1], [0, 0, 0, 1, 1, 1], [], []>} : vector<20x12x8xf32>, vector<8x4xf32>, vector<20x12x4xf32> -> vector<20x12x4xf32>
    %c0_5 = arith.constant 0 : index
    %c0_6 = arith.constant 0 : index
    %4 = vector.load %arg3[%c0_5, %c0_6] : memref<1x4xf32, #tpu.memory_space<vmem>>, vector<1x4xf32>
    %5 = vector.shape_cast %4 : vector<1x4xf32> to vector<1x1x4xf32>
    %6 = vector.broadcast %5 : vector<1x1x4xf32> to vector<20x12x4xf32>
    %7 = arith.addf %3, %6 : vector<20x12x4xf32>
    %cst_7 = arith.constant 0.000000e+00 : f32
    %8 = vector.broadcast %cst_7 : f32 to vector<20x12x4xf32>
    %9 = arith.maximumf %7, %8 : vector<20x12x4xf32>
    %cst_8 = arith.constant 0.000000e+00 : f32
    %10 = vector.broadcast %cst_8 : f32 to vector<2x18x20x4xf32>
    %c0_9 = arith.constant 0 : index
    %c0_10 = arith.constant 0 : index
    %c0_11 = arith.constant 0 : index
    %c0_12 = arith.constant 0 : index
    %11 = vector.load %arg7[%c0_9, %c0_10, %c0_11, %c0_12] : memref<2x18x20x4xf32, #tpu.memory_space<vmem>>, vector<2x18x20x4xf32>
    tpu.vector_store %arg7[%c0_9, %c0_10, %c0_11, %c0_12], %10 {strides = array<i32>} : memref<2x18x20x4xf32, #tpu.memory_space<vmem>>, vector<2x18x20x4xf32>,
    %c0_13 = arith.constant 0 : index
    %c0_14 = arith.constant 0 : index
    %12 = vector.load %arg3[%c0_13, %c0_14] : memref<1x4xf32, #tpu.memory_space<vmem>>, vector<1x4xf32>
    %cst_15 = arith.constant 0.000000e+00 : f32
    %13 = vector.broadcast %cst_15 : f32 to vector<1x4xf32>
    %14 = arith.maximumf %12, %13 : vector<1x4xf32>
    %15 = vector.shape_cast %14 : vector<1x4xf32> to vector<1x1x1x4xf32>
    %16 = vector.broadcast %15 : vector<1x1x1x4xf32> to vector<2x14x16x4xf32>
    %c0_16 = arith.constant 0 : index
    %c2 = arith.constant 2 : index
    %c2_17 = arith.constant 2 : index
    %c0_18 = arith.constant 0 : index
    %17 = vector.load %arg7[%c0_16, %c2, %c2_17, %c0_18] : memref<2x18x20x4xf32, #tpu.memory_space<vmem>>, vector<2x14x16x4xf32>
    tpu.vector_store %arg7[%c0_16, %c2, %c2_17, %c0_18], %16 {strides = array<i32>} : memref<2x18x20x4xf32, #tpu.memory_space<vmem>>, vector<2x14x16x4xf32>,
    %18 = vector.shape_cast %9 : vector<20x12x4xf32> to vector<2x10x12x4xf32>
    %c0_19 = arith.constant 0 : index
    %c4 = arith.constant 4 : index
    %c4_20 = arith.constant 4 : index
    %c0_21 = arith.constant 0 : index
    %19 = vector.load %arg7[%c0_19, %c4, %c4_20, %c0_21] : memref<2x18x20x4xf32, #tpu.memory_space<vmem>>, vector<2x10x12x4xf32>
    tpu.vector_store %arg7[%c0_19, %c4, %c4_20, %c0_21], %18 {strides = array<i32>} : memref<2x18x20x4xf32, #tpu.memory_space<vmem>>, vector<2x10x12x4xf32>,
    %c0_22 = arith.constant 0 : index
    %c0_23 = arith.constant 0 : index
    %c0_24 = arith.constant 0 : index
    %c0_25 = arith.constant 0 : index
    %20 = vector.load %arg7[%c0_22, %c0_23, %c0_24, %c0_25] : memref<2x18x20x4xf32, #tpu.memory_space<vmem>>, vector<2x16x18x4xf32>
    %c0_26 = arith.constant 0 : index
    %c0_27 = arith.constant 0 : index
    %c1 = arith.constant 1 : index
    %c0_28 = arith.constant 0 : index
    %21 = vector.load %arg7[%c0_26, %c0_27, %c1, %c0_28] : memref<2x18x20x4xf32, #tpu.memory_space<vmem>>, vector<2x16x18x4xf32>
    %c0_29 = arith.constant 0 : index
    %c0_30 = arith.constant 0 : index
    %c2_31 = arith.constant 2 : index
    %c0_32 = arith.constant 0 : index
    %22 = vector.load %arg7[%c0_29, %c0_30, %c2_31, %c0_32] : memref<2x18x20x4xf32, #tpu.memory_space<vmem>>, vector<2x16x18x4xf32>
    %c0_33 = arith.constant 0 : index
    %c1_34 = arith.constant 1 : index
    %c0_35 = arith.constant 0 : index
    %c0_36 = arith.constant 0 : index
    %23 = vector.load %arg7[%c0_33, %c1_34, %c0_35, %c0_36] : memref<2x18x20x4xf32, #tpu.memory_space<vmem>>, vector<2x16x18x4xf32>
    %c0_37 = arith.constant 0 : index
    %c1_38 = arith.constant 1 : index
    %c1_39 = arith.constant 1 : index
    %c0_40 = arith.constant 0 : index
    %24 = vector.load %arg7[%c0_37, %c1_38, %c1_39, %c0_40] : memref<2x18x20x4xf32, #tpu.memory_space<vmem>>, vector<2x16x18x4xf32>
    %c0_41 = arith.constant 0 : index
    %c1_42 = arith.constant 1 : index
    %c2_43 = arith.constant 2 : index
    %c0_44 = arith.constant 0 : index
    %25 = vector.load %arg7[%c0_41, %c1_42, %c2_43, %c0_44] : memref<2x18x20x4xf32, #tpu.memory_space<vmem>>, vector<2x16x18x4xf32>
    %c0_45 = arith.constant 0 : index
    %c2_46 = arith.constant 2 : index
    %c0_47 = arith.constant 0 : index
    %c0_48 = arith.constant 0 : index
    %26 = vector.load %arg7[%c0_45, %c2_46, %c0_47, %c0_48] : memref<2x18x20x4xf32, #tpu.memory_space<vmem>>, vector<2x16x18x4xf32>
    %c0_49 = arith.constant 0 : index
    %c2_50 = arith.constant 2 : index
    %c1_51 = arith.constant 1 : index
    %c0_52 = arith.constant 0 : index
    %27 = vector.load %arg7[%c0_49, %c2_50, %c1_51, %c0_52] : memref<2x18x20x4xf32, #tpu.memory_space<vmem>>, vector<2x16x18x4xf32>
    %c0_53 = arith.constant 0 : index
    %c2_54 = arith.constant 2 : index
    %c2_55 = arith.constant 2 : index
    %c0_56 = arith.constant 0 : index
    %28 = vector.load %arg7[%c0_53, %c2_54, %c2_55, %c0_56] : memref<2x18x20x4xf32, #tpu.memory_space<vmem>>, vector<2x16x18x4xf32>
    %29 = tpu.concatenate %20, %21, %22, %23, %24, %25, %26, %27, %28 in 3 : vector<2x16x18x4xf32>, vector<2x16x18x4xf32>, vector<2x16x18x4xf32>, vector<2x16x18x4xf32>, vector<2x16x18x4xf32>, vector<2x16x18x4xf32>, vector<2x16x18x4xf32>, vector<2x16x18x4xf32>, vector<2x16x18x4xf32> -> vector<2x16x18x36xf32>
    %30 = vector.shape_cast %29 : vector<2x16x18x36xf32> to vector<32x18x36xf32>
    %c0_57 = arith.constant 0 : index
    %c0_58 = arith.constant 0 : index
    %31 = vector.load %arg4[%c0_57, %c0_58] : memref<36x16xf32, #tpu.memory_space<vmem>>, vector<36x16xf32>
    %cst_59 = arith.constant dense<0.000000e+00> : vector<32x18x16xf32>
    %32 = tpu.matmul %30, %31, %cst_59 {dimension_numbers = #tpu.dot_dimension_numbers<[2], [0], [0, 1], [1], [0, 0, 0, 1, 1, 1], [], []>} : vector<32x18x36xf32>, vector<36x16xf32>, vector<32x18x16xf32> -> vector<32x18x16xf32>
    %c0_60 = arith.constant 0 : index
    %c0_61 = arith.constant 0 : index
    %33 = vector.load %arg5[%c0_60, %c0_61] : memref<1x16xf32, #tpu.memory_space<vmem>>, vector<1x16xf32>
    %34 = vector.shape_cast %33 : vector<1x16xf32> to vector<1x1x16xf32>
    %35 = vector.broadcast %34 : vector<1x1x16xf32> to vector<32x18x16xf32>
    %36 = arith.addf %32, %35 : vector<32x18x16xf32>
    %cst_62 = arith.constant 0.000000e+00 : f32
    %37 = vector.broadcast %cst_62 : f32 to vector<32x18x16xf32>
    %38 = arith.maximumf %36, %37 : vector<32x18x16xf32>
    %39 = vector.shape_cast %38 : vector<32x18x16xf32> to vector<2x16x18x16xf32>
    %c0_63 = arith.constant 0 : index
    %c0_64 = arith.constant 0 : index
    %c0_65 = arith.constant 0 : index
    %c0_66 = arith.constant 0 : index
    %40 = vector.load %arg6[%c0_63, %c0_64, %c0_65, %c0_66] : memref<2x16x18x16xf32, #tpu.memory_space<vmem>>, vector<2x16x18x16xf32>
    tpu.vector_store %arg6[%c0_63, %c0_64, %c0_65, %c0_66], %39 {strides = array<i32>} : memref<2x16x18x16xf32, #tpu.memory_space<vmem>>, vector<2x16x18x16xf32>,
    return
  }
  func.func @transform_0(%arg0: i32) -> (i32, i32, i32, i32) {
    %c0_i32 = arith.constant 0 : i32
    %c0_i32_0 = arith.constant 0 : i32
    %c0_i32_1 = arith.constant 0 : i32
    %c0_i32_2 = arith.constant 0 : i32
    return %arg0, %c0_i32, %c0_i32_0, %c0_i32_1 : i32, i32, i32, i32
  }
  func.func @transform_1(%arg0: i32) -> (i32, i32) {
    %c0_i32 = arith.constant 0 : i32
    %c0_i32_0 = arith.constant 0 : i32
    %c0_i32_1 = arith.constant 0 : i32
    return %c0_i32, %c0_i32_0 : i32, i32
  }
  func.func @transform_2(%arg0: i32) -> (i32, i32) {
    %c0_i32 = arith.constant 0 : i32
    %c0_i32_0 = arith.constant 0 : i32
    %c0_i32_1 = arith.constant 0 : i32
    return %c0_i32, %c0_i32_0 : i32, i32
  }
  func.func @transform_3(%arg0: i32) -> (i32, i32) {
    %c0_i32 = arith.constant 0 : i32
    %c0_i32_0 = arith.constant 0 : i32
    %c0_i32_1 = arith.constant 0 : i32
    return %c0_i32, %c0_i32_0 : i32, i32
  }
  func.func @transform_4(%arg0: i32) -> (i32, i32) {
    %c0_i32 = arith.constant 0 : i32
    %c0_i32_0 = arith.constant 0 : i32
    %c0_i32_1 = arith.constant 0 : i32
    return %c0_i32, %c0_i32_0 : i32, i32
  }
  func.func @transform_5(%arg0: i32) -> (i32, i32, i32, i32) {
    %c0_i32 = arith.constant 0 : i32
    %c0_i32_0 = arith.constant 0 : i32
    %c0_i32_1 = arith.constant 0 : i32
    %c0_i32_2 = arith.constant 0 : i32
    return %arg0, %c0_i32, %c0_i32_0, %c0_i32_1 : i32, i32, i32, i32
  }
}

</mosaic_0001>

<bundles_post_ra>
// kernel: tpu_custom_call.1
= control target key start
LH: loop header
LB: loop body
LE: loop exit
PB: predicated region body
PF: predicated region fallthrough
CT: control target
= control target key end

     0   :  { %vm593_vm0 = vcmask 27648   ;;  %vm590_vm1 = vcmask 31744   ;;  %v13025_v3 = vmov 0.0   ;;  %v703_v4 = vlaneseq  ;;  %s13026_s14 = smov 4   ;;  %s13030_s28 = smov 20   ;;  %s20054_s1 = inlined_call_operand.vmem [shape: f32[8,4], index: 1, kind: input, shape index: {}]   ;;  %s20055_s0 = inlined_call_operand.vmem [shape: f32[2,10,12,8], index: 0, kind: input, shape index: {}]   ;;  %s20056_s2 = inlined_call_operand.vmem [shape: f32[1,4], index: 2, kind: input, shape index: {}]   ;;  %s20057_s3 = inlined_call_operand.vmem [shape: f32[36,16], index: 3, kind: input, shape index: {}]   ;;  %s20058_s4 = inlined_call_operand.vmem [shape: f32[1,16], index: 4, kind: input, shape index: {}]   ;;  %s20059_s5 = inlined_call_operand.vmem [shape: f32[2,16,18,16], index: 5, kind: output, shape index: {}]  }
   0x1   :  { %v13068_v0 = vld [vmem:[%s20054_s1] sm:$0xff]  ;;  %v13078_v2 = vld [vmem:[%s20055_s0 + $0x8] sm:$0xf]  ;;  %594 = vst.msk [vmem:[#allocation2 + $0x10] sm:$0xf] %vm593_vm0, %v13025_v3  ;;  %vm164_vm2 = vcmask 64512  }
   0x2   :  { %v13073_v1 = vld [vmem:[%s20055_s0] sm:$0xff]  ;;  %597 = vst.msk [vmem:[#allocation2 + $0x28] sm:$0xf] %vm593_vm0, %v13025_v3  ;;  %600 = vst.msk [vmem:[#allocation2 + $0x40] sm:$0xf] %vm593_vm0, %v13025_v3  ;;  %12767 = vmatprep.subr.mxu0 %v13068_v0  ;;  %v22_v6 = vld [vmem:[%s20055_s0 + $0x10] sm:$0xff] }
   0x3   :  { %603 = vst.msk [vmem:[#allocation2 + $0x58] sm:$0xf] %vm593_vm0, %v13025_v3  ;;  %606 = vst.msk [vmem:[#allocation2 + $0x70] sm:$0xf] %vm593_vm0, %v13025_v3  ;;  %v107_v5 = vcombine.high %v13073_v1, %v13073_v1  ;;  %v23_v7 = vld [vmem:[%s20055_s0 + $0x18] sm:$0xf]  ;;  %12768 = vmatpush3.msra.mxu0 %v13068_v0  ;;  %v129_v9 = vcombine.low %v13078_v2, %v22_v6  ;;  %v108_v10 = vcombine.high %v22_v6, %v22_v6 }
   0x4   :  { %609 = vst.msk [vmem:[#allocation2 + $0x88] sm:$0xf] %vm593_vm0, %v13025_v3  ;;  %612 = vst.msk [vmem:[#allocation2 + $0xa0] sm:$0xf] %vm593_vm0, %v13025_v3  ;;  %v24_v8 = vld [vmem:[%s20055_s0 + $0x20] sm:$0xff]  ;;  %v13310_v12 = vshrl.u32 %v703_v4, 7 }
   0x5   :  { %615 = vst.msk [vmem:[#allocation2 + $0xb8] sm:$0xf] %vm593_vm0, %v13025_v3  ;;  %618 = vst.msk [vmem:[#allocation2 + $0xd0] sm:$0xf] %vm593_vm0, %v13025_v3  ;;  %v109_v11 = vcombine.high %v24_v8, %v24_v8  ;;  %v128_v13 = vcombine.low %v13073_v1, %v107_v5  ;;  %v13316_v14 = vld [vmem:[%s20055_s0 + $0x30] sm:$0xff]  ;;  %v130_v16 = vcombine.low %v108_v10, %v23_v7  ;;  %v13330_v20 = vld [vmem:[%s20055_s0 + $0x40] sm:$0xff] }
   0x6   :  { %621 = vst.msk [vmem:[#allocation2 + $0xe8] sm:$0xf] %vm593_vm0, %v13025_v3  ;;  %624 = vst.msk [vmem:[#allocation2 + $0x100] sm:$0xf] %vm593_vm0, %v13025_v3  ;;  %v700_v15 = vld [vmem:[%s20056_s2] sm:$0x1]  ;;  %v110_v22 = vcombine.high %v13316_v14, %v13316_v14  ;;  %v111_v28 = vcombine.high %v13330_v20, %v13330_v20 }
   0x7   :  { %627 = vst.msk [vmem:[#allocation2 + $0x118] sm:$0xf] %vm593_vm0, %v13025_v3  ;;  %630 = vst.msk [vmem:[#allocation2 + $0x130] sm:$0xf] %vm593_vm0, %v13025_v3  ;;  %v13324_v17 = vld [vmem:[%s20055_s0 + $0x28] sm:$0xf]  ;;  %12769 = vmatprep.mubr.msk.f32.mxu0 %vm164_vm2, %v128_v13  ;;  %v13334_v21 = vcombine.low %v24_v8, %v109_v11 }
   0x8   :  { %633 = vst.msk [vmem:[#allocation2 + $0x148] sm:$0xf] %vm593_vm0, %v13025_v3  ;;  %636 = vst.msk [vmem:[#allocation2 + $0x160] sm:$0xf] %vm593_vm0, %v13025_v3  ;;  %v701_v18 = vmax.f32 %v700_v15, 0.0  ;;  %v705_v19 = vsub.s32 0, %v13310_v12  ;;  %12770 = vmatmul.mubr.msk.f32.vlgmr.msra.gmra.mrb[0].mxu0 %vm164_vm2, %v129_v9  ;;  %v132_v26 = vcombine.low %v13324_v17, %v13316_v14  ;;  %v134_v33 = vcombine.low %v13330_v20, %v111_v28 }
   0x9   :  { %639 = vst.msk [vmem:[#allocation2 + $0x178] sm:$0xf] %vm593_vm0, %v13025_v3  ;;  %642 = vst.msk [vmem:[#allocation2 + $0x190] sm:$0xf] %vm593_vm0, %v13025_v3  ;;  %v984_v24 = vld [vmem:[#allocation2 + $0x11] sm:$0x3]  ;;  %12772 = vmatprep.mubr.msk.f32.mxu0 %vm164_vm2, %v130_v16 }
   0xa   :  { %645 = vst.msk [vmem:[#allocation2 + $0x1a8] sm:$0xf] %vm593_vm0, %v13025_v3  ;;  %648 = vst.msk [vmem:[#allocation2 + $0x1c0] sm:$0xf] %vm593_vm0, %v13025_v3  ;;  %v13338_v23 = vrot.slane %v701_v18, %v705_v19  ;;  %v13346_v27 = vld [vmem:[%s20055_s0 + $0x38] sm:$0xf]  ;;  %1851 = vrot.lane.b32.xlu1 %v984_v24, %s13026_s14 }
   0xb   :  { %651 = vst.msk [vmem:[#allocation2 + $0x1d8] sm:$0xf] %vm593_vm0, %v13025_v3  ;;  %654 = vst.msk [vmem:[#allocation2 + $0x1f0] sm:$0xf] %vm593_vm0, %v13025_v3  ;;  %v133_v31 = vcombine.low %v110_v22, %v13346_v27  ;;  %v30_v32 = vld [vmem:[%s20055_s0 + $0x50] sm:$0xff]  ;;  %v32_v36 = vld [vmem:[%s20055_s0 + $0x60] sm:$0xff] }
   0xc   :  { %657 = vst.msk [vmem:[#allocation2 + $0x208] sm:$0xf] %vm593_vm0, %v13025_v3  ;;  %660 = vst.msk [vmem:[#allocation2 + $0x220] sm:$0xf] %vm593_vm0, %v13025_v3  ;;  %12773 = vmatmul.mubr.msk.f32.gmra.mrb[2].mxu0 %vm164_vm2, %v13334_v21  ;;  %v29_v34 = vld [vmem:[%s20055_s0 + $0x48] sm:$0xf]  ;;  %v112_v35 = vcombine.high %v30_v32, %v30_v32  ;;  %v113_v41 = vcombine.high %v32_v36, %v32_v36 }
   0xd   :  { %663 = vst.msk [vmem:[#allocation2 + $0x238] sm:$0xf] %vm593_vm0, %v13025_v3  ;;  %666 = vst.msk [vmem:[#allocation2 + $0x250] sm:$0xf] %vm593_vm0, %v13025_v3  ;;  %12775 = vmatprep.mubr.msk.f32.mxu0 %vm164_vm2, %v132_v26  ;;  %v31_v37 = vld [vmem:[%s20055_s0 + $0x58] sm:$0xf]  ;;  %v135_v40 = vcombine.low %v29_v34, %v30_v32 }
   0xe   :  { %669 = vst.msk [vmem:[#allocation2 + $0x268] sm:$0xf] %vm593_vm0, %v13025_v3  ;;  %672 = vst.msk [vmem:[#allocation2 + $0x280] sm:$0xf] %vm593_vm0, %v13025_v3  ;;  %v987_v38 = vld [vmem:[#allocation2 + $0x29] sm:$0x3]  ;;  %v136_v42 = vcombine.low %v112_v35, %v31_v37  ;;  %v137_v48 = vcombine.low %v32_v36, %v113_v41 }
   0xf   :  { %675 = vst.msk [vmem:[#allocation2 + $0x298] sm:$0xf] %vm593_vm0, %v13025_v3  ;;  %678 = vst.msk [vmem:[#allocation2 + $0x2b0] sm:$0xf] %vm593_vm0, %v13025_v3  ;;  %v34_v43 = vld [vmem:[%s20055_s0 + $0x70] sm:$0xff]  ;;  %v36_v45 = vld [vmem:[%s20055_s0 + $0x80] sm:$0xff] }
  0x10   :  { %681 = vst.msk [vmem:[#allocation2 + $0x2c8] sm:$0xf] %vm593_vm0, %v13025_v3  ;;  %684 = vst.msk [vmem:[#allocation2 + $0x2e0] sm:$0xf] %vm593_vm0, %v13025_v3  ;;  %12776 = vmatmul.mubr.msk.f32.gmra.mrb[4].mxu0 %vm164_vm2, %v133_v31  ;;  %v33_v44 = vld [vmem:[%s20055_s0 + $0x68] sm:$0xf]  ;;  %v114_v49 = vcombine.high %v34_v43, %v34_v43  ;;  %v115_v52 = vcombine.high %v36_v45, %v36_v45 }
  0x11   :  { %687 = vst.msk [vmem:[#allocation2 + $0x2f8] sm:$0xf] %vm593_vm0, %v13025_v3  ;;  %690 = vst.msk [vmem:[#allocation2 + $0x310] sm:$0xf] %vm593_vm0, %v13025_v3  ;;  %12778 = vmatprep.mubr.msk.f32.mxu0 %vm164_vm2, %v134_v33  ;;  %v138_v50 = vcombine.low %v33_v44, %v34_v43  ;;  %v35_v51 = vld [vmem:[%s20055_s0 + $0x78] sm:$0xf] }
  0x12   :  { %693 = vst.msk [vmem:[#allocation2 + $0x328] sm:$0xf] %vm593_vm0, %v13025_v3  ;;  %696 = vst.msk [vmem:[#allocation2 + $0x340] sm:$0xf] %vm593_vm0, %v13025_v3  ;;  %v139_v55 = vcombine.low %v114_v49, %v35_v51  ;;  %v38_v56 = vld [vmem:[%s20055_s0 + $0x90] sm:$0xff]  ;;  %v140_v57 = vcombine.low %v36_v45, %v115_v52  ;;  %v40_v60 = vld [vmem:[%s20055_s0 + $0xa0] sm:$0xff] }
  0x13   :  { %699 = vst.msk [vmem:[#allocation2 + $0x358] sm:$0xf] %vm593_vm0, %v13025_v3  ;;  %v37_v58 = vld [vmem:[%s20055_s0 + $0x88] sm:$0xf]  ;;  %v116_v59 = vcombine.high %v38_v56, %v38_v56  ;;  %v39_v61 = vld [vmem:[%s20055_s0 + $0x98] sm:$0xf]  ;;  %v117_v1 = vcombine.high %v40_v60, %v40_v60 }
  0x14   :  { %591 = vst.msk [vmem:[#allocation2] sm:$0xff] %vm590_vm1, %v13025_v3  ;;  %592 = vst.msk [vmem:[#allocation2 + $0x8] sm:$0xff] %vm590_vm1, %v13025_v3  ;;  %12779 = vmatmul.mubr.msk.f32.gmra.mrb[6].mxu0 %vm164_vm2, %v135_v40  ;;  %v141_v0 = vcombine.low %v37_v58, %v38_v56  ;;  %v41_v4 = vld [vmem:[%s20055_s0 + $0xa8] sm:$0xf]  ;;  %v44_v5 = vld [vmem:[%s20055_s0 + $0xc0] sm:$0xff]  ;;  %s13031_s29 = smov 24  }
  0x15   :  { %595 = vst.msk [vmem:[#allocation2 + $0x18] sm:$0xff] %vm590_vm1, %v13025_v3  ;;  %596 = vst.msk [vmem:[#allocation2 + $0x20] sm:$0xff] %vm590_vm1, %v13025_v3  ;;  %12781 = vmatprep.mubr.msk.f32.mxu0 %vm164_vm2, %v136_v42  ;;  %v142_v2 = vcombine.low %v116_v59, %v39_v61  ;;  %v143_v8 = vcombine.low %v40_v60, %v117_v1  ;;  %v43_v11 = vld [vmem:[%s20055_s0 + $0xb8] sm:$0xf]  ;;  %v119_v13 = vcombine.high %v44_v5, %v44_v5  ;;  %v46_v17 = vld [vmem:[%s20055_s0 + $0xd0] sm:$0xff]  ;;  %s13032_s30 = smov 28  }
  0x16   :  { %598 = vst.msk [vmem:[#allocation2 + $0x30] sm:$0xff] %vm590_vm1, %v13025_v3  ;;  %599 = vst.msk [vmem:[#allocation2 + $0x38] sm:$0xff] %vm590_vm1, %v13025_v3  ;;  %v45_v19 = vld [vmem:[%s20055_s0 + $0xc8] sm:$0xf]  ;;  %v120_v20 = vcombine.high %v46_v17, %v46_v17  ;;  %v48_v21 = vld [vmem:[%s20055_s0 + $0xe0] sm:$0xff]  ;;  %s13033_s6 = smov 32  }
  0x17   :  { %601 = vst.msk [vmem:[#allocation2 + $0x48] sm:$0xff] %vm590_vm1, %v13025_v3  ;;  %602 = vst.msk [vmem:[#allocation2 + $0x50] sm:$0xff] %vm590_vm1, %v13025_v3  ;;  %v146_v18 = vcombine.low %v44_v5, %v119_v13  ;;  %v47_v22 = vld [vmem:[%s20055_s0 + $0xd8] sm:$0xf]  ;;  %v121_v26 = vcombine.high %v48_v21, %v48_v21  ;;  %v50_v28 = vld [vmem:[%s20055_s0 + $0xf0] sm:$0xff]  ;;  %vm8456_vm3 = vcmask 1043456  }
  0x18   :  { %604 = vst.msk [vmem:[#allocation2 + $0x60] sm:$0xff] %vm590_vm1, %v13025_v3  ;;  %605 = vst.msk [vmem:[#allocation2 + $0x68] sm:$0xff] %vm590_vm1, %v13025_v3  ;;  %12782 = vmatmul.mubr.msk.f32.gmra.mrb[8].mxu0 %vm164_vm2, %v137_v48  ;;  %v148_v27 = vcombine.low %v120_v20, %v47_v22  ;;  %v122_v34 = vcombine.high %v50_v28, %v50_v28  ;;  %v51_v36 = vld [vmem:[%s20055_s0 + $0xf8] sm:$0xf]  ;;  %v54_v41 = vld [vmem:[%s20055_s0 + $0x110] sm:$0xff]  ;;  %vm5015_vm4 = vcmask 97280  }
  0x19   :  { %607 = vst.msk [vmem:[#allocation2 + $0x78] sm:$0xff] %vm590_vm1, %v13025_v3  ;;  %608 = vst.msk [vmem:[#allocation2 + $0x80] sm:$0xff] %vm590_vm1, %v13025_v3  ;;  %12784 = vmatprep.mubr.msk.f32.mxu0 %vm164_vm2, %v138_v50  ;;  %v149_v33 = vcombine.low %v48_v21, %v121_v26  ;;  %v53_v43 = vld [vmem:[%s20055_s0 + $0x108] sm:$0xf]  ;;  %v124_v44 = vcombine.high %v54_v41, %v54_v41  ;;  %v56_v45 = vld [vmem:[%s20055_s0 + $0x120] sm:$0xff]  ;;  %vm5112_vm5 = vcmask 130048  }
  0x1a   :  { %610 = vst.msk [vmem:[#allocation2 + $0x90] sm:$0xff] %vm590_vm1, %v13025_v3  ;;  %611 = vst.msk [vmem:[#allocation2 + $0x98] sm:$0xff] %vm590_vm1, %v13025_v3  ;;  %v151_v40 = vcombine.low %v122_v34, %v51_v36  ;;  %v153_v49 = vcombine.low %v53_v43, %v54_v41  ;;  %v125_v50 = vcombine.high %v56_v45, %v56_v45  ;;  %v58_v52 = vld [vmem:[%s20055_s0 + $0x130] sm:$0xff]  ;;  %v59_v59 = vld [vmem:[%s20055_s0 + $0x138] sm:$0xf]  ;;  %vm5209_vm6 = vcmask 162816  }
  0x1b   :  { %613 = vst.msk [vmem:[#allocation2 + $0xa8] sm:$0xff] %vm590_vm1, %v13025_v3  ;;  %614 = vst.msk [vmem:[#allocation2 + $0xb0] sm:$0xff] %vm590_vm1, %v13025_v3  ;;  %v982_v25 = vld [vmem:[#allocation2 + $0x1] sm:$0xff]  ;;  %v983_v30 = vld [vmem:[#allocation2 + $0x9] sm:$0xff]  ;;  %vm5403_vm7 = vcmask 228352   ;;  %vm5306_vm8 = vcmask 195584  }
  0x1c   :  { %616 = vst.msk [vmem:[#allocation2 + $0xc0] sm:$0xff] %vm590_vm1, %v13025_v3  ;;  %617 = vst.msk [vmem:[#allocation2 + $0xc8] sm:$0xff] %vm590_vm1, %v13025_v3  ;;  %1847 = vrot.lane.b32.xlu0 %v982_v25, %s13026_s14  ;;  %v985_v29 = vld [vmem:[#allocation2 + $0x19] sm:$0xff]  ;;  %v986_v39 = vld [vmem:[#allocation2 + $0x21] sm:$0xff]  ;;  %12785 = vmatmul.mubr.msk.f32.gmra.mrb[10].mxu0 %vm164_vm2, %v139_v55  ;;  %v147_v25 = vcombine.low %v45_v19, %v46_v17  ;;  %v155_v56 = vcombine.low %v56_v45, %v125_v50  ;;  %vm5500_vm9 = vcmask 261120   ;;  %vm8311_vm10 = vcmask 293888  }
  0x1d   :  { %619 = vst.msk [vmem:[#allocation2 + $0xd8] sm:$0xff] %vm590_vm1, %v13025_v3  ;;  %620 = vst.msk [vmem:[#allocation2 + $0xe0] sm:$0xff] %vm590_vm1, %v13025_v3  ;;  %1853 = vrot.lane.b32.xlu1 %v985_v29, %s13026_s14  ;;  %12787 = vmatprep.mubr.msk.f32.mxu0 %vm164_vm2, %v140_v57  ;;  %v49_v29 = vld [vmem:[%s20055_s0 + $0xe8] sm:$0xf]  ;;  %v126_v57 = vcombine.high %v58_v52, %v58_v52  ;;  %v1086_v43 = vld [vmem:[#allocation2 + $0x42] sm:$0x3] }
  0x1e   :  { %622 = vst.msk [vmem:[#allocation2 + $0xf0] sm:$0xff] %vm590_vm1, %v13025_v3  ;;  %623 = vst.msk [vmem:[#allocation2 + $0xf8] sm:$0xff] %vm590_vm1, %v13025_v3  ;;  %v150_v35 = vcombine.low %v49_v29, %v50_v28  ;;  %v1079_v28 = vld [vmem:[#allocation2 + $0xa] sm:$0xff]  ;;  %v1078_v29 = vld [vmem:[#allocation2 + $0x2] sm:$0xff]  ;;  %vm12455_vm11 = vcmask 123904  }
  0x1f   :  { %625 = vst.msk [vmem:[#allocation2 + $0x108] sm:$0xff] %vm590_vm1, %v13025_v3  ;;  %626 = vst.msk [vmem:[#allocation2 + $0x110] sm:$0xff] %vm590_vm1, %v13025_v3  ;;  %v1083_v34 = vld [vmem:[#allocation2 + $0x2a] sm:$0x3] }
  0x20   :  { %628 = vst.msk [vmem:[#allocation2 + $0x120] sm:$0xff] %vm590_vm1, %v13025_v3  ;;  %629 = vst.msk [vmem:[#allocation2 + $0x128] sm:$0xff] %vm590_vm1, %v13025_v3  ;;  %1849 = vrot.lane.b32.xlu0 %v983_v30, %s13026_s14  ;;  %12788 = vmatmul.mubr.msk.f32.gmra.mrb[12].mxu0 %vm164_vm2, %v141_v0  ;;  %v52_v30 = vld [vmem:[%s20055_s0 + $0x100] sm:$0xff]  ;;  %v1095_v50 = vld [vmem:[#allocation2 + $0x8a] sm:$0x3] }
  0x21   :  { %631 = vst.msk [vmem:[#allocation2 + $0x138] sm:$0xff] %vm590_vm1, %v13025_v3  ;;  %632 = vst.msk [vmem:[#allocation2 + $0x140] sm:$0xff] %vm590_vm1, %v13025_v3  ;;  %1857 = vrot.lane.b32.xlu1 %v987_v38, %s13026_s14  ;;  %12790 = vmatprep.mubr.msk.f32.mxu0 %vm164_vm2, %v142_v2  ;;  %v123_v37 = vcombine.high %v52_v30, %v52_v30  ;;  %v1032_v2 = vld [vmem:[#allocation2 + $0x1c1] sm:$0x3] }
  0x22   :  { %634 = vst.msk [vmem:[#allocation2 + $0x150] sm:$0xff] %vm590_vm1, %v13025_v3  ;;  %635 = vst.msk [vmem:[#allocation2 + $0x158] sm:$0xff] %vm590_vm1, %v13025_v3 }
  0x23   :  { %637 = vst.msk [vmem:[#allocation2 + $0x168] sm:$0xff] %vm590_vm1, %v13025_v3  ;;  %638 = vst.msk [vmem:[#allocation2 + $0x170] sm:$0xff] %vm590_vm1, %v13025_v3  ;;  %v152_v42 = vcombine.low %v52_v30, %v123_v37  ;;  %v1081_v30 = vld [vmem:[#allocation2 + $0x1a] sm:$0xff] }
  0x24   :  { %640 = vst.msk [vmem:[#allocation2 + $0x180] sm:$0xff] %vm590_vm1, %v13025_v3  ;;  %641 = vst.msk [vmem:[#allocation2 + $0x188] sm:$0xff] %vm590_vm1, %v13025_v3  ;;  %1855 = vrot.lane.b32.xlu0 %v986_v39, %s13026_s14  ;;  %12791 = vmatmul.mubr.msk.f32.gmra.mrb[14].mxu0 %vm164_vm2, %v143_v8 }
  0x25   :  { %643 = vst.msk [vmem:[#allocation2 + $0x198] sm:$0xff] %vm590_vm1, %v13025_v3  ;;  %644 = vst.msk [vmem:[#allocation2 + $0x1a0] sm:$0xff] %vm590_vm1, %v13025_v3 }
  0x26   :  { %646 = vst.msk [vmem:[#allocation2 + $0x1b0] sm:$0xff] %vm590_vm1, %v13025_v3  ;;  %647 = vst.msk [vmem:[#allocation2 + $0x1b8] sm:$0xff] %vm590_vm1, %v13025_v3 }
  0x27   :  { %649 = vst.msk [vmem:[#allocation2 + $0x1c8] sm:$0xff] %vm590_vm1, %v13025_v3  ;;  %650 = vst.msk [vmem:[#allocation2 + $0x1d0] sm:$0xff] %vm590_vm1, %v13025_v3 }
  0x28   :  { %652 = vst.msk [vmem:[#allocation2 + $0x1e0] sm:$0xff] %vm590_vm1, %v13025_v3  ;;  %653 = vst.msk [vmem:[#allocation2 + $0x1e8] sm:$0xff] %vm590_vm1, %v13025_v3 }
  0x29   :  { %655 = vst.msk [vmem:[#allocation2 + $0x1f8] sm:$0xff] %vm590_vm1, %v13025_v3  ;;  %656 = vst.msk [vmem:[#allocation2 + $0x200] sm:$0xff] %vm590_vm1, %v13025_v3 }
  0x2a   :  { %658 = vst.msk [vmem:[#allocation2 + $0x210] sm:$0xff] %vm590_vm1, %v13025_v3  ;;  %659 = vst.msk [vmem:[#allocation2 + $0x218] sm:$0xff] %vm590_vm1, %v13025_v3 }
  0x2b   :  { %661 = vst.msk [vmem:[#allocation2 + $0x228] sm:$0xff] %vm590_vm1, %v13025_v3  ;;  %662 = vst.msk [vmem:[#allocation2 + $0x230] sm:$0xff] %vm590_vm1, %v13025_v3 }
  0x2c   :  { %664 = vst.msk [vmem:[#allocation2 + $0x240] sm:$0xff] %vm590_vm1, %v13025_v3  ;;  %665 = vst.msk [vmem:[#allocation2 + $0x248] sm:$0xff] %vm590_vm1, %v13025_v3 }
  0x2d   :  { %667 = vst.msk [vmem:[#allocation2 + $0x258] sm:$0xff] %vm590_vm1, %v13025_v3  ;;  %668 = vst.msk [vmem:[#allocation2 + $0x260] sm:$0xff] %vm590_vm1, %v13025_v3  ;;  %v1030_v0 = vld [vmem:[#allocation2 + $0x1b1] sm:$0xff] }
  0x2e   :  { %670 = vst.msk [vmem:[#allocation2 + $0x270] sm:$0xff] %vm590_vm1, %v13025_v3  ;;  %671 = vst.msk [vmem:[#allocation2 + $0x278] sm:$0xff] %vm590_vm1, %v13025_v3  ;;  %v1033_v1 = vld [vmem:[#allocation2 + $0x1c9] sm:$0xff] }
  0x2f   :  { %673 = vst.msk [vmem:[#allocation2 + $0x288] sm:$0xff] %vm590_vm1, %v13025_v3  ;;  %674 = vst.msk [vmem:[#allocation2 + $0x290] sm:$0xff] %vm590_vm1, %v13025_v3 }
  0x30   :  { %676 = vst.msk [vmem:[#allocation2 + $0x2a0] sm:$0xff] %vm590_vm1, %v13025_v3  ;;  %677 = vst.msk [vmem:[#allocation2 + $0x2a8] sm:$0xff] %vm590_vm1, %v13025_v3 }
  0x31   :  { %679 = vst.msk [vmem:[#allocation2 + $0x2b8] sm:$0xff] %vm590_vm1, %v13025_v3  ;;  %680 = vst.msk [vmem:[#allocation2 + $0x2c0] sm:$0xff] %vm590_vm1, %v13025_v3 }
  0x32   :  { %682 = vst.msk [vmem:[#allocation2 + $0x2d0] sm:$0xff] %vm590_vm1, %v13025_v3  ;;  %683 = vst.msk [vmem:[#allocation2 + $0x2d8] sm:$0xff] %vm590_vm1, %v13025_v3 }
  0x33   :  { %685 = vst.msk [vmem:[#allocation2 + $0x2e8] sm:$0xff] %vm590_vm1, %v13025_v3  ;;  %686 = vst.msk [vmem:[#allocation2 + $0x2f0] sm:$0xff] %vm590_vm1, %v13025_v3 }
  0x34   :  { %688 = vst.msk [vmem:[#allocation2 + $0x300] sm:$0xff] %vm590_vm1, %v13025_v3  ;;  %689 = vst.msk [vmem:[#allocation2 + $0x308] sm:$0xff] %vm590_vm1, %v13025_v3 }
  0x35   :  { %691 = vst.msk [vmem:[#allocation2 + $0x318] sm:$0xff] %vm590_vm1, %v13025_v3  ;;  %692 = vst.msk [vmem:[#allocation2 + $0x320] sm:$0xff] %vm590_vm1, %v13025_v3 }
  0x36   :  { %694 = vst.msk [vmem:[#allocation2 + $0x330] sm:$0xff] %vm590_vm1, %v13025_v3  ;;  %695 = vst.msk [vmem:[#allocation2 + $0x338] sm:$0xff] %vm590_vm1, %v13025_v3 }
  0x37   :  { %697 = vst.msk [vmem:[#allocation2 + $0x348] sm:$0xff] %vm590_vm1, %v13025_v3  ;;  %698 = vst.msk [vmem:[#allocation2 + $0x350] sm:$0xff] %vm590_vm1, %v13025_v3  ;;  %v42_v3 = vld [vmem:[%s20055_s0 + $0xb0] sm:$0xff] }
  0x38   :  { %709 = vst.msk [vmem:[#allocation2 + $0x32] sm:$0xff] %vm590_vm1, %v13338_v23  ;;  %710 = vst.msk [vmem:[#allocation2 + $0x3a] sm:$0xff] %vm590_vm1, %v13338_v23  ;;  %v118_v9 = vcombine.high %v42_v3, %v42_v3  ;;  %v144_v10 = vcombine.low %v41_v4, %v42_v3  ;;  %v1035_v3 = vld [vmem:[#allocation2 + $0x1d9] sm:$0x3]  ;;  %v1034_v4 = vld [vmem:[#allocation2 + $0x1d1] sm:$0xff] }
  0x39   :  { %711 = vst.msk [vmem:[#allocation2 + $0x4a] sm:$0xff] %vm590_vm1, %v13338_v23  ;;  %712 = vst.msk [vmem:[#allocation2 + $0x52] sm:$0xff] %vm590_vm1, %v13338_v23 }
  0x3a   :  { %713 = vst.msk [vmem:[#allocation2 + $0x62] sm:$0xff] %vm590_vm1, %v13338_v23  ;;  %714 = vst.msk [vmem:[#allocation2 + $0x6a] sm:$0xff] %vm590_vm1, %v13338_v23  ;;  %v145_v16 = vcombine.low %v118_v9, %v43_v11  ;;  %12793 = vmatprep.mubr.msk.f32.mxu0 %vm164_vm2, %v144_v10 }
  0x3b   :  { %715 = vst.msk [vmem:[#allocation2 + $0x7a] sm:$0xff] %vm590_vm1, %v13338_v23  ;;  %716 = vst.msk [vmem:[#allocation2 + $0x82] sm:$0xff] %vm590_vm1, %v13338_v23 }
  0x3c   :  { %717 = vst.msk [vmem:[#allocation2 + $0x92] sm:$0xff] %vm590_vm1, %v13338_v23  ;;  %718 = vst.msk [vmem:[#allocation2 + $0x9a] sm:$0xff] %vm590_vm1, %v13338_v23  ;;  %12794 = vmatmul.mubr.msk.f32.gmra.mrb[16].mxu0 %vm164_vm2, %v145_v16 }
  0x3d   :  { %719 = vst.msk [vmem:[#allocation2 + $0xaa] sm:$0xff] %vm590_vm1, %v13338_v23  ;;  %720 = vst.msk [vmem:[#allocation2 + $0xb2] sm:$0xff] %vm590_vm1, %v13338_v23  ;;  %12796 = vmatprep.mubr.msk.f32.mxu0 %vm164_vm2, %v146_v18 }
  0x3e   :  { %721 = vst.msk [vmem:[#allocation2 + $0xc2] sm:$0xff] %vm590_vm1, %v13338_v23  ;;  %722 = vst.msk [vmem:[#allocation2 + $0xca] sm:$0xff] %vm590_vm1, %v13338_v23 }
  0x3f   :  { %723 = vst.msk [vmem:[#allocation2 + $0xda] sm:$0xff] %vm590_vm1, %v13338_v23  ;;  %724 = vst.msk [vmem:[#allocation2 + $0xe2] sm:$0xff] %vm590_vm1, %v13338_v23  ;;  %v989_v46 = vld [vmem:[#allocation2 + $0x39] sm:$0xff]  ;;  %v988_v47 = vld [vmem:[#allocation2 + $0x31] sm:$0xff] }
  0x40   :  { %725 = vst.msk [vmem:[#allocation2 + $0xf2] sm:$0xff] %vm590_vm1, %v13338_v23  ;;  %726 = vst.msk [vmem:[#allocation2 + $0xfa] sm:$0xff] %vm590_vm1, %v13338_v23  ;;  %1861 = vrot.lane.b32.xlu1 %v989_v46, %s13026_s14  ;;  %1859 = vrot.lane.b32.xlu0 %v988_v47, %s13026_s14  ;;  %v991_v53 = vld [vmem:[#allocation2 + $0x49] sm:$0xff]  ;;  %v990_v54 = vld [vmem:[#allocation2 + $0x41] sm:$0x3] }
  0x41   :  { %727 = vst.msk [vmem:[#allocation2 + $0x10a] sm:$0xff] %vm590_vm1, %v13338_v23  ;;  %728 = vst.msk [vmem:[#allocation2 + $0x112] sm:$0xff] %vm590_vm1, %v13338_v23  ;;  %v993_v62 = vld [vmem:[#allocation2 + $0x59] sm:$0x3]  ;;  %v992_v63 = vld [vmem:[#allocation2 + $0x51] sm:$0xff]  ;;  %12797 = vmatmul.mubr.msk.f32.gmra.mrb[18].mxu0 %vm164_vm2, %v147_v25 }
  0x42   :  { %729 = vst.msk [vmem:[#allocation2 + $0x122] sm:$0xff] %vm590_vm1, %v13338_v23  ;;  %730 = vst.msk [vmem:[#allocation2 + $0x12a] sm:$0xff] %vm590_vm1, %v13338_v23  ;;  %v999_v6 = vld [vmem:[#allocation2 + $0x89] sm:$0x3]  ;;  %v996_v7 = vld [vmem:[#allocation2 + $0x71] sm:$0x3]  ;;  %12799 = vmatprep.mubr.msk.f32.mxu0 %vm164_vm2, %v148_v27 }
  0x43   :  { %731 = vst.msk [vmem:[#allocation2 + $0x13a] sm:$0xff] %vm590_vm1, %v13338_v23  ;;  %732 = vst.msk [vmem:[#allocation2 + $0x142] sm:$0xff] %vm590_vm1, %v13338_v23  ;;  %v1002_v15 = vld [vmem:[#allocation2 + $0xa1] sm:$0x3]  ;;  %v55_v46 = vld [vmem:[%s20055_s0 + $0x118] sm:$0xf] }
  0x44   :  { %733 = vst.msk [vmem:[#allocation2 + $0x152] sm:$0xff] %vm590_vm1, %v13338_v23  ;;  %734 = vst.msk [vmem:[#allocation2 + $0x15a] sm:$0xff] %vm590_vm1, %v13338_v23  ;;  %1865 = vrot.lane.b32.xlu1 %v991_v53, %s13026_s14  ;;  %1863 = vrot.lane.b32.xlu0 %v990_v54, %s13026_s14  ;;  %v1005_v14 = vld [vmem:[#allocation2 + $0xb9] sm:$0x3]  ;;  %v154_v51 = vcombine.low %v124_v44, %v55_v46  ;;  %v57_v53 = vld [vmem:[%s20055_s0 + $0x128] sm:$0xf] }
  0x45   :  { %735 = vst.msk [vmem:[#allocation2 + $0x16a] sm:$0xff] %vm590_vm1, %v13338_v23  ;;  %736 = vst.msk [vmem:[#allocation2 + $0x172] sm:$0xff] %vm590_vm1, %v13338_v23  ;;  %v1008_v24 = vld [vmem:[#allocation2 + $0xd1] sm:$0x3]  ;;  %12800 = vmatmul.mubr.msk.f32.gmra.mrb[20].mxu0 %vm164_vm2, %v149_v33  ;;  %v156_v58 = vcombine.low %v57_v53, %v58_v52  ;;  %s13027_s0 = smov 8  }
  0x46   :  { %737 = vst.msk [vmem:[#allocation2 + $0x1e2] sm:$0xff] %vm590_vm1, %v13338_v23  ;;  %738 = vst.msk [vmem:[#allocation2 + $0x1ea] sm:$0xff] %vm590_vm1, %v13338_v23  ;;  %12802 = vmatprep.mubr.msk.f32.mxu0 %vm164_vm2, %v150_v35  ;;  %v1082_v35 = vld [vmem:[#allocation2 + $0x22] sm:$0xff]  ;;  %v1089_v46 = vld [vmem:[#allocation2 + $0x5a] sm:$0x3] }
  0x47   :  { %739 = vst.msk [vmem:[#allocation2 + $0x1fa] sm:$0xff] %vm590_vm1, %v13338_v23  ;;  %740 = vst.msk [vmem:[#allocation2 + $0x202] sm:$0xff] %vm590_vm1, %v13338_v23  ;;  %v1014_v32 = vld [vmem:[#allocation2 + $0x101] sm:$0x3] }
  0x48   :  { %741 = vst.msk [vmem:[#allocation2 + $0x212] sm:$0xff] %vm590_vm1, %v13338_v23  ;;  %742 = vst.msk [vmem:[#allocation2 + $0x21a] sm:$0xff] %vm590_vm1, %v13338_v23  ;;  %1869 = vrot.lane.b32.xlu1 %v993_v62, %s13026_s14  ;;  %1867 = vrot.lane.b32.xlu0 %v992_v63, %s13026_s14  ;;  %v1017_v31 = vld [vmem:[#allocation2 + $0x119] sm:$0x3]  ;;  %v157_v62 = vcombine.low %v126_v57, %v59_v59  ;;  %v1104_v59 = vld [vmem:[#allocation2 + $0xd2] sm:$0x3] }
  0x49   :  { %743 = vst.msk [vmem:[#allocation2 + $0x22a] sm:$0xff] %vm590_vm1, %v13338_v23  ;;  %744 = vst.msk [vmem:[#allocation2 + $0x232] sm:$0xff] %vm590_vm1, %v13338_v23  ;;  %v1020_v39 = vld [vmem:[#allocation2 + $0x131] sm:$0x3]  ;;  %12803 = vmatmul.mubr.msk.f32.gmra.mrb[22].mxu0 %vm164_vm2, %v151_v40  ;;  %v1031_v63 = vld [vmem:[#allocation2 + $0x1b9] sm:$0xff] }
  0x4a   :  { %745 = vst.msk [vmem:[#allocation2 + $0x242] sm:$0xff] %vm590_vm1, %v13338_v23  ;;  %746 = vst.msk [vmem:[#allocation2 + $0x24a] sm:$0xff] %vm590_vm1, %v13338_v23  ;;  %v1023_v38 = vld [vmem:[#allocation2 + $0x149] sm:$0x3]  ;;  %12805 = vmatprep.mubr.msk.f32.mxu0 %vm164_vm2, %v152_v42 }
  0x4b   :  { %747 = vst.msk [vmem:[#allocation2 + $0x25a] sm:$0xff] %vm590_vm1, %v13338_v23  ;;  %748 = vst.msk [vmem:[#allocation2 + $0x262] sm:$0xff] %vm590_vm1, %v13338_v23  ;;  %v1025_v47 = vld [vmem:[#allocation2 + $0x159] sm:$0xff]  ;;  %v1024_v48 = vld [vmem:[#allocation2 + $0x151] sm:$0xff] }
  0x4c   :  { %749 = vst.msk [vmem:[#allocation2 + $0x272] sm:$0xff] %vm590_vm1, %v13338_v23  ;;  %750 = vst.msk [vmem:[#allocation2 + $0x27a] sm:$0xff] %vm590_vm1, %v13338_v23  ;;  %1881 = vrot.lane.b32.xlu1 %v999_v6, %s13026_s14  ;;  %1875 = vrot.lane.b32.xlu0 %v996_v7, %s13026_s14  ;;  %v1027_v54 = vld [vmem:[#allocation2 + $0x169] sm:$0xff]  ;;  %v1026_v55 = vld [vmem:[#allocation2 + $0x161] sm:$0x3] }
  0x4d   :  { %751 = vst.msk [vmem:[#allocation2 + $0x28a] sm:$0xff] %vm590_vm1, %v13338_v23  ;;  %752 = vst.msk [vmem:[#allocation2 + $0x292] sm:$0xff] %vm590_vm1, %v13338_v23  ;;  %12806 = vmatmul.mubr.msk.f32.gmra.mrb[24].mxu0 %vm164_vm2, %v153_v49  ;;  %v1029_v60 = vld [vmem:[#allocation2 + $0x179] sm:$0x3]  ;;  %v1028_v61 = vld [vmem:[#allocation2 + $0x171] sm:$0xff] }
  0x4e   :  { %753 = vst.msk [vmem:[#allocation2 + $0x2a2] sm:$0xff] %vm590_vm1, %v13338_v23  ;;  %754 = vst.msk [vmem:[#allocation2 + $0x2aa] sm:$0xff] %vm590_vm1, %v13338_v23  ;;  %12808 = vmatprep.mubr.msk.f32.mxu0 %vm164_vm2, %v154_v51  ;;  %v1037_v5 = vld [vmem:[#allocation2 + $0x1e9] sm:$0xff]  ;;  %v1036_v6 = vld [vmem:[#allocation2 + $0x1e1] sm:$0xff] }
  0x4f   :  { %755 = vst.msk [vmem:[#allocation2 + $0x2ba] sm:$0xff] %vm590_vm1, %v13338_v23  ;;  %756 = vst.msk [vmem:[#allocation2 + $0x2c2] sm:$0xff] %vm590_vm1, %v13338_v23  ;;  %v1039_v7 = vld [vmem:[#allocation2 + $0x1f9] sm:$0xff]  ;;  %v1038_v8 = vld [vmem:[#allocation2 + $0x1f1] sm:$0x3] }
  0x50   :  { %757 = vst.msk [vmem:[#allocation2 + $0x2d2] sm:$0xff] %vm590_vm1, %v13338_v23  ;;  %758 = vst.msk [vmem:[#allocation2 + $0x2da] sm:$0xff] %vm590_vm1, %v13338_v23  ;;  %1893 = vrot.lane.b32.xlu1 %v1005_v14, %s13026_s14  ;;  %1887 = vrot.lane.b32.xlu0 %v1002_v15, %s13026_s14  ;;  %v1041_v9 = vld [vmem:[#allocation2 + $0x209] sm:$0x3]  ;;  %v1040_v10 = vld [vmem:[#allocation2 + $0x201] sm:$0xff] }
  0x51   :  { %759 = vst.msk [vmem:[#allocation2 + $0x2ea] sm:$0xff] %vm590_vm1, %v13338_v23  ;;  %760 = vst.msk [vmem:[#allocation2 + $0x2f2] sm:$0xff] %vm590_vm1, %v13338_v23  ;;  %12809 = vmatmul.mubr.msk.f32.gmra.mrb[26].mxu0 %vm164_vm2, %v155_v56  ;;  %v1047_v11 = vld [vmem:[#allocation2 + $0x239] sm:$0x3]  ;;  %v1044_v13 = vld [vmem:[#allocation2 + $0x221] sm:$0x3] }
  0x52   :  { %761 = vst.msk [vmem:[#allocation2 + $0x302] sm:$0xff] %vm590_vm1, %v13338_v23  ;;  %762 = vst.msk [vmem:[#allocation2 + $0x30a] sm:$0xff] %vm590_vm1, %v13338_v23  ;;  %12811 = vmatprep.mubr.msk.f32.mxu0 %vm164_vm2, %v156_v58  ;;  %v1053_v14 = vld [vmem:[#allocation2 + $0x269] sm:$0x3]  ;;  %v1050_v15 = vld [vmem:[#allocation2 + $0x251] sm:$0x3] }
  0x53   :  { %763 = vst.msk [vmem:[#allocation2 + $0x31a] sm:$0xff] %vm590_vm1, %v13338_v23  ;;  %764 = vst.msk [vmem:[#allocation2 + $0x322] sm:$0xff] %vm590_vm1, %v13338_v23  ;;  %v1011_v23 = vld [vmem:[#allocation2 + $0xe9] sm:$0x3]  ;;  %v1056_v17 = vld [vmem:[#allocation2 + $0x281] sm:$0x3] }
  0x54   :  { %1905 = vrot.lane.b32.xlu1 %v1011_v23, %s13026_s14  ;;  %1899 = vrot.lane.b32.xlu0 %v1008_v24, %s13026_s14  ;;  %v1059_v16 = vld [vmem:[#allocation2 + $0x299] sm:$0x3]  ;;  %v1087_v42 = vld [vmem:[#allocation2 + $0x4a] sm:$0xff]  ;;  %v1092_v51 = vld [vmem:[#allocation2 + $0x72] sm:$0x3] }
  0x55   :  { %12812 = vmatmul.mubr.msk.f32.gmra.mrb[28].mxu0 %vm164_vm2, %v157_v62  ;;  %v1062_v19 = vld [vmem:[#allocation2 + $0x2b1] sm:$0x3]  ;;  %v1107_v58 = vld [vmem:[#allocation2 + $0xea] sm:$0x3]  ;;  %v1113_v62 = vld [vmem:[#allocation2 + $0x11a] sm:$0x3] }
  0x56   :  { %v1065_v18 = vld [vmem:[#allocation2 + $0x2c9] sm:$0x3] }
  0x57   :  { %v1068_v21 = vld [vmem:[#allocation2 + $0x2e1] sm:$0x3] }
  0x58   :  { %1917 = vrot.lane.b32.xlu1 %v1017_v31, %s13026_s14  ;;  %1911 = vrot.lane.b32.xlu0 %v1014_v32, %s13026_s14  ;;  %v1071_v20 = vld [vmem:[#allocation2 + $0x2f9] sm:$0x3]  ;;  %v1080_v31 = vld [vmem:[#allocation2 + $0x12] sm:$0x3] }
  0x59   :  { %v1073_v22 = vld [vmem:[#allocation2 + $0x309] sm:$0xff]  ;;  %v1072_v23 = vld [vmem:[#allocation2 + $0x301] sm:$0xff]  ;;  %v1074_v25 = vld [vmem:[#allocation2 + $0x311] sm:$0x3] }
  0x5a   :  { %v1075_v24 = vld [vmem:[#allocation2 + $0x319] sm:$0xff]  ;;  %v1077_v26 = vld [vmem:[#allocation2 + $0x329] sm:$0x3]  ;;  %v1076_v27 = vld [vmem:[#allocation2 + $0x321] sm:$0xff] }
  0x5c   :  { %1929 = vrot.lane.b32.xlu1 %v1023_v38, %s13026_s14  ;;  %1923 = vrot.lane.b32.xlu0 %v1020_v39, %s13026_s14  ;;  %v1085_v38 = vld [vmem:[#allocation2 + $0x3a] sm:$0xff]  ;;  %v1084_v39 = vld [vmem:[#allocation2 + $0x32] sm:$0xff] }
  0x60   :  { %1933 = vrot.lane.b32.xlu1 %v1025_v47, %s13026_s14  ;;  %1931 = vrot.lane.b32.xlu0 %v1024_v48, %s13026_s14  ;;  %v1088_v47 = vld [vmem:[#allocation2 + $0x52] sm:$0xff] }
  0x64   :  { %1937 = vrot.lane.b32.xlu1 %v1027_v54, %s13026_s14  ;;  %1935 = vrot.lane.b32.xlu0 %v1026_v55, %s13026_s14  ;;  %v1101_v54 = vld [vmem:[#allocation2 + $0xba] sm:$0x3]  ;;  %v1098_v55 = vld [vmem:[#allocation2 + $0xa2] sm:$0x3] }
  0x68   :  { %1941 = vrot.lane.b32.xlu1 %v1029_v60, %s13026_s14  ;;  %1939 = vrot.lane.b32.xlu0 %v1028_v61, %s13026_s14 }
  0x6c   :  { %1945 = vrot.lane.b32.xlu1 %v1031_v63, %s13026_s14  ;;  %1943 = vrot.lane.b32.xlu0 %v1030_v0, %s13026_s14  ;;  %v1110_v63 = vld [vmem:[#allocation2 + $0x102] sm:$0x3] }
  0x70   :  { %1949 = vrot.lane.b32.xlu1 %v1033_v1, %s13026_s14  ;;  %1947 = vrot.lane.b32.xlu0 %v1032_v2, %s13026_s14  ;;  %v1119_v2 = vld [vmem:[#allocation2 + $0x14a] sm:$0x3] }
  0x74   :  { %1953 = vrot.lane.b32.xlu1 %v1035_v3, %s13026_s14  ;;  %1951 = vrot.lane.b32.xlu0 %v1034_v4, %s13026_s14  ;;  %v1116_v3 = vld [vmem:[#allocation2 + $0x132] sm:$0x3] }
  0x78   :  { %1957 = vrot.lane.b32.xlu1 %v1037_v5, %s13026_s14  ;;  %1955 = vrot.lane.b32.xlu0 %v1036_v6, %s13026_s14  ;;  %v1121_v6 = vld [vmem:[#allocation2 + $0x15a] sm:$0xff] }
  0x7c   :  { %1961 = vrot.lane.b32.xlu1 %v1039_v7, %s13026_s14  ;;  %1959 = vrot.lane.b32.xlu0 %v1038_v8, %s13026_s14  ;;  %v13652_v32 = vpop.permute.xlu1 %1851  ;;  %v1120_v7 = vld [vmem:[#allocation2 + $0x152] sm:$0xff] }
  0x80   :  { %1965 = vrot.lane.b32.xlu1 %v1041_v9, %s13026_s14  ;;  %1963 = vrot.lane.b32.xlu0 %v1040_v10, %s13026_s14  ;;  %v1123_v10 = vld [vmem:[#allocation2 + $0x16a] sm:$0xff] }
  0x84   :  { %1977 = vrot.lane.b32.xlu1 %v1047_v11, %s13026_s14  ;;  %1971 = vrot.lane.b32.xlu0 %v1044_v13, %s13026_s14  ;;  %v1122_v11 = vld [vmem:[#allocation2 + $0x162] sm:$0x3] }
  0x88   :  { %1989 = vrot.lane.b32.xlu1 %v1053_v14, %s13026_s14  ;;  %1983 = vrot.lane.b32.xlu0 %v1050_v15, %s13026_s14  ;;  %v1125_v15 = vld [vmem:[#allocation2 + $0x17a] sm:$0x3] }
  0x8c   :  { %2001 = vrot.lane.b32.xlu1 %v1059_v16, %s13026_s14  ;;  %1995 = vrot.lane.b32.xlu0 %v1056_v17, %s13026_s14  ;;  %v1124_v16 = vld [vmem:[#allocation2 + $0x172] sm:$0xff] }
  0x8e   :  { %v13654_v33 = vpop.permute.xlu0 %1847 }
  0x8f   :  { %v13658_v36 = vpop.permute.xlu1 %1853 }
  0x90   :  { %2013 = vrot.lane.b32.xlu1 %v1065_v18, %s13026_s14  ;;  %2007 = vrot.lane.b32.xlu0 %v1062_v19, %s13026_s14  ;;  %v1127_v19 = vld [vmem:[#allocation2 + $0x1ba] sm:$0xff] }
  0x92   :  { %v13660_v37 = vpop.permute.xlu0 %1849 }
  0x93   :  { %v13664_v40 = vpop.permute.xlu1 %1857 }
  0x94   :  { %2025 = vrot.lane.b32.xlu1 %v1071_v20, %s13026_s14  ;;  %2019 = vrot.lane.b32.xlu0 %v1068_v21, %s13026_s14  ;;  %v1126_v20 = vld [vmem:[#allocation2 + $0x1b2] sm:$0xff] }
  0x96   :  { %v13666_v41 = vpop.permute.xlu0 %1855 }
  0x98   :  { %2029 = vrot.lane.b32.xlu1 %v1073_v22, %s13026_s14  ;;  %2027 = vrot.lane.b32.xlu0 %v1072_v23, %s13026_s14 }
  0x9c   :  { %2033 = vrot.lane.b32.xlu1 %v1075_v24, %s13026_s14  ;;  %2031 = vrot.lane.b32.xlu0 %v1074_v25, %s13026_s14 }
  0xa0   :  { %2037 = vrot.lane.b32.xlu1 %v1077_v26, %s13026_s14  ;;  %2035 = vrot.lane.b32.xlu0 %v1076_v27, %s13026_s14 }
  0xa4   :  { %2233 = vrot.lane.b32.xlu1 %v1079_v28, %s13027_s0  ;;  %2231 = vrot.lane.b32.xlu0 %v1078_v29, %s13027_s0 }
  0xa8   :  { %2237 = vrot.lane.b32.xlu1 %v1081_v30, %s13027_s0  ;;  %2235 = vrot.lane.b32.xlu0 %v1080_v31, %s13027_s0 }
  0xac   :  { %2241 = vrot.lane.b32.xlu1 %v1083_v34, %s13027_s0  ;;  %2239 = vrot.lane.b32.xlu0 %v1082_v35, %s13027_s0 }
  0xb0   :  { %2245 = vrot.lane.b32.xlu1 %v1085_v38, %s13027_s0  ;;  %2243 = vrot.lane.b32.xlu0 %v1084_v39, %s13027_s0  ;;  %v12554_v39 = vld [vmem:[%s20056_s2] ss:$0 sm:$0xff]  ;;  %s13028_s2 = smov 12  }
  0xb2   :  { %v13670_v44 = vpop.permute.xlu1 %1861  ;;  %v13672_v45 = vpop.permute.xlu0 %1859 }
  0xb4   :  { %2249 = vrot.lane.b32.xlu1 %v1087_v42, %s13027_s0  ;;  %2247 = vrot.lane.b32.xlu0 %v1086_v43, %s13027_s0  ;;  %v127_v42 = vcombine.high %v12554_v39, %v12554_v39 }
  0xb6   :  { %v13676_v48 = vpop.permute.xlu1 %1865  ;;  %v13678_v49 = vpop.permute.xlu0 %1863 }
  0xb8   :  { %2253 = vrot.lane.b32.xlu1 %v1089_v46, %s13027_s0  ;;  %2251 = vrot.lane.b32.xlu0 %v1088_v47, %s13027_s0  ;;  %v13767_v47 = vcombine.low %v12554_v39, %v12554_v39 }
  0xba   :  { %v13682_v52 = vpop.permute.xlu1 %1869  ;;  %v13684_v53 = vpop.permute.xlu0 %1867 }
  0xbc   :  { %2265 = vrot.lane.b32.xlu1 %v1095_v50, %s13027_s0  ;;  %2259 = vrot.lane.b32.xlu0 %v1092_v51, %s13027_s0  ;;  %v13769_v50 = vcombine.low %v12554_v39, %v127_v42 }
  0xbe   :  { %v13688_v56 = vpop.permute.xlu1 %1881  ;;  %v13690_v57 = vpop.permute.xlu0 %1875 }
  0xc0   :  { %2277 = vrot.lane.b32.xlu1 %v1101_v54, %s13027_s0  ;;  %2271 = vrot.lane.b32.xlu0 %v1098_v55, %s13027_s0 }
  0xc2   :  { %v13694_v60 = vpop.permute.xlu1 %1893  ;;  %v13696_v61 = vpop.permute.xlu0 %1887 }
  0xc4   :  { %2289 = vrot.lane.b32.xlu1 %v1107_v58, %s13027_s0  ;;  %2283 = vrot.lane.b32.xlu0 %v1104_v59, %s13027_s0 }
  0xc6   :  { %v13700_v0 = vpop.permute.xlu1 %1905  ;;  %v13702_v1 = vpop.permute.xlu0 %1899 }
  0xc8   :  { %2301 = vrot.lane.b32.xlu1 %v1113_v62, %s13027_s0  ;;  %2295 = vrot.lane.b32.xlu0 %v1110_v63, %s13027_s0 }
  0xca   :  { %v13706_v4 = vpop.permute.xlu1 %1917  ;;  %v13708_v5 = vpop.permute.xlu0 %1911 }
  0xcc   :  { %2313 = vrot.lane.b32.xlu1 %v1119_v2, %s13027_s0  ;;  %2307 = vrot.lane.b32.xlu0 %v1116_v3, %s13027_s0  ;;  %v13777_v2 = vcombine.low %v127_v42, %v12554_v39 }
  0xce   :  { %v13712_v8 = vpop.permute.xlu1 %1929  ;;  %v13714_v9 = vpop.permute.xlu0 %1923 }
  0xd0   :  { %2317 = vrot.lane.b32.xlu1 %v1121_v6, %s13027_s0  ;;  %2315 = vrot.lane.b32.xlu0 %v1120_v7, %s13027_s0 }
  0xd2   :  { %v13718_v13 = vpop.permute.xlu1 %1933  ;;  %v13720_v14 = vpop.permute.xlu0 %1931 }
  0xd4   :  { %2321 = vrot.lane.b32.xlu1 %v1123_v10, %s13027_s0  ;;  %2319 = vrot.lane.b32.xlu0 %v1122_v11, %s13027_s0 }
  0xd6   :  { %v13724_v17 = vpop.permute.xlu1 %1937  ;;  %v13726_v18 = vpop.permute.xlu0 %1935 }
  0xd8   :  { %2325 = vrot.lane.b32.xlu1 %v1125_v15, %s13027_s0  ;;  %2323 = vrot.lane.b32.xlu0 %v1124_v16, %s13027_s0 }
  0xda   :  { %v13730_v21 = vpop.permute.xlu1 %1941  ;;  %v13732_v22 = vpop.permute.xlu0 %1939 }
  0xdb   :  { %v12771_v51 = vpop.f32.mrb[0].mxu0 }
  0xdc   :  { %2329 = vrot.lane.b32.xlu1 %v1127_v19, %s13027_s0  ;;  %2327 = vrot.lane.b32.xlu0 %v1126_v20, %s13027_s0  ;;  %v297_v54 = vadd.f32 %v12771_v51, %v13767_v47  ;;  %v291_v55 = vpop.f32.mrb[1].mxu0 }
  0xdd   :  { %v292_v63 = vadd.f32 %v291_v55, %v13769_v50 }
  0xde   :  { %v13736_v23 = vpop.permute.xlu1 %1945  ;;  %v13738_v24 = vpop.permute.xlu0 %1943  ;;  %v532_v62 = vmax.f32 %v297_v54, 0.0  ;;  %v471_v3 = vcombine.high %v297_v54, %v297_v54 }
  0xdf   :  { %v12774_v6 = vpop.f32.mrb[2].mxu0  ;;  %v470_v7 = vcombine.high %v292_v63, %v292_v63  ;;  %v530_v11 = vmax.f32 %v292_v63, 0.0 }
  0xe0   :  { %847 = vst.msk [vmem:[#allocation2 + $0x6c] sm:$0xf] %vm593_vm0, %v532_v62  ;;  %v307_v10 = vadd.f32 %v12774_v6, %v13769_v50  ;;  %v301_v15 = vpop.f32.mrb[3].mxu0 }
  0xe1   :  { %v531_v16 = vmax.f32 %v470_v7, 0.0  ;;  %v302_v51 = vadd.f32 %v301_v15, %v13777_v2 }
  0xe2   :  { %v13740_v25 = vpop.permute.xlu1 %1949  ;;  %v13742_v26 = vpop.permute.xlu0 %1947  ;;  %v473_v19 = vcombine.high %v307_v10, %v307_v10  ;;  %v536_v20 = vmax.f32 %v307_v10, 0.0 }
  0xe3   :  { %v805_v42 = vcombine.low %v530_v11, %v531_v16  ;;  %v472_v55 = vcombine.high %v302_v51, %v302_v51  ;;  %v534_v62 = vmax.f32 %v302_v51, 0.0 }
  0xe4   :  { %v537_v54 = vmax.f32 %v473_v19, 0.0 }
  0xe5   :  { %846 = vst.msk [vmem:[#allocation2 + $0x64] sm:$0xff] %vm590_vm1, %v805_v42  ;;  %v535_v7 = vmax.f32 %v472_v55, 0.0 }
  0xe6   :  { %v13744_v27 = vpop.permute.xlu1 %1953  ;;  %v13746_v28 = vpop.permute.xlu0 %1951  ;;  %v807_v63 = vcombine.low %v536_v20, %v537_v54 }
  0xe7   :  { %20065 = vst [vmem:[#allocation3_spill] sm:$0xff] %v13746_v28  ;;  %849 = vst.msk [vmem:[#allocation2 + $0x84] sm:$0xf] %vm593_vm0, %v535_v7 }
  0xe8   :  { %850 = vst.msk [vmem:[#allocation2 + $0x94] sm:$0xff] %vm590_vm1, %v807_v63 }
  0xea   :  { %v13748_v29 = vpop.permute.xlu1 %1957  ;;  %v13750_v30 = vpop.permute.xlu0 %1955 }
  0xeb   :  { %20066 = vst [vmem:[#allocation4_spill] sm:$0xff] %v13748_v29  ;;  %20067 = vst [vmem:[#allocation5_spill] sm:$0xff] %v13750_v30  ;;  %v927_v30 = vld [vmem:[#allocation2 + $0x148] sm:$0x3]  ;;  %v924_v29 = vld [vmem:[#allocation2 + $0x130] sm:$0x3] }
  0xee   :  { %v13752_v31 = vpop.permute.xlu1 %1961  ;;  %v13754_v34 = vpop.permute.xlu0 %1959 }
  0xef   :  { %20068 = vst [vmem:[#allocation6_spill] sm:$0xff] %v13752_v31  ;;  %20069 = vst [vmem:[#allocation7_spill] sm:$0xff] %v13754_v34  ;;  %v918_v31 = vld [vmem:[#allocation2 + $0x100] sm:$0x3] }
  0xf2   :  { %v13756_v35 = vpop.permute.xlu1 %1965  ;;  %v13758_v38 = vpop.permute.xlu0 %1963 }
  0xf3   :  { %20070 = vst [vmem:[#allocation8_spill] sm:$0xff] %v13756_v35  ;;  %20071 = vst [vmem:[#allocation9_spill] sm:$0xff] %v13758_v38  ;;  %v1602_v35 = vld [vmem:[#allocation2 + $0x189] sm:$0xff] }
  0xf6   :  { %v13763_v43 = vpop.permute.xlu1 %1977  ;;  %v13765_v46 = vpop.permute.xlu0 %1971 }
  0xf7   :  { %20072 = vst [vmem:[#allocation10_spill] sm:$0xff] %v13763_v43  ;;  %20073 = vst [vmem:[#allocation11_spill] sm:$0xff] %v13765_v46 }
  0xfa   :  { %v13772_v58 = vpop.permute.xlu1 %1989  ;;  %v13774_v59 = vpop.permute.xlu0 %1983 }
  0xfb   :  { %20074 = vst [vmem:[#allocation12_spill] sm:$0xff] %v13772_v58  ;;  %20075 = vst [vmem:[#allocation13_spill] sm:$0xff] %v13774_v59  ;;  %v533_v59 = vmax.f32 %v471_v3, 0.0  ;;  %v12777_v58 = vpop.f32.mrb[4].mxu0 }
  0xfc   :  { %v317_v43 = vadd.f32 %v12777_v58, %v13777_v2  ;;  %v311_v6 = vpop.f32.mrb[5].mxu0 }
  0xfd   :  { %v806_v10 = vcombine.low %v533_v59, %v534_v62  ;;  %v312_v15 = vadd.f32 %v311_v6, %v13767_v47  ;;  %v12780_v38 = vpop.f32.mrb[6].mxu0 }
  0xfe   :  { %v13782_v46 = vpop.permute.xlu1 %2001  ;;  %v13784_v39 = vpop.permute.xlu0 %1995  ;;  %v475_v3 = vcombine.high %v317_v43, %v317_v43  ;;  %v540_v11 = vmax.f32 %v317_v43, 0.0  ;;  %v327_v58 = vadd.f32 %v12780_v38, %v13767_v47 }
  0xff   :  { %20076 = vst [vmem:[#allocation14_spill] sm:$0xff] %v13782_v46  ;;  %20077 = vst [vmem:[#allocation15_spill] sm:$0xff] %v13784_v39  ;;  %v474_v16 = vcombine.high %v312_v15, %v312_v15  ;;  %v538_v19 = vmax.f32 %v312_v15, 0.0  ;;  %v321_v42 = vpop.f32.mrb[7].mxu0  ;;  %v994_v15 = vld [vmem:[#allocation2 + $0x61] sm:$0xff]  ;;  %v1091_v39 = vld [vmem:[#allocation2 + $0x6a] sm:$0xff] }
 0x100   :  { %848 = vst.msk [vmem:[#allocation2 + $0x7c] sm:$0xff] %vm590_vm1, %v806_v10  ;;  %v541_v51 = vmax.f32 %v475_v3, 0.0  ;;  %v477_v55 = vcombine.high %v327_v58, %v327_v58  ;;  %v544_v62 = vmax.f32 %v327_v58, 0.0  ;;  %v322_v6 = vadd.f32 %v321_v42, %v13769_v50  ;;  %v12783_v43 = vpop.f32.mrb[8].mxu0  ;;  %v995_v10 = vld [vmem:[#allocation2 + $0x69] sm:$0xff]  ;;  %1871 = vrot.lane.b32.xlu0 %v994_v15, %s13026_s14 }
 0x101   :  { %v539_v54 = vmax.f32 %v474_v16, 0.0  ;;  %851 = vst.msk [vmem:[#allocation2 + $0x9c] sm:$0xf] %vm593_vm0, %v538_v19  ;;  %v337_v3 = vadd.f32 %v12783_v43, %v13769_v50  ;;  %1873 = vrot.lane.b32.xlu1 %v995_v10, %s13026_s14  ;;  %v1090_v10 = vld [vmem:[#allocation2 + $0x62] sm:$0xff] }
 0x102   :  { %v13793_v20 = vpop.permute.xlu1 %2013  ;;  %v13795_v59 = vpop.permute.xlu0 %2007  ;;  %853 = vst.msk [vmem:[#allocation2 + $0xb4] sm:$0xf] %vm593_vm0, %v541_v51  ;;  %855 = vst.msk [vmem:[#allocation2 + $0xcc] sm:$0xf] %vm593_vm0, %v544_v62  ;;  %v476_v38 = vcombine.high %v322_v6, %v322_v6  ;;  %v542_v7 = vmax.f32 %v322_v6, 0.0  ;;  %v545_v16 = vmax.f32 %v477_v55, 0.0 }
 0x103   :  { %20078 = vst [vmem:[#allocation16_spill] sm:$0xff] %v13793_v20  ;;  %20079 = vst [vmem:[#allocation17_spill] sm:$0xff] %v13795_v59  ;;  %v808_v63 = vcombine.low %v539_v54, %v540_v11  ;;  %v331_v59 = vpop.f32.mrb[9].mxu0  ;;  %v479_v11 = vcombine.high %v337_v3, %v337_v3  ;;  %v548_v51 = vmax.f32 %v337_v3, 0.0 }
 0x104   :  { %v543_v19 = vmax.f32 %v476_v38, 0.0  ;;  %v332_v58 = vadd.f32 %v331_v59, %v13777_v2  ;;  %v12786_v42 = vpop.f32.mrb[10].mxu0  ;;  %2255 = vrot.lane.b32.xlu0 %v1090_v10, %s13027_s0 }
 0x105   :  { %852 = vst.msk [vmem:[#allocation2 + $0xac] sm:$0xff] %vm590_vm1, %v808_v63  ;;  %v347_v63 = vadd.f32 %v12786_v42, %v13777_v2  ;;  %v549_v46 = vmax.f32 %v479_v11, 0.0  ;;  %v341_v15 = vpop.f32.mrb[11].mxu0  ;;  %2257 = vrot.lane.b32.xlu1 %v1091_v39, %s13027_s0 }
 0x106   :  { %v13806_v54 = vpop.permute.xlu1 %2025  ;;  %v13808_v62 = vpop.permute.xlu0 %2019  ;;  %v809_v6 = vcombine.low %v542_v7, %v543_v19  ;;  %v478_v43 = vcombine.high %v332_v58, %v332_v58  ;;  %v546_v20 = vmax.f32 %v332_v58, 0.0  ;;  %v342_v7 = vadd.f32 %v341_v15, %v13767_v47 }
 0x107   :  { %20080 = vst [vmem:[#allocation18_spill] sm:$0xff] %v13806_v54  ;;  %20081 = vst [vmem:[#allocation19_spill] sm:$0xff] %v13808_v62  ;;  %v481_v38 = vcombine.high %v347_v63, %v347_v63  ;;  %v811_v3 = vcombine.low %v548_v51, %v549_v46  ;;  %v12789_v19 = vpop.f32.mrb[12].mxu0  ;;  %v997_v42 = vld [vmem:[#allocation2 + $0x79] sm:$0xff]  ;;  %v998_v39 = vld [vmem:[#allocation2 + $0x81] sm:$0xff]  ;;  %v552_v10 = vmax.f32 %v347_v63, 0.0 }
 0x108   :  { %854 = vst.msk [vmem:[#allocation2 + $0xc4] sm:$0xff] %vm590_vm1, %v809_v6  ;;  %v547_v59 = vmax.f32 %v478_v43, 0.0  ;;  %v810_v55 = vcombine.low %v545_v16, %v546_v20  ;;  %v357_v11 = vadd.f32 %v12789_v19, %v13767_v47  ;;  %v480_v6 = vcombine.high %v342_v7, %v342_v7  ;;  %v351_v20 = vpop.f32.mrb[13].mxu0  ;;  %1879 = vrot.lane.b32.xlu0 %v998_v39, %s13026_s14  ;;  %v1093_v19 = vld [vmem:[#allocation2 + $0x7a] sm:$0xff] }
 0x109   :  { %v553_v58 = vmax.f32 %v481_v38, 0.0  ;;  %858 = vst.msk [vmem:[#allocation2 + $0xf4] sm:$0xff] %vm590_vm1, %v811_v3  ;;  %v550_v43 = vmax.f32 %v342_v7, 0.0  ;;  %1877 = vrot.lane.b32.xlu1 %v997_v42, %s13026_s14  ;;  %v12792_v63 = vpop.f32.mrb[14].mxu0  ;;  %v1094_v42 = vld [vmem:[#allocation2 + $0x82] sm:$0xff]  ;;  %v1001_v62 = vld [vmem:[#allocation2 + $0x99] sm:$0xff] }
 0x10a   :  { %856 = vst.msk [vmem:[#allocation2 + $0xdc] sm:$0xff] %vm590_vm1, %v810_v55  ;;  %v13819_v16 = vpop.permute.xlu1 %2029  ;;  %v13821_v46 = vpop.permute.xlu0 %2027  ;;  %v483_v51 = vcombine.high %v357_v11, %v357_v11  ;;  %v556_v15 = vmax.f32 %v357_v11, 0.0  ;;  %v551_v55 = vmax.f32 %v480_v6, 0.0  ;;  %v367_v7 = vadd.f32 %v12792_v63, %v13769_v50 }
 0x10b   :  { %857 = vst.msk [vmem:[#allocation2 + $0xe4] sm:$0xf] %vm593_vm0, %v547_v59  ;;  %20082 = vst [vmem:[#allocation20_spill] sm:$0xff] %v13819_v16  ;;  %v352_v59 = vadd.f32 %v351_v20, %v13769_v50  ;;  %v361_v16 = vpop.f32.mrb[15].mxu0 }
 0x10c   :  { %20083 = vst [vmem:[#allocation21_spill] sm:$0xff] %v13821_v46  ;;  %861 = vst.msk [vmem:[#allocation2 + $0x114] sm:$0xf] %vm593_vm0, %v553_v58  ;;  %v812_v46 = vcombine.low %v551_v55, %v552_v10  ;;  %v557_v39 = vmax.f32 %v483_v51, 0.0  ;;  %2263 = vrot.lane.b32.xlu0 %v1094_v42, %s13027_s0  ;;  %v485_v11 = vcombine.high %v367_v7, %v367_v7  ;;  %v560_v6 = vmax.f32 %v367_v7, 0.0 }
 0x10d   :  { %859 = vst.msk [vmem:[#allocation2 + $0xfc] sm:$0xf] %vm593_vm0, %v550_v43  ;;  %863 = vst.msk [vmem:[#allocation2 + $0x12c] sm:$0xf] %vm593_vm0, %v556_v15  ;;  %v482_v38 = vcombine.high %v352_v59, %v352_v59  ;;  %v554_v3 = vmax.f32 %v352_v59, 0.0  ;;  %2261 = vrot.lane.b32.xlu1 %v1093_v19, %s13027_s0  ;;  %v362_v43 = vadd.f32 %v361_v16, %v13777_v2  ;;  %v1000_v19 = vld [vmem:[#allocation2 + $0x91] sm:$0xff] }
 0x10e   :  { %860 = vst.msk [vmem:[#allocation2 + $0x10c] sm:$0xff] %vm590_vm1, %v812_v46  ;;  %v13834_v15 = vpop.permute.xlu1 %2033  ;;  %v13836_v59 = vpop.permute.xlu0 %2031  ;;  %v561_v10 = vmax.f32 %v485_v11, 0.0 }
 0x10f   :  { %v555_v58 = vmax.f32 %v482_v38, 0.0  ;;  %v12795_v20 = vpop.f32.mrb[16].mxu0  ;;  %20084 = vst [vmem:[#allocation22_spill] sm:$0xff] %v13834_v15  ;;  %20085 = vst [vmem:[#allocation23_spill] sm:$0xff] %v13836_v59  ;;  %v484_v51 = vcombine.high %v362_v43, %v362_v43  ;;  %v558_v55 = vmax.f32 %v362_v43, 0.0  ;;  %v1099_v15 = vld [vmem:[#allocation2 + $0xaa] sm:$0xff] }
 0x110   :  { %v377_v42 = vadd.f32 %v12795_v20, %v13777_v2  ;;  %v371_v38 = vpop.f32.mrb[17].mxu0  ;;  %1883 = vrot.lane.b32.xlu0 %v1000_v19, %s13026_s14  ;;  %v815_v16 = vcombine.low %v560_v6, %v561_v10  ;;  %v1097_v19 = vld [vmem:[#allocation2 + $0x9a] sm:$0xff] }
 0x111   :  { %v813_v63 = vcombine.low %v554_v3, %v555_v58  ;;  %1885 = vrot.lane.b32.xlu1 %v1001_v62, %s13026_s14  ;;  %v559_v46 = vmax.f32 %v484_v51, 0.0  ;;  %v814_v7 = vcombine.low %v557_v39, %v558_v55  ;;  %v372_v59 = vadd.f32 %v371_v38, %v13767_v47 }
 0x112   :  { %v487_v3 = vcombine.high %v377_v42, %v377_v42  ;;  %866 = vst.msk [vmem:[#allocation2 + $0x214] sm:$0xff] %vm590_vm1, %v815_v16  ;;  %v564_v11 = vmax.f32 %v377_v42, 0.0  ;;  %v13847_v39 = vpop.permute.xlu1 %2037  ;;  %v13849_v51 = vpop.permute.xlu0 %2035 }
 0x113   :  { %862 = vst.msk [vmem:[#allocation2 + $0x124] sm:$0xff] %vm590_vm1, %v813_v63  ;;  %864 = vst.msk [vmem:[#allocation2 + $0x13c] sm:$0xff] %vm590_vm1, %v814_v7  ;;  %v486_v43 = vcombine.high %v372_v59, %v372_v59  ;;  %v562_v62 = vmax.f32 %v372_v59, 0.0  ;;  %v1096_v63 = vld [vmem:[#allocation2 + $0x92] sm:$0xff] }
 0x114   :  { %v12798_v58 = vpop.f32.mrb[18].mxu0  ;;  %865 = vst.msk [vmem:[#allocation2 + $0x144] sm:$0xf] %vm593_vm0, %v559_v46  ;;  %v565_v6 = vmax.f32 %v487_v3, 0.0  ;;  %20086 = vst [vmem:[#allocation24_spill] sm:$0xff] %v13847_v39  ;;  %2267 = vrot.lane.b32.xlu0 %v1096_v63, %s13027_s0 }
 0x115   :  { %v387_v20 = vadd.f32 %v12798_v58, %v13767_v47  ;;  %v381_v10 = vpop.f32.mrb[19].mxu0  ;;  %20087 = vst [vmem:[#allocation25_spill] sm:$0xff] %v13849_v51  ;;  %2269 = vrot.lane.b32.xlu1 %v1097_v19, %s13027_s0  ;;  %v563_v55 = vmax.f32 %v486_v43, 0.0  ;;  %867 = vst.msk [vmem:[#allocation2 + $0x21c] sm:$0xf] %vm593_vm0, %v562_v62  ;;  %v1003_v58 = vld [vmem:[#allocation2 + $0xa9] sm:$0xff] }
 0x116   :  { %v382_v59 = vadd.f32 %v381_v10, %v13769_v50  ;;  %869 = vst.msk [vmem:[#allocation2 + $0x234] sm:$0xf] %vm593_vm0, %v565_v6  ;;  %v1004_v51 = vld [vmem:[#allocation2 + $0xb1] sm:$0xff] }
 0x117   :  { %v489_v42 = vcombine.high %v387_v20, %v387_v20  ;;  %v568_v38 = vmax.f32 %v387_v20, 0.0  ;;  %v816_v46 = vcombine.low %v563_v55, %v564_v11  ;;  %v13862_v55 = vpop.permute.xlu1 %2233 }
 0x118   :  { %v12801_v16 = vpop.f32.mrb[20].mxu0  ;;  %v488_v7 = vcombine.high %v382_v59, %v382_v59  ;;  %v566_v3 = vmax.f32 %v382_v59, 0.0  ;;  %1891 = vrot.lane.b32.xlu0 %v1004_v51, %s13026_s14  ;;  %20088 = vst [vmem:[#allocation26_spill] sm:$0xff] %v13862_v55  ;;  %v1100_v51 = vld [vmem:[#allocation2 + $0xb2] sm:$0xff]  ;;  %v1696_v55 = vld [vmem:[#allocation2 + $0x17a] sm:$0x3] }
 0x119   :  { %871 = vst.msk [vmem:[#allocation2 + $0x24c] sm:$0xf] %vm593_vm0, %v568_v38  ;;  %v397_v19 = vadd.f32 %v12801_v16, %v13769_v50  ;;  %v391_v63 = vpop.f32.mrb[21].mxu0  ;;  %1889 = vrot.lane.b32.xlu1 %v1003_v58, %s13026_s14  ;;  %v569_v43 = vmax.f32 %v489_v42, 0.0  ;;  %v13864_v38 = vpop.permute.xlu0 %2231 }
 0x11a   :  { %868 = vst.msk [vmem:[#allocation2 + $0x22c] sm:$0xff] %vm590_vm1, %v816_v46  ;;  %v567_v62 = vmax.f32 %v488_v7, 0.0  ;;  %v392_v20 = vadd.f32 %v391_v63, %v13777_v2  ;;  %20089 = vst [vmem:[#allocation27_spill] sm:$0xff] %v13864_v38  ;;  %v912_v38 = vld [vmem:[#allocation2 + $0xd0] sm:$0x3] }
 0x11b   :  { %v491_v11 = vcombine.high %v397_v19, %v397_v19  ;;  %v572_v6 = vmax.f32 %v397_v19, 0.0 }
 0x11c   :  { %v12804_v10 = vpop.f32.mrb[22].mxu0  ;;  %v817_v59 = vcombine.low %v566_v3, %v567_v62  ;;  %v490_v16 = vcombine.high %v392_v20, %v392_v20  ;;  %v570_v39 = vmax.f32 %v392_v20, 0.0  ;;  %2275 = vrot.lane.b32.xlu0 %v1100_v51, %s13027_s0 }
 0x11d   :  { %v407_v58 = vadd.f32 %v12804_v10, %v13777_v2  ;;  %v573_v54 = vmax.f32 %v491_v11, 0.0  ;;  %v401_v46 = vpop.f32.mrb[23].mxu0  ;;  %2273 = vrot.lane.b32.xlu1 %v1099_v15, %s13027_s0  ;;  %v1007_v10 = vld [vmem:[#allocation2 + $0xc9] sm:$0xff]  ;;  %v1006_v15 = vld [vmem:[#allocation2 + $0xc1] sm:$0xff] }
 0x11e   :  { %870 = vst.msk [vmem:[#allocation2 + $0x244] sm:$0xff] %vm590_vm1, %v817_v59  ;;  %v571_v42 = vmax.f32 %v490_v16, 0.0  ;;  %v818_v7 = vcombine.low %v569_v43, %v570_v39  ;;  %v402_v3 = vadd.f32 %v401_v46, %v13767_v47  ;;  %v13875_v43 = vpop.permute.xlu1 %2237 }
 0x11f   :  { %v493_v19 = vcombine.high %v407_v58, %v407_v58  ;;  %v819_v63 = vcombine.low %v572_v6, %v573_v54  ;;  %v576_v51 = vmax.f32 %v407_v58, 0.0  ;;  %20090 = vst [vmem:[#allocation28_spill] sm:$0xff] %v13875_v43  ;;  %v13877_v54 = vpop.permute.xlu0 %2235 }
 0x120   :  { %v12807_v62 = vpop.f32.mrb[24].mxu0  ;;  %872 = vst.msk [vmem:[#allocation2 + $0x25c] sm:$0xff] %vm590_vm1, %v818_v7  ;;  %v492_v59 = vcombine.high %v402_v3, %v402_v3  ;;  %v574_v16 = vmax.f32 %v402_v3, 0.0  ;;  %20091 = vst [vmem:[#allocation29_spill] sm:$0xff] %v13877_v54  ;;  %1895 = vrot.lane.b32.xlu0 %v1006_v15, %s13026_s14 }
 0x121   :  { %873 = vst.msk [vmem:[#allocation2 + $0x264] sm:$0xf] %vm593_vm0, %v571_v42  ;;  %v577_v20 = vmax.f32 %v493_v19, 0.0  ;;  %v417_v11 = vadd.f32 %v12807_v62, %v13767_v47  ;;  %v411_v39 = vpop.f32.mrb[25].mxu0  ;;  %1897 = vrot.lane.b32.xlu1 %v1007_v10, %s13026_s14  ;;  %v1103_v62 = vld [vmem:[#allocation2 + $0xca] sm:$0xff]  ;;  %v1102_v10 = vld [vmem:[#allocation2 + $0xc2] sm:$0xff] }
 0x122   :  { %874 = vst.msk [vmem:[#allocation2 + $0x274] sm:$0xff] %vm590_vm1, %v819_v63  ;;  %v412_v42 = vadd.f32 %v411_v39, %v13769_v50  ;;  %v575_v7 = vmax.f32 %v492_v59, 0.0 }
 0x123   :  { %877 = vst.msk [vmem:[#allocation2 + $0x294] sm:$0xf] %vm593_vm0, %v577_v20  ;;  %v495_v6 = vcombine.high %v417_v11, %v417_v11  ;;  %v580_v46 = vmax.f32 %v417_v11, 0.0  ;;  %875 = vst.msk [vmem:[#allocation2 + $0x27c] sm:$0xf] %vm593_vm0, %v574_v16 }
 0x124   :  { %v12810_v58 = vpop.f32.mrb[26].mxu0  ;;  %v494_v19 = vcombine.high %v412_v42, %v412_v42  ;;  %v578_v63 = vmax.f32 %v412_v42, 0.0  ;;  %v820_v54 = vcombine.low %v575_v7, %v576_v51  ;;  %2279 = vrot.lane.b32.xlu0 %v1102_v10, %s13027_s0 }
 0x125   :  { %879 = vst.msk [vmem:[#allocation2 + $0x2ac] sm:$0xf] %vm593_vm0, %v580_v46  ;;  %v427_v3 = vadd.f32 %v12810_v58, %v13769_v50  ;;  %v581_v15 = vmax.f32 %v495_v6, 0.0  ;;  %v421_v43 = vpop.f32.mrb[27].mxu0  ;;  %2281 = vrot.lane.b32.xlu1 %v1103_v62, %s13027_s0  ;;  %v13890_v46 = vpop.permute.xlu1 %2241  ;;  %v1009_v58 = vld [vmem:[#allocation2 + $0xd9] sm:$0xff]  ;;  %v1010_v62 = vld [vmem:[#allocation2 + $0xe1] sm:$0xff] }
 0x126   :  { %v579_v20 = vmax.f32 %v494_v19, 0.0  ;;  %v422_v16 = vadd.f32 %v421_v43, %v13777_v2  ;;  %876 = vst.msk [vmem:[#allocation2 + $0x28c] sm:$0xff] %vm590_vm1, %v820_v54  ;;  %20092 = vst [vmem:[#allocation30_spill] sm:$0xff] %v13890_v46  ;;  %v13892_v50 = vpop.permute.xlu0 %2239  ;;  %v915_v46 = vld [vmem:[#allocation2 + $0xe8] sm:$0x3] }
 0x127   :  { %v497_v11 = vcombine.high %v427_v3, %v427_v3  ;;  %v584_v59 = vmax.f32 %v427_v3, 0.0  ;;  %20093 = vst [vmem:[#allocation31_spill] sm:$0xff] %v13892_v50 }
 0x128   :  { %v12813_v39 = vpop.f32.mrb[28].mxu0  ;;  %v821_v42 = vcombine.low %v578_v63, %v579_v20  ;;  %v496_v6 = vcombine.high %v422_v16, %v422_v16  ;;  %v582_v7 = vmax.f32 %v422_v16, 0.0  ;;  %1903 = vrot.lane.b32.xlu0 %v1010_v62, %s13026_s14  ;;  %v1105_v16 = vld [vmem:[#allocation2 + $0xda] sm:$0xff] }
 0x129   :  { %v585_v51 = vmax.f32 %v497_v11, 0.0  ;;  %v437_v10 = vadd.f32 %v12813_v39, %v13777_v2  ;;  %v431_v19 = vpop.f32.mrb[29].mxu0  ;;  %1901 = vrot.lane.b32.xlu1 %v1009_v58, %s13026_s14  ;;  %v1106_v39 = vld [vmem:[#allocation2 + $0xe2] sm:$0xff]  ;;  %v13902_v62 = vpop.permute.xlu1 %2245 }
 0x12a   :  { %878 = vst.msk [vmem:[#allocation2 + $0x2a4] sm:$0xff] %vm590_vm1, %v821_v42  ;;  %v583_v54 = vmax.f32 %v496_v6, 0.0  ;;  %v822_v3 = vcombine.low %v581_v15, %v582_v7  ;;  %v432_v50 = vadd.f32 %v431_v19, %v13767_v47  ;;  %20094 = vst [vmem:[#allocation32_spill] sm:$0xff] %v13902_v62  ;;  %v1013_v42 = vld [vmem:[#allocation2 + $0xf9] sm:$0xff]  ;;  %v1015_v19 = vld [vmem:[#allocation2 + $0x109] sm:$0xff] }
 0x12b   :  { %v823_v43 = vcombine.low %v584_v59, %v585_v51  ;;  %v499_v63 = vcombine.high %v437_v10, %v437_v10  ;;  %v588_v2 = vmax.f32 %v437_v10, 0.0  ;;  %v13904_v59 = vpop.permute.xlu0 %2243  ;;  %v1012_v51 = vld [vmem:[#allocation2 + $0xf1] sm:$0xff]  ;;  %v1109_v7 = vld [vmem:[#allocation2 + $0xfa] sm:$0xff] }
 0x12c   :  { %880 = vst.msk [vmem:[#allocation2 + $0x2bc] sm:$0xff] %vm590_vm1, %v822_v3  ;;  %v498_v20 = vcombine.high %v432_v50, %v432_v50  ;;  %v586_v11 = vmax.f32 %v432_v50, 0.0  ;;  %20095 = vst [vmem:[#allocation33_spill] sm:$0xff] %v13904_v59  ;;  %2287 = vrot.lane.b32.xlu0 %v1106_v39, %s13027_s0  ;;  %v1108_v10 = vld [vmem:[#allocation2 + $0xf2] sm:$0xff]  ;;  %v1018_v39 = vld [vmem:[#allocation2 + $0x121] sm:$0xff] }
 0x12d   :  { %882 = vst.msk [vmem:[#allocation2 + $0x2d4] sm:$0xff] %vm590_vm1, %v823_v43  ;;  %v589_v58 = vmax.f32 %v499_v63, 0.0  ;;  %2285 = vrot.lane.b32.xlu1 %v1105_v16, %s13027_s0  ;;  %v13913_v50 = vpop.permute.xlu1 %2249  ;;  %v1016_v43 = vld [vmem:[#allocation2 + $0x111] sm:$0xff]  ;;  %v1019_v16 = vld [vmem:[#allocation2 + $0x129] sm:$0xff]  ;;  %v906_v62 = vld [vmem:[#allocation2 + $0xa0] sm:$0x3] }
 0x12e   :  { %881 = vst.msk [vmem:[#allocation2 + $0x2c4] sm:$0xf] %vm593_vm0, %v583_v54  ;;  %v587_v47 = vmax.f32 %v498_v20, 0.0  ;;  %883 = vst.msk [vmem:[#allocation2 + $0x2dc] sm:$0xf] %vm593_vm0, %v586_v11  ;;  %v1111_v63 = vld [vmem:[#allocation2 + $0x10a] sm:$0xff] }
 0x12f   :  { %885 = vst.msk [vmem:[#allocation2 + $0x2f4] sm:$0xf] %vm593_vm0, %v589_v58  ;;  %20096 = vst [vmem:[#allocation34_spill] sm:$0xff] %v13913_v50  ;;  %v13915_v6 = vpop.permute.xlu0 %2247  ;;  %v1115_v58 = vld [vmem:[#allocation2 + $0x12a] sm:$0xff] }
 0x130   :  { %v824_v15 = vcombine.low %v587_v47, %v588_v2  ;;  %1907 = vrot.lane.b32.xlu0 %v1012_v51, %s13026_s14  ;;  %20097 = vst [vmem:[#allocation35_spill] sm:$0xff] %v13915_v6  ;;  %v1112_v2 = vld [vmem:[#allocation2 + $0x112] sm:$0xff]  ;;  %v1114_v47 = vld [vmem:[#allocation2 + $0x122] sm:$0xff]  ;;  %v894_v6 = vld [vmem:[#allocation2 + $0x40] sm:$0x3] }
 0x131   :  { %1909 = vrot.lane.b32.xlu1 %v1013_v42, %s13026_s14  ;;  %v13919_v54 = vpop.permute.xlu1 %2253  ;;  %v1021_v51 = vld [vmem:[#allocation2 + $0x139] sm:$0xff]  ;;  %v896_v50 = vld [vmem:[#allocation2 + $0x50] sm:$0xff] }
 0x132   :  { %884 = vst.msk [vmem:[#allocation2 + $0x2ec] sm:$0xff] %vm590_vm1, %v824_v15  ;;  %20098 = vst [vmem:[#allocation36_spill] sm:$0xff] %v13919_v54  ;;  %v900_v59 = vld [vmem:[#allocation2 + $0x70] sm:$0x3] }
 0x133   :  { %v13921_v3 = vpop.permute.xlu0 %2251 }
 0x134   :  { %2291 = vrot.lane.b32.xlu0 %v1108_v10, %s13027_s0  ;;  %20099 = vst [vmem:[#allocation37_spill] sm:$0xff] %v13921_v3  ;;  %v893_v3 = vld [vmem:[#allocation2 + $0x38] sm:$0xff] }
 0x135   :  { %2293 = vrot.lane.b32.xlu1 %v1109_v7, %s13027_s0  ;;  %v13927_v20 = vpop.permute.xlu1 %2265  ;;  %v1022_v7 = vld [vmem:[#allocation2 + $0x141] sm:$0xff] }
 0x136   :  { %20100 = vst [vmem:[#allocation38_spill] sm:$0xff] %v13927_v20  ;;  %v890_v20 = vld [vmem:[#allocation2 + $0x20] sm:$0xff] }
 0x137   :  { %v13929_v11 = vpop.permute.xlu0 %2259 }
 0x138   :  { %1915 = vrot.lane.b32.xlu0 %v1016_v43, %s13026_s14  ;;  %20101 = vst [vmem:[#allocation39_spill] sm:$0xff] %v13929_v11  ;;  %v1117_v43 = vld [vmem:[#allocation2 + $0x13a] sm:$0xff]  ;;  %v887_v11 = vld [vmem:[#allocation2 + $0x8] sm:$0xff] }
 0x139   :  { %1913 = vrot.lane.b32.xlu1 %v1015_v19, %s13026_s14  ;;  %v13933_v15 = vpop.permute.xlu1 %2277 }
 0x13a   :  { %20102 = vst [vmem:[#allocation40_spill] sm:$0xff] %v13933_v15  ;;  %v1697_v15 = vld [vmem:[#allocation2 + $0x182] sm:$0xff] }
 0x13b   :  { %v13935_v42 = vpop.permute.xlu0 %2271 }
 0x13c   :  { %2299 = vrot.lane.b32.xlu0 %v1112_v2, %s13027_s0  ;;  %20103 = vst [vmem:[#allocation41_spill] sm:$0xff] %v13935_v42  ;;  %v1043_v2 = vld [vmem:[#allocation2 + $0x219] sm:$0xff] }
 0x13d   :  { %2297 = vrot.lane.b32.xlu1 %v1111_v63, %s13027_s0  ;;  %v13941_v10 = vpop.permute.xlu1 %2289  ;;  %v1118_v63 = vld [vmem:[#allocation2 + $0x142] sm:$0xff] }
 0x13e   :  { %20104 = vst [vmem:[#allocation42_spill] sm:$0xff] %v13941_v10 }
 0x13f   :  { %v13943_v19 = vpop.permute.xlu0 %2283 }
 0x140   :  { %1919 = vrot.lane.b32.xlu0 %v1018_v39, %s13026_s14  ;;  %20105 = vst [vmem:[#allocation43_spill] sm:$0xff] %v13943_v19  ;;  %v1048_v19 = vld [vmem:[#allocation2 + $0x241] sm:$0xff] }
 0x141   :  { %1921 = vrot.lane.b32.xlu1 %v1019_v16, %s13026_s14  ;;  %v1042_v16 = vld [vmem:[#allocation2 + $0x211] sm:$0xff]  ;;  %v13947_v39 = vpop.permute.xlu1 %2301 }
 0x142   :  { %20106 = vst [vmem:[#allocation44_spill] sm:$0xff] %v13947_v39 }
 0x144   :  { %2303 = vrot.lane.b32.xlu0 %v1114_v47, %s13027_s0  ;;  %v1045_v47 = vld [vmem:[#allocation2 + $0x229] sm:$0xff] }
 0x145   :  { %2305 = vrot.lane.b32.xlu1 %v1115_v58, %s13027_s0  ;;  %v13949_v58 = vpop.permute.xlu0 %2295 }
 0x146   :  { %20107 = vst [vmem:[#allocation45_spill] sm:$0xff] %v13949_v58  ;;  %v1051_v58 = vld [vmem:[#allocation2 + $0x259] sm:$0xff] }
 0x148   :  { %1927 = vrot.lane.b32.xlu0 %v1022_v7, %s13026_s14  ;;  %v13955_v7 = vpop.permute.xlu1 %2313 }
 0x149   :  { %1925 = vrot.lane.b32.xlu1 %v1021_v51, %s13026_s14  ;;  %v1046_v51 = vld [vmem:[#allocation2 + $0x231] sm:$0xff]  ;;  %20108 = vst [vmem:[#allocation46_spill] sm:$0xff] %v13955_v7 }
 0x14a   :  { %v1058_v7 = vld [vmem:[#allocation2 + $0x291] sm:$0xff] }
 0x14c   :  { %2311 = vrot.lane.b32.xlu0 %v1118_v63, %s13027_s0  ;;  %v1049_v63 = vld [vmem:[#allocation2 + $0x249] sm:$0xff]  ;;  %v13961_v39 = vpop.permute.xlu1 %2317 }
 0x14d   :  { %2309 = vrot.lane.b32.xlu1 %v1117_v43, %s13027_s0  ;;  %v13957_v43 = vpop.permute.xlu0 %2307  ;;  %20110 = vst [vmem:[#allocation48_spill] sm:$0xff] %v13961_v39 }
 0x14e   :  { %20109 = vst [vmem:[#allocation47_spill] sm:$0xff] %v13957_v43 }
 0x150   :  { %1967 = vrot.lane.b32.xlu0 %v1042_v16, %s13026_s14  ;;  %v13969_v43 = vpop.permute.xlu1 %2321 }
 0x151   :  { %1969 = vrot.lane.b32.xlu1 %v1043_v2, %s13026_s14  ;;  %v1052_v2 = vld [vmem:[#allocation2 + $0x261] sm:$0xff]  ;;  %v13963_v16 = vpop.permute.xlu0 %2315  ;;  %20112 = vst [vmem:[#allocation50_spill] sm:$0xff] %v13969_v43  ;;  %v1066_v43 = vld [vmem:[#allocation2 + $0x2d1] sm:$0xff] }
 0x152   :  { %20111 = vst [vmem:[#allocation49_spill] sm:$0xff] %v13963_v16  ;;  %v1061_v16 = vld [vmem:[#allocation2 + $0x2a9] sm:$0xff] }
 0x154   :  { %1975 = vrot.lane.b32.xlu0 %v1046_v51, %s13026_s14  ;;  %v1054_v51 = vld [vmem:[#allocation2 + $0x271] sm:$0xff]  ;;  %v13975_v39 = vpop.permute.xlu1 %2325 }
 0x155   :  { %1973 = vrot.lane.b32.xlu1 %v1045_v47, %s13026_s14  ;;  %v1055_v47 = vld [vmem:[#allocation2 + $0x279] sm:$0xff]  ;;  %20114 = vst [vmem:[#allocation52_spill] sm:$0xff] %v13975_v39 }
 0x156   :  { %v1067_v39 = vld [vmem:[#allocation2 + $0x2d9] sm:$0xff] }
 0x158   :  { %1979 = vrot.lane.b32.xlu0 %v1048_v19, %s13026_s14  ;;  %v1057_v19 = vld [vmem:[#allocation2 + $0x289] sm:$0xff] }
 0x159   :  { %1981 = vrot.lane.b32.xlu1 %v1049_v63, %s13026_s14  ;;  %v13971_v63 = vpop.permute.xlu0 %2319 }
 0x15a   :  { %20113 = vst [vmem:[#allocation51_spill] sm:$0xff] %v13971_v63  ;;  %v1129_v63 = vld [vmem:[#allocation2 + $0x1ca] sm:$0xff] }
 0x15c   :  { %1987 = vrot.lane.b32.xlu0 %v1052_v2, %s13026_s14 }
 0x15d   :  { %1985 = vrot.lane.b32.xlu1 %v1051_v58, %s13026_s14  ;;  %v1060_v58 = vld [vmem:[#allocation2 + $0x2a1] sm:$0xff]  ;;  %v13977_v2 = vpop.permute.xlu0 %2323 }
 0x15e   :  { %20115 = vst [vmem:[#allocation53_spill] sm:$0xff] %v13977_v2  ;;  %v1128_v2 = vld [vmem:[#allocation2 + $0x1c2] sm:$0x3] }
 0x160   :  { %1991 = vrot.lane.b32.xlu0 %v1054_v51, %s13026_s14  ;;  %v1064_v51 = vld [vmem:[#allocation2 + $0x2c1] sm:$0xff] }
 0x161   :  { %1993 = vrot.lane.b32.xlu1 %v1055_v47, %s13026_s14  ;;  %v1063_v47 = vld [vmem:[#allocation2 + $0x2b9] sm:$0xff] }
 0x164   :  { %1999 = vrot.lane.b32.xlu0 %v1058_v7, %s13026_s14  ;;  %v13985_v7 = vpop.permute.xlu0 %2327 }
 0x165   :  { %1997 = vrot.lane.b32.xlu1 %v1057_v19, %s13026_s14  ;;  %v13983_v19 = vpop.permute.xlu1 %2329  ;;  %20117 = vst [vmem:[#allocation55_spill] sm:$0xff] %v13985_v7  ;;  %v1069_v7 = vld [vmem:[#allocation2 + $0x2e9] sm:$0xff] }
 0x166   :  { %20116 = vst [vmem:[#allocation54_spill] sm:$0xff] %v13983_v19  ;;  %v1070_v19 = vld [vmem:[#allocation2 + $0x2f1] sm:$0xff] }
 0x168   :  { %2003 = vrot.lane.b32.xlu0 %v1060_v58, %s13026_s14 }
 0x169   :  { %2005 = vrot.lane.b32.xlu1 %v1061_v16, %s13026_s14 }
 0x16c   :  { %2011 = vrot.lane.b32.xlu0 %v1064_v51, %s13026_s14 }
 0x16d   :  { %2009 = vrot.lane.b32.xlu1 %v1063_v47, %s13026_s14 }
 0x170   :  { %2015 = vrot.lane.b32.xlu0 %v1066_v43, %s13026_s14  ;;  %v1131_v43 = vld [vmem:[#allocation2 + $0x1da] sm:$0x3] }
 0x171   :  { %2333 = vrot.lane.b32.xlu1 %v1129_v63, %s13027_s0  ;;  %v1130_v63 = vld [vmem:[#allocation2 + $0x1d2] sm:$0xff] }
 0x172   :  { %v13991_v58 = vpop.permute.xlu0 %1871 }
 0x173   :  { %v13989_v16 = vpop.permute.xlu1 %1873  ;;  %20119 = vst [vmem:[#allocation57_spill] sm:$0xff] %v13991_v58 }
 0x174   :  { %20118 = vst [vmem:[#allocation56_spill] sm:$0xff] %v13989_v16  ;;  %2331 = vrot.lane.b32.xlu0 %v1128_v2, %s13027_s0  ;;  %v1132_v2 = vld [vmem:[#allocation2 + $0x1e2] sm:$0xff] }
 0x175   :  { %2017 = vrot.lane.b32.xlu1 %v1067_v39, %s13026_s14  ;;  %v1133_v39 = vld [vmem:[#allocation2 + $0x1ea] sm:$0xff] }
 0x176   :  { %v13997_v51 = vpop.permute.xlu0 %2255 }
 0x177   :  { %v13995_v47 = vpop.permute.xlu1 %2257  ;;  %20121 = vst [vmem:[#allocation59_spill] sm:$0xff] %v13997_v51 }
 0x178   :  { %20120 = vst [vmem:[#allocation58_spill] sm:$0xff] %v13995_v47  ;;  %2023 = vrot.lane.b32.xlu0 %v1070_v19, %s13026_s14  ;;  %v1135_v19 = vld [vmem:[#allocation2 + $0x1fa] sm:$0xff] }
 0x179   :  { %2021 = vrot.lane.b32.xlu1 %v1069_v7, %s13026_s14  ;;  %v1134_v7 = vld [vmem:[#allocation2 + $0x1f2] sm:$0x3]  ;;  %s13029_s14 = smov 16  }
 0x17a   :  { %v14003_v58 = vpop.permute.xlu0 %1879 }
 0x17b   :  { %v14001_v16 = vpop.permute.xlu1 %1877  ;;  %20123 = vst [vmem:[#allocation61_spill] sm:$0xff] %v14003_v58 }
 0x17c   :  { %20122 = vst [vmem:[#allocation60_spill] sm:$0xff] %v14001_v16  ;;  %2335 = vrot.lane.b32.xlu0 %v1130_v63, %s13027_s0  ;;  %v1136_v63 = vld [vmem:[#allocation2 + $0x202] sm:$0xff] }
 0x17d   :  { %2337 = vrot.lane.b32.xlu1 %v1131_v43, %s13027_s0  ;;  %v1137_v43 = vld [vmem:[#allocation2 + $0x20a] sm:$0x3] }
 0x17e   :  { %v14009_v51 = vpop.permute.xlu0 %2263 }
 0x17f   :  { %v14007_v47 = vpop.permute.xlu1 %2261  ;;  %20125 = vst [vmem:[#allocation63_spill] sm:$0xff] %v14009_v51  ;;  %v1139_v51 = vld [vmem:[#allocation2 + $0x21a] sm:$0xff] }
 0x180   :  { %20124 = vst [vmem:[#allocation62_spill] sm:$0xff] %v14007_v47  ;;  %2339 = vrot.lane.b32.xlu0 %v1132_v2, %s13027_s0 }
 0x181   :  { %2341 = vrot.lane.b32.xlu1 %v1133_v39, %s13027_s0 }
 0x182   :  { %v14015_v16 = vpop.permute.xlu0 %1883 }
 0x183   :  { %v14013_v10 = vpop.permute.xlu1 %1885  ;;  %20127 = vst [vmem:[#allocation65_spill] sm:$0xff] %v14015_v16  ;;  %v1138_v16 = vld [vmem:[#allocation2 + $0x212] sm:$0xff] }
 0x184   :  { %20126 = vst [vmem:[#allocation64_spill] sm:$0xff] %v14013_v10  ;;  %2343 = vrot.lane.b32.xlu0 %v1134_v7, %s13027_s0 }
 0x185   :  { %2345 = vrot.lane.b32.xlu1 %v1135_v19, %s13027_s0  ;;  %v1140_v19 = vld [vmem:[#allocation2 + $0x222] sm:$0x3] }
 0x186   :  { %v14021_v47 = vpop.permute.xlu0 %2267 }
 0x187   :  { %v14019_v58 = vpop.permute.xlu1 %2269  ;;  %20129 = vst [vmem:[#allocation67_spill] sm:$0xff] %v14021_v47  ;;  %v1141_v47 = vld [vmem:[#allocation2 + $0x22a] sm:$0xff] }
 0x188   :  { %20128 = vst [vmem:[#allocation66_spill] sm:$0xff] %v14019_v58  ;;  %2347 = vrot.lane.b32.xlu0 %v1136_v63, %s13027_s0 }
 0x189   :  { %2349 = vrot.lane.b32.xlu1 %v1137_v43, %s13027_s0  ;;  %v1143_v43 = vld [vmem:[#allocation2 + $0x23a] sm:$0x3] }
 0x18a   :  { %v14027_v2 = vpop.permute.xlu0 %1891 }
 0x18b   :  { %v14025_v39 = vpop.permute.xlu1 %1889  ;;  %20131 = vst [vmem:[#allocation69_spill] sm:$0xff] %v14027_v2 }
 0x18c   :  { %20130 = vst [vmem:[#allocation68_spill] sm:$0xff] %v14025_v39  ;;  %2351 = vrot.lane.b32.xlu0 %v1138_v16, %s13027_s0  ;;  %v1142_v39 = vld [vmem:[#allocation2 + $0x232] sm:$0xff] }
 0x18d   :  { %2353 = vrot.lane.b32.xlu1 %v1139_v51, %s13027_s0 }
 0x18e   :  { %v14033_v58 = vpop.permute.xlu0 %2275 }
 0x18f   :  { %v14031_v7 = vpop.permute.xlu1 %2273  ;;  %20133 = vst [vmem:[#allocation71_spill] sm:$0xff] %v14033_v58  ;;  %v1145_v58 = vld [vmem:[#allocation2 + $0x24a] sm:$0xff] }
 0x190   :  { %20132 = vst [vmem:[#allocation70_spill] sm:$0xff] %v14031_v7  ;;  %2355 = vrot.lane.b32.xlu0 %v1140_v19, %s13027_s0  ;;  %v1144_v7 = vld [vmem:[#allocation2 + $0x242] sm:$0xff] }
 0x191   :  { %2357 = vrot.lane.b32.xlu1 %v1141_v47, %s13027_s0  ;;  %v1146_v47 = vld [vmem:[#allocation2 + $0x252] sm:$0x3] }
 0x192   :  { %v14039_v2 = vpop.permute.xlu0 %1895 }
 0x193   :  { %v14037_v63 = vpop.permute.xlu1 %1897  ;;  %20135 = vst [vmem:[#allocation73_spill] sm:$0xff] %v14039_v2  ;;  %v1147_v2 = vld [vmem:[#allocation2 + $0x25a] sm:$0xff] }
 0x194   :  { %20134 = vst [vmem:[#allocation72_spill] sm:$0xff] %v14037_v63  ;;  %2359 = vrot.lane.b32.xlu0 %v1142_v39, %s13027_s0  ;;  %v1149_v39 = vld [vmem:[#allocation2 + $0x26a] sm:$0x3] }
 0x195   :  { %2361 = vrot.lane.b32.xlu1 %v1143_v43, %s13027_s0 }
 0x196   :  { %v14045_v51 = vpop.permute.xlu0 %2279 }
 0x197   :  { %v14043_v16 = vpop.permute.xlu1 %2281  ;;  %20137 = vst [vmem:[#allocation75_spill] sm:$0xff] %v14045_v51 }
 0x198   :  { %20136 = vst [vmem:[#allocation74_spill] sm:$0xff] %v14043_v16  ;;  %2363 = vrot.lane.b32.xlu0 %v1144_v7, %s13027_s0  ;;  %v1148_v16 = vld [vmem:[#allocation2 + $0x262] sm:$0xff] }
 0x199   :  { %2365 = vrot.lane.b32.xlu1 %v1145_v58, %s13027_s0 }
 0x19a   :  { %v14051_v63 = vpop.permute.xlu0 %1903 }
 0x19b   :  { %v14049_v19 = vpop.permute.xlu1 %1901  ;;  %20139 = vst [vmem:[#allocation77_spill] sm:$0xff] %v14051_v63  ;;  %v1151_v63 = vld [vmem:[#allocation2 + $0x27a] sm:$0xff] }
 0x19c   :  { %20138 = vst [vmem:[#allocation76_spill] sm:$0xff] %v14049_v19  ;;  %2367 = vrot.lane.b32.xlu0 %v1146_v47, %s13027_s0  ;;  %v1150_v19 = vld [vmem:[#allocation2 + $0x272] sm:$0xff] }
 0x19d   :  { %2369 = vrot.lane.b32.xlu1 %v1147_v2, %s13027_s0  ;;  %v1152_v2 = vld [vmem:[#allocation2 + $0x282] sm:$0x3] }
 0x19e   :  { %v14057_v51 = vpop.permute.xlu0 %2287 }
 0x19f   :  { %v14055_v43 = vpop.permute.xlu1 %2285  ;;  %20141 = vst [vmem:[#allocation79_spill] sm:$0xff] %v14057_v51  ;;  %v1153_v51 = vld [vmem:[#allocation2 + $0x28a] sm:$0xff] }
 0x1a0   :  { %20140 = vst [vmem:[#allocation78_spill] sm:$0xff] %v14055_v43  ;;  %2371 = vrot.lane.b32.xlu0 %v1148_v16, %s13027_s0  ;;  %v1155_v16 = vld [vmem:[#allocation2 + $0x29a] sm:$0x3] }
 0x1a1   :  { %2373 = vrot.lane.b32.xlu1 %v1149_v39, %s13027_s0 }
 0x1a2   :  { %v14063_v7 = vpop.permute.xlu0 %1907 }
 0x1a3   :  { %v14061_v58 = vpop.permute.xlu1 %1909  ;;  %20143 = vst [vmem:[#allocation81_spill] sm:$0xff] %v14063_v7 }
 0x1a4   :  { %20142 = vst [vmem:[#allocation80_spill] sm:$0xff] %v14061_v58  ;;  %2375 = vrot.lane.b32.xlu0 %v1150_v19, %s13027_s0  ;;  %v1154_v58 = vld [vmem:[#allocation2 + $0x292] sm:$0xff] }
 0x1a5   :  { %2377 = vrot.lane.b32.xlu1 %v1151_v63, %s13027_s0 }
 0x1a6   :  { %v14069_v43 = vpop.permute.xlu0 %2291 }
 0x1a7   :  { %v14067_v47 = vpop.permute.xlu1 %2293  ;;  %20145 = vst [vmem:[#allocation83_spill] sm:$0xff] %v14069_v43  ;;  %v1157_v43 = vld [vmem:[#allocation2 + $0x2aa] sm:$0xff] }
 0x1a8   :  { %20144 = vst [vmem:[#allocation82_spill] sm:$0xff] %v14067_v47  ;;  %2379 = vrot.lane.b32.xlu0 %v1152_v2, %s13027_s0  ;;  %v1156_v47 = vld [vmem:[#allocation2 + $0x2a2] sm:$0xff] }
 0x1a9   :  { %2381 = vrot.lane.b32.xlu1 %v1153_v51, %s13027_s0  ;;  %v1158_v51 = vld [vmem:[#allocation2 + $0x2b2] sm:$0x3] }
 0x1aa   :  { %v14075_v7 = vpop.permute.xlu0 %1915 }
 0x1ab   :  { %v14073_v39 = vpop.permute.xlu1 %1913  ;;  %20147 = vst [vmem:[#allocation85_spill] sm:$0xff] %v14075_v7  ;;  %v1159_v7 = vld [vmem:[#allocation2 + $0x2ba] sm:$0xff] }
 0x1ac   :  { %20146 = vst [vmem:[#allocation84_spill] sm:$0xff] %v14073_v39  ;;  %2383 = vrot.lane.b32.xlu0 %v1154_v58, %s13027_s0  ;;  %v1161_v58 = vld [vmem:[#allocation2 + $0x2ca] sm:$0x3] }
 0x1ad   :  { %2385 = vrot.lane.b32.xlu1 %v1155_v16, %s13027_s0 }
 0x1ae   :  { %v14081_v19 = vpop.permute.xlu0 %2299 }
 0x1af   :  { %v14079_v63 = vpop.permute.xlu1 %2297  ;;  %20149 = vst [vmem:[#allocation87_spill] sm:$0xff] %v14081_v19 }
 0x1b0   :  { %20148 = vst [vmem:[#allocation86_spill] sm:$0xff] %v14079_v63  ;;  %2387 = vrot.lane.b32.xlu0 %v1156_v47, %s13027_s0  ;;  %v1160_v63 = vld [vmem:[#allocation2 + $0x2c2] sm:$0xff] }
 0x1b1   :  { %2389 = vrot.lane.b32.xlu1 %v1157_v43, %s13027_s0 }
 0x1b2   :  { %v14087_v39 = vpop.permute.xlu0 %1919 }
 0x1b3   :  { %v14085_v2 = vpop.permute.xlu1 %1921  ;;  %20151 = vst [vmem:[#allocation89_spill] sm:$0xff] %v14087_v39  ;;  %v1163_v39 = vld [vmem:[#allocation2 + $0x2da] sm:$0xff] }
 0x1b4   :  { %20150 = vst [vmem:[#allocation88_spill] sm:$0xff] %v14085_v2  ;;  %2391 = vrot.lane.b32.xlu0 %v1158_v51, %s13027_s0  ;;  %v1162_v2 = vld [vmem:[#allocation2 + $0x2d2] sm:$0xff] }
 0x1b5   :  { %2393 = vrot.lane.b32.xlu1 %v1159_v7, %s13027_s0  ;;  %v1164_v7 = vld [vmem:[#allocation2 + $0x2e2] sm:$0x3] }
 0x1b6   :  { %v14093_v19 = vpop.permute.xlu0 %2303 }
 0x1b7   :  { %v14091_v16 = vpop.permute.xlu1 %2305  ;;  %20153 = vst [vmem:[#allocation91_spill] sm:$0xff] %v14093_v19  ;;  %v1165_v19 = vld [vmem:[#allocation2 + $0x2ea] sm:$0xff] }
 0x1b8   :  { %20152 = vst [vmem:[#allocation90_spill] sm:$0xff] %v14091_v16  ;;  %2395 = vrot.lane.b32.xlu0 %v1160_v63, %s13027_s0  ;;  %v1167_v63 = vld [vmem:[#allocation2 + $0x2fa] sm:$0x3] }
 0x1b9   :  { %2397 = vrot.lane.b32.xlu1 %v1161_v58, %s13027_s0 }
 0x1ba   :  { %v14099_v47 = vpop.permute.xlu0 %1927 }
 0x1bb   :  { %v14097_v43 = vpop.permute.xlu1 %1925  ;;  %20155 = vst [vmem:[#allocation93_spill] sm:$0xff] %v14099_v47 }
 0x1bc   :  { %20154 = vst [vmem:[#allocation92_spill] sm:$0xff] %v14097_v43  ;;  %2399 = vrot.lane.b32.xlu0 %v1162_v2, %s13027_s0  ;;  %v1166_v43 = vld [vmem:[#allocation2 + $0x2f2] sm:$0xff]  ;;  %v1168_v2 = vld [vmem:[#allocation2 + $0x302] sm:$0xff] }
 0x1bd   :  { %2401 = vrot.lane.b32.xlu1 %v1163_v39, %s13027_s0  ;;  %v1169_v39 = vld [vmem:[#allocation2 + $0x30a] sm:$0xff] }
 0x1be   :  { %v14105_v16 = vpop.permute.xlu0 %2311 }
 0x1bf   :  { %v14103_v51 = vpop.permute.xlu1 %2309  ;;  %20157 = vst [vmem:[#allocation95_spill] sm:$0xff] %v14105_v16 }
 0x1c0   :  { %20156 = vst [vmem:[#allocation94_spill] sm:$0xff] %v14103_v51  ;;  %2403 = vrot.lane.b32.xlu0 %v1164_v7, %s13027_s0  ;;  %v1170_v7 = vld [vmem:[#allocation2 + $0x312] sm:$0x3] }
 0x1c1   :  { %2405 = vrot.lane.b32.xlu1 %v1165_v19, %s13027_s0  ;;  %v1171_v19 = vld [vmem:[#allocation2 + $0x31a] sm:$0xff] }
 0x1c2   :  { %v14111_v47 = vpop.permute.xlu0 %1967 }
 0x1c3   :  { %v14109_v58 = vpop.permute.xlu1 %1969  ;;  %20159 = vst [vmem:[#allocation97_spill] sm:$0xff] %v14111_v47 }
 0x1c4   :  { %20158 = vst [vmem:[#allocation96_spill] sm:$0xff] %v14109_v58  ;;  %2407 = vrot.lane.b32.xlu0 %v1166_v43, %s13027_s0  ;;  %v1173_v43 = vld [vmem:[#allocation2 + $0x32a] sm:$0x3] }
 0x1c5   :  { %2409 = vrot.lane.b32.xlu1 %v1167_v63, %s13027_s0  ;;  %v1172_v63 = vld [vmem:[#allocation2 + $0x322] sm:$0xff] }
 0x1c6   :  { %v14117_v16 = vpop.permute.xlu0 %1975 }
 0x1c7   :  { %v14115_v51 = vpop.permute.xlu1 %1973  ;;  %20161 = vst [vmem:[#allocation99_spill] sm:$0xff] %v14117_v16 }
 0x1c8   :  { %20160 = vst [vmem:[#allocation98_spill] sm:$0xff] %v14115_v51  ;;  %2411 = vrot.lane.b32.xlu0 %v1168_v2, %s13027_s0  ;;  %v1175_v2 = vld [vmem:[#allocation2 + $0x18] sm:$0xff] }
 0x1c9   :  { %2413 = vrot.lane.b32.xlu1 %v1169_v39, %s13027_s0  ;;  %v1176_v39 = vld [vmem:[#allocation2 + $0x20] sm:$0xff] }
 0x1ca   :  { %v14123_v47 = vpop.permute.xlu0 %1979 }
 0x1cb   :  { %v14121_v58 = vpop.permute.xlu1 %1981  ;;  %20163 = vst [vmem:[#allocation101_spill] sm:$0xff] %v14123_v47 }
 0x1cc   :  { %20162 = vst [vmem:[#allocation100_spill] sm:$0xff] %v14121_v58  ;;  %2415 = vrot.lane.b32.xlu0 %v1170_v7, %s13027_s0  ;;  %v1177_v7 = vld [vmem:[#allocation2 + $0x28] sm:$0x3] }
 0x1cd   :  { %2417 = vrot.lane.b32.xlu1 %v1171_v19, %s13027_s0  ;;  %v1178_v19 = vld [vmem:[#allocation2 + $0x30] sm:$0xff] }
 0x1ce   :  { %v14129_v51 = vpop.permute.xlu0 %1987 }
 0x1cf   :  { %v14127_v10 = vpop.permute.xlu1 %1985  ;;  %20165 = vst [vmem:[#allocation103_spill] sm:$0xff] %v14129_v51 }
 0x1d0   :  { %20164 = vst [vmem:[#allocation102_spill] sm:$0xff] %v14127_v10  ;;  %2419 = vrot.lane.b32.xlu0 %v1172_v63, %s13027_s0  ;;  %v1179_v63 = vld [vmem:[#allocation2 + $0x38] sm:$0xff] }
 0x1d1   :  { %2421 = vrot.lane.b32.xlu1 %v1173_v43, %s13027_s0  ;;  %v1180_v43 = vld [vmem:[#allocation2 + $0x40] sm:$0x3] }
 0x1d2   :  { %v14135_v58 = vpop.permute.xlu0 %1991 }
 0x1d3   :  { %v14133_v16 = vpop.permute.xlu1 %1993  ;;  %20167 = vst [vmem:[#allocation105_spill] sm:$0xff] %v14135_v58 }
 0x1d4   :  { %20166 = vst [vmem:[#allocation104_spill] sm:$0xff] %v14133_v16  ;;  %2615 = vrot.lane.b32.xlu0 %v1175_v2, %s13028_s2  ;;  %v1181_v2 = vld [vmem:[#allocation2 + $0x48] sm:$0xff] }
 0x1d5   :  { %2617 = vrot.lane.b32.xlu1 %v1176_v39, %s13028_s2  ;;  %v1182_v39 = vld [vmem:[#allocation2 + $0x50] sm:$0xff] }
 0x1d6   :  { %v14141_v51 = vpop.permute.xlu0 %1999 }
 0x1d7   :  { %v14139_v10 = vpop.permute.xlu1 %1997  ;;  %20169 = vst [vmem:[#allocation107_spill] sm:$0xff] %v14141_v51 }
 0x1d8   :  { %20168 = vst [vmem:[#allocation106_spill] sm:$0xff] %v14139_v10  ;;  %2619 = vrot.lane.b32.xlu0 %v1177_v7, %s13028_s2 }
 0x1d9   :  { %2621 = vrot.lane.b32.xlu1 %v1178_v19, %s13028_s2  ;;  %v1183_v19 = vld [vmem:[#allocation2 + $0x58] sm:$0x3] }
 0x1da   :  { %v14147_v58 = vpop.permute.xlu0 %2003 }
 0x1db   :  { %v14145_v16 = vpop.permute.xlu1 %2005  ;;  %20171 = vst [vmem:[#allocation109_spill] sm:$0xff] %v14147_v58  ;;  %v898_v58 = vld [vmem:[#allocation2 + $0x60] sm:$0xff] }
 0x1dc   :  { %20170 = vst [vmem:[#allocation108_spill] sm:$0xff] %v14145_v16  ;;  %2623 = vrot.lane.b32.xlu0 %v1179_v63, %s13028_s2 }
 0x1dd   :  { %2625 = vrot.lane.b32.xlu1 %v1180_v43, %s13028_s2  ;;  %v1186_v43 = vld [vmem:[#allocation2 + $0x70] sm:$0x3] }
 0x1de   :  { %v14153_v10 = vpop.permute.xlu0 %2011 }
 0x1df   :  { %v14151_v47 = vpop.permute.xlu1 %2009  ;;  %20173 = vst [vmem:[#allocation111_spill] sm:$0xff] %v14153_v10  ;;  %v899_v10 = vld [vmem:[#allocation2 + $0x68] sm:$0xff] }
 0x1e0   :  { %20172 = vst [vmem:[#allocation110_spill] sm:$0xff] %v14151_v47  ;;  %2627 = vrot.lane.b32.xlu0 %v1181_v2, %s13028_s2 }
 0x1e1   :  { %2629 = vrot.lane.b32.xlu1 %v1182_v39, %s13028_s2 }
 0x1e2   :  { %v14159_v16 = vpop.permute.xlu0 %2015 }
 0x1e3   :  { %v14157_v7 = vpop.permute.xlu1 %2333  ;;  %20175 = vst [vmem:[#allocation113_spill] sm:$0xff] %v14159_v16  ;;  %v901_v16 = vld [vmem:[#allocation2 + $0x78] sm:$0xff] }
 0x1e4   :  { %20174 = vst [vmem:[#allocation112_spill] sm:$0xff] %v14157_v7  ;;  %2631 = vrot.lane.b32.xlu0 %v1183_v19, %s13028_s2  ;;  %v902_v7 = vld [vmem:[#allocation2 + $0x80] sm:$0xff] }
 0x1e5   :  { %2633 = vrot.lane.b32.xlu1 %v898_v58, %s13028_s2  ;;  %v1189_v58 = vld [vmem:[#allocation2 + $0x88] sm:$0x3] }
 0x1e6   :  { %v14165_v47 = vpop.permute.xlu0 %2331 }
 0x1e7   :  { %v14163_v63 = vpop.permute.xlu1 %2017  ;;  %20177 = vst [vmem:[#allocation115_spill] sm:$0xff] %v14165_v47  ;;  %v904_v47 = vld [vmem:[#allocation2 + $0x90] sm:$0xff] }
 0x1e8   :  { %20176 = vst [vmem:[#allocation114_spill] sm:$0xff] %v14163_v63  ;;  %2635 = vrot.lane.b32.xlu0 %v899_v10, %s13028_s2  ;;  %v1192_v10 = vld [vmem:[#allocation2 + $0xa0] sm:$0x3] }
 0x1e9   :  { %2637 = vrot.lane.b32.xlu1 %v1186_v43, %s13028_s2 }
 0x1ea   :  { %v14171_v2 = vpop.permute.xlu0 %2023 }
 0x1eb   :  { %v14169_v39 = vpop.permute.xlu1 %2021  ;;  %20179 = vst [vmem:[#allocation117_spill] sm:$0xff] %v14171_v2 }
 0x1ec   :  { %20178 = vst [vmem:[#allocation116_spill] sm:$0xff] %v14169_v39  ;;  %2639 = vrot.lane.b32.xlu0 %v901_v16, %s13028_s2  ;;  %v905_v39 = vld [vmem:[#allocation2 + $0x98] sm:$0xff] }
 0x1ed   :  { %2641 = vrot.lane.b32.xlu1 %v902_v7, %s13028_s2 }
 0x1ee   :  { %v14177_v63 = vpop.permute.xlu0 %2335 }
 0x1ef   :  { %v14175_v19 = vpop.permute.xlu1 %2337  ;;  %20181 = vst [vmem:[#allocation119_spill] sm:$0xff] %v14177_v63  ;;  %v907_v63 = vld [vmem:[#allocation2 + $0xa8] sm:$0xff] }
 0x1f0   :  { %20180 = vst [vmem:[#allocation118_spill] sm:$0xff] %v14175_v19  ;;  %2643 = vrot.lane.b32.xlu0 %v1189_v58, %s13028_s2  ;;  %v908_v19 = vld [vmem:[#allocation2 + $0xb0] sm:$0xff] }
 0x1f1   :  { %2645 = vrot.lane.b32.xlu1 %v904_v47, %s13028_s2  ;;  %v1195_v47 = vld [vmem:[#allocation2 + $0xb8] sm:$0x3] }
 0x1f2   :  { %v14183_v2 = vpop.permute.xlu0 %2339 }
 0x1f3   :  { %v14181_v43 = vpop.permute.xlu1 %2341  ;;  %20183 = vst [vmem:[#allocation121_spill] sm:$0xff] %v14183_v2  ;;  %v910_v2 = vld [vmem:[#allocation2 + $0xc0] sm:$0xff] }
 0x1f4   :  { %20182 = vst [vmem:[#allocation120_spill] sm:$0xff] %v14181_v43  ;;  %2647 = vrot.lane.b32.xlu0 %v905_v39, %s13028_s2  ;;  %v1198_v39 = vld [vmem:[#allocation2 + $0xd0] sm:$0x3] }
 0x1f5   :  { %2649 = vrot.lane.b32.xlu1 %v1192_v10, %s13028_s2 }
 0x1f6   :  { %v14189_v7 = vpop.permute.xlu0 %2343 }
 0x1f7   :  { %v14187_v16 = vpop.permute.xlu1 %2345  ;;  %20185 = vst [vmem:[#allocation123_spill] sm:$0xff] %v14189_v7 }
 0x1f8   :  { %20184 = vst [vmem:[#allocation122_spill] sm:$0xff] %v14187_v16  ;;  %2651 = vrot.lane.b32.xlu0 %v907_v63, %s13028_s2  ;;  %v911_v16 = vld [vmem:[#allocation2 + $0xc8] sm:$0xff] }
 0x1f9   :  { %2653 = vrot.lane.b32.xlu1 %v908_v19, %s13028_s2 }
 0x1fa   :  { %v14195_v43 = vpop.permute.xlu0 %2347 }
 0x1fb   :  { %v14193_v58 = vpop.permute.xlu1 %2349  ;;  %20187 = vst [vmem:[#allocation125_spill] sm:$0xff] %v14195_v43  ;;  %v913_v43 = vld [vmem:[#allocation2 + $0xd8] sm:$0xff] }
 0x1fc   :  { %20186 = vst [vmem:[#allocation124_spill] sm:$0xff] %v14193_v58  ;;  %2655 = vrot.lane.b32.xlu0 %v1195_v47, %s13028_s2  ;;  %v914_v58 = vld [vmem:[#allocation2 + $0xe0] sm:$0xff] }
 0x1fd   :  { %2657 = vrot.lane.b32.xlu1 %v910_v2, %s13028_s2  ;;  %v1201_v2 = vld [vmem:[#allocation2 + $0xe8] sm:$0x3] }
 0x1fe   :  { %v14201_v7 = vpop.permute.xlu0 %2351 }
 0x1ff   :  { %v14199_v10 = vpop.permute.xlu1 %2353  ;;  %20189 = vst [vmem:[#allocation127_spill] sm:$0xff] %v14201_v7  ;;  %v916_v7 = vld [vmem:[#allocation2 + $0xf0] sm:$0xff] }
 0x200   :  { %20188 = vst [vmem:[#allocation126_spill] sm:$0xff] %v14199_v10  ;;  %2659 = vrot.lane.b32.xlu0 %v911_v16, %s13028_s2  ;;  %v1204_v16 = vld [vmem:[#allocation2 + $0x100] sm:$0x3] }
 0x201   :  { %2661 = vrot.lane.b32.xlu1 %v1198_v39, %s13028_s2 }
 0x202   :  { %v14207_v19 = vpop.permute.xlu0 %2355 }
 0x203   :  { %v14205_v63 = vpop.permute.xlu1 %2357  ;;  %20191 = vst [vmem:[#allocation129_spill] sm:$0xff] %v14207_v19 }
 0x204   :  { %20190 = vst [vmem:[#allocation128_spill] sm:$0xff] %v14205_v63  ;;  %2663 = vrot.lane.b32.xlu0 %v913_v43, %s13028_s2  ;;  %v917_v63 = vld [vmem:[#allocation2 + $0xf8] sm:$0xff] }
 0x205   :  { %2665 = vrot.lane.b32.xlu1 %v914_v58, %s13028_s2 }
 0x206   :  { %v14213_v10 = vpop.permute.xlu0 %2359 }
 0x207   :  { %v14211_v47 = vpop.permute.xlu1 %2361  ;;  %20193 = vst [vmem:[#allocation131_spill] sm:$0xff] %v14213_v10  ;;  %v919_v10 = vld [vmem:[#allocation2 + $0x108] sm:$0xff] }
 0x208   :  { %20192 = vst [vmem:[#allocation130_spill] sm:$0xff] %v14211_v47  ;;  %2667 = vrot.lane.b32.xlu0 %v1201_v2, %s13028_s2  ;;  %v920_v47 = vld [vmem:[#allocation2 + $0x110] sm:$0xff] }
 0x209   :  { %2669 = vrot.lane.b32.xlu1 %v916_v7, %s13028_s2  ;;  %v1207_v7 = vld [vmem:[#allocation2 + $0x118] sm:$0x3] }
 0x20a   :  { %v14219_v19 = vpop.permute.xlu0 %2363 }
 0x20b   :  { %v14217_v39 = vpop.permute.xlu1 %2365  ;;  %20195 = vst [vmem:[#allocation133_spill] sm:$0xff] %v14219_v19  ;;  %v922_v19 = vld [vmem:[#allocation2 + $0x120] sm:$0xff] }
 0x20c   :  { %20194 = vst [vmem:[#allocation132_spill] sm:$0xff] %v14217_v39  ;;  %2671 = vrot.lane.b32.xlu0 %v917_v63, %s13028_s2  ;;  %v1210_v63 = vld [vmem:[#allocation2 + $0x130] sm:$0x3] }
 0x20d   :  { %2673 = vrot.lane.b32.xlu1 %v1204_v16, %s13028_s2 }
 0x20e   :  { %v14225_v58 = vpop.permute.xlu0 %2367 }
 0x20f   :  { %v14223_v43 = vpop.permute.xlu1 %2369  ;;  %20197 = vst [vmem:[#allocation135_spill] sm:$0xff] %v14225_v58 }
 0x210   :  { %20196 = vst [vmem:[#allocation134_spill] sm:$0xff] %v14223_v43  ;;  %2675 = vrot.lane.b32.xlu0 %v919_v10, %s13028_s2  ;;  %v923_v43 = vld [vmem:[#allocation2 + $0x128] sm:$0xff] }
 0x211   :  { %2677 = vrot.lane.b32.xlu1 %v920_v47, %s13028_s2 }
 0x212   :  { %v14231_v39 = vpop.permute.xlu0 %2371 }
 0x213   :  { %v14229_v2 = vpop.permute.xlu1 %2373  ;;  %20199 = vst [vmem:[#allocation137_spill] sm:$0xff] %v14231_v39  ;;  %v925_v39 = vld [vmem:[#allocation2 + $0x138] sm:$0xff] }
 0x214   :  { %20198 = vst [vmem:[#allocation136_spill] sm:$0xff] %v14229_v2  ;;  %2679 = vrot.lane.b32.xlu0 %v1207_v7, %s13028_s2  ;;  %v926_v2 = vld [vmem:[#allocation2 + $0x140] sm:$0xff]  ;;  %v1213_v7 = vld [vmem:[#allocation2 + $0x148] sm:$0x3] }
 0x215   :  { %2681 = vrot.lane.b32.xlu1 %v922_v19, %s13028_s2  ;;  %v1214_v19 = vld [vmem:[#allocation2 + $0x150] sm:$0xff] }
 0x216   :  { %v14237_v58 = vpop.permute.xlu0 %2375 }
 0x217   :  { %v14235_v16 = vpop.permute.xlu1 %2377  ;;  %20201 = vst [vmem:[#allocation139_spill] sm:$0xff] %v14237_v58 }
 0x218   :  { %20200 = vst [vmem:[#allocation138_spill] sm:$0xff] %v14235_v16  ;;  %2683 = vrot.lane.b32.xlu0 %v923_v43, %s13028_s2  ;;  %v1216_v43 = vld [vmem:[#allocation2 + $0x160] sm:$0x3] }
 0x219   :  { %2685 = vrot.lane.b32.xlu1 %v1210_v63, %s13028_s2  ;;  %v1215_v63 = vld [vmem:[#allocation2 + $0x158] sm:$0xff] }
 0x21a   :  { %v14243_v47 = vpop.permute.xlu0 %2379 }
 0x21b   :  { %v14241_v10 = vpop.permute.xlu1 %2381  ;;  %20203 = vst [vmem:[#allocation141_spill] sm:$0xff] %v14243_v47 }
 0x21c   :  { %20202 = vst [vmem:[#allocation140_spill] sm:$0xff] %v14241_v10  ;;  %2687 = vrot.lane.b32.xlu0 %v925_v39, %s13028_s2  ;;  %v1218_v39 = vld [vmem:[#allocation2 + $0x170] sm:$0xff] }
 0x21d   :  { %2689 = vrot.lane.b32.xlu1 %v926_v2, %s13028_s2  ;;  %v1217_v2 = vld [vmem:[#allocation2 + $0x168] sm:$0xff] }
 0x21e   :  { %v14249_v58 = vpop.permute.xlu0 %2383 }
 0x21f   :  { %v14247_v16 = vpop.permute.xlu1 %2385  ;;  %20205 = vst [vmem:[#allocation143_spill] sm:$0xff] %v14249_v58 }
 0x220   :  { %20204 = vst [vmem:[#allocation142_spill] sm:$0xff] %v14247_v16  ;;  %2691 = vrot.lane.b32.xlu0 %v1213_v7, %s13028_s2  ;;  %v1219_v7 = vld [vmem:[#allocation2 + $0x178] sm:$0x3] }
 0x221   :  { %2693 = vrot.lane.b32.xlu1 %v1214_v19, %s13028_s2  ;;  %v1220_v19 = vld [vmem:[#allocation2 + $0x180] sm:$0xff] }
 0x222   :  { %v14255_v47 = vpop.permute.xlu0 %2387 }
 0x223   :  { %v14253_v10 = vpop.permute.xlu1 %2389  ;;  %20207 = vst [vmem:[#allocation145_spill] sm:$0xff] %v14255_v47 }
 0x224   :  { %20206 = vst [vmem:[#allocation144_spill] sm:$0xff] %v14253_v10  ;;  %2695 = vrot.lane.b32.xlu0 %v1215_v63, %s13028_s2  ;;  %v1221_v63 = vld [vmem:[#allocation2 + $0x188] sm:$0xff] }
 0x225   :  { %2697 = vrot.lane.b32.xlu1 %v1216_v43, %s13028_s2  ;;  %v1222_v43 = vld [vmem:[#allocation2 + $0x190] sm:$0x3] }
 0x226   :  { %v14261_v16 = vpop.permute.xlu0 %2391 }
 0x227   :  { %v14259_v51 = vpop.permute.xlu1 %2393  ;;  %20209 = vst [vmem:[#allocation147_spill] sm:$0xff] %v14261_v16 }
 0x228   :  { %20208 = vst [vmem:[#allocation146_spill] sm:$0xff] %v14259_v51  ;;  %2699 = vrot.lane.b32.xlu0 %v1217_v2, %s13028_s2  ;;  %v1223_v2 = vld [vmem:[#allocation2 + $0x1c8] sm:$0xff] }
 0x229   :  { %2701 = vrot.lane.b32.xlu1 %v1218_v39, %s13028_s2  ;;  %v1224_v39 = vld [vmem:[#allocation2 + $0x1d0] sm:$0xff] }
 0x22a   :  { %v14267_v10 = vpop.permute.xlu0 %2395 }
 0x22b   :  { %v14265_v58 = vpop.permute.xlu1 %2397  ;;  %20211 = vst [vmem:[#allocation149_spill] sm:$0xff] %v14267_v10 }
 0x22c   :  { %20210 = vst [vmem:[#allocation148_spill] sm:$0xff] %v14265_v58  ;;  %2703 = vrot.lane.b32.xlu0 %v1219_v7, %s13028_s2  ;;  %v1225_v7 = vld [vmem:[#allocation2 + $0x1d8] sm:$0x3] }
 0x22d   :  { %2705 = vrot.lane.b32.xlu1 %v1220_v19, %s13028_s2  ;;  %v1226_v19 = vld [vmem:[#allocation2 + $0x1e0] sm:$0xff] }
 0x22e   :  { %v14273_v51 = vpop.permute.xlu0 %2399 }
 0x22f   :  { %v14271_v47 = vpop.permute.xlu1 %2401  ;;  %20213 = vst [vmem:[#allocation151_spill] sm:$0xff] %v14273_v51 }
 0x230   :  { %20212 = vst [vmem:[#allocation150_spill] sm:$0xff] %v14271_v47  ;;  %2707 = vrot.lane.b32.xlu0 %v1221_v63, %s13028_s2  ;;  %v1227_v63 = vld [vmem:[#allocation2 + $0x1e8] sm:$0xff] }
 0x231   :  { %2709 = vrot.lane.b32.xlu1 %v1222_v43, %s13028_s2  ;;  %v1228_v43 = vld [vmem:[#allocation2 + $0x1f0] sm:$0x3] }
 0x232   :  { %v14279_v58 = vpop.permute.xlu0 %2403 }
 0x233   :  { %v14277_v16 = vpop.permute.xlu1 %2405  ;;  %20215 = vst [vmem:[#allocation153_spill] sm:$0xff] %v14279_v58 }
 0x234   :  { %20214 = vst [vmem:[#allocation152_spill] sm:$0xff] %v14277_v16  ;;  %2711 = vrot.lane.b32.xlu0 %v1223_v2, %s13028_s2  ;;  %v1229_v2 = vld [vmem:[#allocation2 + $0x1f8] sm:$0xff] }
 0x235   :  { %2713 = vrot.lane.b32.xlu1 %v1224_v39, %s13028_s2  ;;  %v1230_v39 = vld [vmem:[#allocation2 + $0x200] sm:$0xff] }
 0x236   :  { %v14285_v47 = vpop.permute.xlu0 %2407 }
 0x237   :  { %v14283_v10 = vpop.permute.xlu1 %2409  ;;  %20217 = vst [vmem:[#allocation155_spill] sm:$0xff] %v14285_v47 }
 0x238   :  { %20216 = vst [vmem:[#allocation154_spill] sm:$0xff] %v14283_v10  ;;  %2715 = vrot.lane.b32.xlu0 %v1225_v7, %s13028_s2 }
 0x239   :  { %2717 = vrot.lane.b32.xlu1 %v1226_v19, %s13028_s2  ;;  %v1231_v19 = vld [vmem:[#allocation2 + $0x208] sm:$0x3] }
 0x23a   :  { %v14291_v16 = vpop.permute.xlu0 %2411 }
 0x23b   :  { %v14289_v51 = vpop.permute.xlu1 %2413  ;;  %20219 = vst [vmem:[#allocation157_spill] sm:$0xff] %v14291_v16  ;;  %v946_v16 = vld [vmem:[#allocation2 + $0x210] sm:$0xff] }
 0x23c   :  { %20218 = vst [vmem:[#allocation156_spill] sm:$0xff] %v14289_v51  ;;  %2719 = vrot.lane.b32.xlu0 %v1227_v63, %s13028_s2 }
 0x23d   :  { %2721 = vrot.lane.b32.xlu1 %v1228_v43, %s13028_s2  ;;  %v1234_v43 = vld [vmem:[#allocation2 + $0x220] sm:$0x3] }
 0x23e   :  { %v14297_v10 = vpop.permute.xlu0 %2415 }
 0x23f   :  { %v14295_v58 = vpop.permute.xlu1 %2417  ;;  %20221 = vst [vmem:[#allocation159_spill] sm:$0xff] %v14297_v10  ;;  %v947_v10 = vld [vmem:[#allocation2 + $0x218] sm:$0xff] }
 0x240   :  { %20220 = vst [vmem:[#allocation158_spill] sm:$0xff] %v14295_v58  ;;  %2723 = vrot.lane.b32.xlu0 %v1229_v2, %s13028_s2 }
 0x241   :  { %2725 = vrot.lane.b32.xlu1 %v1230_v39, %s13028_s2 }
 0x242   :  { %v14303_v51 = vpop.permute.xlu0 %2419 }
 0x243   :  { %v14301_v7 = vpop.permute.xlu1 %2421  ;;  %20223 = vst [vmem:[#allocation161_spill] sm:$0xff] %v14303_v51  ;;  %v949_v51 = vld [vmem:[#allocation2 + $0x228] sm:$0xff] }
 0x244   :  { %20222 = vst [vmem:[#allocation160_spill] sm:$0xff] %v14301_v7  ;;  %2727 = vrot.lane.b32.xlu0 %v1231_v19, %s13028_s2  ;;  %v950_v7 = vld [vmem:[#allocation2 + $0x230] sm:$0xff] }
 0x245   :  { %2729 = vrot.lane.b32.xlu1 %v946_v16, %s13028_s2  ;;  %v1237_v16 = vld [vmem:[#allocation2 + $0x238] sm:$0x3] }
 0x246   :  { %v14309_v58 = vpop.permute.xlu0 %2615 }
 0x247   :  { %v14307_v63 = vpop.permute.xlu1 %2617  ;;  %20225 = vst [vmem:[#allocation163_spill] sm:$0xff] %v14309_v58  ;;  %v952_v58 = vld [vmem:[#allocation2 + $0x240] sm:$0xff] }
 0x248   :  { %20224 = vst [vmem:[#allocation162_spill] sm:$0xff] %v14307_v63  ;;  %2731 = vrot.lane.b32.xlu0 %v947_v10, %s13028_s2  ;;  %v1240_v10 = vld [vmem:[#allocation2 + $0x250] sm:$0x3] }
 0x249   :  { %2733 = vrot.lane.b32.xlu1 %v1234_v43, %s13028_s2 }
 0x24a   :  { %v14315_v2 = vpop.permute.xlu0 %2619 }
 0x24b   :  { %v14313_v39 = vpop.permute.xlu1 %2621  ;;  %20227 = vst [vmem:[#allocation165_spill] sm:$0xff] %v14315_v2 }
 0x24c   :  { %20226 = vst [vmem:[#allocation164_spill] sm:$0xff] %v14313_v39  ;;  %2735 = vrot.lane.b32.xlu0 %v949_v51, %s13028_s2  ;;  %v953_v39 = vld [vmem:[#allocation2 + $0x248] sm:$0xff] }
 0x24d   :  { %2737 = vrot.lane.b32.xlu1 %v950_v7, %s13028_s2 }
 0x24e   :  { %v14321_v63 = vpop.permute.xlu0 %2623 }
 0x24f   :  { %v14319_v19 = vpop.permute.xlu1 %2625  ;;  %20229 = vst [vmem:[#allocation167_spill] sm:$0xff] %v14321_v63  ;;  %v955_v63 = vld [vmem:[#allocation2 + $0x258] sm:$0xff] }
 0x250   :  { %20228 = vst [vmem:[#allocation166_spill] sm:$0xff] %v14319_v19  ;;  %2739 = vrot.lane.b32.xlu0 %v1237_v16, %s13028_s2  ;;  %v956_v19 = vld [vmem:[#allocation2 + $0x260] sm:$0xff] }
 0x251   :  { %2741 = vrot.lane.b32.xlu1 %v952_v58, %s13028_s2  ;;  %v1243_v58 = vld [vmem:[#allocation2 + $0x268] sm:$0x3] }
 0x252   :  { %v14327_v2 = vpop.permute.xlu0 %2627 }
 0x253   :  { %v14325_v43 = vpop.permute.xlu1 %2629  ;;  %20231 = vst [vmem:[#allocation169_spill] sm:$0xff] %v14327_v2  ;;  %v958_v2 = vld [vmem:[#allocation2 + $0x270] sm:$0xff] }
 0x254   :  { %20230 = vst [vmem:[#allocation168_spill] sm:$0xff] %v14325_v43  ;;  %2743 = vrot.lane.b32.xlu0 %v953_v39, %s13028_s2  ;;  %v1246_v39 = vld [vmem:[#allocation2 + $0x280] sm:$0x3] }
 0x255   :  { %2745 = vrot.lane.b32.xlu1 %v1240_v10, %s13028_s2 }
 0x256   :  { %v14333_v7 = vpop.permute.xlu0 %2631 }
 0x257   :  { %v14331_v51 = vpop.permute.xlu1 %2633  ;;  %20233 = vst [vmem:[#allocation171_spill] sm:$0xff] %v14333_v7 }
 0x258   :  { %20232 = vst [vmem:[#allocation170_spill] sm:$0xff] %v14331_v51  ;;  %2747 = vrot.lane.b32.xlu0 %v955_v63, %s13028_s2  ;;  %v959_v51 = vld [vmem:[#allocation2 + $0x278] sm:$0xff] }
 0x259   :  { %2749 = vrot.lane.b32.xlu1 %v956_v19, %s13028_s2 }
 0x25a   :  { %v14339_v43 = vpop.permute.xlu0 %2635 }
 0x25b   :  { %v14337_v16 = vpop.permute.xlu1 %2637  ;;  %20235 = vst [vmem:[#allocation173_spill] sm:$0xff] %v14339_v43  ;;  %v961_v43 = vld [vmem:[#allocation2 + $0x288] sm:$0xff] }
 0x25c   :  { %20234 = vst [vmem:[#allocation172_spill] sm:$0xff] %v14337_v16  ;;  %2751 = vrot.lane.b32.xlu0 %v1243_v58, %s13028_s2  ;;  %v962_v16 = vld [vmem:[#allocation2 + $0x290] sm:$0xff] }
 0x25d   :  { %2753 = vrot.lane.b32.xlu1 %v958_v2, %s13028_s2  ;;  %v1249_v2 = vld [vmem:[#allocation2 + $0x298] sm:$0x3] }
 0x25e   :  { %v14345_v7 = vpop.permute.xlu0 %2639 }
 0x25f   :  { %v14343_v10 = vpop.permute.xlu1 %2641  ;;  %20237 = vst [vmem:[#allocation175_spill] sm:$0xff] %v14345_v7  ;;  %v964_v7 = vld [vmem:[#allocation2 + $0x2a0] sm:$0xff] }
 0x260   :  { %20236 = vst [vmem:[#allocation174_spill] sm:$0xff] %v14343_v10  ;;  %2755 = vrot.lane.b32.xlu0 %v959_v51, %s13028_s2  ;;  %v1252_v51 = vld [vmem:[#allocation2 + $0x2b0] sm:$0x3] }
 0x261   :  { %2757 = vrot.lane.b32.xlu1 %v1246_v39, %s13028_s2 }
 0x262   :  { %v14351_v19 = vpop.permute.xlu0 %2643 }
 0x263   :  { %v14349_v63 = vpop.permute.xlu1 %2645  ;;  %20239 = vst [vmem:[#allocation177_spill] sm:$0xff] %v14351_v19 }
 0x264   :  { %20238 = vst [vmem:[#allocation176_spill] sm:$0xff] %v14349_v63  ;;  %2759 = vrot.lane.b32.xlu0 %v961_v43, %s13028_s2  ;;  %v965_v63 = vld [vmem:[#allocation2 + $0x2a8] sm:$0xff] }
 0x265   :  { %2761 = vrot.lane.b32.xlu1 %v962_v16, %s13028_s2 }
 0x266   :  { %v14357_v10 = vpop.permute.xlu0 %2647 }
 0x267   :  { %v14355_v58 = vpop.permute.xlu1 %2649  ;;  %20241 = vst [vmem:[#allocation179_spill] sm:$0xff] %v14357_v10  ;;  %v967_v10 = vld [vmem:[#allocation2 + $0x2b8] sm:$0xff] }
 0x268   :  { %20240 = vst [vmem:[#allocation178_spill] sm:$0xff] %v14355_v58  ;;  %2763 = vrot.lane.b32.xlu0 %v1249_v2, %s13028_s2  ;;  %v968_v58 = vld [vmem:[#allocation2 + $0x2c0] sm:$0xff] }
 0x269   :  { %2765 = vrot.lane.b32.xlu1 %v964_v7, %s13028_s2  ;;  %v1255_v7 = vld [vmem:[#allocation2 + $0x2c8] sm:$0x3] }
 0x26a   :  { %v14363_v19 = vpop.permute.xlu0 %2651 }
 0x26b   :  { %v14361_v39 = vpop.permute.xlu1 %2653  ;;  %20243 = vst [vmem:[#allocation181_spill] sm:$0xff] %v14363_v19  ;;  %v970_v19 = vld [vmem:[#allocation2 + $0x2d0] sm:$0xff] }
 0x26c   :  { %20242 = vst [vmem:[#allocation180_spill] sm:$0xff] %v14361_v39  ;;  %2767 = vrot.lane.b32.xlu0 %v965_v63, %s13028_s2  ;;  %v1258_v63 = vld [vmem:[#allocation2 + $0x2e0] sm:$0x3] }
 0x26d   :  { %2769 = vrot.lane.b32.xlu1 %v1252_v51, %s13028_s2 }
 0x26e   :  { %v14369_v16 = vpop.permute.xlu0 %2655 }
 0x26f   :  { %v14367_v43 = vpop.permute.xlu1 %2657  ;;  %20245 = vst [vmem:[#allocation183_spill] sm:$0xff] %v14369_v16 }
 0x270   :  { %20244 = vst [vmem:[#allocation182_spill] sm:$0xff] %v14367_v43  ;;  %2771 = vrot.lane.b32.xlu0 %v967_v10, %s13028_s2  ;;  %v971_v43 = vld [vmem:[#allocation2 + $0x2d8] sm:$0xff] }
 0x271   :  { %2773 = vrot.lane.b32.xlu1 %v968_v58, %s13028_s2 }
 0x272   :  { %v14375_v39 = vpop.permute.xlu0 %2659 }
 0x273   :  { %v14373_v2 = vpop.permute.xlu1 %2661  ;;  %20247 = vst [vmem:[#allocation185_spill] sm:$0xff] %v14375_v39  ;;  %v973_v39 = vld [vmem:[#allocation2 + $0x2e8] sm:$0xff] }
 0x274   :  { %20246 = vst [vmem:[#allocation184_spill] sm:$0xff] %v14373_v2  ;;  %2775 = vrot.lane.b32.xlu0 %v1255_v7, %s13028_s2  ;;  %v974_v2 = vld [vmem:[#allocation2 + $0x2f0] sm:$0xff]  ;;  %v1261_v7 = vld [vmem:[#allocation2 + $0x2f8] sm:$0x3] }
 0x275   :  { %2777 = vrot.lane.b32.xlu1 %v970_v19, %s13028_s2  ;;  %v1262_v19 = vld [vmem:[#allocation2 + $0x300] sm:$0xff] }
 0x276   :  { %v14381_v16 = vpop.permute.xlu0 %2663 }
 0x277   :  { %v14379_v51 = vpop.permute.xlu1 %2665  ;;  %20249 = vst [vmem:[#allocation187_spill] sm:$0xff] %v14381_v16 }
 0x278   :  { %20248 = vst [vmem:[#allocation186_spill] sm:$0xff] %v14379_v51  ;;  %2779 = vrot.lane.b32.xlu0 %v971_v43, %s13028_s2  ;;  %v1264_v43 = vld [vmem:[#allocation2 + $0x310] sm:$0x3] }
 0x279   :  { %2781 = vrot.lane.b32.xlu1 %v1258_v63, %s13028_s2  ;;  %v1263_v63 = vld [vmem:[#allocation2 + $0x308] sm:$0xff] }
 0x27a   :  { %v14387_v58 = vpop.permute.xlu0 %2667 }
 0x27b   :  { %v14385_v10 = vpop.permute.xlu1 %2669  ;;  %20251 = vst [vmem:[#allocation189_spill] sm:$0xff] %v14387_v58 }
 0x27c   :  { %20250 = vst [vmem:[#allocation188_spill] sm:$0xff] %v14385_v10  ;;  %2783 = vrot.lane.b32.xlu0 %v973_v39, %s13028_s2  ;;  %v1266_v39 = vld [vmem:[#allocation2 + $0x320] sm:$0xff] }
 0x27d   :  { %2785 = vrot.lane.b32.xlu1 %v974_v2, %s13028_s2  ;;  %v1265_v2 = vld [vmem:[#allocation2 + $0x318] sm:$0xff] }
 0x27e   :  { %v14393_v16 = vpop.permute.xlu0 %2671 }
 0x27f   :  { %v14391_v51 = vpop.permute.xlu1 %2673  ;;  %20253 = vst [vmem:[#allocation191_spill] sm:$0xff] %v14393_v16 }
 0x280   :  { %20252 = vst [vmem:[#allocation190_spill] sm:$0xff] %v14391_v51  ;;  %2787 = vrot.lane.b32.xlu0 %v1261_v7, %s13028_s2  ;;  %v1267_v7 = vld [vmem:[#allocation2 + $0x328] sm:$0x3] }
 0x281   :  { %2789 = vrot.lane.b32.xlu1 %v1262_v19, %s13028_s2  ;;  %v1268_v19 = vld [vmem:[#allocation2 + $0x330] sm:$0xff] }
 0x282   :  { %v14399_v58 = vpop.permute.xlu0 %2675 }
 0x283   :  { %v14397_v10 = vpop.permute.xlu1 %2677  ;;  %20255 = vst [vmem:[#allocation193_spill] sm:$0xff] %v14399_v58 }
 0x284   :  { %20254 = vst [vmem:[#allocation192_spill] sm:$0xff] %v14397_v10  ;;  %2791 = vrot.lane.b32.xlu0 %v1263_v63, %s13028_s2  ;;  %v1269_v63 = vld [vmem:[#allocation2 + $0x338] sm:$0xff] }
 0x285   :  { %2793 = vrot.lane.b32.xlu1 %v1264_v43, %s13028_s2  ;;  %v1270_v43 = vld [vmem:[#allocation2 + $0x340] sm:$0x3] }
 0x286   :  { %v14405_v51 = vpop.permute.xlu0 %2679 }
 0x287   :  { %v14403_v47 = vpop.permute.xlu1 %2681  ;;  %20257 = vst [vmem:[#allocation195_spill] sm:$0xff] %v14405_v51 }
 0x288   :  { %20256 = vst [vmem:[#allocation194_spill] sm:$0xff] %v14403_v47  ;;  %2795 = vrot.lane.b32.xlu0 %v1265_v2, %s13028_s2  ;;  %v1271_v2 = vld [vmem:[#allocation2 + $0x19] sm:$0xff] }
 0x289   :  { %2797 = vrot.lane.b32.xlu1 %v1266_v39, %s13028_s2  ;;  %v1272_v39 = vld [vmem:[#allocation2 + $0x21] sm:$0xff] }
 0x28a   :  { %v14411_v10 = vpop.permute.xlu0 %2683 }
 0x28b   :  { %v14409_v16 = vpop.permute.xlu1 %2685  ;;  %20259 = vst [vmem:[#allocation197_spill] sm:$0xff] %v14411_v10 }
 0x28c   :  { %20258 = vst [vmem:[#allocation196_spill] sm:$0xff] %v14409_v16  ;;  %2799 = vrot.lane.b32.xlu0 %v1267_v7, %s13028_s2  ;;  %v1273_v7 = vld [vmem:[#allocation2 + $0x29] sm:$0x3] }
 0x28d   :  { %2801 = vrot.lane.b32.xlu1 %v1268_v19, %s13028_s2  ;;  %v1274_v19 = vld [vmem:[#allocation2 + $0x31] sm:$0xff] }
 0x28e   :  { %v14417_v47 = vpop.permute.xlu0 %2687 }
 0x28f   :  { %v14415_v58 = vpop.permute.xlu1 %2689  ;;  %20261 = vst [vmem:[#allocation199_spill] sm:$0xff] %v14417_v47 }
 0x290   :  { %20260 = vst [vmem:[#allocation198_spill] sm:$0xff] %v14415_v58  ;;  %2803 = vrot.lane.b32.xlu0 %v1269_v63, %s13028_s2  ;;  %v1275_v63 = vld [vmem:[#allocation2 + $0x39] sm:$0xff] }
 0x291   :  { %2805 = vrot.lane.b32.xlu1 %v1270_v43, %s13028_s2  ;;  %v1276_v43 = vld [vmem:[#allocation2 + $0x41] sm:$0x3] }
 0x292   :  { %v14423_v16 = vpop.permute.xlu0 %2691 }
 0x293   :  { %v14421_v51 = vpop.permute.xlu1 %2693  ;;  %20263 = vst [vmem:[#allocation201_spill] sm:$0xff] %v14423_v16 }
 0x294   :  { %20262 = vst [vmem:[#allocation200_spill] sm:$0xff] %v14421_v51  ;;  %2999 = vrot.lane.b32.xlu0 %v1271_v2, %s13029_s14  ;;  %v1277_v2 = vld [vmem:[#allocation2 + $0x49] sm:$0xff] }
 0x295   :  { %3001 = vrot.lane.b32.xlu1 %v1272_v39, %s13029_s14  ;;  %v1278_v39 = vld [vmem:[#allocation2 + $0x51] sm:$0xff] }
 0x296   :  { %v14429_v47 = vpop.permute.xlu0 %2695 }
 0x297   :  { %v14427_v58 = vpop.permute.xlu1 %2697  ;;  %20265 = vst [vmem:[#allocation203_spill] sm:$0xff] %v14429_v47 }
 0x298   :  { %20264 = vst [vmem:[#allocation202_spill] sm:$0xff] %v14427_v58  ;;  %3003 = vrot.lane.b32.xlu0 %v1273_v7, %s13029_s14 }
 0x299   :  { %3005 = vrot.lane.b32.xlu1 %v1274_v19, %s13029_s14  ;;  %v1279_v19 = vld [vmem:[#allocation2 + $0x59] sm:$0x3] }
 0x29a   :  { %v14435_v16 = vpop.permute.xlu0 %2699 }
 0x29b   :  { %v14433_v51 = vpop.permute.xlu1 %2701  ;;  %20267 = vst [vmem:[#allocation205_spill] sm:$0xff] %v14435_v16  ;;  %v1280_v16 = vld [vmem:[#allocation2 + $0x61] sm:$0xff] }
 0x29c   :  { %20266 = vst [vmem:[#allocation204_spill] sm:$0xff] %v14433_v51  ;;  %3007 = vrot.lane.b32.xlu0 %v1275_v63, %s13029_s14 }
 0x29d   :  { %3009 = vrot.lane.b32.xlu1 %v1276_v43, %s13029_s14  ;;  %v1282_v43 = vld [vmem:[#allocation2 + $0x71] sm:$0x3] }
 0x29e   :  { %v14441_v58 = vpop.permute.xlu0 %2703 }
 0x29f   :  { %v14439_v10 = vpop.permute.xlu1 %2705  ;;  %20269 = vst [vmem:[#allocation207_spill] sm:$0xff] %v14441_v58  ;;  %v1281_v58 = vld [vmem:[#allocation2 + $0x69] sm:$0xff] }
 0x2a0   :  { %20268 = vst [vmem:[#allocation206_spill] sm:$0xff] %v14439_v10  ;;  %3011 = vrot.lane.b32.xlu0 %v1277_v2, %s13029_s14 }
 0x2a1   :  { %3013 = vrot.lane.b32.xlu1 %v1278_v39, %s13029_s14 }
 0x2a2   :  { %v14447_v51 = vpop.permute.xlu0 %2707 }
 0x2a3   :  { %v14445_v7 = vpop.permute.xlu1 %2709  ;;  %20271 = vst [vmem:[#allocation209_spill] sm:$0xff] %v14447_v51  ;;  %v1284_v51 = vld [vmem:[#allocation2 + $0x81] sm:$0xff] }
 0x2a4   :  { %20270 = vst [vmem:[#allocation208_spill] sm:$0xff] %v14445_v7  ;;  %3015 = vrot.lane.b32.xlu0 %v1279_v19, %s13029_s14  ;;  %v1283_v7 = vld [vmem:[#allocation2 + $0x79] sm:$0xff] }
 0x2a5   :  { %3017 = vrot.lane.b32.xlu1 %v1280_v16, %s13029_s14  ;;  %v1285_v16 = vld [vmem:[#allocation2 + $0x89] sm:$0x3] }
 0x2a6   :  { %v14453_v10 = vpop.permute.xlu0 %2711 }
 0x2a7   :  { %v14451_v63 = vpop.permute.xlu1 %2713  ;;  %20273 = vst [vmem:[#allocation211_spill] sm:$0xff] %v14453_v10  ;;  %v1286_v10 = vld [vmem:[#allocation2 + $0x91] sm:$0xff] }
 0x2a8   :  { %20272 = vst [vmem:[#allocation210_spill] sm:$0xff] %v14451_v63  ;;  %3019 = vrot.lane.b32.xlu0 %v1281_v58, %s13029_s14  ;;  %v1288_v58 = vld [vmem:[#allocation2 + $0xa1] sm:$0x3] }
 0x2a9   :  { %3021 = vrot.lane.b32.xlu1 %v1282_v43, %s13029_s14 }
 0x2aa   :  { %v14459_v2 = vpop.permute.xlu0 %2715 }
 0x2ab   :  { %v14457_v39 = vpop.permute.xlu1 %2717  ;;  %20275 = vst [vmem:[#allocation213_spill] sm:$0xff] %v14459_v2 }
 0x2ac   :  { %20274 = vst [vmem:[#allocation212_spill] sm:$0xff] %v14457_v39  ;;  %3023 = vrot.lane.b32.xlu0 %v1283_v7, %s13029_s14  ;;  %v1287_v39 = vld [vmem:[#allocation2 + $0x99] sm:$0xff] }
 0x2ad   :  { %3025 = vrot.lane.b32.xlu1 %v1284_v51, %s13029_s14 }
 0x2ae   :  { %v14465_v63 = vpop.permute.xlu0 %2719 }
 0x2af   :  { %v14463_v19 = vpop.permute.xlu1 %2721  ;;  %20277 = vst [vmem:[#allocation215_spill] sm:$0xff] %v14465_v63  ;;  %v1290_v63 = vld [vmem:[#allocation2 + $0xb1] sm:$0xff] }
 0x2b0   :  { %20276 = vst [vmem:[#allocation214_spill] sm:$0xff] %v14463_v19  ;;  %3027 = vrot.lane.b32.xlu0 %v1285_v16, %s13029_s14  ;;  %v1289_v19 = vld [vmem:[#allocation2 + $0xa9] sm:$0xff] }
 0x2b1   :  { %3029 = vrot.lane.b32.xlu1 %v1286_v10, %s13029_s14  ;;  %v1291_v10 = vld [vmem:[#allocation2 + $0xb9] sm:$0x3] }
 0x2b2   :  { %v14471_v2 = vpop.permute.xlu0 %2723 }
 0x2b3   :  { %v14469_v43 = vpop.permute.xlu1 %2725  ;;  %20279 = vst [vmem:[#allocation217_spill] sm:$0xff] %v14471_v2  ;;  %v1292_v2 = vld [vmem:[#allocation2 + $0xc1] sm:$0xff] }
 0x2b4   :  { %20278 = vst [vmem:[#allocation216_spill] sm:$0xff] %v14469_v43  ;;  %3031 = vrot.lane.b32.xlu0 %v1287_v39, %s13029_s14  ;;  %v1294_v39 = vld [vmem:[#allocation2 + $0xd1] sm:$0x3] }
 0x2b5   :  { %3033 = vrot.lane.b32.xlu1 %v1288_v58, %s13029_s14 }
 0x2b6   :  { %v14477_v7 = vpop.permute.xlu0 %2727 }
 0x2b7   :  { %v14475_v51 = vpop.permute.xlu1 %2729  ;;  %20281 = vst [vmem:[#allocation219_spill] sm:$0xff] %v14477_v7 }
 0x2b8   :  { %20280 = vst [vmem:[#allocation218_spill] sm:$0xff] %v14475_v51  ;;  %3035 = vrot.lane.b32.xlu0 %v1289_v19, %s13029_s14  ;;  %v1293_v51 = vld [vmem:[#allocation2 + $0xc9] sm:$0xff] }
 0x2b9   :  { %3037 = vrot.lane.b32.xlu1 %v1290_v63, %s13029_s14 }
 0x2ba   :  { %v14483_v43 = vpop.permute.xlu0 %2731 }
 0x2bb   :  { %v14481_v16 = vpop.permute.xlu1 %2733  ;;  %20283 = vst [vmem:[#allocation221_spill] sm:$0xff] %v14483_v43  ;;  %v1296_v43 = vld [vmem:[#allocation2 + $0xe1] sm:$0xff] }
 0x2bc   :  { %20282 = vst [vmem:[#allocation220_spill] sm:$0xff] %v14481_v16  ;;  %3039 = vrot.lane.b32.xlu0 %v1291_v10, %s13029_s14  ;;  %v1295_v16 = vld [vmem:[#allocation2 + $0xd9] sm:$0xff] }
 0x2bd   :  { %3041 = vrot.lane.b32.xlu1 %v1292_v2, %s13029_s14  ;;  %v1297_v2 = vld [vmem:[#allocation2 + $0xe9] sm:$0x3] }
 0x2be   :  { %v14489_v7 = vpop.permute.xlu0 %2735 }
 0x2bf   :  { %v14487_v58 = vpop.permute.xlu1 %2737  ;;  %20285 = vst [vmem:[#allocation223_spill] sm:$0xff] %v14489_v7  ;;  %v1298_v7 = vld [vmem:[#allocation2 + $0xf1] sm:$0xff] }
 0x2c0   :  { %20284 = vst [vmem:[#allocation222_spill] sm:$0xff] %v14487_v58  ;;  %3043 = vrot.lane.b32.xlu0 %v1293_v51, %s13029_s14  ;;  %v1300_v51 = vld [vmem:[#allocation2 + $0x101] sm:$0x3] }
 0x2c1   :  { %3045 = vrot.lane.b32.xlu1 %v1294_v39, %s13029_s14 }
 0x2c2   :  { %v14495_v19 = vpop.permute.xlu0 %2739 }
 0x2c3   :  { %v14493_v63 = vpop.permute.xlu1 %2741  ;;  %20287 = vst [vmem:[#allocation225_spill] sm:$0xff] %v14495_v19 }
 0x2c4   :  { %20286 = vst [vmem:[#allocation224_spill] sm:$0xff] %v14493_v63  ;;  %3047 = vrot.lane.b32.xlu0 %v1295_v16, %s13029_s14  ;;  %v1299_v63 = vld [vmem:[#allocation2 + $0xf9] sm:$0xff] }
 0x2c5   :  { %3049 = vrot.lane.b32.xlu1 %v1296_v43, %s13029_s14 }
 0x2c6   :  { %v14501_v58 = vpop.permute.xlu0 %2743 }
 0x2c7   :  { %v14499_v10 = vpop.permute.xlu1 %2745  ;;  %20289 = vst [vmem:[#allocation227_spill] sm:$0xff] %v14501_v58  ;;  %v1302_v58 = vld [vmem:[#allocation2 + $0x111] sm:$0xff] }
 0x2c8   :  { %20288 = vst [vmem:[#allocation226_spill] sm:$0xff] %v14499_v10  ;;  %3051 = vrot.lane.b32.xlu0 %v1297_v2, %s13029_s14  ;;  %v1301_v10 = vld [vmem:[#allocation2 + $0x109] sm:$0xff] }
 0x2c9   :  { %3053 = vrot.lane.b32.xlu1 %v1298_v7, %s13029_s14  ;;  %v1303_v7 = vld [vmem:[#allocation2 + $0x119] sm:$0x3] }
 0x2ca   :  { %v14507_v19 = vpop.permute.xlu0 %2747 }
 0x2cb   :  { %v14505_v39 = vpop.permute.xlu1 %2749  ;;  %20291 = vst [vmem:[#allocation229_spill] sm:$0xff] %v14507_v19  ;;  %v1304_v19 = vld [vmem:[#allocation2 + $0x121] sm:$0xff] }
 0x2cc   :  { %20290 = vst [vmem:[#allocation228_spill] sm:$0xff] %v14505_v39  ;;  %3055 = vrot.lane.b32.xlu0 %v1299_v63, %s13029_s14  ;;  %v1306_v63 = vld [vmem:[#allocation2 + $0x131] sm:$0x3] }
 0x2cd   :  { %3057 = vrot.lane.b32.xlu1 %v1300_v51, %s13029_s14 }
 0x2ce   :  { %v14513_v16 = vpop.permute.xlu0 %2751 }
 0x2cf   :  { %v14511_v43 = vpop.permute.xlu1 %2753  ;;  %20293 = vst [vmem:[#allocation231_spill] sm:$0xff] %v14513_v16 }
 0x2d0   :  { %20292 = vst [vmem:[#allocation230_spill] sm:$0xff] %v14511_v43  ;;  %3059 = vrot.lane.b32.xlu0 %v1301_v10, %s13029_s14  ;;  %v1305_v43 = vld [vmem:[#allocation2 + $0x129] sm:$0xff] }
 0x2d1   :  { %3061 = vrot.lane.b32.xlu1 %v1302_v58, %s13029_s14 }
 0x2d2   :  { %v14519_v39 = vpop.permute.xlu0 %2755 }
 0x2d3   :  { %v14517_v2 = vpop.permute.xlu1 %2757  ;;  %20295 = vst [vmem:[#allocation233_spill] sm:$0xff] %v14519_v39  ;;  %v1308_v39 = vld [vmem:[#allocation2 + $0x141] sm:$0xff] }
 0x2d4   :  { %20294 = vst [vmem:[#allocation232_spill] sm:$0xff] %v14517_v2  ;;  %3063 = vrot.lane.b32.xlu0 %v1303_v7, %s13029_s14  ;;  %v1307_v2 = vld [vmem:[#allocation2 + $0x139] sm:$0xff]  ;;  %v1309_v7 = vld [vmem:[#allocation2 + $0x149] sm:$0x3] }
 0x2d5   :  { %3065 = vrot.lane.b32.xlu1 %v1304_v19, %s13029_s14  ;;  %v1310_v19 = vld [vmem:[#allocation2 + $0x151] sm:$0xff] }
 0x2d6   :  { %v14525_v16 = vpop.permute.xlu0 %2759 }
 0x2d7   :  { %v14523_v51 = vpop.permute.xlu1 %2761  ;;  %20297 = vst [vmem:[#allocation235_spill] sm:$0xff] %v14525_v16 }
 0x2d8   :  { %20296 = vst [vmem:[#allocation234_spill] sm:$0xff] %v14523_v51  ;;  %3067 = vrot.lane.b32.xlu0 %v1305_v43, %s13029_s14  ;;  %v1312_v43 = vld [vmem:[#allocation2 + $0x161] sm:$0x3] }
 0x2d9   :  { %3069 = vrot.lane.b32.xlu1 %v1306_v63, %s13029_s14  ;;  %v1311_v63 = vld [vmem:[#allocation2 + $0x159] sm:$0xff] }
 0x2da   :  { %v14531_v10 = vpop.permute.xlu0 %2763 }
 0x2db   :  { %v14529_v58 = vpop.permute.xlu1 %2765  ;;  %20299 = vst [vmem:[#allocation237_spill] sm:$0xff] %v14531_v10 }
 0x2dc   :  { %20298 = vst [vmem:[#allocation236_spill] sm:$0xff] %v14529_v58  ;;  %3071 = vrot.lane.b32.xlu0 %v1307_v2, %s13029_s14  ;;  %v1313_v2 = vld [vmem:[#allocation2 + $0x169] sm:$0xff] }
 0x2dd   :  { %3073 = vrot.lane.b32.xlu1 %v1308_v39, %s13029_s14  ;;  %v1314_v39 = vld [vmem:[#allocation2 + $0x171] sm:$0xff] }
 0x2de   :  { %v14537_v16 = vpop.permute.xlu0 %2767 }
 0x2df   :  { %v14535_v51 = vpop.permute.xlu1 %2769  ;;  %20301 = vst [vmem:[#allocation239_spill] sm:$0xff] %v14537_v16 }
 0x2e0   :  { %20300 = vst [vmem:[#allocation238_spill] sm:$0xff] %v14535_v51  ;;  %3075 = vrot.lane.b32.xlu0 %v1309_v7, %s13029_s14  ;;  %v1315_v7 = vld [vmem:[#allocation2 + $0x179] sm:$0x3] }
 0x2e1   :  { %3077 = vrot.lane.b32.xlu1 %v1310_v19, %s13029_s14  ;;  %v1316_v19 = vld [vmem:[#allocation2 + $0x181] sm:$0xff] }
 0x2e2   :  { %v14543_v10 = vpop.permute.xlu0 %2771 }
 0x2e3   :  { %v14541_v58 = vpop.permute.xlu1 %2773  ;;  %20303 = vst [vmem:[#allocation241_spill] sm:$0xff] %v14543_v10 }
 0x2e4   :  { %20302 = vst [vmem:[#allocation240_spill] sm:$0xff] %v14541_v58  ;;  %3079 = vrot.lane.b32.xlu0 %v1311_v63, %s13029_s14  ;;  %v1317_v63 = vld [vmem:[#allocation2 + $0x189] sm:$0xff] }
 0x2e5   :  { %3081 = vrot.lane.b32.xlu1 %v1312_v43, %s13029_s14  ;;  %v1318_v43 = vld [vmem:[#allocation2 + $0x191] sm:$0x3] }
 0x2e6   :  { %v14549_v51 = vpop.permute.xlu0 %2775 }
 0x2e7   :  { %v14547_v47 = vpop.permute.xlu1 %2777  ;;  %20305 = vst [vmem:[#allocation243_spill] sm:$0xff] %v14549_v51 }
 0x2e8   :  { %20304 = vst [vmem:[#allocation242_spill] sm:$0xff] %v14547_v47  ;;  %3083 = vrot.lane.b32.xlu0 %v1313_v2, %s13029_s14  ;;  %v1319_v2 = vld [vmem:[#allocation2 + $0x1c9] sm:$0xff] }
 0x2e9   :  { %3085 = vrot.lane.b32.xlu1 %v1314_v39, %s13029_s14  ;;  %v1320_v39 = vld [vmem:[#allocation2 + $0x1d1] sm:$0xff] }
 0x2ea   :  { %v14555_v58 = vpop.permute.xlu0 %2779 }
 0x2eb   :  { %v14553_v16 = vpop.permute.xlu1 %2781  ;;  %20307 = vst [vmem:[#allocation245_spill] sm:$0xff] %v14555_v58 }
 0x2ec   :  { %20306 = vst [vmem:[#allocation244_spill] sm:$0xff] %v14553_v16  ;;  %3087 = vrot.lane.b32.xlu0 %v1315_v7, %s13029_s14  ;;  %v1321_v7 = vld [vmem:[#allocation2 + $0x1d9] sm:$0x3] }
 0x2ed   :  { %3089 = vrot.lane.b32.xlu1 %v1316_v19, %s13029_s14  ;;  %v1322_v19 = vld [vmem:[#allocation2 + $0x1e1] sm:$0xff] }
 0x2ee   :  { %v14561_v47 = vpop.permute.xlu0 %2783 }
 0x2ef   :  { %v14559_v10 = vpop.permute.xlu1 %2785  ;;  %20309 = vst [vmem:[#allocation247_spill] sm:$0xff] %v14561_v47 }
 0x2f0   :  { %20308 = vst [vmem:[#allocation246_spill] sm:$0xff] %v14559_v10  ;;  %3091 = vrot.lane.b32.xlu0 %v1317_v63, %s13029_s14  ;;  %v1323_v63 = vld [vmem:[#allocation2 + $0x1e9] sm:$0xff] }
 0x2f1   :  { %3093 = vrot.lane.b32.xlu1 %v1318_v43, %s13029_s14  ;;  %v1324_v43 = vld [vmem:[#allocation2 + $0x1f1] sm:$0x3] }
 0x2f2   :  { %v14567_v16 = vpop.permute.xlu0 %2787 }
 0x2f3   :  { %v14565_v51 = vpop.permute.xlu1 %2789  ;;  %20311 = vst [vmem:[#allocation249_spill] sm:$0xff] %v14567_v16 }
 0x2f4   :  { %20310 = vst [vmem:[#allocation248_spill] sm:$0xff] %v14565_v51  ;;  %3095 = vrot.lane.b32.xlu0 %v1319_v2, %s13029_s14  ;;  %v1325_v2 = vld [vmem:[#allocation2 + $0x1f9] sm:$0xff] }
 0x2f5   :  { %3097 = vrot.lane.b32.xlu1 %v1320_v39, %s13029_s14  ;;  %v1326_v39 = vld [vmem:[#allocation2 + $0x201] sm:$0xff] }
 0x2f6   :  { %v14573_v10 = vpop.permute.xlu0 %2791 }
 0x2f7   :  { %v14571_v58 = vpop.permute.xlu1 %2793  ;;  %20313 = vst [vmem:[#allocation251_spill] sm:$0xff] %v14573_v10 }
 0x2f8   :  { %20312 = vst [vmem:[#allocation250_spill] sm:$0xff] %v14571_v58  ;;  %3099 = vrot.lane.b32.xlu0 %v1321_v7, %s13029_s14 }
 0x2f9   :  { %3101 = vrot.lane.b32.xlu1 %v1322_v19, %s13029_s14  ;;  %v1327_v19 = vld [vmem:[#allocation2 + $0x209] sm:$0x3] }
 0x2fa   :  { %v14579_v51 = vpop.permute.xlu0 %2795 }
 0x2fb   :  { %v14577_v47 = vpop.permute.xlu1 %2797  ;;  %20315 = vst [vmem:[#allocation253_spill] sm:$0xff] %v14579_v51  ;;  %v1328_v51 = vld [vmem:[#allocation2 + $0x211] sm:$0xff] }
 0x2fc   :  { %20314 = vst [vmem:[#allocation252_spill] sm:$0xff] %v14577_v47  ;;  %3103 = vrot.lane.b32.xlu0 %v1323_v63, %s13029_s14 }
 0x2fd   :  { %3105 = vrot.lane.b32.xlu1 %v1324_v43, %s13029_s14  ;;  %v1330_v43 = vld [vmem:[#allocation2 + $0x221] sm:$0x3] }
 0x2fe   :  { %v14585_v58 = vpop.permute.xlu0 %2799 }
 0x2ff   :  { %v14583_v16 = vpop.permute.xlu1 %2801  ;;  %20317 = vst [vmem:[#allocation255_spill] sm:$0xff] %v14585_v58  ;;  %v1329_v58 = vld [vmem:[#allocation2 + $0x219] sm:$0xff] }
 0x300   :  { %20316 = vst [vmem:[#allocation254_spill] sm:$0xff] %v14583_v16  ;;  %3107 = vrot.lane.b32.xlu0 %v1325_v2, %s13029_s14 }
 0x301   :  { %3109 = vrot.lane.b32.xlu1 %v1326_v39, %s13029_s14 }
 0x302   :  { %v14591_v47 = vpop.permute.xlu0 %2803 }
 0x303   :  { %v14589_v7 = vpop.permute.xlu1 %2805  ;;  %20319 = vst [vmem:[#allocation257_spill] sm:$0xff] %v14591_v47  ;;  %v1332_v47 = vld [vmem:[#allocation2 + $0x231] sm:$0xff] }
 0x304   :  { %20318 = vst [vmem:[#allocation256_spill] sm:$0xff] %v14589_v7  ;;  %3111 = vrot.lane.b32.xlu0 %v1327_v19, %s13029_s14  ;;  %v1331_v7 = vld [vmem:[#allocation2 + $0x229] sm:$0xff] }
 0x305   :  { %3113 = vrot.lane.b32.xlu1 %v1328_v51, %s13029_s14  ;;  %v1333_v51 = vld [vmem:[#allocation2 + $0x239] sm:$0x3] }
 0x306   :  { %v14597_v16 = vpop.permute.xlu0 %2999 }
 0x307   :  { %v14595_v63 = vpop.permute.xlu1 %3001  ;;  %20321 = vst [vmem:[#allocation259_spill] sm:$0xff] %v14597_v16  ;;  %v1334_v16 = vld [vmem:[#allocation2 + $0x241] sm:$0xff] }
 0x308   :  { %20320 = vst [vmem:[#allocation258_spill] sm:$0xff] %v14595_v63  ;;  %3115 = vrot.lane.b32.xlu0 %v1329_v58, %s13029_s14  ;;  %v1336_v58 = vld [vmem:[#allocation2 + $0x251] sm:$0x3] }
 0x309   :  { %3117 = vrot.lane.b32.xlu1 %v1330_v43, %s13029_s14 }
 0x30a   :  { %v14603_v2 = vpop.permute.xlu0 %3003 }
 0x30b   :  { %v14601_v39 = vpop.permute.xlu1 %3005  ;;  %20323 = vst [vmem:[#allocation261_spill] sm:$0xff] %v14603_v2 }
 0x30c   :  { %20322 = vst [vmem:[#allocation260_spill] sm:$0xff] %v14601_v39  ;;  %3119 = vrot.lane.b32.xlu0 %v1331_v7, %s13029_s14  ;;  %v1335_v39 = vld [vmem:[#allocation2 + $0x249] sm:$0xff] }
 0x30d   :  { %3121 = vrot.lane.b32.xlu1 %v1332_v47, %s13029_s14 }
 0x30e   :  { %v14609_v63 = vpop.permute.xlu0 %3007 }
 0x30f   :  { %v14607_v19 = vpop.permute.xlu1 %3009  ;;  %20325 = vst [vmem:[#allocation263_spill] sm:$0xff] %v14609_v63  ;;  %v1338_v63 = vld [vmem:[#allocation2 + $0x261] sm:$0xff] }
 0x310   :  { %20324 = vst [vmem:[#allocation262_spill] sm:$0xff] %v14607_v19  ;;  %3123 = vrot.lane.b32.xlu0 %v1333_v51, %s13029_s14  ;;  %v1337_v19 = vld [vmem:[#allocation2 + $0x259] sm:$0xff] }
 0x311   :  { %3125 = vrot.lane.b32.xlu1 %v1334_v16, %s13029_s14  ;;  %v1339_v16 = vld [vmem:[#allocation2 + $0x269] sm:$0x3] }
 0x312   :  { %v14615_v2 = vpop.permute.xlu0 %3011 }
 0x313   :  { %v14613_v43 = vpop.permute.xlu1 %3013  ;;  %20327 = vst [vmem:[#allocation265_spill] sm:$0xff] %v14615_v2  ;;  %v1340_v2 = vld [vmem:[#allocation2 + $0x271] sm:$0xff] }
 0x314   :  { %20326 = vst [vmem:[#allocation264_spill] sm:$0xff] %v14613_v43  ;;  %3127 = vrot.lane.b32.xlu0 %v1335_v39, %s13029_s14  ;;  %v1342_v39 = vld [vmem:[#allocation2 + $0x281] sm:$0x3] }
 0x315   :  { %3129 = vrot.lane.b32.xlu1 %v1336_v58, %s13029_s14 }
 0x316   :  { %v14621_v7 = vpop.permute.xlu0 %3015 }
 0x317   :  { %v14619_v47 = vpop.permute.xlu1 %3017  ;;  %20329 = vst [vmem:[#allocation267_spill] sm:$0xff] %v14621_v7 }
 0x318   :  { %20328 = vst [vmem:[#allocation266_spill] sm:$0xff] %v14619_v47  ;;  %3131 = vrot.lane.b32.xlu0 %v1337_v19, %s13029_s14  ;;  %v1341_v47 = vld [vmem:[#allocation2 + $0x279] sm:$0xff] }
 0x319   :  { %3133 = vrot.lane.b32.xlu1 %v1338_v63, %s13029_s14 }
 0x31a   :  { %v14627_v43 = vpop.permute.xlu0 %3019 }
 0x31b   :  { %v14625_v51 = vpop.permute.xlu1 %3021  ;;  %20331 = vst [vmem:[#allocation269_spill] sm:$0xff] %v14627_v43  ;;  %v1344_v43 = vld [vmem:[#allocation2 + $0x291] sm:$0xff] }
 0x31c   :  { %20330 = vst [vmem:[#allocation268_spill] sm:$0xff] %v14625_v51  ;;  %3135 = vrot.lane.b32.xlu0 %v1339_v16, %s13029_s14  ;;  %v1343_v51 = vld [vmem:[#allocation2 + $0x289] sm:$0xff] }
 0x31d   :  { %3137 = vrot.lane.b32.xlu1 %v1340_v2, %s13029_s14  ;;  %v1345_v2 = vld [vmem:[#allocation2 + $0x299] sm:$0x3] }
 0x31e   :  { %v14633_v7 = vpop.permute.xlu0 %3023 }
 0x31f   :  { %v14631_v58 = vpop.permute.xlu1 %3025  ;;  %20333 = vst [vmem:[#allocation271_spill] sm:$0xff] %v14633_v7  ;;  %v1346_v7 = vld [vmem:[#allocation2 + $0x2a1] sm:$0xff] }
 0x320   :  { %20332 = vst [vmem:[#allocation270_spill] sm:$0xff] %v14631_v58  ;;  %3139 = vrot.lane.b32.xlu0 %v1341_v47, %s13029_s14  ;;  %v1348_v47 = vld [vmem:[#allocation2 + $0x2b1] sm:$0x3] }
 0x321   :  { %3141 = vrot.lane.b32.xlu1 %v1342_v39, %s13029_s14 }
 0x322   :  { %v14639_v19 = vpop.permute.xlu0 %3027 }
 0x323   :  { %v14637_v63 = vpop.permute.xlu1 %3029  ;;  %20335 = vst [vmem:[#allocation273_spill] sm:$0xff] %v14639_v19 }
 0x324   :  { %20334 = vst [vmem:[#allocation272_spill] sm:$0xff] %v14637_v63  ;;  %3143 = vrot.lane.b32.xlu0 %v1343_v51, %s13029_s14  ;;  %v1347_v63 = vld [vmem:[#allocation2 + $0x2a9] sm:$0xff] }
 0x325   :  { %3145 = vrot.lane.b32.xlu1 %v1344_v43, %s13029_s14 }
 0x326   :  { %v14645_v58 = vpop.permute.xlu0 %3031 }
 0x327   :  { %v14643_v16 = vpop.permute.xlu1 %3033  ;;  %20337 = vst [vmem:[#allocation275_spill] sm:$0xff] %v14645_v58  ;;  %v1350_v58 = vld [vmem:[#allocation2 + $0x2c1] sm:$0xff] }
 0x328   :  { %20336 = vst [vmem:[#allocation274_spill] sm:$0xff] %v14643_v16  ;;  %3147 = vrot.lane.b32.xlu0 %v1345_v2, %s13029_s14  ;;  %v1349_v16 = vld [vmem:[#allocation2 + $0x2b9] sm:$0xff] }
 0x329   :  { %3149 = vrot.lane.b32.xlu1 %v1346_v7, %s13029_s14  ;;  %v1351_v7 = vld [vmem:[#allocation2 + $0x2c9] sm:$0x3] }
 0x32a   :  { %v14651_v19 = vpop.permute.xlu0 %3035 }
 0x32b   :  { %v14649_v39 = vpop.permute.xlu1 %3037  ;;  %20339 = vst [vmem:[#allocation277_spill] sm:$0xff] %v14651_v19  ;;  %v1352_v19 = vld [vmem:[#allocation2 + $0x2d1] sm:$0xff] }
 0x32c   :  { %20338 = vst [vmem:[#allocation276_spill] sm:$0xff] %v14649_v39  ;;  %3151 = vrot.lane.b32.xlu0 %v1347_v63, %s13029_s14  ;;  %v1354_v63 = vld [vmem:[#allocation2 + $0x2e1] sm:$0x3] }
 0x32d   :  { %3153 = vrot.lane.b32.xlu1 %v1348_v47, %s13029_s14 }
 0x32e   :  { %v14657_v51 = vpop.permute.xlu0 %3039 }
 0x32f   :  { %v14655_v43 = vpop.permute.xlu1 %3041  ;;  %20341 = vst [vmem:[#allocation279_spill] sm:$0xff] %v14657_v51 }
 0x330   :  { %20340 = vst [vmem:[#allocation278_spill] sm:$0xff] %v14655_v43  ;;  %3155 = vrot.lane.b32.xlu0 %v1349_v16, %s13029_s14  ;;  %v1353_v43 = vld [vmem:[#allocation2 + $0x2d9] sm:$0xff] }
 0x331   :  { %3157 = vrot.lane.b32.xlu1 %v1350_v58, %s13029_s14 }
 0x332   :  { %v14663_v39 = vpop.permute.xlu0 %3043 }
 0x333   :  { %v14661_v2 = vpop.permute.xlu1 %3045  ;;  %20343 = vst [vmem:[#allocation281_spill] sm:$0xff] %v14663_v39  ;;  %v1356_v39 = vld [vmem:[#allocation2 + $0x2f1] sm:$0xff] }
 0x334   :  { %20342 = vst [vmem:[#allocation280_spill] sm:$0xff] %v14661_v2  ;;  %3159 = vrot.lane.b32.xlu0 %v1351_v7, %s13029_s14  ;;  %v1355_v2 = vld [vmem:[#allocation2 + $0x2e9] sm:$0xff]  ;;  %v1357_v7 = vld [vmem:[#allocation2 + $0x2f9] sm:$0x3] }
 0x335   :  { %3161 = vrot.lane.b32.xlu1 %v1352_v19, %s13029_s14  ;;  %v1358_v19 = vld [vmem:[#allocation2 + $0x301] sm:$0xff] }
 0x336   :  { %v14669_v51 = vpop.permute.xlu0 %3047 }
 0x337   :  { %v14667_v47 = vpop.permute.xlu1 %3049  ;;  %20345 = vst [vmem:[#allocation283_spill] sm:$0xff] %v14669_v51 }
 0x338   :  { %20344 = vst [vmem:[#allocation282_spill] sm:$0xff] %v14667_v47  ;;  %3163 = vrot.lane.b32.xlu0 %v1353_v43, %s13029_s14  ;;  %v1360_v43 = vld [vmem:[#allocation2 + $0x311] sm:$0x3] }
 0x339   :  { %3165 = vrot.lane.b32.xlu1 %v1354_v63, %s13029_s14  ;;  %v1359_v63 = vld [vmem:[#allocation2 + $0x309] sm:$0xff] }
 0x33a   :  { %v14675_v16 = vpop.permute.xlu0 %3051 }
 0x33b   :  { %v14673_v58 = vpop.permute.xlu1 %3053  ;;  %20347 = vst [vmem:[#allocation285_spill] sm:$0xff] %v14675_v16 }
 0x33c   :  { %20346 = vst [vmem:[#allocation284_spill] sm:$0xff] %v14673_v58  ;;  %3167 = vrot.lane.b32.xlu0 %v1355_v2, %s13029_s14  ;;  %v1361_v2 = vld [vmem:[#allocation2 + $0x319] sm:$0xff] }
 0x33d   :  { %3169 = vrot.lane.b32.xlu1 %v1356_v39, %s13029_s14  ;;  %v1362_v39 = vld [vmem:[#allocation2 + $0x321] sm:$0xff] }
 0x33e   :  { %v14681_v51 = vpop.permute.xlu0 %3055 }
 0x33f   :  { %v14679_v47 = vpop.permute.xlu1 %3057  ;;  %20349 = vst [vmem:[#allocation287_spill] sm:$0xff] %v14681_v51 }
 0x340   :  { %20348 = vst [vmem:[#allocation286_spill] sm:$0xff] %v14679_v47  ;;  %3171 = vrot.lane.b32.xlu0 %v1357_v7, %s13029_s14  ;;  %v1363_v7 = vld [vmem:[#allocation2 + $0x329] sm:$0x3] }
 0x341   :  { %3173 = vrot.lane.b32.xlu1 %v1358_v19, %s13029_s14  ;;  %v1364_v19 = vld [vmem:[#allocation2 + $0x331] sm:$0xff] }
 0x342   :  { %v14687_v16 = vpop.permute.xlu0 %3059 }
 0x343   :  { %v14685_v58 = vpop.permute.xlu1 %3061  ;;  %20351 = vst [vmem:[#allocation289_spill] sm:$0xff] %v14687_v16 }
 0x344   :  { %20350 = vst [vmem:[#allocation288_spill] sm:$0xff] %v14685_v58  ;;  %3175 = vrot.lane.b32.xlu0 %v1359_v63, %s13029_s14  ;;  %v1365_v63 = vld [vmem:[#allocation2 + $0x339] sm:$0xff] }
 0x345   :  { %3177 = vrot.lane.b32.xlu1 %v1360_v43, %s13029_s14  ;;  %v1366_v43 = vld [vmem:[#allocation2 + $0x341] sm:$0x3] }
 0x346   :  { %v14693_v47 = vpop.permute.xlu0 %3063 }
 0x347   :  { %v14691_v10 = vpop.permute.xlu1 %3065  ;;  %20353 = vst [vmem:[#allocation291_spill] sm:$0xff] %v14693_v47 }
 0x348   :  { %20352 = vst [vmem:[#allocation290_spill] sm:$0xff] %v14691_v10  ;;  %3179 = vrot.lane.b32.xlu0 %v1361_v2, %s13029_s14  ;;  %v1367_v2 = vld [vmem:[#allocation2 + $0x1a] sm:$0xff] }
 0x349   :  { %3181 = vrot.lane.b32.xlu1 %v1362_v39, %s13029_s14  ;;  %v1368_v39 = vld [vmem:[#allocation2 + $0x22] sm:$0xff] }
 0x34a   :  { %v14699_v58 = vpop.permute.xlu0 %3067 }
 0x34b   :  { %v14697_v51 = vpop.permute.xlu1 %3069  ;;  %20355 = vst [vmem:[#allocation293_spill] sm:$0xff] %v14699_v58 }
 0x34c   :  { %20354 = vst [vmem:[#allocation292_spill] sm:$0xff] %v14697_v51  ;;  %3183 = vrot.lane.b32.xlu0 %v1363_v7, %s13029_s14  ;;  %v1369_v7 = vld [vmem:[#allocation2 + $0x2a] sm:$0x3] }
 0x34d   :  { %3185 = vrot.lane.b32.xlu1 %v1364_v19, %s13029_s14  ;;  %v1370_v19 = vld [vmem:[#allocation2 + $0x32] sm:$0xff] }
 0x34e   :  { %v14705_v10 = vpop.permute.xlu0 %3071 }
 0x34f   :  { %v14703_v16 = vpop.permute.xlu1 %3073  ;;  %20357 = vst [vmem:[#allocation295_spill] sm:$0xff] %v14705_v10 }
 0x350   :  { %20356 = vst [vmem:[#allocation294_spill] sm:$0xff] %v14703_v16  ;;  %3187 = vrot.lane.b32.xlu0 %v1365_v63, %s13029_s14  ;;  %v1371_v63 = vld [vmem:[#allocation2 + $0x3a] sm:$0xff] }
 0x351   :  { %3189 = vrot.lane.b32.xlu1 %v1366_v43, %s13029_s14  ;;  %v1372_v43 = vld [vmem:[#allocation2 + $0x42] sm:$0x3] }
 0x352   :  { %v14711_v51 = vpop.permute.xlu0 %3075 }
 0x353   :  { %v14709_v47 = vpop.permute.xlu1 %3077  ;;  %20359 = vst [vmem:[#allocation297_spill] sm:$0xff] %v14711_v51 }
 0x354   :  { %20358 = vst [vmem:[#allocation296_spill] sm:$0xff] %v14709_v47  ;;  %3383 = vrot.lane.b32.xlu0 %v1367_v2, %s13030_s28  ;;  %v1373_v2 = vld [vmem:[#allocation2 + $0x4a] sm:$0xff] }
 0x355   :  { %3385 = vrot.lane.b32.xlu1 %v1368_v39, %s13030_s28  ;;  %v1374_v39 = vld [vmem:[#allocation2 + $0x52] sm:$0xff] }
 0x356   :  { %v14717_v10 = vpop.permute.xlu0 %3079 }
 0x357   :  { %v14715_v16 = vpop.permute.xlu1 %3081  ;;  %20361 = vst [vmem:[#allocation299_spill] sm:$0xff] %v14717_v10 }
 0x358   :  { %20360 = vst [vmem:[#allocation298_spill] sm:$0xff] %v14715_v16  ;;  %3387 = vrot.lane.b32.xlu0 %v1369_v7, %s13030_s28 }
 0x359   :  { %3389 = vrot.lane.b32.xlu1 %v1370_v19, %s13030_s28  ;;  %v1375_v19 = vld [vmem:[#allocation2 + $0x5a] sm:$0x3] }
 0x35a   :  { %v14723_v51 = vpop.permute.xlu0 %3083 }
 0x35b   :  { %v14721_v47 = vpop.permute.xlu1 %3085  ;;  %20363 = vst [vmem:[#allocation301_spill] sm:$0xff] %v14723_v51  ;;  %v1376_v51 = vld [vmem:[#allocation2 + $0x62] sm:$0xff] }
 0x35c   :  { %20362 = vst [vmem:[#allocation300_spill] sm:$0xff] %v14721_v47  ;;  %3391 = vrot.lane.b32.xlu0 %v1371_v63, %s13030_s28 }
 0x35d   :  { %3393 = vrot.lane.b32.xlu1 %v1372_v43, %s13030_s28  ;;  %v1378_v43 = vld [vmem:[#allocation2 + $0x72] sm:$0x3] }
 0x35e   :  { %v14729_v16 = vpop.permute.xlu0 %3087 }
 0x35f   :  { %v14727_v58 = vpop.permute.xlu1 %3089  ;;  %20365 = vst [vmem:[#allocation303_spill] sm:$0xff] %v14729_v16  ;;  %v1377_v16 = vld [vmem:[#allocation2 + $0x6a] sm:$0xff] }
 0x360   :  { %20364 = vst [vmem:[#allocation302_spill] sm:$0xff] %v14727_v58  ;;  %3395 = vrot.lane.b32.xlu0 %v1373_v2, %s13030_s28 }
 0x361   :  { %3397 = vrot.lane.b32.xlu1 %v1374_v39, %s13030_s28 }
 0x362   :  { %v14735_v47 = vpop.permute.xlu0 %3091 }
 0x363   :  { %v14733_v7 = vpop.permute.xlu1 %3093  ;;  %20367 = vst [vmem:[#allocation305_spill] sm:$0xff] %v14735_v47  ;;  %v1379_v47 = vld [vmem:[#allocation2 + $0x7a] sm:$0xff] }
 0x364   :  { %20366 = vst [vmem:[#allocation304_spill] sm:$0xff] %v14733_v7  ;;  %3399 = vrot.lane.b32.xlu0 %v1375_v19, %s13030_s28  ;;  %v1380_v7 = vld [vmem:[#allocation2 + $0x82] sm:$0xff] }
 0x365   :  { %3401 = vrot.lane.b32.xlu1 %v1376_v51, %s13030_s28  ;;  %v1381_v51 = vld [vmem:[#allocation2 + $0x8a] sm:$0x3] }
 0x366   :  { %v14741_v58 = vpop.permute.xlu0 %3095 }
 0x367   :  { %v14739_v63 = vpop.permute.xlu1 %3097  ;;  %20369 = vst [vmem:[#allocation307_spill] sm:$0xff] %v14741_v58  ;;  %v1382_v58 = vld [vmem:[#allocation2 + $0x92] sm:$0xff] }
 0x368   :  { %20368 = vst [vmem:[#allocation306_spill] sm:$0xff] %v14739_v63  ;;  %3403 = vrot.lane.b32.xlu0 %v1377_v16, %s13030_s28  ;;  %v1384_v16 = vld [vmem:[#allocation2 + $0xa2] sm:$0x3] }
 0x369   :  { %3405 = vrot.lane.b32.xlu1 %v1378_v43, %s13030_s28 }
 0x36a   :  { %v14747_v2 = vpop.permute.xlu0 %3099 }
 0x36b   :  { %v14745_v39 = vpop.permute.xlu1 %3101  ;;  %20371 = vst [vmem:[#allocation309_spill] sm:$0xff] %v14747_v2 }
 0x36c   :  { %20370 = vst [vmem:[#allocation308_spill] sm:$0xff] %v14745_v39  ;;  %3407 = vrot.lane.b32.xlu0 %v1379_v47, %s13030_s28  ;;  %v1383_v39 = vld [vmem:[#allocation2 + $0x9a] sm:$0xff] }
 0x36d   :  { %3409 = vrot.lane.b32.xlu1 %v1380_v7, %s13030_s28 }
 0x36e   :  { %v14753_v63 = vpop.permute.xlu0 %3103 }
 0x36f   :  { %v14751_v19 = vpop.permute.xlu1 %3105  ;;  %20373 = vst [vmem:[#allocation311_spill] sm:$0xff] %v14753_v63  ;;  %v1385_v63 = vld [vmem:[#allocation2 + $0xaa] sm:$0xff] }
 0x370   :  { %20372 = vst [vmem:[#allocation310_spill] sm:$0xff] %v14751_v19  ;;  %3411 = vrot.lane.b32.xlu0 %v1381_v51, %s13030_s28  ;;  %v1386_v19 = vld [vmem:[#allocation2 + $0xb2] sm:$0xff] }
 0x371   :  { %3413 = vrot.lane.b32.xlu1 %v1382_v58, %s13030_s28  ;;  %v1387_v58 = vld [vmem:[#allocation2 + $0xba] sm:$0x3] }
 0x372   :  { %v14759_v2 = vpop.permute.xlu0 %3107 }
 0x373   :  { %v14757_v43 = vpop.permute.xlu1 %3109  ;;  %20375 = vst [vmem:[#allocation313_spill] sm:$0xff] %v14759_v2  ;;  %v1388_v2 = vld [vmem:[#allocation2 + $0xc2] sm:$0xff] }
 0x374   :  { %20374 = vst [vmem:[#allocation312_spill] sm:$0xff] %v14757_v43  ;;  %3415 = vrot.lane.b32.xlu0 %v1383_v39, %s13030_s28  ;;  %v1390_v39 = vld [vmem:[#allocation2 + $0xd2] sm:$0x3] }
 0x375   :  { %3417 = vrot.lane.b32.xlu1 %v1384_v16, %s13030_s28 }
 0x376   :  { %v14765_v7 = vpop.permute.xlu0 %3111 }
 0x377   :  { %v14763_v47 = vpop.permute.xlu1 %3113  ;;  %20377 = vst [vmem:[#allocation315_spill] sm:$0xff] %v14765_v7 }
 0x378   :  { %20376 = vst [vmem:[#allocation314_spill] sm:$0xff] %v14763_v47  ;;  %3419 = vrot.lane.b32.xlu0 %v1385_v63, %s13030_s28  ;;  %v1389_v47 = vld [vmem:[#allocation2 + $0xca] sm:$0xff] }
 0x379   :  { %3421 = vrot.lane.b32.xlu1 %v1386_v19, %s13030_s28 }
 0x37a   :  { %v14771_v43 = vpop.permute.xlu0 %3115 }
 0x37b   :  { %v14769_v51 = vpop.permute.xlu1 %3117  ;;  %20379 = vst [vmem:[#allocation317_spill] sm:$0xff] %v14771_v43  ;;  %v1392_v43 = vld [vmem:[#allocation2 + $0xe2] sm:$0xff] }
 0x37c   :  { %20378 = vst [vmem:[#allocation316_spill] sm:$0xff] %v14769_v51  ;;  %3423 = vrot.lane.b32.xlu0 %v1387_v58, %s13030_s28  ;;  %v1391_v51 = vld [vmem:[#allocation2 + $0xda] sm:$0xff] }
 0x37d   :  { %3425 = vrot.lane.b32.xlu1 %v1388_v2, %s13030_s28  ;;  %v1393_v2 = vld [vmem:[#allocation2 + $0xea] sm:$0x3] }
 0x37e   :  { %v14777_v7 = vpop.permute.xlu0 %3119 }
 0x37f   :  { %v14775_v16 = vpop.permute.xlu1 %3121  ;;  %20381 = vst [vmem:[#allocation319_spill] sm:$0xff] %v14777_v7  ;;  %v1394_v7 = vld [vmem:[#allocation2 + $0xf2] sm:$0xff] }
 0x380   :  { %20380 = vst [vmem:[#allocation318_spill] sm:$0xff] %v14775_v16  ;;  %3427 = vrot.lane.b32.xlu0 %v1389_v47, %s13030_s28  ;;  %v1396_v47 = vld [vmem:[#allocation2 + $0x102] sm:$0x3] }
 0x381   :  { %3429 = vrot.lane.b32.xlu1 %v1390_v39, %s13030_s28 }
 0x382   :  { %v14783_v19 = vpop.permute.xlu0 %3123 }
 0x383   :  { %v14781_v63 = vpop.permute.xlu1 %3125  ;;  %20383 = vst [vmem:[#allocation321_spill] sm:$0xff] %v14783_v19 }
 0x384   :  { %20382 = vst [vmem:[#allocation320_spill] sm:$0xff] %v14781_v63  ;;  %3431 = vrot.lane.b32.xlu0 %v1391_v51, %s13030_s28  ;;  %v1395_v63 = vld [vmem:[#allocation2 + $0xfa] sm:$0xff] }
 0x385   :  { %3433 = vrot.lane.b32.xlu1 %v1392_v43, %s13030_s28 }
 0x386   :  { %v14789_v16 = vpop.permute.xlu0 %3127 }
 0x387   :  { %v14787_v58 = vpop.permute.xlu1 %3129  ;;  %20385 = vst [vmem:[#allocation323_spill] sm:$0xff] %v14789_v16  ;;  %v1398_v16 = vld [vmem:[#allocation2 + $0x112] sm:$0xff] }
 0x388   :  { %20384 = vst [vmem:[#allocation322_spill] sm:$0xff] %v14787_v58  ;;  %3435 = vrot.lane.b32.xlu0 %v1393_v2, %s13030_s28  ;;  %v1397_v58 = vld [vmem:[#allocation2 + $0x10a] sm:$0xff] }
 0x389   :  { %3437 = vrot.lane.b32.xlu1 %v1394_v7, %s13030_s28  ;;  %v1399_v7 = vld [vmem:[#allocation2 + $0x11a] sm:$0x3] }
 0x38a   :  { %v14795_v19 = vpop.permute.xlu0 %3131 }
 0x38b   :  { %v14793_v39 = vpop.permute.xlu1 %3133  ;;  %20387 = vst [vmem:[#allocation325_spill] sm:$0xff] %v14795_v19  ;;  %v1400_v19 = vld [vmem:[#allocation2 + $0x122] sm:$0xff] }
 0x38c   :  { %20386 = vst [vmem:[#allocation324_spill] sm:$0xff] %v14793_v39  ;;  %3439 = vrot.lane.b32.xlu0 %v1395_v63, %s13030_s28  ;;  %v1402_v63 = vld [vmem:[#allocation2 + $0x132] sm:$0x3] }
 0x38d   :  { %3441 = vrot.lane.b32.xlu1 %v1396_v47, %s13030_s28 }
 0x38e   :  { %v14801_v51 = vpop.permute.xlu0 %3135 }
 0x38f   :  { %v14799_v43 = vpop.permute.xlu1 %3137  ;;  %20389 = vst [vmem:[#allocation327_spill] sm:$0xff] %v14801_v51 }
 0x390   :  { %20388 = vst [vmem:[#allocation326_spill] sm:$0xff] %v14799_v43  ;;  %3443 = vrot.lane.b32.xlu0 %v1397_v58, %s13030_s28  ;;  %v1401_v43 = vld [vmem:[#allocation2 + $0x12a] sm:$0xff] }
 0x391   :  { %3445 = vrot.lane.b32.xlu1 %v1398_v16, %s13030_s28 }
 0x392   :  { %v14807_v39 = vpop.permute.xlu0 %3139 }
 0x393   :  { %v14805_v2 = vpop.permute.xlu1 %3141  ;;  %20391 = vst [vmem:[#allocation329_spill] sm:$0xff] %v14807_v39  ;;  %v1404_v39 = vld [vmem:[#allocation2 + $0x142] sm:$0xff] }
 0x394   :  { %20390 = vst [vmem:[#allocation328_spill] sm:$0xff] %v14805_v2  ;;  %3447 = vrot.lane.b32.xlu0 %v1399_v7, %s13030_s28  ;;  %v1403_v2 = vld [vmem:[#allocation2 + $0x13a] sm:$0xff]  ;;  %v1405_v7 = vld [vmem:[#allocation2 + $0x14a] sm:$0x3] }
 0x395   :  { %3449 = vrot.lane.b32.xlu1 %v1400_v19, %s13030_s28  ;;  %v1406_v19 = vld [vmem:[#allocation2 + $0x152] sm:$0xff] }
 0x396   :  { %v14813_v51 = vpop.permute.xlu0 %3143 }
 0x397   :  { %v14811_v47 = vpop.permute.xlu1 %3145  ;;  %20393 = vst [vmem:[#allocation331_spill] sm:$0xff] %v14813_v51 }
 0x398   :  { %20392 = vst [vmem:[#allocation330_spill] sm:$0xff] %v14811_v47  ;;  %3451 = vrot.lane.b32.xlu0 %v1401_v43, %s13030_s28  ;;  %v1408_v43 = vld [vmem:[#allocation2 + $0x162] sm:$0x3] }
 0x399   :  { %3453 = vrot.lane.b32.xlu1 %v1402_v63, %s13030_s28  ;;  %v1407_v63 = vld [vmem:[#allocation2 + $0x15a] sm:$0xff] }
 0x39a   :  { %v14819_v58 = vpop.permute.xlu0 %3147 }
 0x39b   :  { %v14817_v16 = vpop.permute.xlu1 %3149  ;;  %20395 = vst [vmem:[#allocation333_spill] sm:$0xff] %v14819_v58 }
 0x39c   :  { %20394 = vst [vmem:[#allocation332_spill] sm:$0xff] %v14817_v16  ;;  %3455 = vrot.lane.b32.xlu0 %v1403_v2, %s13030_s28  ;;  %v1409_v2 = vld [vmem:[#allocation2 + $0x16a] sm:$0xff] }
 0x39d   :  { %3457 = vrot.lane.b32.xlu1 %v1404_v39, %s13030_s28  ;;  %v1410_v39 = vld [vmem:[#allocation2 + $0x172] sm:$0xff] }
 0x39e   :  { %v14825_v51 = vpop.permute.xlu0 %3151 }
 0x39f   :  { %v14823_v47 = vpop.permute.xlu1 %3153  ;;  %20397 = vst [vmem:[#allocation335_spill] sm:$0xff] %v14825_v51 }
 0x3a0   :  { %20396 = vst [vmem:[#allocation334_spill] sm:$0xff] %v14823_v47  ;;  %3459 = vrot.lane.b32.xlu0 %v1405_v7, %s13030_s28  ;;  %v1411_v7 = vld [vmem:[#allocation2 + $0x17a] sm:$0x3] }
 0x3a1   :  { %3461 = vrot.lane.b32.xlu1 %v1406_v19, %s13030_s28  ;;  %v1412_v19 = vld [vmem:[#allocation2 + $0x182] sm:$0xff] }
 0x3a2   :  { %v14831_v58 = vpop.permute.xlu0 %3155 }
 0x3a3   :  { %v14829_v16 = vpop.permute.xlu1 %3157  ;;  %20399 = vst [vmem:[#allocation337_spill] sm:$0xff] %v14831_v58 }
 0x3a4   :  { %20398 = vst [vmem:[#allocation336_spill] sm:$0xff] %v14829_v16  ;;  %3463 = vrot.lane.b32.xlu0 %v1407_v63, %s13030_s28  ;;  %v1413_v63 = vld [vmem:[#allocation2 + $0x18a] sm:$0xff] }
 0x3a5   :  { %3465 = vrot.lane.b32.xlu1 %v1408_v43, %s13030_s28  ;;  %v1414_v43 = vld [vmem:[#allocation2 + $0x192] sm:$0x3] }
 0x3a6   :  { %v14837_v47 = vpop.permute.xlu0 %3159 }
 0x3a7   :  { %v14835_v10 = vpop.permute.xlu1 %3161  ;;  %20401 = vst [vmem:[#allocation339_spill] sm:$0xff] %v14837_v47 }
 0x3a8   :  { %20400 = vst [vmem:[#allocation338_spill] sm:$0xff] %v14835_v10  ;;  %3467 = vrot.lane.b32.xlu0 %v1409_v2, %s13030_s28  ;;  %v1415_v2 = vld [vmem:[#allocation2 + $0x1ca] sm:$0xff] }
 0x3a9   :  { %3469 = vrot.lane.b32.xlu1 %v1410_v39, %s13030_s28  ;;  %v1416_v39 = vld [vmem:[#allocation2 + $0x1d2] sm:$0xff] }
 0x3aa   :  { %v14843_v16 = vpop.permute.xlu0 %3163 }
 0x3ab   :  { %v14841_v51 = vpop.permute.xlu1 %3165  ;;  %20403 = vst [vmem:[#allocation341_spill] sm:$0xff] %v14843_v16 }
 0x3ac   :  { %20402 = vst [vmem:[#allocation340_spill] sm:$0xff] %v14841_v51  ;;  %3471 = vrot.lane.b32.xlu0 %v1411_v7, %s13030_s28  ;;  %v1417_v7 = vld [vmem:[#allocation2 + $0x1da] sm:$0x3] }
 0x3ad   :  { %3473 = vrot.lane.b32.xlu1 %v1412_v19, %s13030_s28  ;;  %v1418_v19 = vld [vmem:[#allocation2 + $0x1e2] sm:$0xff] }
 0x3ae   :  { %v14849_v10 = vpop.permute.xlu0 %3167 }
 0x3af   :  { %v14847_v58 = vpop.permute.xlu1 %3169  ;;  %20405 = vst [vmem:[#allocation343_spill] sm:$0xff] %v14849_v10 }
 0x3b0   :  { %20404 = vst [vmem:[#allocation342_spill] sm:$0xff] %v14847_v58  ;;  %3475 = vrot.lane.b32.xlu0 %v1413_v63, %s13030_s28  ;;  %v1419_v63 = vld [vmem:[#allocation2 + $0x1ea] sm:$0xff] }
 0x3b1   :  { %3477 = vrot.lane.b32.xlu1 %v1414_v43, %s13030_s28  ;;  %v1420_v43 = vld [vmem:[#allocation2 + $0x1f2] sm:$0x3] }
 0x3b2   :  { %v14855_v51 = vpop.permute.xlu0 %3171 }
 0x3b3   :  { %v14853_v47 = vpop.permute.xlu1 %3173  ;;  %20407 = vst [vmem:[#allocation345_spill] sm:$0xff] %v14855_v51 }
 0x3b4   :  { %20406 = vst [vmem:[#allocation344_spill] sm:$0xff] %v14853_v47  ;;  %3479 = vrot.lane.b32.xlu0 %v1415_v2, %s13030_s28  ;;  %v1421_v2 = vld [vmem:[#allocation2 + $0x1fa] sm:$0xff] }
 0x3b5   :  { %3481 = vrot.lane.b32.xlu1 %v1416_v39, %s13030_s28  ;;  %v1422_v39 = vld [vmem:[#allocation2 + $0x202] sm:$0xff] }
 0x3b6   :  { %v14861_v58 = vpop.permute.xlu0 %3175 }
 0x3b7   :  { %v14859_v16 = vpop.permute.xlu1 %3177  ;;  %20409 = vst [vmem:[#allocation347_spill] sm:$0xff] %v14861_v58 }
 0x3b8   :  { %20408 = vst [vmem:[#allocation346_spill] sm:$0xff] %v14859_v16  ;;  %3483 = vrot.lane.b32.xlu0 %v1417_v7, %s13030_s28 }
 0x3b9   :  { %3485 = vrot.lane.b32.xlu1 %v1418_v19, %s13030_s28  ;;  %v1423_v19 = vld [vmem:[#allocation2 + $0x20a] sm:$0x3] }
 0x3ba   :  { %v14867_v47 = vpop.permute.xlu0 %3179 }
 0x3bb   :  { %v14865_v10 = vpop.permute.xlu1 %3181  ;;  %20411 = vst [vmem:[#allocation349_spill] sm:$0xff] %v14867_v47  ;;  %v1424_v47 = vld [vmem:[#allocation2 + $0x212] sm:$0xff] }
 0x3bc   :  { %20410 = vst [vmem:[#allocation348_spill] sm:$0xff] %v14865_v10  ;;  %3487 = vrot.lane.b32.xlu0 %v1419_v63, %s13030_s28 }
 0x3bd   :  { %3489 = vrot.lane.b32.xlu1 %v1420_v43, %s13030_s28  ;;  %v1426_v43 = vld [vmem:[#allocation2 + $0x222] sm:$0x3] }
 0x3be   :  { %v14873_v16 = vpop.permute.xlu0 %3183 }
 0x3bf   :  { %v14871_v51 = vpop.permute.xlu1 %3185  ;;  %20413 = vst [vmem:[#allocation351_spill] sm:$0xff] %v14873_v16  ;;  %v1425_v16 = vld [vmem:[#allocation2 + $0x21a] sm:$0xff] }
 0x3c0   :  { %20412 = vst [vmem:[#allocation350_spill] sm:$0xff] %v14871_v51  ;;  %3491 = vrot.lane.b32.xlu0 %v1421_v2, %s13030_s28 }
 0x3c1   :  { %3493 = vrot.lane.b32.xlu1 %v1422_v39, %s13030_s28 }
 0x3c2   :  { %v14879_v10 = vpop.permute.xlu0 %3187 }
 0x3c3   :  { %v14877_v7 = vpop.permute.xlu1 %3189  ;;  %20415 = vst [vmem:[#allocation353_spill] sm:$0xff] %v14879_v10  ;;  %v1428_v10 = vld [vmem:[#allocation2 + $0x232] sm:$0xff] }
 0x3c4   :  { %20414 = vst [vmem:[#allocation352_spill] sm:$0xff] %v14877_v7  ;;  %3495 = vrot.lane.b32.xlu0 %v1423_v19, %s13030_s28  ;;  %v1427_v7 = vld [vmem:[#allocation2 + $0x22a] sm:$0xff] }
 0x3c5   :  { %3497 = vrot.lane.b32.xlu1 %v1424_v47, %s13030_s28  ;;  %v1429_v47 = vld [vmem:[#allocation2 + $0x23a] sm:$0x3] }
 0x3c6   :  { %v14885_v51 = vpop.permute.xlu0 %3383 }
 0x3c7   :  { %v14883_v63 = vpop.permute.xlu1 %3385  ;;  %20417 = vst [vmem:[#allocation355_spill] sm:$0xff] %v14885_v51  ;;  %v1430_v51 = vld [vmem:[#allocation2 + $0x242] sm:$0xff] }
 0x3c8   :  { %20416 = vst [vmem:[#allocation354_spill] sm:$0xff] %v14883_v63  ;;  %3499 = vrot.lane.b32.xlu0 %v1425_v16, %s13030_s28  ;;  %v1432_v16 = vld [vmem:[#allocation2 + $0x252] sm:$0x3] }
 0x3c9   :  { %3501 = vrot.lane.b32.xlu1 %v1426_v43, %s13030_s28 }
 0x3ca   :  { %v14891_v2 = vpop.permute.xlu0 %3387 }
 0x3cb   :  { %v14889_v39 = vpop.permute.xlu1 %3389  ;;  %20419 = vst [vmem:[#allocation357_spill] sm:$0xff] %v14891_v2 }
 0x3cc   :  { %20418 = vst [vmem:[#allocation356_spill] sm:$0xff] %v14889_v39  ;;  %3503 = vrot.lane.b32.xlu0 %v1427_v7, %s13030_s28  ;;  %v1431_v39 = vld [vmem:[#allocation2 + $0x24a] sm:$0xff] }
 0x3cd   :  { %3505 = vrot.lane.b32.xlu1 %v1428_v10, %s13030_s28 }
 0x3ce   :  { %v14897_v63 = vpop.permute.xlu0 %3391 }
 0x3cf   :  { %v14895_v19 = vpop.permute.xlu1 %3393  ;;  %20421 = vst [vmem:[#allocation359_spill] sm:$0xff] %v14897_v63  ;;  %v1434_v63 = vld [vmem:[#allocation2 + $0x262] sm:$0xff] }
 0x3d0   :  { %20420 = vst [vmem:[#allocation358_spill] sm:$0xff] %v14895_v19  ;;  %3507 = vrot.lane.b32.xlu0 %v1429_v47, %s13030_s28  ;;  %v1433_v19 = vld [vmem:[#allocation2 + $0x25a] sm:$0xff] }
 0x3d1   :  { %3509 = vrot.lane.b32.xlu1 %v1430_v51, %s13030_s28  ;;  %v1435_v51 = vld [vmem:[#allocation2 + $0x26a] sm:$0x3] }
 0x3d2   :  { %v14903_v2 = vpop.permute.xlu0 %3395 }
 0x3d3   :  { %v14901_v43 = vpop.permute.xlu1 %3397  ;;  %20423 = vst [vmem:[#allocation361_spill] sm:$0xff] %v14903_v2  ;;  %v1436_v2 = vld [vmem:[#allocation2 + $0x272] sm:$0xff] }
 0x3d4   :  { %20422 = vst [vmem:[#allocation360_spill] sm:$0xff] %v14901_v43  ;;  %3511 = vrot.lane.b32.xlu0 %v1431_v39, %s13030_s28  ;;  %v1438_v39 = vld [vmem:[#allocation2 + $0x282] sm:$0x3] }
 0x3d5   :  { %3513 = vrot.lane.b32.xlu1 %v1432_v16, %s13030_s28 }
 0x3d6   :  { %v14909_v7 = vpop.permute.xlu0 %3399 }
 0x3d7   :  { %v14907_v10 = vpop.permute.xlu1 %3401  ;;  %20425 = vst [vmem:[#allocation363_spill] sm:$0xff] %v14909_v7 }
 0x3d8   :  { %20424 = vst [vmem:[#allocation362_spill] sm:$0xff] %v14907_v10  ;;  %3515 = vrot.lane.b32.xlu0 %v1433_v19, %s13030_s28  ;;  %v1437_v10 = vld [vmem:[#allocation2 + $0x27a] sm:$0xff] }
 0x3d9   :  { %3517 = vrot.lane.b32.xlu1 %v1434_v63, %s13030_s28 }
 0x3da   :  { %v14915_v43 = vpop.permute.xlu0 %3403 }
 0x3db   :  { %v14913_v47 = vpop.permute.xlu1 %3405  ;;  %20427 = vst [vmem:[#allocation365_spill] sm:$0xff] %v14915_v43  ;;  %v1440_v43 = vld [vmem:[#allocation2 + $0x292] sm:$0xff] }
 0x3dc   :  { %20426 = vst [vmem:[#allocation364_spill] sm:$0xff] %v14913_v47  ;;  %3519 = vrot.lane.b32.xlu0 %v1435_v51, %s13030_s28  ;;  %v1439_v47 = vld [vmem:[#allocation2 + $0x28a] sm:$0xff] }
 0x3dd   :  { %3521 = vrot.lane.b32.xlu1 %v1436_v2, %s13030_s28  ;;  %v1441_v2 = vld [vmem:[#allocation2 + $0x29a] sm:$0x3] }
 0x3de   :  { %v14921_v7 = vpop.permute.xlu0 %3407 }
 0x3df   :  { %v14919_v16 = vpop.permute.xlu1 %3409  ;;  %20429 = vst [vmem:[#allocation367_spill] sm:$0xff] %v14921_v7  ;;  %v1442_v7 = vld [vmem:[#allocation2 + $0x2a2] sm:$0xff] }
 0x3e0   :  { %20428 = vst [vmem:[#allocation366_spill] sm:$0xff] %v14919_v16  ;;  %3523 = vrot.lane.b32.xlu0 %v1437_v10, %s13030_s28  ;;  %v1444_v10 = vld [vmem:[#allocation2 + $0x2b2] sm:$0x3] }
 0x3e1   :  { %3525 = vrot.lane.b32.xlu1 %v1438_v39, %s13030_s28 }
 0x3e2   :  { %v14927_v19 = vpop.permute.xlu0 %3411 }
 0x3e3   :  { %v14925_v63 = vpop.permute.xlu1 %3413  ;;  %20431 = vst [vmem:[#allocation369_spill] sm:$0xff] %v14927_v19 }
 0x3e4   :  { %20430 = vst [vmem:[#allocation368_spill] sm:$0xff] %v14925_v63  ;;  %3527 = vrot.lane.b32.xlu0 %v1439_v47, %s13030_s28  ;;  %v1443_v63 = vld [vmem:[#allocation2 + $0x2aa] sm:$0xff] }
 0x3e5   :  { %3529 = vrot.lane.b32.xlu1 %v1440_v43, %s13030_s28 }
 0x3e6   :  { %v14933_v16 = vpop.permute.xlu0 %3415 }
 0x3e7   :  { %v14931_v51 = vpop.permute.xlu1 %3417  ;;  %20433 = vst [vmem:[#allocation371_spill] sm:$0xff] %v14933_v16  ;;  %v1446_v16 = vld [vmem:[#allocation2 + $0x2c2] sm:$0xff] }
 0x3e8   :  { %20432 = vst [vmem:[#allocation370_spill] sm:$0xff] %v14931_v51  ;;  %3531 = vrot.lane.b32.xlu0 %v1441_v2, %s13030_s28  ;;  %v1445_v51 = vld [vmem:[#allocation2 + $0x2ba] sm:$0xff] }
 0x3e9   :  { %3533 = vrot.lane.b32.xlu1 %v1442_v7, %s13030_s28  ;;  %v1447_v7 = vld [vmem:[#allocation2 + $0x2ca] sm:$0x3] }
 0x3ea   :  { %v14939_v19 = vpop.permute.xlu0 %3419 }
 0x3eb   :  { %v14937_v39 = vpop.permute.xlu1 %3421  ;;  %20435 = vst [vmem:[#allocation373_spill] sm:$0xff] %v14939_v19  ;;  %v1448_v19 = vld [vmem:[#allocation2 + $0x2d2] sm:$0xff] }
 0x3ec   :  { %20434 = vst [vmem:[#allocation372_spill] sm:$0xff] %v14937_v39  ;;  %3535 = vrot.lane.b32.xlu0 %v1443_v63, %s13030_s28  ;;  %v1450_v63 = vld [vmem:[#allocation2 + $0x2e2] sm:$0x3] }
 0x3ed   :  { %3537 = vrot.lane.b32.xlu1 %v1444_v10, %s13030_s28 }
 0x3ee   :  { %v14945_v47 = vpop.permute.xlu0 %3423 }
 0x3ef   :  { %v14943_v43 = vpop.permute.xlu1 %3425  ;;  %20437 = vst [vmem:[#allocation375_spill] sm:$0xff] %v14945_v47 }
 0x3f0   :  { %20436 = vst [vmem:[#allocation374_spill] sm:$0xff] %v14943_v43  ;;  %3539 = vrot.lane.b32.xlu0 %v1445_v51, %s13030_s28  ;;  %v1449_v43 = vld [vmem:[#allocation2 + $0x2da] sm:$0xff] }
 0x3f1   :  { %3541 = vrot.lane.b32.xlu1 %v1446_v16, %s13030_s28 }
 0x3f2   :  { %v14951_v39 = vpop.permute.xlu0 %3427 }
 0x3f3   :  { %v14949_v2 = vpop.permute.xlu1 %3429  ;;  %20439 = vst [vmem:[#allocation377_spill] sm:$0xff] %v14951_v39  ;;  %v1452_v39 = vld [vmem:[#allocation2 + $0x2f2] sm:$0xff] }
 0x3f4   :  { %20438 = vst [vmem:[#allocation376_spill] sm:$0xff] %v14949_v2  ;;  %3543 = vrot.lane.b32.xlu0 %v1447_v7, %s13030_s28  ;;  %v1451_v2 = vld [vmem:[#allocation2 + $0x2ea] sm:$0xff]  ;;  %v1453_v7 = vld [vmem:[#allocation2 + $0x2fa] sm:$0x3] }
 0x3f5   :  { %3545 = vrot.lane.b32.xlu1 %v1448_v19, %s13030_s28  ;;  %v1454_v19 = vld [vmem:[#allocation2 + $0x302] sm:$0xff] }
 0x3f6   :  { %v14957_v47 = vpop.permute.xlu0 %3431 }
 0x3f7   :  { %v14955_v10 = vpop.permute.xlu1 %3433  ;;  %20441 = vst [vmem:[#allocation379_spill] sm:$0xff] %v14957_v47 }
 0x3f8   :  { %20440 = vst [vmem:[#allocation378_spill] sm:$0xff] %v14955_v10  ;;  %3547 = vrot.lane.b32.xlu0 %v1449_v43, %s13030_s28  ;;  %v1456_v43 = vld [vmem:[#allocation2 + $0x312] sm:$0x3] }
 0x3f9   :  { %3549 = vrot.lane.b32.xlu1 %v1450_v63, %s13030_s28  ;;  %v1455_v63 = vld [vmem:[#allocation2 + $0x30a] sm:$0xff] }
 0x3fa   :  { %v14963_v51 = vpop.permute.xlu0 %3435 }
 0x3fb   :  { %v14961_v16 = vpop.permute.xlu1 %3437  ;;  %20443 = vst [vmem:[#allocation381_spill] sm:$0xff] %v14963_v51 }
 0x3fc   :  { %20442 = vst [vmem:[#allocation380_spill] sm:$0xff] %v14961_v16  ;;  %3551 = vrot.lane.b32.xlu0 %v1451_v2, %s13030_s28  ;;  %v1457_v2 = vld [vmem:[#allocation2 + $0x31a] sm:$0xff] }
 0x3fd   :  { %3553 = vrot.lane.b32.xlu1 %v1452_v39, %s13030_s28  ;;  %v1458_v39 = vld [vmem:[#allocation2 + $0x322] sm:$0xff] }
 0x3fe   :  { %v14969_v47 = vpop.permute.xlu0 %3439 }
 0x3ff   :  { %v14967_v10 = vpop.permute.xlu1 %3441  ;;  %20445 = vst [vmem:[#allocation383_spill] sm:$0xff] %v14969_v47 }
 0x400   :  { %20444 = vst [vmem:[#allocation382_spill] sm:$0xff] %v14967_v10  ;;  %3555 = vrot.lane.b32.xlu0 %v1453_v7, %s13030_s28  ;;  %v1459_v7 = vld [vmem:[#allocation2 + $0x32a] sm:$0x3] }
 0x401   :  { %3557 = vrot.lane.b32.xlu1 %v1454_v19, %s13030_s28  ;;  %v1460_v19 = vld [vmem:[#allocation2 + $0x332] sm:$0xff] }
 0x402   :  { %v14975_v51 = vpop.permute.xlu0 %3443 }
 0x403   :  { %v14973_v16 = vpop.permute.xlu1 %3445  ;;  %20447 = vst [vmem:[#allocation385_spill] sm:$0xff] %v14975_v51 }
 0x404   :  { %20446 = vst [vmem:[#allocation384_spill] sm:$0xff] %v14973_v16  ;;  %3559 = vrot.lane.b32.xlu0 %v1455_v63, %s13030_s28  ;;  %v1461_v63 = vld [vmem:[#allocation2 + $0x33a] sm:$0xff] }
 0x405   :  { %3561 = vrot.lane.b32.xlu1 %v1456_v43, %s13030_s28  ;;  %v1462_v43 = vld [vmem:[#allocation2 + $0x342] sm:$0x3] }
 0x406   :  { %v14981_v10 = vpop.permute.xlu0 %3447 }
 0x407   :  { %v14979_v58 = vpop.permute.xlu1 %3449  ;;  %20449 = vst [vmem:[#allocation387_spill] sm:$0xff] %v14981_v10 }
 0x408   :  { %20448 = vst [vmem:[#allocation386_spill] sm:$0xff] %v14979_v58  ;;  %3563 = vrot.lane.b32.xlu0 %v1457_v2, %s13030_s28  ;;  %v1463_v2 = vld [vmem:[#allocation2 + $0x30] sm:$0xff] }
 0x409   :  { %3565 = vrot.lane.b32.xlu1 %v1458_v39, %s13030_s28  ;;  %v1464_v39 = vld [vmem:[#allocation2 + $0x38] sm:$0xff] }
 0x40a   :  { %v14987_v16 = vpop.permute.xlu0 %3451 }
 0x40b   :  { %v14985_v47 = vpop.permute.xlu1 %3453  ;;  %20451 = vst [vmem:[#allocation389_spill] sm:$0xff] %v14987_v16 }
 0x40c   :  { %20450 = vst [vmem:[#allocation388_spill] sm:$0xff] %v14985_v47  ;;  %3567 = vrot.lane.b32.xlu0 %v1459_v7, %s13030_s28  ;;  %v1465_v7 = vld [vmem:[#allocation2 + $0x40] sm:$0x3] }
 0x40d   :  { %3569 = vrot.lane.b32.xlu1 %v1460_v19, %s13030_s28  ;;  %v1466_v19 = vld [vmem:[#allocation2 + $0x48] sm:$0xff] }
 0x40e   :  { %v14993_v58 = vpop.permute.xlu0 %3455 }
 0x40f   :  { %v14991_v51 = vpop.permute.xlu1 %3457  ;;  %20453 = vst [vmem:[#allocation391_spill] sm:$0xff] %v14993_v58 }
 0x410   :  { %20452 = vst [vmem:[#allocation390_spill] sm:$0xff] %v14991_v51  ;;  %3571 = vrot.lane.b32.xlu0 %v1461_v63, %s13030_s28  ;;  %v1467_v63 = vld [vmem:[#allocation2 + $0x50] sm:$0xff] }
 0x411   :  { %3573 = vrot.lane.b32.xlu1 %v1462_v43, %s13030_s28  ;;  %v1468_v43 = vld [vmem:[#allocation2 + $0x58] sm:$0x3] }
 0x412   :  { %v14999_v47 = vpop.permute.xlu0 %3459 }
 0x413   :  { %v14997_v10 = vpop.permute.xlu1 %3461  ;;  %20455 = vst [vmem:[#allocation393_spill] sm:$0xff] %v14999_v47 }
 0x414   :  { %20454 = vst [vmem:[#allocation392_spill] sm:$0xff] %v14997_v10  ;;  %3767 = vrot.lane.b32.xlu0 %v1463_v2, %s13031_s29 }
 0x415   :  { %3769 = vrot.lane.b32.xlu1 %v1464_v39, %s13031_s29 }
 0x416   :  { %v15005_v58 = vpop.permute.xlu0 %3463 }
 0x417   :  { %v15003_v51 = vpop.permute.xlu1 %3465  ;;  %20457 = vst [vmem:[#allocation395_spill] sm:$0xff] %v15005_v58  ;;  %v1469_v58 = vld [vmem:[#allocation2 + $0x60] sm:$0xff] }
 0x418   :  { %20456 = vst [vmem:[#allocation394_spill] sm:$0xff] %v15003_v51  ;;  %3771 = vrot.lane.b32.xlu0 %v1465_v7, %s13031_s29  ;;  %v1470_v51 = vld [vmem:[#allocation2 + $0x68] sm:$0xff] }
 0x419   :  { %3773 = vrot.lane.b32.xlu1 %v1466_v19, %s13031_s29  ;;  %v1471_v19 = vld [vmem:[#allocation2 + $0x70] sm:$0x3] }
 0x41a   :  { %v15011_v47 = vpop.permute.xlu0 %3467 }
 0x41b   :  { %v15009_v10 = vpop.permute.xlu1 %3469  ;;  %20459 = vst [vmem:[#allocation397_spill] sm:$0xff] %v15011_v47  ;;  %v1472_v47 = vld [vmem:[#allocation2 + $0x78] sm:$0xff] }
 0x41c   :  { %20458 = vst [vmem:[#allocation396_spill] sm:$0xff] %v15009_v10  ;;  %3775 = vrot.lane.b32.xlu0 %v1467_v63, %s13031_s29 }
 0x41d   :  { %3777 = vrot.lane.b32.xlu1 %v1468_v43, %s13031_s29  ;;  %v1474_v43 = vld [vmem:[#allocation2 + $0x88] sm:$0x3] }
 0x41e   :  { %v15017_v2 = vpop.permute.xlu0 %3471 }
 0x41f   :  { %v15015_v39 = vpop.permute.xlu1 %3473  ;;  %20461 = vst [vmem:[#allocation399_spill] sm:$0xff] %v15017_v2 }
 0x420   :  { %20460 = vst [vmem:[#allocation398_spill] sm:$0xff] %v15015_v39  ;;  %3779 = vrot.lane.b32.xlu0 %v1469_v58, %s13031_s29  ;;  %v1473_v39 = vld [vmem:[#allocation2 + $0x80] sm:$0xff] }
 0x421   :  { %3781 = vrot.lane.b32.xlu1 %v1470_v51, %s13031_s29 }
 0x422   :  { %v15023_v10 = vpop.permute.xlu0 %3475 }
 0x423   :  { %v15021_v7 = vpop.permute.xlu1 %3477  ;;  %20463 = vst [vmem:[#allocation401_spill] sm:$0xff] %v15023_v10  ;;  %v1475_v10 = vld [vmem:[#allocation2 + $0x90] sm:$0xff] }
 0x424   :  { %20462 = vst [vmem:[#allocation400_spill] sm:$0xff] %v15021_v7  ;;  %3783 = vrot.lane.b32.xlu0 %v1471_v19, %s13031_s29  ;;  %v1476_v7 = vld [vmem:[#allocation2 + $0x98] sm:$0xff] }
 0x425   :  { %3785 = vrot.lane.b32.xlu1 %v1472_v47, %s13031_s29  ;;  %v1477_v47 = vld [vmem:[#allocation2 + $0xa0] sm:$0x3] }
 0x426   :  { %v15029_v2 = vpop.permute.xlu0 %3479 }
 0x427   :  { %v15027_v63 = vpop.permute.xlu1 %3481  ;;  %20465 = vst [vmem:[#allocation403_spill] sm:$0xff] %v15029_v2  ;;  %v1478_v2 = vld [vmem:[#allocation2 + $0xa8] sm:$0xff] }
 0x428   :  { %20464 = vst [vmem:[#allocation402_spill] sm:$0xff] %v15027_v63  ;;  %3787 = vrot.lane.b32.xlu0 %v1473_v39, %s13031_s29  ;;  %v1480_v39 = vld [vmem:[#allocation2 + $0xb8] sm:$0x3] }
 0x429   :  { %3789 = vrot.lane.b32.xlu1 %v1474_v43, %s13031_s29 }
 0x42a   :  { %v15035_v51 = vpop.permute.xlu0 %3483 }
 0x42b   :  { %v15033_v58 = vpop.permute.xlu1 %3485  ;;  %20467 = vst [vmem:[#allocation405_spill] sm:$0xff] %v15035_v51 }
 0x42c   :  { %20466 = vst [vmem:[#allocation404_spill] sm:$0xff] %v15033_v58  ;;  %3791 = vrot.lane.b32.xlu0 %v1475_v10, %s13031_s29  ;;  %v1479_v58 = vld [vmem:[#allocation2 + $0xb0] sm:$0xff] }
 0x42d   :  { %3793 = vrot.lane.b32.xlu1 %v1476_v7, %s13031_s29 }
 0x42e   :  { %v15041_v63 = vpop.permute.xlu0 %3487 }
 0x42f   :  { %v15039_v19 = vpop.permute.xlu1 %3489  ;;  %20469 = vst [vmem:[#allocation407_spill] sm:$0xff] %v15041_v63  ;;  %v1481_v63 = vld [vmem:[#allocation2 + $0xc0] sm:$0xff] }
 0x430   :  { %20468 = vst [vmem:[#allocation406_spill] sm:$0xff] %v15039_v19  ;;  %3795 = vrot.lane.b32.xlu0 %v1477_v47, %s13031_s29  ;;  %v1482_v19 = vld [vmem:[#allocation2 + $0xc8] sm:$0xff] }
 0x431   :  { %3797 = vrot.lane.b32.xlu1 %v1478_v2, %s13031_s29  ;;  %v1483_v2 = vld [vmem:[#allocation2 + $0xd0] sm:$0x3] }
 0x432   :  { %v15047_v51 = vpop.permute.xlu0 %3491 }
 0x433   :  { %v15045_v43 = vpop.permute.xlu1 %3493  ;;  %20471 = vst [vmem:[#allocation409_spill] sm:$0xff] %v15047_v51  ;;  %v1484_v51 = vld [vmem:[#allocation2 + $0xd8] sm:$0xff] }
 0x434   :  { %20470 = vst [vmem:[#allocation408_spill] sm:$0xff] %v15045_v43  ;;  %3799 = vrot.lane.b32.xlu0 %v1479_v58, %s13031_s29  ;;  %v1486_v58 = vld [vmem:[#allocation2 + $0xe8] sm:$0x3] }
 0x435   :  { %3801 = vrot.lane.b32.xlu1 %v1480_v39, %s13031_s29 }
 0x436   :  { %v15053_v7 = vpop.permute.xlu0 %3495 }
 0x437   :  { %v15051_v10 = vpop.permute.xlu1 %3497  ;;  %20473 = vst [vmem:[#allocation411_spill] sm:$0xff] %v15053_v7 }
 0x438   :  { %20472 = vst [vmem:[#allocation410_spill] sm:$0xff] %v15051_v10  ;;  %3803 = vrot.lane.b32.xlu0 %v1481_v63, %s13031_s29  ;;  %v1485_v10 = vld [vmem:[#allocation2 + $0xe0] sm:$0xff] }
 0x439   :  { %3805 = vrot.lane.b32.xlu1 %v1482_v19, %s13031_s29 }
 0x43a   :  { %v15059_v43 = vpop.permute.xlu0 %3499 }
 0x43b   :  { %v15057_v47 = vpop.permute.xlu1 %3501  ;;  %20475 = vst [vmem:[#allocation413_spill] sm:$0xff] %v15059_v43  ;;  %v1487_v43 = vld [vmem:[#allocation2 + $0xf0] sm:$0xff] }
 0x43c   :  { %20474 = vst [vmem:[#allocation412_spill] sm:$0xff] %v15057_v47  ;;  %3807 = vrot.lane.b32.xlu0 %v1483_v2, %s13031_s29  ;;  %v1488_v47 = vld [vmem:[#allocation2 + $0xf8] sm:$0xff] }
 0x43d   :  { %3809 = vrot.lane.b32.xlu1 %v1484_v51, %s13031_s29  ;;  %v1489_v51 = vld [vmem:[#allocation2 + $0x100] sm:$0x3] }
 0x43e   :  { %v15065_v7 = vpop.permute.xlu0 %3503 }
 0x43f   :  { %v15063_v39 = vpop.permute.xlu1 %3505  ;;  %20477 = vst [vmem:[#allocation415_spill] sm:$0xff] %v15065_v7  ;;  %v1490_v7 = vld [vmem:[#allocation2 + $0x108] sm:$0xff] }
 0x440   :  { %20476 = vst [vmem:[#allocation414_spill] sm:$0xff] %v15063_v39  ;;  %3811 = vrot.lane.b32.xlu0 %v1485_v10, %s13031_s29  ;;  %v1492_v10 = vld [vmem:[#allocation2 + $0x118] sm:$0x3] }
 0x441   :  { %3813 = vrot.lane.b32.xlu1 %v1486_v58, %s13031_s29 }
 0x442   :  { %v15071_v19 = vpop.permute.xlu0 %3507 }
 0x443   :  { %v15069_v63 = vpop.permute.xlu1 %3509  ;;  %20479 = vst [vmem:[#allocation417_spill] sm:$0xff] %v15071_v19 }
 0x444   :  { %20478 = vst [vmem:[#allocation416_spill] sm:$0xff] %v15069_v63  ;;  %3815 = vrot.lane.b32.xlu0 %v1487_v43, %s13031_s29  ;;  %v1491_v63 = vld [vmem:[#allocation2 + $0x110] sm:$0xff] }
 0x445   :  { %3817 = vrot.lane.b32.xlu1 %v1488_v47, %s13031_s29 }
 0x446   :  { %v15077_v39 = vpop.permute.xlu0 %3511 }
 0x447   :  { %v15075_v2 = vpop.permute.xlu1 %3513  ;;  %20481 = vst [vmem:[#allocation419_spill] sm:$0xff] %v15077_v39  ;;  %v1493_v39 = vld [vmem:[#allocation2 + $0x120] sm:$0xff] }
 0x448   :  { %20480 = vst [vmem:[#allocation418_spill] sm:$0xff] %v15075_v2  ;;  %3819 = vrot.lane.b32.xlu0 %v1489_v51, %s13031_s29  ;;  %v1494_v2 = vld [vmem:[#allocation2 + $0x128] sm:$0xff] }
 0x449   :  { %3821 = vrot.lane.b32.xlu1 %v1490_v7, %s13031_s29  ;;  %v1495_v7 = vld [vmem:[#allocation2 + $0x130] sm:$0x3] }
 0x44a   :  { %v15083_v19 = vpop.permute.xlu0 %3515 }
 0x44b   :  { %v15081_v58 = vpop.permute.xlu1 %3517  ;;  %20483 = vst [vmem:[#allocation421_spill] sm:$0xff] %v15083_v19  ;;  %v1496_v19 = vld [vmem:[#allocation2 + $0x138] sm:$0xff] }
 0x44c   :  { %20482 = vst [vmem:[#allocation420_spill] sm:$0xff] %v15081_v58  ;;  %3823 = vrot.lane.b32.xlu0 %v1491_v63, %s13031_s29  ;;  %v1498_v63 = vld [vmem:[#allocation2 + $0x148] sm:$0x3] }
 0x44d   :  { %3825 = vrot.lane.b32.xlu1 %v1492_v10, %s13031_s29 }
 0x44e   :  { %v15089_v47 = vpop.permute.xlu0 %3519 }
 0x44f   :  { %v15087_v43 = vpop.permute.xlu1 %3521  ;;  %20485 = vst [vmem:[#allocation423_spill] sm:$0xff] %v15089_v47 }
 0x450   :  { %20484 = vst [vmem:[#allocation422_spill] sm:$0xff] %v15087_v43  ;;  %3827 = vrot.lane.b32.xlu0 %v1493_v39, %s13031_s29  ;;  %v1497_v43 = vld [vmem:[#allocation2 + $0x140] sm:$0xff]  ;;  %v1500_v39 = vld [vmem:[#allocation2 + $0x158] sm:$0xff] }
 0x451   :  { %3829 = vrot.lane.b32.xlu1 %v1494_v2, %s13031_s29  ;;  %v1499_v2 = vld [vmem:[#allocation2 + $0x150] sm:$0xff] }
 0x452   :  { %v15095_v58 = vpop.permute.xlu0 %3523 }
 0x453   :  { %v15093_v51 = vpop.permute.xlu1 %3525  ;;  %20487 = vst [vmem:[#allocation425_spill] sm:$0xff] %v15095_v58 }
 0x454   :  { %20486 = vst [vmem:[#allocation424_spill] sm:$0xff] %v15093_v51  ;;  %3831 = vrot.lane.b32.xlu0 %v1495_v7, %s13031_s29  ;;  %v1501_v7 = vld [vmem:[#allocation2 + $0x160] sm:$0x3] }
 0x455   :  { %3833 = vrot.lane.b32.xlu1 %v1496_v19, %s13031_s29  ;;  %v1502_v19 = vld [vmem:[#allocation2 + $0x168] sm:$0xff] }
 0x456   :  { %v15101_v47 = vpop.permute.xlu0 %3527 }
 0x457   :  { %v15099_v10 = vpop.permute.xlu1 %3529  ;;  %20489 = vst [vmem:[#allocation427_spill] sm:$0xff] %v15101_v47 }
 0x458   :  { %20488 = vst [vmem:[#allocation426_spill] sm:$0xff] %v15099_v10  ;;  %3835 = vrot.lane.b32.xlu0 %v1497_v43, %s13031_s29  ;;  %v1504_v43 = vld [vmem:[#allocation2 + $0x178] sm:$0x3] }
 0x459   :  { %3837 = vrot.lane.b32.xlu1 %v1498_v63, %s13031_s29  ;;  %v1503_v63 = vld [vmem:[#allocation2 + $0x170] sm:$0xff] }
 0x45a   :  { %v15107_v58 = vpop.permute.xlu0 %3531 }
 0x45b   :  { %v15105_v51 = vpop.permute.xlu1 %3533  ;;  %20491 = vst [vmem:[#allocation429_spill] sm:$0xff] %v15107_v58 }
 0x45c   :  { %20490 = vst [vmem:[#allocation428_spill] sm:$0xff] %v15105_v51  ;;  %3839 = vrot.lane.b32.xlu0 %v1499_v2, %s13031_s29  ;;  %v1505_v2 = vld [vmem:[#allocation2 + $0x180] sm:$0xff] }
 0x45d   :  { %3841 = vrot.lane.b32.xlu1 %v1500_v39, %s13031_s29  ;;  %v1506_v39 = vld [vmem:[#allocation2 + $0x188] sm:$0xff] }
 0x45e   :  { %v15113_v47 = vpop.permute.xlu0 %3535 }
 0x45f   :  { %v15111_v10 = vpop.permute.xlu1 %3537  ;;  %20493 = vst [vmem:[#allocation431_spill] sm:$0xff] %v15113_v47 }
 0x460   :  { %20492 = vst [vmem:[#allocation430_spill] sm:$0xff] %v15111_v10  ;;  %3843 = vrot.lane.b32.xlu0 %v1501_v7, %s13031_s29  ;;  %v1507_v7 = vld [vmem:[#allocation2 + $0x190] sm:$0x3] }
 0x461   :  { %3845 = vrot.lane.b32.xlu1 %v1502_v19, %s13031_s29  ;;  %v1508_v19 = vld [vmem:[#allocation2 + $0x198] sm:$0xff] }
 0x462   :  { %v15119_v51 = vpop.permute.xlu0 %3539 }
 0x463   :  { %v15117_v16 = vpop.permute.xlu1 %3541  ;;  %20495 = vst [vmem:[#allocation433_spill] sm:$0xff] %v15119_v51 }
 0x464   :  { %20494 = vst [vmem:[#allocation432_spill] sm:$0xff] %v15117_v16  ;;  %3847 = vrot.lane.b32.xlu0 %v1503_v63, %s13031_s29  ;;  %v1509_v63 = vld [vmem:[#allocation2 + $0x1a0] sm:$0xff] }
 0x465   :  { %3849 = vrot.lane.b32.xlu1 %v1504_v43, %s13031_s29  ;;  %v1510_v43 = vld [vmem:[#allocation2 + $0x1a8] sm:$0x3] }
 0x466   :  { %v15125_v10 = vpop.permute.xlu0 %3543 }
 0x467   :  { %v15123_v58 = vpop.permute.xlu1 %3545  ;;  %20497 = vst [vmem:[#allocation435_spill] sm:$0xff] %v15125_v10 }
 0x468   :  { %20496 = vst [vmem:[#allocation434_spill] sm:$0xff] %v15123_v58  ;;  %3851 = vrot.lane.b32.xlu0 %v1505_v2, %s13031_s29  ;;  %v1511_v2 = vld [vmem:[#allocation2 + $0x1e0] sm:$0xff] }
 0x469   :  { %3853 = vrot.lane.b32.xlu1 %v1506_v39, %s13031_s29  ;;  %v1512_v39 = vld [vmem:[#allocation2 + $0x1e8] sm:$0xff] }
 0x46a   :  { %v15131_v16 = vpop.permute.xlu0 %3547 }
 0x46b   :  { %v15129_v47 = vpop.permute.xlu1 %3549  ;;  %20499 = vst [vmem:[#allocation437_spill] sm:$0xff] %v15131_v16 }
 0x46c   :  { %20498 = vst [vmem:[#allocation436_spill] sm:$0xff] %v15129_v47  ;;  %3855 = vrot.lane.b32.xlu0 %v1507_v7, %s13031_s29  ;;  %v1513_v7 = vld [vmem:[#allocation2 + $0x1f0] sm:$0x3] }
 0x46d   :  { %3857 = vrot.lane.b32.xlu1 %v1508_v19, %s13031_s29  ;;  %v1514_v19 = vld [vmem:[#allocation2 + $0x1f8] sm:$0xff] }
 0x46e   :  { %v15137_v58 = vpop.permute.xlu0 %3551 }
 0x46f   :  { %v15135_v51 = vpop.permute.xlu1 %3553  ;;  %20501 = vst [vmem:[#allocation439_spill] sm:$0xff] %v15137_v58 }
 0x470   :  { %20500 = vst [vmem:[#allocation438_spill] sm:$0xff] %v15135_v51  ;;  %3859 = vrot.lane.b32.xlu0 %v1509_v63, %s13031_s29  ;;  %v1515_v63 = vld [vmem:[#allocation2 + $0x200] sm:$0xff] }
 0x471   :  { %3861 = vrot.lane.b32.xlu1 %v1510_v43, %s13031_s29  ;;  %v1516_v43 = vld [vmem:[#allocation2 + $0x208] sm:$0x3] }
 0x472   :  { %v15143_v47 = vpop.permute.xlu0 %3555 }
 0x473   :  { %v15141_v10 = vpop.permute.xlu1 %3557  ;;  %20503 = vst [vmem:[#allocation441_spill] sm:$0xff] %v15143_v47 }
 0x474   :  { %20502 = vst [vmem:[#allocation440_spill] sm:$0xff] %v15141_v10  ;;  %3863 = vrot.lane.b32.xlu0 %v1511_v2, %s13031_s29 }
 0x475   :  { %3865 = vrot.lane.b32.xlu1 %v1512_v39, %s13031_s29 }
 0x476   :  { %v15149_v51 = vpop.permute.xlu0 %3559 }
 0x477   :  { %v15147_v16 = vpop.permute.xlu1 %3561  ;;  %20505 = vst [vmem:[#allocation443_spill] sm:$0xff] %v15149_v51  ;;  %v1517_v51 = vld [vmem:[#allocation2 + $0x210] sm:$0xff] }
 0x478   :  { %20504 = vst [vmem:[#allocation442_spill] sm:$0xff] %v15147_v16  ;;  %3867 = vrot.lane.b32.xlu0 %v1513_v7, %s13031_s29  ;;  %v1518_v16 = vld [vmem:[#allocation2 + $0x218] sm:$0xff] }
 0x479   :  { %3869 = vrot.lane.b32.xlu1 %v1514_v19, %s13031_s29  ;;  %v1519_v19 = vld [vmem:[#allocation2 + $0x220] sm:$0x3] }
 0x47a   :  { %v15155_v10 = vpop.permute.xlu0 %3563 }
 0x47b   :  { %v15153_v58 = vpop.permute.xlu1 %3565  ;;  %20507 = vst [vmem:[#allocation445_spill] sm:$0xff] %v15155_v10  ;;  %v1520_v10 = vld [vmem:[#allocation2 + $0x228] sm:$0xff] }
 0x47c   :  { %20506 = vst [vmem:[#allocation444_spill] sm:$0xff] %v15153_v58  ;;  %3871 = vrot.lane.b32.xlu0 %v1515_v63, %s13031_s29 }
 0x47d   :  { %3873 = vrot.lane.b32.xlu1 %v1516_v43, %s13031_s29  ;;  %v1522_v43 = vld [vmem:[#allocation2 + $0x238] sm:$0x3] }
 0x47e   :  { %v15161_v2 = vpop.permute.xlu0 %3567 }
 0x47f   :  { %v15159_v39 = vpop.permute.xlu1 %3569  ;;  %20509 = vst [vmem:[#allocation447_spill] sm:$0xff] %v15161_v2 }
 0x480   :  { %20508 = vst [vmem:[#allocation446_spill] sm:$0xff] %v15159_v39  ;;  %3875 = vrot.lane.b32.xlu0 %v1517_v51, %s13031_s29  ;;  %v1521_v39 = vld [vmem:[#allocation2 + $0x230] sm:$0xff] }
 0x481   :  { %3877 = vrot.lane.b32.xlu1 %v1518_v16, %s13031_s29 }
 0x482   :  { %v15167_v58 = vpop.permute.xlu0 %3571 }
 0x483   :  { %v15165_v7 = vpop.permute.xlu1 %3573  ;;  %20511 = vst [vmem:[#allocation449_spill] sm:$0xff] %v15167_v58  ;;  %v1524_v58 = vld [vmem:[#allocation2 + $0x248] sm:$0xff] }
 0x484   :  { %20510 = vst [vmem:[#allocation448_spill] sm:$0xff] %v15165_v7  ;;  %3879 = vrot.lane.b32.xlu0 %v1519_v19, %s13031_s29  ;;  %v1523_v7 = vld [vmem:[#allocation2 + $0x240] sm:$0xff] }
 0x485   :  { %3881 = vrot.lane.b32.xlu1 %v1520_v10, %s13031_s29  ;;  %v1525_v10 = vld [vmem:[#allocation2 + $0x250] sm:$0x3] }
 0x486   :  { %v15173_v2 = vpop.permute.xlu0 %3767 }
 0x487   :  { %v15171_v63 = vpop.permute.xlu1 %3769  ;;  %20513 = vst [vmem:[#allocation451_spill] sm:$0xff] %v15173_v2  ;;  %v1683_v2 = vld [vmem:[#allocation2 + $0x112] sm:$0xff] }
 0x488   :  { %20512 = vst [vmem:[#allocation450_spill] sm:$0xff] %v15171_v63  ;;  %3883 = vrot.lane.b32.xlu0 %v1521_v39, %s13031_s29  ;;  %v1526_v63 = vld [vmem:[#allocation2 + $0x258] sm:$0xff]  ;;  %v1528_v39 = vld [vmem:[#allocation2 + $0x268] sm:$0x3] }
 0x489   :  { %3885 = vrot.lane.b32.xlu1 %v1522_v43, %s13031_s29 }
 0x48a   :  { %v15179_v51 = vpop.permute.xlu0 %3771 }
 0x48b   :  { %v15177_v16 = vpop.permute.xlu1 %3773  ;;  %20515 = vst [vmem:[#allocation453_spill] sm:$0xff] %v15179_v51 }
 0x48c   :  { %20514 = vst [vmem:[#allocation452_spill] sm:$0xff] %v15177_v16  ;;  %3887 = vrot.lane.b32.xlu0 %v1523_v7, %s13031_s29  ;;  %v1527_v16 = vld [vmem:[#allocation2 + $0x260] sm:$0xff] }
 0x48d   :  { %3889 = vrot.lane.b32.xlu1 %v1524_v58, %s13031_s29 }
 0x48e   :  { %v15185_v47 = vpop.permute.xlu0 %3775 }
 0x48f   :  { %v15183_v19 = vpop.permute.xlu1 %3777  ;;  %20517 = vst [vmem:[#allocation455_spill] sm:$0xff] %v15185_v47  ;;  %v1529_v47 = vld [vmem:[#allocation2 + $0x270] sm:$0xff] }
 0x490   :  { %20516 = vst [vmem:[#allocation454_spill] sm:$0xff] %v15183_v19  ;;  %3891 = vrot.lane.b32.xlu0 %v1525_v10, %s13031_s29  ;;  %v1530_v19 = vld [vmem:[#allocation2 + $0x278] sm:$0xff] }
 0x491   :  { %3893 = vrot.lane.b32.xlu1 %v1526_v63, %s13031_s29  ;;  %v1531_v63 = vld [vmem:[#allocation2 + $0x280] sm:$0x3] }
 0x492   :  { %v15191_v51 = vpop.permute.xlu0 %3779 }
 0x493   :  { %v15189_v43 = vpop.permute.xlu1 %3781  ;;  %20519 = vst [vmem:[#allocation457_spill] sm:$0xff] %v15191_v51  ;;  %v1532_v51 = vld [vmem:[#allocation2 + $0x288] sm:$0xff] }
 0x494   :  { %20518 = vst [vmem:[#allocation456_spill] sm:$0xff] %v15189_v43  ;;  %3895 = vrot.lane.b32.xlu0 %v1527_v16, %s13031_s29  ;;  %v1534_v16 = vld [vmem:[#allocation2 + $0x298] sm:$0x3] }
 0x495   :  { %3897 = vrot.lane.b32.xlu1 %v1528_v39, %s13031_s29 }
 0x496   :  { %v15197_v7 = vpop.permute.xlu0 %3783 }
 0x497   :  { %v15195_v58 = vpop.permute.xlu1 %3785  ;;  %20521 = vst [vmem:[#allocation459_spill] sm:$0xff] %v15197_v7 }
 0x498   :  { %20520 = vst [vmem:[#allocation458_spill] sm:$0xff] %v15195_v58  ;;  %3899 = vrot.lane.b32.xlu0 %v1529_v47, %s13031_s29  ;;  %v1533_v58 = vld [vmem:[#allocation2 + $0x290] sm:$0xff] }
 0x499   :  { %3901 = vrot.lane.b32.xlu1 %v1530_v19, %s13031_s29 }
 0x49a   :  { %v15203_v43 = vpop.permute.xlu0 %3787 }
 0x49b   :  { %v15201_v10 = vpop.permute.xlu1 %3789  ;;  %20523 = vst [vmem:[#allocation461_spill] sm:$0xff] %v15203_v43  ;;  %v1536_v43 = vld [vmem:[#allocation2 + $0x2a8] sm:$0xff] }
 0x49c   :  { %20522 = vst [vmem:[#allocation460_spill] sm:$0xff] %v15201_v10  ;;  %3903 = vrot.lane.b32.xlu0 %v1531_v63, %s13031_s29  ;;  %v1535_v10 = vld [vmem:[#allocation2 + $0x2a0] sm:$0xff] }
 0x49d   :  { %3905 = vrot.lane.b32.xlu1 %v1532_v51, %s13031_s29  ;;  %v1537_v51 = vld [vmem:[#allocation2 + $0x2b0] sm:$0x3] }
 0x49e   :  { %v15209_v7 = vpop.permute.xlu0 %3791 }
 0x49f   :  { %v15207_v39 = vpop.permute.xlu1 %3793  ;;  %20525 = vst [vmem:[#allocation463_spill] sm:$0xff] %v15209_v7  ;;  %v1538_v7 = vld [vmem:[#allocation2 + $0x2b8] sm:$0xff] }
 0x4a0   :  { %20524 = vst [vmem:[#allocation462_spill] sm:$0xff] %v15207_v39  ;;  %3907 = vrot.lane.b32.xlu0 %v1533_v58, %s13031_s29  ;;  %v1540_v58 = vld [vmem:[#allocation2 + $0x2c8] sm:$0x3] }
 0x4a1   :  { %3909 = vrot.lane.b32.xlu1 %v1534_v16, %s13031_s29 }
 0x4a2   :  { %v15215_v19 = vpop.permute.xlu0 %3795 }
 0x4a3   :  { %v15213_v47 = vpop.permute.xlu1 %3797  ;;  %20527 = vst [vmem:[#allocation465_spill] sm:$0xff] %v15215_v19 }
 0x4a4   :  { %20526 = vst [vmem:[#allocation464_spill] sm:$0xff] %v15213_v47  ;;  %3911 = vrot.lane.b32.xlu0 %v1535_v10, %s13031_s29  ;;  %v1539_v47 = vld [vmem:[#allocation2 + $0x2c0] sm:$0xff] }
 0x4a5   :  { %3913 = vrot.lane.b32.xlu1 %v1536_v43, %s13031_s29 }
 0x4a6   :  { %v15221_v39 = vpop.permute.xlu0 %3799 }
 0x4a7   :  { %v15219_v63 = vpop.permute.xlu1 %3801  ;;  %20529 = vst [vmem:[#allocation467_spill] sm:$0xff] %v15221_v39  ;;  %v1542_v39 = vld [vmem:[#allocation2 + $0x2d8] sm:$0xff] }
 0x4a8   :  { %20528 = vst [vmem:[#allocation466_spill] sm:$0xff] %v15219_v63  ;;  %3915 = vrot.lane.b32.xlu0 %v1537_v51, %s13031_s29  ;;  %v1541_v63 = vld [vmem:[#allocation2 + $0x2d0] sm:$0xff] }
 0x4a9   :  { %3917 = vrot.lane.b32.xlu1 %v1538_v7, %s13031_s29  ;;  %v1543_v7 = vld [vmem:[#allocation2 + $0x2e0] sm:$0x3] }
 0x4aa   :  { %v15227_v19 = vpop.permute.xlu0 %3803 }
 0x4ab   :  { %v15225_v16 = vpop.permute.xlu1 %3805  ;;  %20531 = vst [vmem:[#allocation469_spill] sm:$0xff] %v15227_v19  ;;  %v1544_v19 = vld [vmem:[#allocation2 + $0x2e8] sm:$0xff] }
 0x4ac   :  { %20530 = vst [vmem:[#allocation468_spill] sm:$0xff] %v15225_v16  ;;  %3919 = vrot.lane.b32.xlu0 %v1539_v47, %s13031_s29  ;;  %v1546_v47 = vld [vmem:[#allocation2 + $0x2f8] sm:$0x3] }
 0x4ad   :  { %3921 = vrot.lane.b32.xlu1 %v1540_v58, %s13031_s29 }
 0x4ae   :  { %v15233_v10 = vpop.permute.xlu0 %3807 }
 0x4af   :  { %v15231_v43 = vpop.permute.xlu1 %3809  ;;  %20533 = vst [vmem:[#allocation471_spill] sm:$0xff] %v15233_v10 }
 0x4b0   :  { %20532 = vst [vmem:[#allocation470_spill] sm:$0xff] %v15231_v43  ;;  %3923 = vrot.lane.b32.xlu0 %v1541_v63, %s13031_s29  ;;  %v1545_v43 = vld [vmem:[#allocation2 + $0x2f0] sm:$0xff]  ;;  %v1547_v63 = vld [vmem:[#allocation2 + $0x300] sm:$0xff] }
 0x4b1   :  { %3925 = vrot.lane.b32.xlu1 %v1542_v39, %s13031_s29  ;;  %v1548_v39 = vld [vmem:[#allocation2 + $0x308] sm:$0xff] }
 0x4b2   :  { %v15239_v16 = vpop.permute.xlu0 %3811 }
 0x4b3   :  { %v15237_v51 = vpop.permute.xlu1 %3813  ;;  %20535 = vst [vmem:[#allocation473_spill] sm:$0xff] %v15239_v16 }
 0x4b4   :  { %20534 = vst [vmem:[#allocation472_spill] sm:$0xff] %v15237_v51  ;;  %3927 = vrot.lane.b32.xlu0 %v1543_v7, %s13031_s29  ;;  %v1549_v7 = vld [vmem:[#allocation2 + $0x310] sm:$0x3] }
 0x4b5   :  { %3929 = vrot.lane.b32.xlu1 %v1544_v19, %s13031_s29  ;;  %v1550_v19 = vld [vmem:[#allocation2 + $0x318] sm:$0xff] }
 0x4b6   :  { %v15245_v10 = vpop.permute.xlu0 %3815 }
 0x4b7   :  { %v15243_v58 = vpop.permute.xlu1 %3817  ;;  %20537 = vst [vmem:[#allocation475_spill] sm:$0xff] %v15245_v10 }
 0x4b8   :  { %20536 = vst [vmem:[#allocation474_spill] sm:$0xff] %v15243_v58  ;;  %3931 = vrot.lane.b32.xlu0 %v1545_v43, %s13031_s29  ;;  %v1551_v43 = vld [vmem:[#allocation2 + $0x320] sm:$0xff] }
 0x4b9   :  { %3933 = vrot.lane.b32.xlu1 %v1546_v47, %s13031_s29 }
 0x4ba   :  { %v15251_v16 = vpop.permute.xlu0 %3819 }
 0x4bb   :  { %v15249_v51 = vpop.permute.xlu1 %3821  ;;  %20539 = vst [vmem:[#allocation477_spill] sm:$0xff] %v15251_v16  ;;  %v1587_v16 = vld [vmem:[#allocation2 + $0x111] sm:$0xff] }
 0x4bc   :  { %20538 = vst [vmem:[#allocation476_spill] sm:$0xff] %v15249_v51  ;;  %3935 = vrot.lane.b32.xlu0 %v1547_v63, %s13031_s29 }
 0x4bd   :  { %3937 = vrot.lane.b32.xlu1 %v1548_v39, %s13031_s29 }
 0x4be   :  { %v15257_v10 = vpop.permute.xlu0 %3823 }
 0x4bf   :  { %v15255_v58 = vpop.permute.xlu1 %3825  ;;  %20541 = vst [vmem:[#allocation479_spill] sm:$0xff] %v15257_v10 }
 0x4c0   :  { %20540 = vst [vmem:[#allocation478_spill] sm:$0xff] %v15255_v58  ;;  %3939 = vrot.lane.b32.xlu0 %v1549_v7, %s13031_s29  ;;  %v1589_v58 = vld [vmem:[#allocation2 + $0x121] sm:$0xff] }
 0x4c1   :  { %3941 = vrot.lane.b32.xlu1 %v1550_v19, %s13031_s29 }
 0x4c2   :  { %v15263_v51 = vpop.permute.xlu0 %3827 }
 0x4c3   :  { %v15261_v47 = vpop.permute.xlu1 %3829  ;;  %20543 = vst [vmem:[#allocation481_spill] sm:$0xff] %v15263_v51  ;;  %v1685_v51 = vld [vmem:[#allocation2 + $0x122] sm:$0xff] }
 0x4c4   :  { %20542 = vst [vmem:[#allocation480_spill] sm:$0xff] %v15261_v47  ;;  %3943 = vrot.lane.b32.xlu0 %v1551_v43, %s13031_s29  ;;  %v1590_v47 = vld [vmem:[#allocation2 + $0x129] sm:$0xff]  ;;  %v5597_v43 = vld [vmem:[%s20057_s3] sm:$0xff] }
 0x4c5   :  { %4207 = vrot.lane.b32.xlu1 %v1587_v16, %s13032_s30  ;;  %v1588_v16 = vld [vmem:[#allocation2 + $0x119] sm:$0x3] }
 0x4c6   :  { %v15269_v63 = vpop.permute.xlu0 %3831 }
 0x4c7   :  { %v15267_v39 = vpop.permute.xlu1 %3833  ;;  %20545 = vst [vmem:[#allocation483_spill] sm:$0xff] %v15269_v63  ;;  %v1686_v63 = vld [vmem:[#allocation2 + $0x12a] sm:$0xff] }
 0x4c8   :  { %20544 = vst [vmem:[#allocation482_spill] sm:$0xff] %v15267_v39  ;;  %4211 = vrot.lane.b32.xlu0 %v1589_v58, %s13032_s30 }
 0x4c9   :  { %4591 = vrot.lane.b32.xlu1 %v1683_v2, %s13033_s6  ;;  %v5598_v2 = vld [vmem:[%s20057_s3 + $0x8] sm:$0xff] }
 0x4ca   :  { %v15275_v7 = vpop.permute.xlu0 %3835 }
 0x4cb   :  { %v15273_v19 = vpop.permute.xlu1 %3837  ;;  %20547 = vst [vmem:[#allocation485_spill] sm:$0xff] %v15275_v7  ;;  %v12932_v7 = vpack.c.bf16 %v5598_v2, %v5597_v43  ;;  %v5600_v43 = vld [vmem:[%s20057_s3 + $0x18] sm:$0xff] }
 0x4cc   :  { %20546 = vst [vmem:[#allocation484_spill] sm:$0xff] %v15273_v19  ;;  %4595 = vrot.lane.b32.xlu0 %v1685_v51, %s13033_s6  ;;  %v1684_v51 = vld [vmem:[#allocation2 + $0x11a] sm:$0x3] }
 0x4cd   :  { %4213 = vrot.lane.b32.xlu1 %v1590_v47, %s13032_s30  ;;  %12940 = vmatprep.subr.bf16.mxu1 %v12932_v7 }
 0x4ce   :  { %v15287_v19 = vpop.permute.xlu0 %3839  ;;  %12933 = vmatprep.subr.bf16.mxu0 %v12932_v7  ;;  %12943 = vmatpush3.bf16.msra.mxu1 %v12932_v7 }
 0x4cf   :  { %v15285_v58 = vpop.permute.xlu1 %3841  ;;  %20549 = vst [vmem:[#allocation487_spill] sm:$0xff] %v15287_v19  ;;  %12935 = vmatpush3.bf16.msra.mxu0 %v12932_v7  ;;  %v1688_v7 = vld [vmem:[#allocation2 + $0x13a] sm:$0xff] }
 0x4d0   :  { %20548 = vst [vmem:[#allocation486_spill] sm:$0xff] %v15285_v58  ;;  %4209 = vrot.lane.b32.xlu0 %v1588_v16, %s13032_s30  ;;  %v5599_v58 = vld [vmem:[%s20057_s3 + $0x10] sm:$0xff]  ;;  %v5601_v16 = vld [vmem:[%s20057_s3 + $0x20] sm:$0xf] }
 0x4d1   :  { %4597 = vrot.lane.b32.xlu1 %v1686_v63, %s13033_s6  ;;  %v1592_v63 = vld [vmem:[#allocation2 + $0x139] sm:$0xff]  ;;  %v12936_v2 = vpack.c.bf16 %v5600_v43, %v5599_v58  ;;  %v1595_v58 = vld [vmem:[#allocation2 + $0x151] sm:$0xff] }
 0x4d2   :  { %v15293_v39 = vpop.permute.xlu0 %3843 }
 0x4d3   :  { %v15291_v47 = vpop.permute.xlu1 %3845  ;;  %20551 = vst [vmem:[#allocation489_spill] sm:$0xff] %v15293_v39  ;;  %v1591_v39 = vld [vmem:[#allocation2 + $0x131] sm:$0x3]  ;;  %12941 = vmatprep.subr.bf16.mxu1 %v12936_v2  ;;  %12937 = vmatprep.subr.bf16.mxu0 %v12936_v2 }
 0x4d4   :  { %20550 = vst [vmem:[#allocation488_spill] sm:$0xff] %v15291_v47  ;;  %4217 = vrot.lane.b32.xlu0 %v1592_v63, %s13032_s30  ;;  %12944 = vmatpush3.bf16.msra.mxu1 %v12936_v2  ;;  %v1593_v63 = vld [vmem:[#allocation2 + $0x141] sm:$0xff] }
 0x4d5   :  { %4593 = vrot.lane.b32.xlu1 %v1684_v51, %s13033_s6  ;;  %12939 = vmatpush3.bf16.msra.mxu0 %v12936_v2  ;;  %v1687_v2 = vld [vmem:[#allocation2 + $0x132] sm:$0x3] }
 0x4d6   :  { %v15308_v19 = vpop.permute.xlu0 %3847  ;;  %12942 = vmatprep.subr.msk.mxu1 %vm8456_vm3, %v5601_v16  ;;  %12822 = vmatprep.subr.msk.mxu0 %vm8456_vm3, %v5601_v16 }
 0x4d7   :  { %v15306_v47 = vpop.permute.xlu1 %3849  ;;  %20553 = vst [vmem:[#allocation491_spill] sm:$0xff] %v15308_v19 }
 0x4d8   :  { %20552 = vst [vmem:[#allocation490_spill] sm:$0xff] %v15306_v47  ;;  %4601 = vrot.lane.b32.xlu0 %v1688_v7, %s13033_s6  ;;  %12945 = vmatpush3.msk.msra.mxu1 %vm8456_vm3, %v5601_v16  ;;  %v1689_v7 = vld [vmem:[#allocation2 + $0x142] sm:$0xff] }
 0x4d9   :  { %4215 = vrot.lane.b32.xlu1 %v1591_v39, %s13032_s30  ;;  %12823 = vmatpush3.msk.msra.mxu0 %vm8456_vm3, %v5601_v16 }
 0x4da   :  { %v15316_v43 = vpop.permute.xlu0 %3851 }
 0x4db   :  { %v15314_v51 = vpop.permute.xlu1 %3853  ;;  %20555 = vst [vmem:[#allocation493_spill] sm:$0xff] %v15316_v43  ;;  %v1691_v43 = vld [vmem:[#allocation2 + $0x152] sm:$0xff] }
 0x4dc   :  { %20554 = vst [vmem:[#allocation492_spill] sm:$0xff] %v15314_v51  ;;  %4219 = vrot.lane.b32.xlu0 %v1593_v63, %s13032_s30  ;;  %v1594_v51 = vld [vmem:[#allocation2 + $0x149] sm:$0x3]  ;;  %v1596_v63 = vld [vmem:[#allocation2 + $0x159] sm:$0xff] }
 0x4dd   :  { %4223 = vrot.lane.b32.xlu1 %v1595_v58, %s13032_s30  ;;  %v1690_v58 = vld [vmem:[#allocation2 + $0x14a] sm:$0x3] }
 0x4de   :  { %v15324_v39 = vpop.permute.xlu0 %3855 }
 0x4df   :  { %v15322_v47 = vpop.permute.xlu1 %3857  ;;  %20557 = vst [vmem:[#allocation495_spill] sm:$0xff] %v15324_v39 }
 0x4e0   :  { %20556 = vst [vmem:[#allocation494_spill] sm:$0xff] %v15322_v47  ;;  %4599 = vrot.lane.b32.xlu0 %v1687_v2, %s13033_s6  ;;  %v1598_v2 = vld [vmem:[#allocation2 + $0x169] sm:$0xff] }
 0x4e1   :  { %4603 = vrot.lane.b32.xlu1 %v1689_v7, %s13033_s6  ;;  %v1692_v7 = vld [vmem:[#allocation2 + $0x15a] sm:$0xff] }
 0x4e2   :  { %v15330_v16 = vpop.permute.xlu0 %3859 }
 0x4e3   :  { %v15328_v19 = vpop.permute.xlu1 %3861  ;;  %20559 = vst [vmem:[#allocation497_spill] sm:$0xff] %v15330_v16 }
 0x4e4   :  { %20558 = vst [vmem:[#allocation496_spill] sm:$0xff] %v15328_v19  ;;  %4607 = vrot.lane.b32.xlu0 %v1691_v43, %s13033_s6  ;;  %v1694_v43 = vld [vmem:[#allocation2 + $0x16a] sm:$0xff] }
 0x4e5   :  { %4221 = vrot.lane.b32.xlu1 %v1594_v51, %s13032_s30  ;;  %v1597_v51 = vld [vmem:[#allocation2 + $0x161] sm:$0x3] }
 0x4e6   :  { %v15336_v39 = vpop.permute.xlu0 %3863 }
 0x4e7   :  { %v15334_v47 = vpop.permute.xlu1 %3865  ;;  %20561 = vst [vmem:[#allocation499_spill] sm:$0xff] %v15336_v39 }
 0x4e8   :  { %20560 = vst [vmem:[#allocation498_spill] sm:$0xff] %v15334_v47  ;;  %4225 = vrot.lane.b32.xlu0 %v1596_v63, %s13032_s30  ;;  %v1599_v63 = vld [vmem:[#allocation2 + $0x171] sm:$0xff] }
 0x4e9   :  { %4605 = vrot.lane.b32.xlu1 %v1690_v58, %s13033_s6  ;;  %v1693_v58 = vld [vmem:[#allocation2 + $0x162] sm:$0x3] }
 0x4ea   :  { %v15342_v19 = vpop.permute.xlu0 %3867 }
 0x4eb   :  { %v15340_v10 = vpop.permute.xlu1 %3869  ;;  %20563 = vst [vmem:[#allocation501_spill] sm:$0xff] %v15342_v19  ;;  %v13034_v19 = vmov 1983009808  }
 0x4ec   :  { %20562 = vst [vmem:[#allocation500_spill] sm:$0xff] %v15340_v10  ;;  %4609 = vrot.lane.b32.xlu0 %v1692_v7, %s13033_s6  ;;  %v1695_v7 = vld [vmem:[#allocation2 + $0x172] sm:$0xff] }
 0x4ed   :  { %4229 = vrot.lane.b32.xlu1 %v1598_v2, %s13032_s30  ;;  %v1601_v2 = vld [vmem:[#allocation2 + $0x181] sm:$0xff] }
 0x4ee   :  { %v15348_v47 = vpop.permute.xlu0 %3871 }
 0x4ef   :  { %v15346_v16 = vpop.permute.xlu1 %3873  ;;  %20565 = vst [vmem:[#allocation503_spill] sm:$0xff] %v15348_v47 }
 0x4f0   :  { %20564 = vst [vmem:[#allocation502_spill] sm:$0xff] %v15346_v16  ;;  %4613 = vrot.lane.b32.xlu0 %v1694_v43, %s13033_s6  ;;  %v5706_v16 = vunpack.c.l.s4 %v13034_v19  ;;  %v886_v43 = vld [vmem:[#allocation2] sm:$0xff] }
 0x4f1   :  { %4227 = vrot.lane.b32.xlu1 %v1597_v51, %s13032_s30  ;;  %v888_v51 = vld [vmem:[#allocation2 + $0x10] sm:$0x3]  ;;  %v15379_v34 = vsel %vm590_vm1, %v886_v43, %v13654_v33 }
 0x4f2   :  { %v15354_v10 = vpop.permute.xlu0 %3875  ;;  %v928_v43 = vld [vmem:[#allocation2 + $0x150] sm:$0xff] }
 0x4f3   :  { %v15352_v39 = vpop.permute.xlu1 %3877  ;;  %20567 = vst [vmem:[#allocation505_spill] sm:$0xff] %v15354_v10  ;;  %v1600_v10 = vld [vmem:[#allocation2 + $0x179] sm:$0x3] }
 0x4f4   :  { %20566 = vst [vmem:[#allocation504_spill] sm:$0xff] %v15352_v39  ;;  %4231 = vrot.lane.b32.xlu0 %v1599_v63, %s13032_s30  ;;  %v889_v39 = vld [vmem:[#allocation2 + $0x18] sm:$0xff]  ;;  %v891_v63 = vld [vmem:[#allocation2 + $0x28] sm:$0x3] }
 0x4f5   :  { %4611 = vrot.lane.b32.xlu1 %v1693_v58, %s13033_s6  ;;  %v5707_v58 = vunpack.c.0.s8 %v5706_v16  ;;  %v909_v16 = vld [vmem:[#allocation2 + $0xb8] sm:$0x3]  ;;  %v15395_v33 = vsel %vm590_vm1, %v891_v63, %v13664_v40  ;;  %v15415_v40 = vsel %vm590_vm1, %v894_v6, %v13678_v49  ;;  %v15433_v6 = vsel %vm590_vm1, %v900_v59, %v13690_v57  ;;  %v1698_v63 = vld [vmem:[#allocation2 + $0x18a] sm:$0xff] }
 0x4f6   :  { %v15360_v47 = vpop.permute.xlu0 %3879  ;;  %v15449_v57 = vsel %vm590_vm1, %v912_v38, %v13702_v1  ;;  %v938_v59 = vld [vmem:[#allocation2 + $0x1d0] sm:$0xff]  ;;  %v15465_v1 = vsel %vm590_vm1, %v927_v30, %v13712_v8  ;;  %v15469_v38 = vsel %vm590_vm1, %v924_v29, %v13714_v9  ;;  %v951_v8 = vld [vmem:[#allocation2 + $0x238] sm:$0x3]  ;;  %v948_v30 = vld [vmem:[#allocation2 + $0x220] sm:$0x3] }
 0x4f7   :  { %v15358_v42 = vpop.permute.xlu1 %3881  ;;  %20569 = vst [vmem:[#allocation507_spill] sm:$0xff] %v15360_v47  ;;  %v895_v47 = vld [vmem:[#allocation2 + $0x48] sm:$0xff]  ;;  %v954_v9 = vld [vmem:[#allocation2 + $0x250] sm:$0x3] }
 0x4f8   :  { %20568 = vst [vmem:[#allocation506_spill] sm:$0xff] %v15358_v42  ;;  %4615 = vrot.lane.b32.xlu0 %v1695_v7, %s13033_s6  ;;  %v892_v42 = vld [vmem:[#allocation2 + $0x30] sm:$0xff]  ;;  %v903_v7 = vld [vmem:[#allocation2 + $0x88] sm:$0x3] }
 0x4f9   :  { %4235 = vrot.lane.b32.xlu1 %v1601_v2, %s13032_s30  ;;  %v897_v2 = vld [vmem:[#allocation2 + $0x58] sm:$0x3]  ;;  %v15429_v49 = vsel %vm590_vm1, %v903_v7, %v13688_v56  ;;  %v15445_v56 = vsel %vm590_vm1, %v915_v46, %v13700_v0  ;;  %v15461_v0 = vsel %vm590_vm1, %v918_v31, %v13708_v5  ;;  %v942_v46 = vld [vmem:[#allocation2 + $0x1f0] sm:$0x3]  ;;  %v957_v31 = vld [vmem:[#allocation2 + $0x268] sm:$0x3] }
 0x4fa   :  { %v15366_v19 = vpop.permute.xlu0 %3883  ;;  %v943_v7 = vld [vmem:[#allocation2 + $0x1f8] sm:$0xff] }
 0x4fb   :  { %v15364_v54 = vpop.permute.xlu1 %3885  ;;  %20571 = vst [vmem:[#allocation509_spill] sm:$0xff] %v15366_v19  ;;  %v15375_v19 = vsel %vm590_vm1, %v888_v51, %v13652_v32  ;;  %v15391_v32 = vsel %vm590_vm1, %v887_v11, %v13660_v37  ;;  %v929_v51 = vld [vmem:[#allocation2 + $0x158] sm:$0xff]  ;;  %v15411_v37 = vsel %vm590_vm1, %v895_v47, %v13676_v48  ;;  %v932_v11 = vld [vmem:[#allocation2 + $0x170] sm:$0xff]  ;;  %v15425_v48 = vsel %vm590_vm1, %v896_v50, %v13684_v53  ;;  %v941_v50 = vld [vmem:[#allocation2 + $0x1e8] sm:$0xff] }
 0x4fc   :  { %20570 = vst [vmem:[#allocation508_spill] sm:$0xff] %v15364_v54  ;;  %4619 = vrot.lane.b32.xlu0 %v1697_v15, %s13033_s6  ;;  %v15371_v54 = vsub.s32 %v5707_v58, %v13310_v12  ;;  %v15383_v15 = vsel %vm590_vm1, %v889_v39, %v13658_v36  ;;  %v15399_v36 = vsel %vm590_vm1, %v890_v20, %v13666_v41  ;;  %v931_v58 = vld [vmem:[#allocation2 + $0x168] sm:$0xff]  ;;  %v930_v41 = vld [vmem:[#allocation2 + $0x160] sm:$0x3]  ;;  %v933_v20 = vld [vmem:[#allocation2 + $0x178] sm:$0x3] }
 0x4fd   :  { %4233 = vrot.lane.b32.xlu1 %v1600_v10, %s13032_s30  ;;  %v921_v10 = vld [vmem:[#allocation2 + $0x118] sm:$0x3]  ;;  %v15403_v39 = vsel %vm590_vm1, %v893_v3, %v13670_v44  ;;  %v934_v3 = vld [vmem:[#allocation2 + $0x1b0] sm:$0xff]  ;;  %v15441_v53 = vsel %vm590_vm1, %v906_v62, %v13696_v61  ;;  %v945_v62 = vld [vmem:[#allocation2 + $0x208] sm:$0x3]  ;;  %v15481_v5 = vsel %vm590_vm1, %v931_v58, %v13724_v17  ;;  %v15495_v17 = vsel %vm590_vm1, %v932_v11, %v13732_v22 }
 0x4fe   :  { %20572 = vst [vmem:[#allocation510_spill] sm:$0xff] %v15371_v54  ;;  %v15387_v12 = vpop.permute.xlu0 %3887  ;;  %v935_v44 = vld [vmem:[#allocation2 + $0x1b8] sm:$0xff]  ;;  %v15457_v61 = vsel %vm590_vm1, %v921_v10, %v13706_v4  ;;  %v15477_v4 = vsel %vm590_vm1, %v928_v43, %v13720_v14  ;;  %v15491_v14 = vsel %vm590_vm1, %v933_v20, %v13730_v21  ;;  %v1603_v43 = vld [vmem:[#allocation2 + $0x191] sm:$0x3]  ;;  %v15503_v58 = vsel %vm590_vm1, %v934_v3, %v13738_v24  ;;  %v20579_v24 = vld [vmem:[#allocation3_spill] sm:$0xff] }
 0x4ff   :  { %v15385_v28 = vpop.permute.xlu1 %3889  ;;  %20574 = vst [vmem:[#allocation512_spill] sm:$0xff] %v15387_v12  ;;  %v1604_v47 = vld [vmem:[#allocation2 + $0x199] sm:$0xff]  ;;  %v15499_v29 = vsel %vm590_vm1, %v935_v44, %v13736_v23  ;;  %v966_v20 = vld [vmem:[#allocation2 + $0x2b0] sm:$0x3]  ;;  %v15523_v3 = vsel %vm590_vm1, %v938_v59, %v20579_v24  ;;  %v20585_v59 = vld [vmem:[#allocation8_spill] sm:$0xff] }
 0x500   :  { %20573 = vst [vmem:[#allocation511_spill] sm:$0xff] %v15385_v28  ;;  %v15407_v28 = vsel %vm590_vm1, %v892_v42, %v13672_v45  ;;  %4237 = vrot.lane.b32.xlu0 %v1602_v35, %s13032_s30  ;;  %v15421_v45 = vsel %vm590_vm1, %v897_v2, %v13682_v52  ;;  %v936_v42 = vld [vmem:[#allocation2 + $0x1c0] sm:$0x3]  ;;  %v939_v35 = vld [vmem:[#allocation2 + $0x1d8] sm:$0x3]  ;;  %v15437_v52 = vsel %vm590_vm1, %v909_v16, %v13694_v60 }
 0x501   :  { %4617 = vrot.lane.b32.xlu1 %v1696_v55, %s13033_s6  ;;  %v937_v55 = vld [vmem:[#allocation2 + $0x1c8] sm:$0xff]  ;;  %v940_v2 = vld [vmem:[#allocation2 + $0x1e0] sm:$0xff]  ;;  %v963_v10 = vld [vmem:[#allocation2 + $0x298] sm:$0x3]  ;;  %v15511_v21 = vsel %vm590_vm1, %v936_v42, %v13742_v26  ;;  %v15515_v22 = vsel %vm590_vm1, %v939_v35, %v13744_v27  ;;  %v15543_v24 = vsel %vm590_vm1, %v945_v62, %v20585_v59 }
 0x502   :  { %v15453_v60 = vpop.permute.xlu0 %3891  ;;  %v944_v16 = vld [vmem:[#allocation2 + $0x200] sm:$0xff]  ;;  %v20581_v26 = vld [vmem:[#allocation5_spill] sm:$0xff]  ;;  %v20582_v27 = vld [vmem:[#allocation6_spill] sm:$0xff] }
 0x503   :  { %v15451_v12 = vpop.permute.xlu1 %3893  ;;  %20576 = vst [vmem:[#allocation514_spill] sm:$0xff] %v15453_v60  ;;  %v15473_v60 = vsel %vm590_vm1, %v929_v51, %v13718_v13  ;;  %v15487_v13 = vsel %vm590_vm1, %v930_v41, %v13726_v18  ;;  %v1605_v51 = vld [vmem:[#allocation2 + $0x1a1] sm:$0xff]  ;;  %v15507_v18 = vsel %vm590_vm1, %v937_v55, %v13740_v25  ;;  %v15531_v42 = vsel %vm590_vm1, %v940_v2, %v20581_v26  ;;  %v979_v26 = vld [vmem:[#allocation2 + $0x318] sm:$0xff]  ;;  %v978_v54 = vld [vmem:[#allocation2 + $0x310] sm:$0x3] }
 0x504   :  { %20575 = vst [vmem:[#allocation513_spill] sm:$0xff] %v15451_v12  ;;  %4621 = vrot.lane.b32.xlu0 %v1698_v63, %s13033_s6  ;;  %v960_v23 = vld [vmem:[#allocation2 + $0x280] sm:$0x3]  ;;  %v969_v41 = vld [vmem:[#allocation2 + $0x2c8] sm:$0x3]  ;;  %v15535_v35 = vsel %vm590_vm1, %v943_v7, %v20582_v27  ;;  %v20589_v7 = vld [vmem:[#allocation10_spill] sm:$0xff] }
 0x505   :  { %4241 = vrot.lane.b32.xlu1 %v1604_v47, %s13032_s30  ;;  %v20580_v25 = vld [vmem:[#allocation4_spill] sm:$0xff]  ;;  %v975_v47 = vld [vmem:[#allocation2 + $0x2f8] sm:$0x3]  ;;  %v972_v63 = vld [vmem:[#allocation2 + $0x2e0] sm:$0x3]  ;;  %v15553_v27 = vsel %vm590_vm1, %v951_v8, %v20589_v7 }
 0x506   :  { %v15519_v44 = vpop.permute.xlu0 %3895  ;;  %v15527_v55 = vsel %vm590_vm1, %v941_v50, %v20580_v25  ;;  %20586 = vst [vmem:[#allocation4_spill] sm:$0xff] %v15543_v24  ;;  %v20587_v50 = vld [vmem:[#allocation9_spill] sm:$0xff]  ;;  %v976_v2 = vld [vmem:[#allocation2 + $0x300] sm:$0xff]  ;;  %v20591_v62 = vld [vmem:[#allocation12_spill] sm:$0xff] }
 0x507   :  { %v15517_v11 = vpop.permute.xlu1 %3897  ;;  %20578 = vst [vmem:[#allocation516_spill] sm:$0xff] %v15519_v44  ;;  %v20583_v44 = vld [vmem:[#allocation7_spill] sm:$0xff]  ;;  %v15547_v25 = vsel %vm590_vm1, %v944_v16, %v20587_v50  ;;  %v15561_v59 = vsel %vm590_vm1, %v957_v31, %v20591_v62  ;;  %v20593_v16 = vld [vmem:[#allocation13_spill] sm:$0xff] }
 0x508   :  { %20577 = vst [vmem:[#allocation515_spill] sm:$0xff] %v15517_v11  ;;  %v977_v11 = vld [vmem:[#allocation2 + $0x308] sm:$0xff]  ;;  %v15539_v12 = vsel %vm590_vm1, %v942_v46, %v20583_v44  ;;  %20588 = vst [vmem:[#allocation5_spill] sm:$0xff] %v15547_v25  ;;  %4239 = vrot.lane.b32.xlu0 %v1603_v43, %s13032_s30  ;;  %v20590_v46 = vld [vmem:[#allocation11_spill] sm:$0xff]  ;;  %v15565_v50 = vsel %vm590_vm1, %v954_v9, %v20593_v16 }
 0x509   :  { %20584 = vst [vmem:[#allocation3_spill] sm:$0xff] %v15539_v12  ;;  %4243 = vrot.lane.b32.xlu1 %v1605_v51, %s13032_s30  ;;  %v15557_v44 = vsel %vm590_vm1, %v948_v30, %v20590_v46  ;;  %20592 = vst [vmem:[#allocation6_spill] sm:$0xff] %v15561_v59  ;;  %v981_v25 = vld [vmem:[#allocation2 + $0x328] sm:$0x3]  ;;  %v1699_v51 = vld [vmem:[#allocation2 + $0x192] sm:$0x3] }
 0x50a   :  { %20594 = vst [vmem:[#allocation7_spill] sm:$0xff] %v15565_v50  ;;  %v1700_v24 = vld [vmem:[#allocation2 + $0x19a] sm:$0xff]  ;;  %v20597_v30 = vld [vmem:[#allocation16_spill] sm:$0xff]  ;;  %v20598_v31 = vld [vmem:[#allocation17_spill] sm:$0xff]  ;;  %v15585_v59 = vpop.permute.xlu0 %3899 }
 0x50b   :  { %v20595_v43 = vld [vmem:[#allocation14_spill] sm:$0xff]  ;;  %v20596_v8 = vld [vmem:[#allocation15_spill] sm:$0xff]  ;;  %v15577_v46 = vsel %vm590_vm1, %v969_v41, %v20597_v30  ;;  %v15581_v62 = vsel %vm590_vm1, %v966_v20, %v20598_v31  ;;  %v15583_v16 = vpop.permute.xlu1 %3901  ;;  %20600 = vst [vmem:[#allocation9_spill] sm:$0xff] %v15585_v59  ;;  %v20604_v30 = vld [vmem:[#allocation21_spill] sm:$0xff] }
 0x50c   :  { %v15569_v12 = vsel %vm590_vm1, %v963_v10, %v20595_v43  ;;  %v15573_v7 = vsel %vm590_vm1, %v960_v23, %v20596_v8  ;;  %v980_v9 = vld [vmem:[#allocation2 + $0x320] sm:$0xff]  ;;  %20599 = vst [vmem:[#allocation8_spill] sm:$0xff] %v15583_v16  ;;  %v20601_v50 = vld [vmem:[#allocation18_spill] sm:$0xff]  ;;  %v20603_v8 = vld [vmem:[#allocation20_spill] sm:$0xff]  ;;  %v15601_v20 = vsel %vm590_vm1, %v976_v2, %v20604_v30  ;;  %4625 = vrot.lane.b32.xlu0 %v1700_v24, %s13033_s6 }
 0x50d   :  { %v15589_v10 = vsel %vm590_vm1, %v975_v47, %v20601_v50  ;;  %v20602_v43 = vld [vmem:[#allocation19_spill] sm:$0xff]  ;;  %v15597_v41 = vsel %vm590_vm1, %v977_v11, %v20603_v8  ;;  %v20605_v31 = vld [vmem:[#allocation22_spill] sm:$0xff]  ;;  %v20607_v50 = vld [vmem:[#allocation24_spill] sm:$0xff]  ;;  %4623 = vrot.lane.b32.xlu1 %v1699_v51, %s13033_s6 }
 0x50e   :  { %v15593_v23 = vsel %vm590_vm1, %v972_v63, %v20602_v43  ;;  %v15605_v16 = vsel %vm590_vm1, %v979_v26, %v20605_v31  ;;  %v20606_v59 = vld [vmem:[#allocation23_spill] sm:$0xff]  ;;  %v15613_v63 = vsel %vm590_vm1, %v981_v25, %v20607_v50  ;;  %v20608_v11 = vld [vmem:[#allocation25_spill] sm:$0xff]  ;;  %v20609_v43 = vld [vmem:[#allocation26_spill] sm:$0xff] }
 0x50f   :  { %v15609_v47 = vsel %vm590_vm1, %v978_v54, %v20606_v59  ;;  %v15619_v2 = vsel %vm590_vm1, %v980_v9, %v20608_v11  ;;  %v15624_v26 = vsel %vm164_vm2, %v15391_v32, %v20609_v43  ;;  %v20610_v8 = vld [vmem:[#allocation27_spill] sm:$0xff]  ;;  %v20611_v25 = vld [vmem:[#allocation28_spill] sm:$0xff]  ;;  %v20612_v30 = vld [vmem:[#allocation29_spill] sm:$0xff]  ;;  %v15656_v43 = vpop.permute.xlu1 %3905 }
 0x510   :  { %v15629_v54 = vsel %vm164_vm2, %v15379_v34, %v20610_v8  ;;  %v15634_v59 = vsel %vm164_vm2, %v15383_v15, %v20611_v25  ;;  %v1607_v24 = vld [vmem:[#allocation2 + $0x1e1] sm:$0xff]  ;;  %v15639_v9 = vsel %vm164_vm2, %v15375_v19, %v20612_v30  ;;  %v20613_v31 = vld [vmem:[#allocation30_spill] sm:$0xff]  ;;  %20616 = vst [vmem:[#allocation10_spill] sm:$0xff] %v15656_v43  ;;  %v15658_v8 = vpop.permute.xlu0 %3903  ;;  %v20618_v19 = vld [vmem:[#allocation33_spill] sm:$0xff] }
 0x511   :  { %v1701_v51 = vld [vmem:[#allocation2 + $0x1a2] sm:$0xff]  ;;  %v15644_v32 = vsel %vm164_vm2, %v15395_v33, %v20613_v31  ;;  %20617 = vst [vmem:[#allocation11_spill] sm:$0xff] %v15658_v8  ;;  %v15663_v25 = vsel %vm164_vm2, %v15407_v28, %v20618_v19  ;;  %v20619_v33 = vld [vmem:[#allocation34_spill] sm:$0xff]  ;;  %4247 = vrot.lane.b32.xlu1 %v1607_v24, %s13032_s30 }
 0x512   :  { %v20614_v50 = vld [vmem:[#allocation31_spill] sm:$0xff]  ;;  %v20615_v11 = vld [vmem:[#allocation32_spill] sm:$0xff]  ;;  %v15668_v30 = vsel %vm164_vm2, %v15411_v37, %v20619_v33  ;;  %v20623_v19 = vld [vmem:[#allocation38_spill] sm:$0xff]  ;;  %4627 = vrot.lane.b32.xlu0 %v1701_v51, %s13033_s6 }
 0x513   :  { %v15649_v34 = vsel %vm164_vm2, %v15399_v36, %v20614_v50  ;;  %v15654_v15 = vsel %vm164_vm2, %v15403_v39, %v20615_v11  ;;  %v20620_v36 = vld [vmem:[#allocation35_spill] sm:$0xff]  ;;  %v20621_v39 = vld [vmem:[#allocation36_spill] sm:$0xff]  ;;  %v20622_v11 = vld [vmem:[#allocation37_spill] sm:$0xff]  ;;  %v15688_v37 = vsel %vm164_vm2, %v15429_v49, %v20623_v19 }
 0x514   :  { %v15673_v31 = vsel %vm164_vm2, %v15415_v40, %v20620_v36  ;;  %v15678_v50 = vsel %vm164_vm2, %v15421_v45, %v20621_v39  ;;  %v15683_v28 = vsel %vm164_vm2, %v15425_v48, %v20622_v11  ;;  %20624 = vst [vmem:[#allocation12_spill] sm:$0xff] %v15688_v37  ;;  %v20625_v33 = vld [vmem:[#allocation39_spill] sm:$0xff]  ;;  %v20627_v45 = vld [vmem:[#allocation40_spill] sm:$0xff]  ;;  %v20629_v48 = vld [vmem:[#allocation41_spill] sm:$0xff]  ;;  %v15739_v8 = vpop.permute.xlu0 %3907 }
 0x515   :  { %v15693_v40 = vsel %vm164_vm2, %v15433_v6, %v20625_v33  ;;  %v15700_v36 = vsel %vm164_vm2, %v15437_v52, %v20627_v45  ;;  %v15705_v39 = vsel %vm164_vm2, %v15441_v53, %v20629_v48  ;;  %v20631_v49 = vld [vmem:[#allocation42_spill] sm:$0xff]  ;;  %v20633_v6 = vld [vmem:[#allocation43_spill] sm:$0xff]  ;;  %v1608_v51 = vld [vmem:[#allocation2 + $0x1e9] sm:$0xff]  ;;  %20644 = vst [vmem:[#allocation23_spill] sm:$0xff] %v15739_v8 }
 0x516   :  { %20626 = vst [vmem:[#allocation13_spill] sm:$0xff] %v15693_v40  ;;  %20628 = vst [vmem:[#allocation14_spill] sm:$0xff] %v15700_v36  ;;  %v15710_v11 = vsel %vm164_vm2, %v15445_v56, %v20631_v49  ;;  %v15715_v24 = vsel %vm164_vm2, %v15449_v57, %v20633_v6  ;;  %v1606_v19 = vld [vmem:[#allocation2 + $0x1a9] sm:$0x3]  ;;  %v20637_v45 = vld [vmem:[#allocation45_spill] sm:$0xff]  ;;  %v15737_v6 = vpop.permute.xlu1 %3909  ;;  %4249 = vrot.lane.b32.xlu1 %v1608_v51, %s13032_s30 }
 0x517   :  { %20630 = vst [vmem:[#allocation15_spill] sm:$0xff] %v15705_v39  ;;  %20632 = vst [vmem:[#allocation16_spill] sm:$0xff] %v15710_v11  ;;  %v20635_v33 = vld [vmem:[#allocation44_spill] sm:$0xff]  ;;  %v15725_v53 = vsel %vm164_vm2, %v15461_v0, %v20637_v45  ;;  %v20639_v48 = vld [vmem:[#allocation46_spill] sm:$0xff]  ;;  %4245 = vrot.lane.b32.xlu0 %v1606_v19, %s13032_s30 }
 0x518   :  { %20634 = vst [vmem:[#allocation17_spill] sm:$0xff] %v15715_v24  ;;  %v15720_v52 = vsel %vm164_vm2, %v15457_v61, %v20635_v33  ;;  %20638 = vst [vmem:[#allocation19_spill] sm:$0xff] %v15725_v53  ;;  %v15730_v56 = vsel %vm164_vm2, %v15465_v1, %v20639_v48  ;;  %v20641_v49 = vld [vmem:[#allocation47_spill] sm:$0xff]  ;;  %v20645_v61 = vld [vmem:[#allocation48_spill] sm:$0xff] }
 0x519   :  { %20636 = vst [vmem:[#allocation18_spill] sm:$0xff] %v15720_v52  ;;  %20640 = vst [vmem:[#allocation20_spill] sm:$0xff] %v15730_v56  ;;  %v15735_v57 = vsel %vm164_vm2, %v15469_v38, %v20641_v49  ;;  %v15744_v33 = vsel %vm164_vm2, %v15473_v60, %v20645_v61  ;;  %v20647_v0 = vld [vmem:[#allocation49_spill] sm:$0xff]  ;;  %v20649_v1 = vld [vmem:[#allocation50_spill] sm:$0xff] }
 0x51a   :  { %20642 = vst [vmem:[#allocation21_spill] sm:$0xff] %v15735_v57  ;;  %20643 = vst [vmem:[#allocation22_spill] sm:$0xff] %v15737_v6  ;;  %v15749_v45 = vsel %vm164_vm2, %v15477_v4, %v20647_v0  ;;  %v15754_v48 = vsel %vm164_vm2, %v15481_v5, %v20649_v1  ;;  %v20651_v38 = vld [vmem:[#allocation51_spill] sm:$0xff]  ;;  %v20653_v6 = vld [vmem:[#allocation52_spill] sm:$0xff] }
 0x51b   :  { %20646 = vst [vmem:[#allocation24_spill] sm:$0xff] %v15744_v33  ;;  %20648 = vst [vmem:[#allocation25_spill] sm:$0xff] %v15749_v45  ;;  %v15759_v49 = vsel %vm164_vm2, %v15487_v13, %v20651_v38  ;;  %v15764_v60 = vsel %vm164_vm2, %v15491_v14, %v20653_v6  ;;  %v20655_v61 = vld [vmem:[#allocation53_spill] sm:$0xff]  ;;  %v12985_v0 = vld [vmem:[#allocation2 + $0x68] sm:$0xff] }
 0x51c   :  { %20650 = vst [vmem:[#allocation26_spill] sm:$0xff] %v15754_v48  ;;  %20652 = vst [vmem:[#allocation27_spill] sm:$0xff] %v15759_v49  ;;  %v15769_v4 = vsel %vm164_vm2, %v15495_v17, %v20655_v61  ;;  %v20657_v8 = vld [vmem:[#allocation56_spill] sm:$0xff]  ;;  %v20658_v13 = vld [vmem:[#allocation54_spill] sm:$0xff] }
 0x51d   :  { %20654 = vst [vmem:[#allocation28_spill] sm:$0xff] %v15764_v60  ;;  %20656 = vst [vmem:[#allocation29_spill] sm:$0xff] %v15769_v4  ;;  %v4836_v5 = vsel %vm590_vm1, %v12985_v0, %v20657_v8  ;;  %v15778_v1 = vsel %vm164_vm2, %v15499_v29, %v20658_v13  ;;  %v20660_v14 = vld [vmem:[#allocation55_spill] sm:$0xff]  ;;  %v20662_v38 = vld [vmem:[#allocation57_spill] sm:$0xff] }
 0x51e   :  { %20659 = vst [vmem:[#allocation30_spill] sm:$0xff] %v15778_v1  ;;  %v15783_v6 = vsel %vm164_vm2, %v15503_v58, %v20660_v14  ;;  %v12986_v17 = vld [vmem:[#allocation2 + $0x60] sm:$0xff]  ;;  %v20663_v43 = vld [vmem:[#allocation58_spill] sm:$0xff]  ;;  %v1702_v51 = vld [vmem:[#allocation2 + $0x1aa] sm:$0x3] }
 0x51f   :  { %20661 = vst [vmem:[#allocation31_spill] sm:$0xff] %v15783_v6  ;;  %v4835_v61 = vsel %vm590_vm1, %v12986_v17, %v20662_v38  ;;  %v15789_v8 = vsel %vm164_vm2, %v4836_v5, %v20663_v43  ;;  %v1703_v19 = vld [vmem:[#allocation2 + $0x1e2] sm:$0xff]  ;;  %v12987_v29 = vld [vmem:[#allocation2 + $0x78] sm:$0xff]  ;;  %v20668_v14 = vld [vmem:[#allocation61_spill] sm:$0xff]  ;;  %v15801_v43 = vpop.permute.xlu1 %3913  ;;  %v15803_v5 = vpop.permute.xlu0 %3911  ;;  %4629 = vrot.lane.b32.xlu1 %v1702_v51, %s13033_s6 }
 0x520   :  { %20664 = vst [vmem:[#allocation32_spill] sm:$0xff] %v15789_v8  ;;  %v20665_v0 = vld [vmem:[#allocation59_spill] sm:$0xff]  ;;  %v20667_v13 = vld [vmem:[#allocation60_spill] sm:$0xff]  ;;  %v12989_v60 = vld [vmem:[#allocation2 + $0x98] sm:$0xff]  ;;  %4631 = vrot.lane.b32.xlu0 %v1703_v19, %s13033_s6 }
 0x521   :  { %v15793_v4 = vsel %vm164_vm2, %v4835_v61, %v20665_v0  ;;  %v4838_v1 = vsel %vm590_vm1, %v12987_v29, %v20667_v13  ;;  %v12988_v58 = vld [vmem:[#allocation2 + $0x80] sm:$0xff]  ;;  %v20669_v17 = vld [vmem:[#allocation64_spill] sm:$0xff]  ;;  %20670 = vst [vmem:[#allocation34_spill] sm:$0xff] %v15801_v43  ;;  %20671 = vst [vmem:[#allocation35_spill] sm:$0xff] %v15803_v5 }
 0x522   :  { %20666 = vst [vmem:[#allocation33_spill] sm:$0xff] %v15793_v4  ;;  %v4839_v6 = vsel %vm590_vm1, %v12988_v58, %v20668_v14  ;;  %v4842_v38 = vsel %vm590_vm1, %v12989_v60, %v20669_v17  ;;  %v20672_v49 = vld [vmem:[#allocation62_spill] sm:$0xff]  ;;  %v20674_v0 = vld [vmem:[#allocation63_spill] sm:$0xff]  ;;  %v12990_v29 = vld [vmem:[#allocation2 + $0x90] sm:$0xff] }
 0x523   :  { %v15807_v61 = vsel %vm164_vm2, %v4838_v1, %v20672_v49  ;;  %v15811_v48 = vsel %vm164_vm2, %v4839_v6, %v20674_v0  ;;  %v20676_v13 = vld [vmem:[#allocation65_spill] sm:$0xff]  ;;  %v20677_v14 = vld [vmem:[#allocation66_spill] sm:$0xff]  ;;  %v20679_v60 = vld [vmem:[#allocation67_spill] sm:$0xff]  ;;  %v15853_v53 = vpop.permute.xlu1 %3917 }
 0x524   :  { %20673 = vst [vmem:[#allocation36_spill] sm:$0xff] %v15807_v61  ;;  %20675 = vst [vmem:[#allocation37_spill] sm:$0xff] %v15811_v48  ;;  %v4841_v58 = vsel %vm590_vm1, %v12990_v29, %v20676_v13  ;;  %v15817_v45 = vsel %vm164_vm2, %v4842_v38, %v20677_v14  ;;  %v12991_v43 = vld [vmem:[#allocation2 + $0xa8] sm:$0xff]  ;;  %v12992_v1 = vld [vmem:[#allocation2 + $0xb0] sm:$0xff] }
 0x525   :  { %20678 = vst [vmem:[#allocation38_spill] sm:$0xff] %v15817_v45  ;;  %v15821_v17 = vsel %vm164_vm2, %v4841_v58, %v20679_v60  ;;  %v20681_v5 = vld [vmem:[#allocation68_spill] sm:$0xff]  ;;  %v20682_v33 = vld [vmem:[#allocation69_spill] sm:$0xff]  ;;  %v20683_v0 = vld [vmem:[#allocation70_spill] sm:$0xff] }
 0x526   :  { %20680 = vst [vmem:[#allocation39_spill] sm:$0xff] %v15821_v17  ;;  %v4844_v49 = vsel %vm590_vm1, %v12991_v43, %v20681_v5  ;;  %v4845_v6 = vsel %vm590_vm1, %v12992_v1, %v20682_v33  ;;  %v20685_v29 = vld [vmem:[#allocation71_spill] sm:$0xff]  ;;  %v12993_v58 = vld [vmem:[#allocation2 + $0xc8] sm:$0xff]  ;;  %v20688_v60 = vld [vmem:[#allocation73_spill] sm:$0xff] }
 0x527   :  { %v15831_v38 = vsel %vm164_vm2, %v4844_v49, %v20683_v0  ;;  %v15835_v13 = vsel %vm164_vm2, %v4845_v6, %v20685_v29  ;;  %v20687_v14 = vld [vmem:[#allocation72_spill] sm:$0xff]  ;;  %v12994_v5 = vld [vmem:[#allocation2 + $0xc0] sm:$0xff]  ;;  %v20689_v56 = vld [vmem:[#allocation74_spill] sm:$0xff]  ;;  %20695 = vst [vmem:[#allocation44_spill] sm:$0xff] %v15853_v53 }
 0x528   :  { %20684 = vst [vmem:[#allocation40_spill] sm:$0xff] %v15831_v38  ;;  %20686 = vst [vmem:[#allocation41_spill] sm:$0xff] %v15835_v13  ;;  %v4848_v43 = vsel %vm590_vm1, %v12993_v58, %v20687_v14  ;;  %v4847_v33 = vsel %vm590_vm1, %v12994_v5, %v20688_v60  ;;  %v1610_v1 = vld [vmem:[#allocation2 + $0x1f9] sm:$0xff]  ;;  %v1704_v51 = vld [vmem:[#allocation2 + $0x1ea] sm:$0xff]  ;;  %v15855_v5 = vpop.permute.xlu0 %3915 }
 0x529   :  { %v15843_v19 = vsel %vm164_vm2, %v4848_v43, %v20689_v56  ;;  %v20691_v49 = vld [vmem:[#allocation75_spill] sm:$0xff]  ;;  %v12995_v6 = vld [vmem:[#allocation2 + $0xd8] sm:$0xff]  ;;  %v20693_v29 = vld [vmem:[#allocation76_spill] sm:$0xff]  ;;  %20696 = vst [vmem:[#allocation45_spill] sm:$0xff] %v15855_v5  ;;  %4253 = vrot.lane.b32.xlu1 %v1610_v1, %s13032_s30  ;;  %4633 = vrot.lane.b32.xlu0 %v1704_v51, %s13033_s6 }
 0x52a   :  { %20690 = vst [vmem:[#allocation42_spill] sm:$0xff] %v15843_v19  ;;  %v15847_v0 = vsel %vm164_vm2, %v4847_v33, %v20691_v49  ;;  %v4850_v57 = vsel %vm590_vm1, %v12995_v6, %v20693_v29  ;;  %v12996_v52 = vld [vmem:[#allocation2 + $0xe0] sm:$0xff]  ;;  %v20694_v58 = vld [vmem:[#allocation77_spill] sm:$0xff]  ;;  %v20697_v60 = vld [vmem:[#allocation78_spill] sm:$0xff] }
 0x52b   :  { %20692 = vst [vmem:[#allocation43_spill] sm:$0xff] %v15847_v0  ;;  %v4851_v14 = vsel %vm590_vm1, %v12996_v52, %v20694_v58  ;;  %v15859_v56 = vsel %vm164_vm2, %v4850_v57, %v20697_v60  ;;  %v20699_v43 = vld [vmem:[#allocation79_spill] sm:$0xff]  ;;  %v12997_v49 = vld [vmem:[#allocation2 + $0xf8] sm:$0xff]  ;;  %v20701_v11 = vld [vmem:[#allocation80_spill] sm:$0xff] }
 0x52c   :  { %20698 = vst [vmem:[#allocation46_spill] sm:$0xff] %v15859_v56  ;;  %v15863_v33 = vsel %vm164_vm2, %v4851_v14, %v20699_v43  ;;  %v4854_v6 = vsel %vm590_vm1, %v12997_v49, %v20701_v11  ;;  %v12998_v29 = vld [vmem:[#allocation2 + $0xf0] sm:$0xff]  ;;  %v20703_v58 = vld [vmem:[#allocation82_spill] sm:$0xff]  ;;  %v12999_v5 = vld [vmem:[#allocation2 + $0x108] sm:$0xff] }
 0x52d   :  { %20700 = vst [vmem:[#allocation47_spill] sm:$0xff] %v15863_v33  ;;  %v20702_v24 = vld [vmem:[#allocation81_spill] sm:$0xff]  ;;  %v15871_v53 = vsel %vm164_vm2, %v4854_v6, %v20703_v58  ;;  %v20705_v0 = vld [vmem:[#allocation84_spill] sm:$0xff]  ;;  %v20707_v11 = vld [vmem:[#allocation83_spill] sm:$0xff] }
 0x52e   :  { %v4853_v52 = vsel %vm590_vm1, %v12998_v29, %v20702_v24  ;;  %20704 = vst [vmem:[#allocation48_spill] sm:$0xff] %v15871_v53  ;;  %v4856_v57 = vsel %vm590_vm1, %v12999_v5, %v20705_v0  ;;  %v13000_v60 = vld [vmem:[#allocation2 + $0x110] sm:$0xff]  ;;  %v20709_v24 = vld [vmem:[#allocation86_spill] sm:$0xff]  ;;  %v20711_v6 = vld [vmem:[#allocation87_spill] sm:$0xff] }
 0x52f   :  { %v20706_v56 = vld [vmem:[#allocation85_spill] sm:$0xff]  ;;  %v15881_v43 = vsel %vm164_vm2, %v4853_v52, %v20707_v11  ;;  %v15885_v49 = vsel %vm164_vm2, %v4856_v57, %v20709_v24  ;;  %v13001_v0 = vld [vmem:[#allocation2 + $0x128] sm:$0xff]  ;;  %v1706_v1 = vld [vmem:[#allocation2 + $0x1fa] sm:$0xff] }
 0x530   :  { %v4857_v14 = vsel %vm590_vm1, %v13000_v60, %v20706_v56  ;;  %20708 = vst [vmem:[#allocation49_spill] sm:$0xff] %v15881_v43  ;;  %20710 = vst [vmem:[#allocation50_spill] sm:$0xff] %v15885_v49  ;;  %v20713_v5 = vld [vmem:[#allocation88_spill] sm:$0xff]  ;;  %v13002_v60 = vld [vmem:[#allocation2 + $0x120] sm:$0xff]  ;;  %v15903_v43 = vpop.permute.xlu1 %3921  ;;  %4637 = vrot.lane.b32.xlu0 %v1706_v1, %s13033_s6 }
 0x531   :  { %v15889_v29 = vsel %vm164_vm2, %v4857_v14, %v20711_v6  ;;  %v4860_v56 = vsel %vm590_vm1, %v13001_v0, %v20713_v5  ;;  %v1611_v58 = vld [vmem:[#allocation2 + $0x201] sm:$0xff]  ;;  %v20714_v51 = vld [vmem:[#allocation89_spill] sm:$0xff]  ;;  %v20715_v52 = vld [vmem:[#allocation90_spill] sm:$0xff]  ;;  %20719 = vst [vmem:[#allocation53_spill] sm:$0xff] %v15903_v43  ;;  %v15905_v0 = vpop.permute.xlu0 %3919 }
 0x532   :  { %20712 = vst [vmem:[#allocation51_spill] sm:$0xff] %v15889_v29  ;;  %v4859_v53 = vsel %vm590_vm1, %v13002_v60, %v20714_v51  ;;  %v15897_v11 = vsel %vm164_vm2, %v4860_v56, %v20715_v52  ;;  %v13003_v57 = vld [vmem:[#allocation2 + $0x138] sm:$0xff]  ;;  %v20717_v24 = vld [vmem:[#allocation92_spill] sm:$0xff]  ;;  %v13004_v14 = vld [vmem:[#allocation2 + $0x140] sm:$0xff]  ;;  %4255 = vrot.lane.b32.xlu1 %v1611_v58, %s13032_s30 }
 0x533   :  { %20716 = vst [vmem:[#allocation52_spill] sm:$0xff] %v15897_v11  ;;  %v4862_v49 = vsel %vm590_vm1, %v13003_v57, %v20717_v24  ;;  %v20718_v6 = vld [vmem:[#allocation93_spill] sm:$0xff]  ;;  %20720 = vst [vmem:[#allocation56_spill] sm:$0xff] %v15905_v0  ;;  %v20721_v5 = vld [vmem:[#allocation91_spill] sm:$0xff] }
 0x534   :  { %v4863_v29 = vsel %vm590_vm1, %v13004_v14, %v20718_v6  ;;  %v15909_v19 = vsel %vm164_vm2, %v4859_v53, %v20721_v5  ;;  %v20723_v60 = vld [vmem:[#allocation94_spill] sm:$0xff]  ;;  %v20725_v51 = vld [vmem:[#allocation95_spill] sm:$0xff]  ;;  %v20727_v24 = vld [vmem:[#allocation96_spill] sm:$0xff]  ;;  %v15947_v45 = vpop.permute.xlu1 %3925 }
 0x535   :  { %20722 = vst [vmem:[#allocation54_spill] sm:$0xff] %v15909_v19  ;;  %v15913_v56 = vsel %vm164_vm2, %v4862_v49, %v20723_v60  ;;  %v15917_v52 = vsel %vm164_vm2, %v4863_v29, %v20725_v51  ;;  %v13005_v57 = vld [vmem:[#allocation2 + $0x218] sm:$0xff]  ;;  %v13006_v6 = vld [vmem:[#allocation2 + $0x210] sm:$0xff]  ;;  %v13007_v11 = vld [vmem:[#allocation2 + $0x228] sm:$0xff] }
 0x536   :  { %20724 = vst [vmem:[#allocation55_spill] sm:$0xff] %v15913_v56  ;;  %20726 = vst [vmem:[#allocation57_spill] sm:$0xff] %v15917_v52  ;;  %v4884_v14 = vsel %vm590_vm1, %v13005_v57, %v20727_v24  ;;  %v20728_v43 = vld [vmem:[#allocation97_spill] sm:$0xff]  ;;  %v20729_v13 = vld [vmem:[#allocation98_spill] sm:$0xff] }
 0x537   :  { %v4883_v0 = vsel %vm590_vm1, %v13006_v6, %v20728_v43  ;;  %v4886_v53 = vsel %vm590_vm1, %v13007_v11, %v20729_v13  ;;  %v13008_v5 = vld [vmem:[#allocation2 + $0x230] sm:$0xff]  ;;  %v20730_v19 = vld [vmem:[#allocation99_spill] sm:$0xff]  ;;  %v13009_v29 = vld [vmem:[#allocation2 + $0x248] sm:$0xff]  ;;  %20739 = vst [vmem:[#allocation58_spill] sm:$0xff] %v15947_v45 }
 0x538   :  { %v15927_v49 = vsel %vm590_vm1, %v13008_v5, %v20730_v19  ;;  %v20731_v60 = vld [vmem:[#allocation100_spill] sm:$0xff]  ;;  %v13010_v57 = vld [vmem:[#allocation2 + $0x240] sm:$0xff]  ;;  %v20732_v24 = vld [vmem:[#allocation101_spill] sm:$0xff] }
 0x539   :  { %v4890_v51 = vsel %vm590_vm1, %v13009_v29, %v20731_v60  ;;  %v4889_v43 = vsel %vm590_vm1, %v13010_v57, %v20732_v24  ;;  %v13011_v6 = vld [vmem:[#allocation2 + $0x258] sm:$0xff]  ;;  %v13012_v11 = vld [vmem:[#allocation2 + $0x260] sm:$0xff]  ;;  %v1609_v58 = vld [vmem:[#allocation2 + $0x1f1] sm:$0x3] }
 0x53a   :  { %v20733_v52 = vld [vmem:[#allocation102_spill] sm:$0xff]  ;;  %v20734_v56 = vld [vmem:[#allocation103_spill] sm:$0xff]  ;;  %v20735_v1 = vld [vmem:[#allocation104_spill] sm:$0xff]  ;;  %4251 = vrot.lane.b32.xlu0 %v1609_v58, %s13032_s30 }
 0x53b   :  { %v4892_v13 = vsel %vm590_vm1, %v13011_v6, %v20733_v52  ;;  %v4893_v19 = vsel %vm590_vm1, %v13012_v11, %v20734_v56  ;;  %v1707_v5 = vld [vmem:[#allocation2 + $0x202] sm:$0xff]  ;;  %v13013_v36 = vld [vmem:[#allocation2 + $0x278] sm:$0xff]  ;;  %v13014_v38 = vld [vmem:[#allocation2 + $0x270] sm:$0xff]  ;;  %v15949_v56 = vpop.permute.xlu0 %3923 }
 0x53c   :  { %v4896_v39 = vsel %vm590_vm1, %v13013_v36, %v20735_v1  ;;  %v20736_v29 = vld [vmem:[#allocation105_spill] sm:$0xff]  ;;  %v13015_v17 = vld [vmem:[#allocation2 + $0x288] sm:$0xff]  ;;  %v20737_v57 = vld [vmem:[#allocation106_spill] sm:$0xff]  ;;  %20740 = vst [vmem:[#allocation59_spill] sm:$0xff] %v15949_v56  ;;  %4639 = vrot.lane.b32.xlu1 %v1707_v5, %s13033_s6 }
 0x53d   :  { %v4895_v60 = vsel %vm590_vm1, %v13014_v38, %v20736_v29  ;;  %v4898_v24 = vsel %vm590_vm1, %v13015_v17, %v20737_v57  ;;  %v13016_v33 = vld [vmem:[#allocation2 + $0x290] sm:$0xff]  ;;  %v20738_v52 = vld [vmem:[#allocation107_spill] sm:$0xff]  ;;  %v13017_v11 = vld [vmem:[#allocation2 + $0x2a8] sm:$0xff] }
 0x53e   :  { %v4899_v6 = vsel %vm590_vm1, %v13016_v33, %v20738_v52  ;;  %v20741_v48 = vld [vmem:[#allocation108_spill] sm:$0xff]  ;;  %v13018_v1 = vld [vmem:[#allocation2 + $0x2a0] sm:$0xff]  ;;  %v20742_v37 = vld [vmem:[#allocation109_spill] sm:$0xff] }
 0x53f   :  { %v4902_v36 = vsel %vm590_vm1, %v13017_v11, %v20741_v48  ;;  %v4901_v38 = vsel %vm590_vm1, %v13018_v1, %v20742_v37  ;;  %v13019_v29 = vld [vmem:[#allocation2 + $0x2b8] sm:$0xff]  ;;  %v13020_v57 = vld [vmem:[#allocation2 + $0x2c0] sm:$0xff]  ;;  %v20745_v52 = vld [vmem:[#allocation112_spill] sm:$0xff] }
 0x540   :  { %v20743_v40 = vld [vmem:[#allocation110_spill] sm:$0xff]  ;;  %v20744_v61 = vld [vmem:[#allocation111_spill] sm:$0xff]  ;;  %v15962_v56 = vsel %vm164_vm2, %v15507_v18, %v20745_v52  ;;  %v13021_v45 = vld [vmem:[#allocation2 + $0x2d0] sm:$0xff] }
 0x541   :  { %v4904_v17 = vsel %vm590_vm1, %v13019_v29, %v20743_v40  ;;  %v4905_v33 = vsel %vm590_vm1, %v13020_v57, %v20744_v61  ;;  %v20746_v4 = vld [vmem:[#allocation113_spill] sm:$0xff]  ;;  %v13022_v11 = vld [vmem:[#allocation2 + $0x2d8] sm:$0xff]  ;;  %v20748_v40 = vld [vmem:[#allocation115_spill] sm:$0xff] }
 0x542   :  { %v4907_v48 = vsel %vm590_vm1, %v13021_v45, %v20746_v4  ;;  %v20747_v8 = vld [vmem:[#allocation114_spill] sm:$0xff]  ;;  %v15973_v61 = vsel %vm164_vm2, %v15511_v21, %v20748_v40  ;;  %v13023_v1 = vld [vmem:[#allocation2 + $0x2e8] sm:$0xff]  ;;  %v13024_v57 = vld [vmem:[#allocation2 + $0x2f0] sm:$0xff] }
 0x543   :  { %v4908_v37 = vsel %vm590_vm1, %v13022_v11, %v20747_v8  ;;  %v20749_v18 = vld [vmem:[#allocation116_spill] sm:$0xff]  ;;  %v20750_v52 = vld [vmem:[#allocation117_spill] sm:$0xff]  ;;  %v20751_v4 = vld [vmem:[#allocation118_spill] sm:$0xff] }
 0x544   :  { %v4910_v29 = vsel %vm590_vm1, %v13023_v1, %v20749_v18  ;;  %v4911_v45 = vsel %vm590_vm1, %v13024_v57, %v20750_v52  ;;  %v15982_v8 = vsel %vm164_vm2, %v15515_v22, %v20751_v4  ;;  %v1705_v5 = vld [vmem:[#allocation2 + $0x1f2] sm:$0x3]  ;;  %v20752_v58 = vld [vmem:[#allocation119_spill] sm:$0xff]  ;;  %v20754_v21 = vld [vmem:[#allocation120_spill] sm:$0xff]  ;;  %v16004_v52 = vpop.permute.xlu1 %3929  ;;  %v16006_v4 = vpop.permute.xlu0 %3927 }
 0x545   :  { %v15987_v11 = vsel %vm164_vm2, %v15523_v3, %v20752_v58  ;;  %v15992_v40 = vsel %vm164_vm2, %v15527_v55, %v20754_v21  ;;  %v20756_v1 = vld [vmem:[#allocation121_spill] sm:$0xff]  ;;  %v20758_v57 = vld [vmem:[#allocation122_spill] sm:$0xff]  ;;  %20760 = vst [vmem:[#allocation63_spill] sm:$0xff] %v16004_v52  ;;  %20761 = vst [vmem:[#allocation65_spill] sm:$0xff] %v16006_v4  ;;  %4635 = vrot.lane.b32.xlu1 %v1705_v5, %s13033_s6 }
 0x546   :  { %20753 = vst [vmem:[#allocation60_spill] sm:$0xff] %v15987_v11  ;;  %20755 = vst [vmem:[#allocation61_spill] sm:$0xff] %v15992_v40  ;;  %v15997_v18 = vsel %vm164_vm2, %v15531_v42, %v20756_v1  ;;  %v16002_v22 = vsel %vm164_vm2, %v15535_v35, %v20758_v57  ;;  %v20762_v3 = vld [vmem:[#allocation123_spill] sm:$0xff]  ;;  %v20764_v55 = vld [vmem:[#allocation124_spill] sm:$0xff] }
 0x547   :  { %20757 = vst [vmem:[#allocation64_spill] sm:$0xff] %v15997_v18  ;;  %20759 = vst [vmem:[#allocation62_spill] sm:$0xff] %v16002_v22  ;;  %v20763_v58 = vld [vmem:[#allocation3_spill] sm:$0xff]  ;;  %v20765_v21 = vld [vmem:[#allocation4_spill] sm:$0xff] }
 0x548   :  { %v16011_v11 = vsel %vm164_vm2, %v20763_v58, %v20762_v3  ;;  %v16016_v40 = vsel %vm164_vm2, %v20765_v21, %v20764_v55  ;;  %v20766_v42 = vld [vmem:[#allocation125_spill] sm:$0xff]  ;;  %v20768_v35 = vld [vmem:[#allocation126_spill] sm:$0xff]  ;;  %v20769_v52 = vld [vmem:[#allocation127_spill] sm:$0xff] }
 0x549   :  { %v20767_v1 = vld [vmem:[#allocation5_spill] sm:$0xff]  ;;  %v16025_v57 = vsel %vm164_vm2, %v4884_v14, %v20768_v35  ;;  %v16029_v22 = vsel %vm164_vm2, %v4883_v0, %v20769_v52  ;;  %v20770_v3 = vld [vmem:[#allocation128_spill] sm:$0xff]  ;;  %v20772_v14 = vld [vmem:[#allocation130_spill] sm:$0xff] }
 0x54a   :  { %v16021_v18 = vsel %vm164_vm2, %v20767_v1, %v20766_v42  ;;  %v1613_v4 = vld [vmem:[#allocation2 + $0x211] sm:$0xff]  ;;  %v16033_v58 = vsel %vm164_vm2, %v4886_v53, %v20770_v3  ;;  %v16045_v42 = vsel %vm164_vm2, %v15553_v27, %v20772_v14  ;;  %v20773_v0 = vld [vmem:[#allocation131_spill] sm:$0xff]  ;;  %v20774_v53 = vld [vmem:[#allocation132_spill] sm:$0xff] }
 0x54b   :  { %v20771_v55 = vld [vmem:[#allocation129_spill] sm:$0xff]  ;;  %4259 = vrot.lane.b32.xlu0 %v1613_v4, %s13032_s30  ;;  %v16050_v52 = vsel %vm164_vm2, %v15927_v49, %v20773_v0  ;;  %v16054_v1 = vsel %vm164_vm2, %v4890_v51, %v20774_v53  ;;  %v20776_v5 = vld [vmem:[#allocation134_spill] sm:$0xff]  ;;  %v20778_v3 = vld [vmem:[#allocation135_spill] sm:$0xff] }
 0x54c   :  { %v16038_v21 = vsel %vm164_vm2, %v15557_v44, %v20771_v55  ;;  %v20775_v44 = vld [vmem:[#allocation133_spill] sm:$0xff]  ;;  %v16062_v4 = vsel %vm164_vm2, %v4892_v13, %v20776_v5  ;;  %v20779_v27 = vld [vmem:[#allocation7_spill] sm:$0xff]  ;;  %v20780_v14 = vld [vmem:[#allocation136_spill] sm:$0xff] }
 0x54d   :  { %v16058_v35 = vsel %vm164_vm2, %v4889_v43, %v20775_v44  ;;  %20777 = vst [vmem:[#allocation66_spill] sm:$0xff] %v16062_v4  ;;  %v16067_v55 = vsel %vm164_vm2, %v20779_v27, %v20778_v3  ;;  %v20781_v49 = vld [vmem:[#allocation6_spill] sm:$0xff]  ;;  %v20782_v51 = vld [vmem:[#allocation137_spill] sm:$0xff]  ;;  %v16078_v43 = vpop.permute.xlu1 %3933  ;;  %v16080_v44 = vpop.permute.xlu0 %3931  ;;  %v20786_v4 = vld [vmem:[#allocation139_spill] sm:$0xff] }
 0x54e   :  { %v16072_v0 = vsel %vm164_vm2, %v20781_v49, %v20780_v14  ;;  %v16076_v53 = vsel %vm164_vm2, %v4893_v19, %v20782_v51  ;;  %20783 = vst [vmem:[#allocation67_spill] sm:$0xff] %v16078_v43  ;;  %20784 = vst [vmem:[#allocation68_spill] sm:$0xff] %v16080_v44  ;;  %v20785_v13 = vld [vmem:[#allocation138_spill] sm:$0xff]  ;;  %v16088_v3 = vsel %vm164_vm2, %v4895_v60, %v20786_v4  ;;  %v20787_v27 = vld [vmem:[#allocation140_spill] sm:$0xff] }
 0x54f   :  { %v16084_v5 = vsel %vm164_vm2, %v4896_v39, %v20785_v13  ;;  %v16092_v14 = vsel %vm164_vm2, %v4898_v24, %v20787_v27  ;;  %v20788_v49 = vld [vmem:[#allocation141_spill] sm:$0xff]  ;;  %v1614_v51 = vld [vmem:[#allocation2 + $0x219] sm:$0xff]  ;;  %v20791_v4 = vld [vmem:[#allocation144_spill] sm:$0xff] }
 0x550   :  { %v16097_v19 = vsel %vm164_vm2, %v15573_v7, %v20788_v49  ;;  %v1709_v43 = vld [vmem:[#allocation2 + $0x212] sm:$0xff]  ;;  %v20790_v13 = vld [vmem:[#allocation143_spill] sm:$0xff]  ;;  %v16110_v24 = vsel %vm164_vm2, %v4902_v36, %v20791_v4  ;;  %4261 = vrot.lane.b32.xlu1 %v1614_v51, %s13032_s30  ;;  %v20797_v36 = vld [vmem:[#allocation148_spill] sm:$0xff] }
 0x551   :  { %v20789_v44 = vld [vmem:[#allocation142_spill] sm:$0xff]  ;;  %v16106_v60 = vsel %vm164_vm2, %v4899_v6, %v20790_v13  ;;  %4643 = vrot.lane.b32.xlu0 %v1709_v43, %s13033_s6  ;;  %v20792_v7 = vld [vmem:[#allocation145_spill] sm:$0xff]  ;;  %v16130_v13 = vsel %vm164_vm2, %v15577_v46, %v20797_v36  ;;  %v1612_v51 = vld [vmem:[#allocation2 + $0x209] sm:$0x3]  ;;  %v16150_v46 = vpop.permute.xlu0 %3935 }
 0x552   :  { %v16102_v39 = vsel %vm164_vm2, %v15569_v12, %v20789_v44  ;;  %v16116_v27 = vsel %vm164_vm2, %v4901_v38, %v20792_v7  ;;  %v20793_v49 = vld [vmem:[#allocation146_spill] sm:$0xff]  ;;  %v20795_v44 = vld [vmem:[#allocation147_spill] sm:$0xff]  ;;  %20798 = vst [vmem:[#allocation71_spill] sm:$0xff] %v16130_v13  ;;  %v20799_v43 = vld [vmem:[#allocation149_spill] sm:$0xff] }
 0x553   :  { %v16120_v12 = vsel %vm164_vm2, %v4904_v17, %v20793_v49  ;;  %v16125_v6 = vsel %vm164_vm2, %v15581_v62, %v20795_v44  ;;  %v16134_v4 = vsel %vm164_vm2, %v4905_v33, %v20799_v43  ;;  %v20801_v38 = vld [vmem:[#allocation150_spill] sm:$0xff]  ;;  %v20803_v17 = vld [vmem:[#allocation151_spill] sm:$0xff]  ;;  %v20805_v62 = vld [vmem:[#allocation152_spill] sm:$0xff]  ;;  %20808 = vst [vmem:[#allocation77_spill] sm:$0xff] %v16150_v46 }
 0x554   :  { %20794 = vst [vmem:[#allocation69_spill] sm:$0xff] %v16120_v12  ;;  %20796 = vst [vmem:[#allocation70_spill] sm:$0xff] %v16125_v6  ;;  %v16138_v7 = vsel %vm164_vm2, %v4908_v37, %v20801_v38  ;;  %v16142_v49 = vsel %vm164_vm2, %v4907_v48, %v20803_v17  ;;  %v16146_v44 = vsel %vm164_vm2, %v4910_v29, %v20805_v62  ;;  %v16148_v6 = vpop.permute.xlu1 %3937  ;;  %v20809_v36 = vld [vmem:[#allocation153_spill] sm:$0xff]  ;;  %v20811_v43 = vld [vmem:[#allocation154_spill] sm:$0xff] }
 0x555   :  { %20800 = vst [vmem:[#allocation72_spill] sm:$0xff] %v16134_v4  ;;  %20802 = vst [vmem:[#allocation73_spill] sm:$0xff] %v16138_v7  ;;  %v16155_v33 = vsel %vm164_vm2, %v15593_v23, %v20809_v36  ;;  %v16160_v37 = vsel %vm164_vm2, %v15589_v10, %v20811_v43  ;;  %v20813_v48 = vld [vmem:[#allocation155_spill] sm:$0xff]  ;;  %v20815_v29 = vld [vmem:[#allocation156_spill] sm:$0xff]  ;;  %4257 = vrot.lane.b32.xlu0 %v1612_v51, %s13032_s30 }
 0x556   :  { %20804 = vst [vmem:[#allocation74_spill] sm:$0xff] %v16142_v49  ;;  %20806 = vst [vmem:[#allocation75_spill] sm:$0xff] %v16146_v44  ;;  %v16164_v38 = vsel %vm164_vm2, %v4911_v45, %v20813_v48  ;;  %v16169_v17 = vsel %vm164_vm2, %v15597_v41, %v20815_v29  ;;  %v1710_v62 = vld [vmem:[#allocation2 + $0x21a] sm:$0xff]  ;;  %v20817_v46 = vld [vmem:[#allocation157_spill] sm:$0xff] }
 0x557   :  { %20807 = vst [vmem:[#allocation76_spill] sm:$0xff] %v16148_v6  ;;  %20810 = vst [vmem:[#allocation78_spill] sm:$0xff] %v16155_v33  ;;  %v16174_v23 = vsel %vm164_vm2, %v15601_v20, %v20817_v46  ;;  %v20819_v36 = vld [vmem:[#allocation158_spill] sm:$0xff]  ;;  %v20821_v43 = vld [vmem:[#allocation159_spill] sm:$0xff]  ;;  %4645 = vrot.lane.b32.xlu1 %v1710_v62, %s13033_s6 }
 0x558   :  { %20812 = vst [vmem:[#allocation79_spill] sm:$0xff] %v16160_v37  ;;  %20814 = vst [vmem:[#allocation80_spill] sm:$0xff] %v16164_v38  ;;  %v16179_v10 = vsel %vm164_vm2, %v15605_v16, %v20819_v36  ;;  %v16184_v45 = vsel %vm164_vm2, %v15609_v47, %v20821_v43  ;;  %v20823_v41 = vld [vmem:[#allocation160_spill] sm:$0xff]  ;;  %v20825_v20 = vld [vmem:[#allocation161_spill] sm:$0xff] }
 0x559   :  { %20816 = vst [vmem:[#allocation81_spill] sm:$0xff] %v16169_v17  ;;  %20818 = vst [vmem:[#allocation82_spill] sm:$0xff] %v16174_v23  ;;  %v16191_v48 = vsel %vm164_vm2, %v15613_v63, %v20823_v41  ;;  %v16196_v46 = vsel %vm164_vm2, %v15619_v2, %v20825_v20  ;;  %v20827_v16 = vld [vmem:[#allocation162_spill] sm:$0xff]  ;;  %v20829_v47 = vld [vmem:[#allocation163_spill] sm:$0xff] }
 0x55a   :  { %20820 = vst [vmem:[#allocation84_spill] sm:$0xff] %v16179_v10  ;;  %20822 = vst [vmem:[#allocation85_spill] sm:$0xff] %v16184_v45  ;;  %v16201_v29 = vsel %vm5015_vm4, %v15624_v26, %v20827_v16  ;;  %v16206_v62 = vsel %vm5015_vm4, %v15629_v54, %v20829_v47  ;;  %v1708_v51 = vld [vmem:[#allocation2 + $0x20a] sm:$0x3]  ;;  %v20833_v43 = vld [vmem:[#allocation165_spill] sm:$0xff]  ;;  %v16228_v16 = vpop.permute.xlu1 %3941  ;;  %v16230_v47 = vpop.permute.xlu0 %3939 }
 0x55b   :  { %20824 = vst [vmem:[#allocation83_spill] sm:$0xff] %v16191_v48  ;;  %20826 = vst [vmem:[#allocation86_spill] sm:$0xff] %v16196_v46  ;;  %v20831_v36 = vld [vmem:[#allocation164_spill] sm:$0xff]  ;;  %v16216_v2 = vsel %vm5015_vm4, %v15639_v9, %v20833_v43  ;;  %v20835_v41 = vld [vmem:[#allocation166_spill] sm:$0xff]  ;;  %4641 = vrot.lane.b32.xlu1 %v1708_v51, %s13033_s6 }
 0x55c   :  { %20828 = vst [vmem:[#allocation87_spill] sm:$0xff] %v16201_v29  ;;  %20830 = vst [vmem:[#allocation88_spill] sm:$0xff] %v16206_v62  ;;  %v16211_v63 = vsel %vm5015_vm4, %v15634_v59, %v20831_v36  ;;  %v16221_v26 = vsel %vm5015_vm4, %v15644_v32, %v20835_v41  ;;  %v20837_v20 = vld [vmem:[#allocation167_spill] sm:$0xff]  ;;  %v20841_v59 = vld [vmem:[#allocation168_spill] sm:$0xff] }
 0x55d   :  { %20832 = vst [vmem:[#allocation89_spill] sm:$0xff] %v16211_v63  ;;  %20834 = vst [vmem:[#allocation90_spill] sm:$0xff] %v16216_v2  ;;  %v16226_v54 = vsel %vm5015_vm4, %v15649_v34, %v20837_v20  ;;  %v16235_v36 = vsel %vm5015_vm4, %v15654_v15, %v20841_v59  ;;  %v20843_v9 = vld [vmem:[#allocation169_spill] sm:$0xff]  ;;  %v20845_v32 = vld [vmem:[#allocation170_spill] sm:$0xff] }
 0x55e   :  { %20836 = vst [vmem:[#allocation92_spill] sm:$0xff] %v16221_v26  ;;  %20838 = vst [vmem:[#allocation93_spill] sm:$0xff] %v16226_v54  ;;  %v16240_v43 = vsel %vm5015_vm4, %v15663_v25, %v20843_v9  ;;  %v16245_v41 = vsel %vm5015_vm4, %v15668_v30, %v20845_v32  ;;  %v20847_v34 = vld [vmem:[#allocation171_spill] sm:$0xff]  ;;  %v20851_v59 = vld [vmem:[#allocation173_spill] sm:$0xff] }
 0x55f   :  { %20839 = vst [vmem:[#allocation91_spill] sm:$0xff] %v16228_v16  ;;  %20840 = vst [vmem:[#allocation94_spill] sm:$0xff] %v16230_v47  ;;  %v16250_v20 = vsel %vm5015_vm4, %v15673_v31, %v20847_v34  ;;  %v1616_v47 = vld [vmem:[#allocation2 + $0x229] sm:$0xff]  ;;  %v16260_v25 = vsel %vm5015_vm4, %v15683_v28, %v20851_v59  ;;  %v20853_v9 = vld [vmem:[#allocation174_spill] sm:$0xff] }
 0x560   :  { %20842 = vst [vmem:[#allocation95_spill] sm:$0xff] %v16235_v36  ;;  %20844 = vst [vmem:[#allocation96_spill] sm:$0xff] %v16240_v43  ;;  %v20849_v16 = vld [vmem:[#allocation172_spill] sm:$0xff]  ;;  %4265 = vrot.lane.b32.xlu0 %v1616_v47, %s13032_s30  ;;  %v20856_v31 = vld [vmem:[#allocation175_spill] sm:$0xff] }
 0x561   :  { %20846 = vst [vmem:[#allocation97_spill] sm:$0xff] %v16245_v41  ;;  %20848 = vst [vmem:[#allocation98_spill] sm:$0xff] %v16250_v20  ;;  %v16255_v15 = vsel %vm5015_vm4, %v15678_v50, %v20849_v16  ;;  %v20854_v6 = vld [vmem:[#allocation32_spill] sm:$0xff]  ;;  %v20857_v32 = vld [vmem:[#allocation33_spill] sm:$0xff] }
 0x562   :  { %20850 = vst [vmem:[#allocation99_spill] sm:$0xff] %v16255_v15  ;;  %20852 = vst [vmem:[#allocation100_spill] sm:$0xff] %v16260_v25  ;;  %v16265_v30 = vsel %vm5015_vm4, %v20854_v6, %v20853_v9  ;;  %v16272_v34 = vsel %vm5015_vm4, %v20857_v32, %v20856_v31  ;;  %v20859_v50 = vld [vmem:[#allocation176_spill] sm:$0xff]  ;;  %v20862_v28 = vld [vmem:[#allocation177_spill] sm:$0xff] }
 0x563   :  { %20855 = vst [vmem:[#allocation101_spill] sm:$0xff] %v16265_v30  ;;  %20858 = vst [vmem:[#allocation102_spill] sm:$0xff] %v16272_v34  ;;  %v20860_v16 = vld [vmem:[#allocation36_spill] sm:$0xff]  ;;  %v20863_v59 = vld [vmem:[#allocation13_spill] sm:$0xff] }
 0x564   :  { %v16277_v15 = vsel %vm5015_vm4, %v20860_v16, %v20859_v50  ;;  %v16282_v25 = vsel %vm5015_vm4, %v20863_v59, %v20862_v28  ;;  %v20865_v6 = vld [vmem:[#allocation178_spill] sm:$0xff]  ;;  %v20866_v9 = vld [vmem:[#allocation12_spill] sm:$0xff]  ;;  %v1615_v47 = vld [vmem:[#allocation2 + $0x221] sm:$0x3]  ;;  %v4208_v59 = vpop.permute.xlu1 %4207 }
 0x565   :  { %20861 = vst [vmem:[#allocation103_spill] sm:$0xff] %v16277_v15  ;;  %20864 = vst [vmem:[#allocation104_spill] sm:$0xff] %v16282_v25  ;;  %v16287_v51 = vsel %vm5015_vm4, %v20866_v9, %v20865_v6  ;;  %v20868_v30 = vld [vmem:[#allocation179_spill] sm:$0xff]  ;;  %v20869_v20 = vld [vmem:[#allocation37_spill] sm:$0xff]  ;;  %v16302_v25 = vpop.permute.xlu0 %3943  ;;  %4263 = vrot.lane.b32.xlu1 %v1615_v47, %s13032_s30 }
 0x566   :  { %20867 = vst [vmem:[#allocation105_spill] sm:$0xff] %v16287_v51  ;;  %v16292_v31 = vsel %vm5015_vm4, %v20869_v20, %v20868_v30  ;;  %v20871_v32 = vld [vmem:[#allocation180_spill] sm:$0xff]  ;;  %v20872_v34 = vld [vmem:[#allocation38_spill] sm:$0xff]  ;;  %v20874_v16 = vld [vmem:[#allocation191_spill] sm:$0xff] }
 0x567   :  { %20870 = vst [vmem:[#allocation106_spill] sm:$0xff] %v16292_v31  ;;  %v16297_v50 = vsel %vm5015_vm4, %v20872_v34, %v20871_v32  ;;  %v20875_v15 = vld [vmem:[#allocation47_spill] sm:$0xff]  ;;  %20876 = vst [vmem:[#allocation108_spill] sm:$0xff] %v16302_v25  ;;  %v20877_v6 = vld [vmem:[#allocation181_spill] sm:$0xff] }
 0x568   :  { %20873 = vst [vmem:[#allocation107_spill] sm:$0xff] %v16297_v50  ;;  %v5044_v28 = vsel %vm5015_vm4, %v20875_v15, %v20874_v16  ;;  %v20878_v9 = vld [vmem:[#allocation39_spill] sm:$0xff]  ;;  %v1712_v34 = vld [vmem:[#allocation2 + $0x22a] sm:$0xff]  ;;  %v20881_v32 = vld [vmem:[#allocation182_spill] sm:$0xff] }
 0x569   :  { %v16307_v51 = vsel %vm5015_vm4, %v20878_v9, %v20877_v6  ;;  %v20880_v20 = vld [vmem:[#allocation287_spill] sm:$0xff]  ;;  %v20882_v50 = vld [vmem:[#allocation40_spill] sm:$0xff]  ;;  %4649 = vrot.lane.b32.xlu0 %v1712_v34, %s13033_s6  ;;  %v20889_v25 = vld [vmem:[#allocation14_spill] sm:$0xff] }
 0x56a   :  { %20879 = vst [vmem:[#allocation109_spill] sm:$0xff] %v16307_v51  ;;  %v5141_v30 = vsel %vm5112_vm5, %v5044_v28, %v20880_v20  ;;  %v16314_v31 = vsel %vm5015_vm4, %v20882_v50, %v20881_v32  ;;  %v20884_v15 = vld [vmem:[#allocation383_spill] sm:$0xff]  ;;  %v20888_v20 = vld [vmem:[#allocation184_spill] sm:$0xff]  ;;  %v20891_v50 = vld [vmem:[#allocation185_spill] sm:$0xff] }
 0x56b   :  { %20883 = vst [vmem:[#allocation110_spill] sm:$0xff] %v16314_v31  ;;  %v5238_v16 = vsel %vm5209_vm6, %v5141_v30, %v20884_v15  ;;  %v20885_v6 = vld [vmem:[#allocation183_spill] sm:$0xff]  ;;  %v16328_v51 = vsel %vm5015_vm4, %v20889_v25, %v20888_v20  ;;  %v20892_v32 = vld [vmem:[#allocation41_spill] sm:$0xff]  ;;  %v20895_v34 = vld [vmem:[#allocation186_spill] sm:$0xff] }
 0x56c   :  { %v20886_v9 = vld [vmem:[#allocation15_spill] sm:$0xff]  ;;  %20890 = vst [vmem:[#allocation112_spill] sm:$0xff] %v16328_v51  ;;  %v16333_v30 = vsel %vm5015_vm4, %v20892_v32, %v20891_v50  ;;  %v20896_v31 = vld [vmem:[#allocation42_spill] sm:$0xff]  ;;  %v20901_v25 = vld [vmem:[#allocation193_spill] sm:$0xff]  ;;  %v4592_v32 = vpop.permute.xlu1 %4591 }
 0x56d   :  { %v16323_v28 = vsel %vm5015_vm4, %v20886_v9, %v20885_v6  ;;  %20893 = vst [vmem:[#allocation113_spill] sm:$0xff] %v16333_v30  ;;  %v20894_v15 = vld [vmem:[#allocation479_spill] sm:$0xff]  ;;  %v16340_v41 = vsel %vm5015_vm4, %v20896_v31, %v20895_v34  ;;  %v20902_v20 = vld [vmem:[#allocation49_spill] sm:$0xff]  ;;  %v4212_v30 = vpop.permute.xlu0 %4211  ;;  %v20903_v43 = vld [vmem:[#allocation188_spill] sm:$0xff] }
 0x56e   :  { %20887 = vst [vmem:[#allocation111_spill] sm:$0xff] %v16323_v28  ;;  %v5335_v47 = vsel %vm5306_vm8, %v5238_v16, %v20894_v15  ;;  %20897 = vst [vmem:[#allocation114_spill] sm:$0xff] %v16340_v41  ;;  %v20898_v6 = vld [vmem:[#allocation187_spill] sm:$0xff]  ;;  %v5046_v51 = vsel %vm5015_vm4, %v20902_v20, %v20901_v25  ;;  %v20904_v16 = vld [vmem:[#allocation46_spill] sm:$0xff] }
 0x56f   :  { %v20899_v9 = vld [vmem:[#allocation43_spill] sm:$0xff]  ;;  %v5432_v50 = vsel %vm5403_vm7, %v5335_v47, %v4208_v59  ;;  %v16354_v15 = vsel %vm5015_vm4, %v20904_v16, %v20903_v43  ;;  %v20906_v31 = vld [vmem:[#allocation189_spill] sm:$0xff]  ;;  %v20911_v54 = vld [vmem:[#allocation510_spill] sm:$0xff] }
 0x570   :  { %v16345_v28 = vsel %vm5015_vm4, %v20899_v9, %v20898_v6  ;;  %20905 = vst [vmem:[#allocation116_spill] sm:$0xff] %v16354_v15  ;;  %v20907_v34 = vld [vmem:[#allocation17_spill] sm:$0xff]  ;;  %v1619_v25 = vld [vmem:[#allocation2 + $0x241] sm:$0xff]  ;;  %v20913_v43 = vld [vmem:[#allocation190_spill] sm:$0xff] }
 0x571   :  { %20900 = vst [vmem:[#allocation115_spill] sm:$0xff] %v16345_v28  ;;  %v16359_v41 = vsel %vm5015_vm4, %v20907_v34, %v20906_v31  ;;  %v20909_v6 = vld [vmem:[#allocation289_spill] sm:$0xff]  ;;  %v5529_v28 = vsel %vm5500_vm9, %v5432_v50, %v4592_v32  ;;  %4271 = vrot.lane.b32.xlu1 %v1619_v25, %s13032_s30  ;;  %v20914_v16 = vld [vmem:[#allocation16_spill] sm:$0xff]  ;;  %v20917_v32 = vld [vmem:[#allocation194_spill] sm:$0xff] }
 0x572   :  { %20908 = vst [vmem:[#allocation117_spill] sm:$0xff] %v16359_v41  ;;  %v5143_v9 = vsel %vm5112_vm5, %v5046_v51, %v20909_v6  ;;  %v1617_v20 = vld [vmem:[#allocation2 + $0x231] sm:$0xff]  ;;  %v6090_v36 = vcombine.high %v5529_v28, %v5529_v28  ;;  %v16367_v26 = vrot.slane %v5529_v28, %v20911_v54  ;;  %v5045_v31 = vsel %vm5015_vm4, %v20914_v16, %v20913_v43  ;;  %v20915_v51 = vld [vmem:[#allocation192_spill] sm:$0xff]  ;;  %v1711_v41 = vld [vmem:[#allocation2 + $0x222] sm:$0x3] }
 0x573   :  { %v20910_v59 = vld [vmem:[#allocation385_spill] sm:$0xff]  ;;  %4267 = vrot.lane.b32.xlu0 %v1617_v20, %s13032_s30  ;;  %v20916_v34 = vld [vmem:[#allocation48_spill] sm:$0xff]  ;;  %v20918_v6 = vld [vmem:[#allocation50_spill] sm:$0xff] }
 0x574   :  { %v5240_v47 = vsel %vm5209_vm6, %v5143_v9, %v20910_v59  ;;  %20912 = vst [vmem:[#allocation118_spill] sm:$0xff] %v16367_v26  ;;  %v5047_v50 = vsel %vm5015_vm4, %v20916_v34, %v20915_v51  ;;  %v5049_v9 = vsel %vm5015_vm4, %v20918_v6, %v20917_v32  ;;  %v20919_v59 = vld [vmem:[#allocation481_spill] sm:$0xff]  ;;  %v20920_v15 = vld [vmem:[#allocation288_spill] sm:$0xff]  ;;  %v16385_v20 = vrot.slane %v6090_v36, %v20911_v54  ;;  %v4214_v51 = vpop.permute.xlu1 %4213  ;;  %v4596_v34 = vpop.permute.xlu0 %4595  ;;  %v20921_v2 = vld [vmem:[#allocation195_spill] sm:$0xff] }
 0x575   :  { %v5337_v28 = vsel %vm5306_vm8, %v5240_v47, %v20919_v59  ;;  %v5144_v25 = vsel %vm5112_vm5, %v5047_v50, %v20920_v15  ;;  %v6105_v43 = vcombine.high %v16367_v26, %v16367_v26  ;;  %v20922_v63 = vld [vmem:[#allocation19_spill] sm:$0xff]  ;;  %v20923_v47 = vld [vmem:[#allocation196_spill] sm:$0xff]  ;;  %v20924_v6 = vld [vmem:[#allocation18_spill] sm:$0xff] }
 0x576   :  { %v5434_v16 = vsel %vm5403_vm7, %v5337_v28, %v4212_v30  ;;  %v16393_v32 = vsel %vm5015_vm4, %v20922_v63, %v20921_v2  ;;  %v16398_v59 = vsel %vm5015_vm4, %v20924_v6, %v20923_v47  ;;  %v20925_v15 = vld [vmem:[#allocation384_spill] sm:$0xff]  ;;  %v1713_v26 = vld [vmem:[#allocation2 + $0x232] sm:$0xff]  ;;  %v20928_v2 = vld [vmem:[#allocation51_spill] sm:$0xff] }
 0x577   :  { %v5241_v36 = vsel %vm5209_vm6, %v5144_v25, %v20925_v15  ;;  %v5531_v50 = vsel %vm5500_vm9, %v5434_v16, %v4596_v34  ;;  %v16404_v30 = vcombine.low %v6105_v43, %v16385_v20  ;;  %4651 = vrot.lane.b32.xlu1 %v1713_v26, %s13033_s6  ;;  %4647 = vrot.lane.b32.xlu0 %v1711_v41, %s13033_s6  ;;  %v20927_v63 = vld [vmem:[#allocation197_spill] sm:$0xff]  ;;  %v20929_v6 = vld [vmem:[#allocation198_spill] sm:$0xff]  ;;  %v20930_v25 = vld [vmem:[#allocation52_spill] sm:$0xff] }
 0x578   :  { %v6114_v28 = vcombine.high %v5531_v50, %v5531_v50  ;;  %v6121_v62 = vrot.slane %v5531_v50, %v20911_v54  ;;  %v16412_v47 = vsel %vm5015_vm4, %v20928_v2, %v20927_v63  ;;  %v16417_v16 = vsel %vm5015_vm4, %v20930_v25, %v20929_v6  ;;  %v20931_v34 = vld [vmem:[#allocation199_spill] sm:$0xff]  ;;  %v20932_v43 = vld [vmem:[#allocation54_spill] sm:$0xff]  ;;  %v20933_v50 = vld [vmem:[#allocation480_spill] sm:$0xff] }
 0x579   :  { %20926 = vst [vmem:[#allocation119_spill] sm:$0xff] %v16404_v30  ;;  %v16422_v15 = vsel %vm5015_vm4, %v20932_v43, %v20931_v34  ;;  %v5338_v26 = vsel %vm5306_vm8, %v5241_v36, %v20933_v50  ;;  %v1618_v30 = vld [vmem:[#allocation2 + $0x239] sm:$0x3]  ;;  %v20934_v41 = vld [vmem:[#allocation200_spill] sm:$0xff]  ;;  %v20935_v29 = vld [vmem:[#allocation55_spill] sm:$0xff]  ;;  %v4598_v34 = vpop.permute.xlu1 %4597  ;;  %v4210_v43 = vpop.permute.xlu0 %4209 }
 0x57a   :  { %v16429_v46 = vsel %vm5015_vm4, %v20935_v29, %v20934_v41  ;;  %v20936_v63 = vld [vmem:[#allocation201_spill] sm:$0xff]  ;;  %v5435_v6 = vsel %vm5403_vm7, %v5338_v26, %v4214_v51  ;;  %v6128_v25 = vrot.slane %v6114_v28, %v20911_v54  ;;  %v20938_v45 = vld [vmem:[#allocation202_spill] sm:$0xff]  ;;  %v20939_v10 = vld [vmem:[#allocation20_spill] sm:$0xff] }
 0x57b   :  { %v20937_v2 = vld [vmem:[#allocation21_spill] sm:$0xff]  ;;  %v16441_v36 = vsel %vm5015_vm4, %v20939_v10, %v20938_v45  ;;  %v20940_v50 = vld [vmem:[#allocation203_spill] sm:$0xff]  ;;  %v20942_v41 = vld [vmem:[#allocation286_spill] sm:$0xff]  ;;  %v6129_v10 = vcombine.high %v6121_v62, %v6121_v62  ;;  %4269 = vrot.lane.b32.xlu1 %v1618_v30, %s13032_s30 }
 0x57c   :  { %v16434_v48 = vsel %vm5015_vm4, %v20937_v2, %v20936_v63  ;;  %v20941_v23 = vld [vmem:[#allocation57_spill] sm:$0xff]  ;;  %v5142_v63 = vsel %vm5112_vm5, %v5045_v31, %v20942_v41  ;;  %v5532_v2 = vsel %vm5500_vm9, %v5435_v6, %v4598_v34  ;;  %v20943_v51 = vld [vmem:[#allocation204_spill] sm:$0xff]  ;;  %v20945_v17 = vld [vmem:[#allocation382_spill] sm:$0xff] }
 0x57d   :  { %v16446_v29 = vsel %vm5015_vm4, %v20941_v23, %v20940_v50  ;;  %v20944_v26 = vld [vmem:[#allocation24_spill] sm:$0xff]  ;;  %v5239_v38 = vsel %vm5209_vm6, %v5142_v63, %v20945_v17  ;;  %v6138_v45 = vrot.slane %v5532_v2, %v20911_v54  ;;  %v20946_v50 = vld [vmem:[#allocation205_spill] sm:$0xff]  ;;  %v20948_v6 = vld [vmem:[#allocation206_spill] sm:$0xff]  ;;  %v6130_v17 = vcombine.high %v6128_v25, %v6128_v25 }
 0x57e   :  { %v16454_v28 = vsel %vm5015_vm4, %v20944_v26, %v20943_v51  ;;  %v1715_v23 = vld [vmem:[#allocation2 + $0x242] sm:$0xff]  ;;  %v20947_v37 = vld [vmem:[#allocation25_spill] sm:$0xff]  ;;  %v20949_v34 = vld [vmem:[#allocation26_spill] sm:$0xff]  ;;  %v6131_v13 = vcombine.high %v5532_v2, %v5532_v2 }
 0x57f   :  { %v16463_v31 = vsel %vm5015_vm4, %v20947_v37, %v20946_v50  ;;  %v16468_v41 = vsel %vm5015_vm4, %v20949_v34, %v20948_v6  ;;  %v20951_v51 = vld [vmem:[#allocation478_spill] sm:$0xff]  ;;  %4655 = vrot.lane.b32.xlu0 %v1715_v23, %s13033_s6  ;;  %v20952_v33 = vld [vmem:[#allocation207_spill] sm:$0xff]  ;;  %v6146_v50 = vcombine.high %v6138_v45, %v6138_v45  ;;  %v4594_v6 = vpop.permute.xlu1 %4593  ;;  %v4218_v34 = vpop.permute.xlu0 %4217  ;;  %v20957_v4 = vld [vmem:[#allocation28_spill] sm:$0xff] }
 0x580   :  { %20950 = vst [vmem:[#allocation120_spill] sm:$0xff] %v16468_v41  ;;  %v5336_v26 = vsel %vm5306_vm8, %v5239_v38, %v20951_v51  ;;  %v1714_v63 = vld [vmem:[#allocation2 + $0x23a] sm:$0x3]  ;;  %v20953_v30 = vld [vmem:[#allocation27_spill] sm:$0xff]  ;;  %v20956_v41 = vld [vmem:[#allocation208_spill] sm:$0xff] }
 0x581   :  { %v16476_v44 = vsel %vm5015_vm4, %v20953_v30, %v20952_v33  ;;  %v20955_v49 = vld [vmem:[#allocation290_spill] sm:$0xff]  ;;  %v5433_v7 = vsel %vm5403_vm7, %v5336_v26, %v4210_v43  ;;  %v16484_v38 = vsel %vm5015_vm4, %v20957_v4, %v20956_v41  ;;  %v7408_v30 = vcombine.low %v6121_v62, %v6129_v10  ;;  %4653 = vrot.lane.b32.xlu1 %v1714_v63, %s13033_s6  ;;  %v1620_v43 = vld [vmem:[#allocation2 + $0x249] sm:$0xff] }
 0x582   :  { %20954 = vst [vmem:[#allocation121_spill] sm:$0xff] %v16476_v44  ;;  %v5146_v37 = vsel %vm5112_vm5, %v5049_v9, %v20955_v49  ;;  %v20958_v23 = vld [vmem:[#allocation386_spill] sm:$0xff]  ;;  %v5530_v33 = vsel %vm5500_vm9, %v5433_v7, %v4594_v6  ;;  %v7425_v44 = vcombine.low %v6138_v45, %v6146_v50  ;;  %v6106_v49 = vcombine.high %v16385_v20, %v16385_v20  ;;  %v20959_v26 = vld [vmem:[#allocation209_spill] sm:$0xff]  ;;  %v20964_v20 = vld [vmem:[#allocation211_spill] sm:$0xff] }
 0x583   :  { %v5243_v51 = vsel %vm5209_vm6, %v5146_v37, %v20958_v23  ;;  %v6113_v9 = vrot.slane %v5530_v33, %v20911_v54  ;;  %v20960_v12 = vld [vmem:[#allocation29_spill] sm:$0xff]  ;;  %v20961_v41 = vld [vmem:[#allocation210_spill] sm:$0xff]  ;;  %v7424_v10 = vcombine.low %v6128_v25, %v6130_v17  ;;  %4273 = vrot.lane.b32.xlu0 %v1620_v43, %s13032_s30  ;;  %v20965_v45 = vld [vmem:[#allocation31_spill] sm:$0xff]  ;;  %v4216_v33 = vpop.permute.xlu1 %4215  ;;  %v6145_v17 = vrot.slane %v6131_v13, %v20911_v54 }
 0x584   :  { %v16496_v4 = vsel %vm5015_vm4, %v20960_v12, %v20959_v26  ;;  %v20962_v37 = vld [vmem:[#allocation30_spill] sm:$0xff]  ;;  %v16509_v63 = vsel %vm5015_vm4, %v20965_v45, %v20964_v20  ;;  %v20966_v50 = vld [vmem:[#allocation212_spill] sm:$0xff]  ;;  %v4602_v26 = vpop.permute.xlu0 %4601  ;;  %v20971_v13 = vld [vmem:[#allocation215_spill] sm:$0xff] }
 0x585   :  { %v16501_v2 = vsel %vm5015_vm4, %v20962_v37, %v20961_v41  ;;  %v20963_v7 = vld [vmem:[#allocation482_spill] sm:$0xff]  ;;  %v16514_v12 = vsel %vm5015_vm4, %v15962_v56, %v20966_v50  ;;  %v7407_v6 = vcombine.low %v6106_v49, %v6113_v9  ;;  %v20967_v41 = vld [vmem:[#allocation213_spill] sm:$0xff]  ;;  %v7422_v9 = vrot.slane %v7408_v30, %v20911_v54 }
 0x586   :  { %v5340_v62 = vsel %vm5306_vm8, %v5243_v51, %v20963_v7  ;;  %v16520_v25 = vsel %vm5015_vm4, %v15973_v61, %v20967_v41  ;;  %v7439_v51 = vrot.slane %v7425_v44, %v20911_v54  ;;  %v1622_v37 = vld [vmem:[#allocation2 + $0x259] sm:$0xff]  ;;  %v20972_v44 = vld [vmem:[#allocation60_spill] sm:$0xff]  ;;  %v7432_v45 = vrot.slane %v7424_v10, %v20911_v54  ;;  %v1621_v50 = vld [vmem:[#allocation2 + $0x251] sm:$0x3] }
 0x587   :  { %v5437_v23 = vsel %vm5403_vm7, %v5340_v62, %v4218_v34  ;;  %20968 = vst [vmem:[#allocation122_spill] sm:$0xff] %v16520_v25  ;;  %4277 = vrot.lane.b32.xlu1 %v1622_v37, %s13032_s30  ;;  %v1716_v34 = vld [vmem:[#allocation2 + $0x24a] sm:$0xff]  ;;  %v7415_v49 = vrot.slane %v7407_v6, %v20911_v54  ;;  %v20969_v62 = vld [vmem:[#allocation214_spill] sm:$0xff]  ;;  %v16537_v20 = vsel %vm5015_vm4, %v20972_v44, %v20971_v13  ;;  %v4224_v37 = vpop.permute.xlu1 %4223 }
 0x588   :  { %v5534_v43 = vsel %vm5500_vm9, %v5437_v23, %v4602_v26  ;;  %v16532_v61 = vsel %vm5015_vm4, %v15982_v8, %v20969_v62  ;;  %20973 = vst [vmem:[#allocation3_spill] sm:$0xff] %v16537_v20  ;;  %4657 = vrot.lane.b32.xlu0 %v1716_v34, %s13033_s6  ;;  %v20974_v23 = vld [vmem:[#allocation216_spill] sm:$0xff]  ;;  %v20975_v6 = vld [vmem:[#allocation61_spill] sm:$0xff]  ;;  %v20977_v26 = vld [vmem:[#allocation291_spill] sm:$0xff]  ;;  %v4220_v62 = vpop.permute.xlu0 %4219  ;;  %v6147_v13 = vcombine.high %v6145_v17, %v6145_v17 }
 0x589   :  { %v6155_v7 = vcombine.high %v5534_v43, %v5534_v43  ;;  %v6162_v56 = vrot.slane %v5534_v43, %v20911_v54  ;;  %20970 = vst [vmem:[#allocation123_spill] sm:$0xff] %v16532_v61  ;;  %v16544_v30 = vsel %vm5015_vm4, %v20975_v6, %v20974_v23  ;;  %v5145_v8 = vsel %vm5112_vm5, %v16393_v32, %v20977_v26  ;;  %v20978_v41 = vld [vmem:[#allocation293_spill] sm:$0xff]  ;;  %v20980_v20 = vld [vmem:[#allocation64_spill] sm:$0xff]  ;;  %v20981_v6 = vld [vmem:[#allocation387_spill] sm:$0xff] }
 0x58a   :  { %20976 = vst [vmem:[#allocation124_spill] sm:$0xff] %v16544_v30  ;;  %v5147_v43 = vsel %vm5112_vm5, %v16412_v47, %v20978_v41  ;;  %v7423_v10 = vcombine.low %v7415_v49, %v7422_v9  ;;  %v7440_v61 = vcombine.low %v7432_v45, %v7439_v51  ;;  %v20979_v25 = vld [vmem:[#allocation217_spill] sm:$0xff]  ;;  %v5242_v32 = vsel %vm5209_vm6, %v5145_v8, %v20981_v6  ;;  %v1718_v47 = vld [vmem:[#allocation2 + $0x25a] sm:$0xff] }
 0x58b   :  { %v6169_v34 = vrot.slane %v6155_v7, %v20911_v54  ;;  %v6170_v44 = vcombine.high %v6162_v56, %v6162_v56  ;;  %v16556_v23 = vsel %vm5015_vm4, %v20980_v20, %v20979_v25  ;;  %v20982_v26 = vld [vmem:[#allocation389_spill] sm:$0xff]  ;;  %4275 = vrot.lane.b32.xlu1 %v1621_v50, %s13032_s30  ;;  %v20983_v49 = vld [vmem:[#allocation295_spill] sm:$0xff]  ;;  %v20986_v8 = vld [vmem:[#allocation218_spill] sm:$0xff] }
 0x58c   :  { %v5244_v30 = vsel %vm5209_vm6, %v5147_v43, %v20982_v26  ;;  %12857 = vmatprep.mubr.msk.f32.mxu1 %vm8311_vm10, %v7423_v10  ;;  %v5149_v51 = vsel %vm5112_vm5, %v16422_v15, %v20983_v49  ;;  %v20984_v7 = vld [vmem:[#allocation483_spill] sm:$0xff]  ;;  %v20985_v25 = vld [vmem:[#allocation485_spill] sm:$0xff]  ;;  %4661 = vrot.lane.b32.xlu0 %v1718_v47, %s13033_s6  ;;  %v20987_v50 = vld [vmem:[#allocation62_spill] sm:$0xff]  ;;  %v4600_v26 = vpop.permute.xlu0 %4599 }
 0x58d   :  { %v5339_v9 = vsel %vm5306_vm8, %v5242_v32, %v20984_v7  ;;  %v5341_v20 = vsel %vm5306_vm8, %v5244_v30, %v20985_v25  ;;  %12858 = vmatmul.mubr.msk.f32.vlgmr.msra.gmra.mrb[0].mxu1 %vm8311_vm10, %v7440_v61  ;;  %v1717_v45 = vld [vmem:[#allocation2 + $0x252] sm:$0x3]  ;;  %v16576_v41 = vsel %vm5015_vm4, %v20987_v50, %v20986_v8  ;;  %v20988_v43 = vld [vmem:[#allocation391_spill] sm:$0xff]  ;;  %v4604_v32 = vpop.permute.xlu1 %4603  ;;  %v7441_v30 = vcombine.low %v6145_v17, %v6147_v13  ;;  %v20990_v17 = vld [vmem:[#allocation220_spill] sm:$0xff] }
 0x58e   :  { %v5246_v10 = vsel %vm5209_vm6, %v5149_v51, %v20988_v43  ;;  %v5436_v15 = vsel %vm5403_vm7, %v5339_v9, %v4216_v33  ;;  %v5438_v6 = vsel %vm5403_vm7, %v5341_v20, %v4220_v62  ;;  %v7458_v49 = vcombine.low %v6170_v44, %v6169_v34  ;;  %v1623_v51 = vld [vmem:[#allocation2 + $0x261] sm:$0xff] }
 0x58f   :  { %v5535_v47 = vsel %vm5500_vm9, %v5438_v6, %v4604_v32  ;;  %v5533_v61 = vsel %vm5500_vm9, %v5436_v15, %v4600_v26  ;;  %v6171_v7 = vcombine.high %v6169_v34, %v6169_v34  ;;  %4659 = vrot.lane.b32.xlu1 %v1717_v45, %s13033_s6  ;;  %v20989_v33 = vld [vmem:[#allocation219_spill] sm:$0xff]  ;;  %v16595_v13 = vsel %vm5015_vm4, %v16016_v40, %v20990_v17  ;;  %v20991_v44 = vld [vmem:[#allocation292_spill] sm:$0xff] }
 0x590   :  { %v6172_v25 = vcombine.high %v5535_v47, %v5535_v47  ;;  %v6179_v8 = vrot.slane %v5535_v47, %v20911_v54  ;;  %v6154_v50 = vrot.slane %v5533_v61, %v20911_v54  ;;  %v16590_v62 = vsel %vm5015_vm4, %v16011_v11, %v20989_v33  ;;  %v20992_v9 = vld [vmem:[#allocation487_spill] sm:$0xff]  ;;  %4279 = vrot.lane.b32.xlu0 %v1623_v51, %s13032_s30  ;;  %v20993_v45 = vld [vmem:[#allocation388_spill] sm:$0xff]  ;;  %v4608_v26 = vpop.permute.xlu0 %4607  ;;  %v1625_v33 = vld [vmem:[#allocation2 + $0x271] sm:$0xff] }
 0x591   :  { %v5148_v34 = vsel %vm5112_vm5, %v16398_v59, %v20991_v44  ;;  %v5343_v20 = vsel %vm5306_vm8, %v5246_v10, %v20992_v9  ;;  %v4222_v32 = vpop.permute.xlu1 %4221  ;;  %v7449_v40 = vrot.slane %v7441_v30, %v20911_v54  ;;  %v7466_v10 = vrot.slane %v7458_v49, %v20911_v54 }
 0x592   :  { %v5245_v43 = vsel %vm5209_vm6, %v5148_v34, %v20993_v45  ;;  %v5440_v11 = vsel %vm5403_vm7, %v5343_v20, %v4224_v37  ;;  %v7459_v15 = vcombine.low %v6171_v7, %v6179_v8  ;;  %v7442_v6 = vcombine.low %v6154_v50, %v6162_v56  ;;  %v1719_v56 = vld [vmem:[#allocation2 + $0x262] sm:$0xff]  ;;  %v20994_v37 = vld [vmem:[#allocation221_spill] sm:$0xff]  ;;  %v20995_v7 = vld [vmem:[#allocation294_spill] sm:$0xff] }
 0x593   :  { %v6186_v47 = vrot.slane %v6172_v25, %v20911_v54  ;;  %v6187_v61 = vcombine.high %v6179_v8, %v6179_v8  ;;  %v5537_v59 = vsel %vm5500_vm9, %v5440_v11, %v4608_v26  ;;  %4283 = vrot.lane.b32.xlu1 %v1625_v33, %s13032_s30  ;;  %v16616_v30 = vsel %vm5015_vm4, %v16021_v18, %v20994_v37  ;;  %v20996_v8 = vld [vmem:[#allocation484_spill] sm:$0xff]  ;;  %v1559_v11 = vld [vmem:[#allocation2 + $0x31] sm:$0xff] }
 0x594   :  { %v7473_v51 = vrot.slane %v7459_v15, %v20911_v54  ;;  %v7456_v17 = vrot.slane %v7442_v6, %v20911_v54  ;;  %v6196_v44 = vcombine.high %v5537_v59, %v5537_v59  ;;  %v5150_v25 = vsel %vm5112_vm5, %v16417_v16, %v20995_v7  ;;  %4663 = vrot.lane.b32.xlu0 %v1719_v56, %s13033_s6  ;;  %v4226_v45 = vpop.permute.xlu0 %4225  ;;  %v20997_v6 = vld [vmem:[#allocation390_spill] sm:$0xff] }
 0x595   :  { %v5342_v49 = vsel %vm5306_vm8, %v5245_v43, %v20996_v8  ;;  %v6203_v50 = vrot.slane %v5537_v59, %v20911_v54  ;;  %v4606_v20 = vpop.permute.xlu1 %4605  ;;  %v5247_v26 = vsel %vm5209_vm6, %v5150_v25, %v20997_v6  ;;  %v7475_v16 = vcombine.low %v6187_v61, %v6186_v47  ;;  %v1721_v37 = vld [vmem:[#allocation2 + $0x272] sm:$0xff] }
 0x596   :  { %v5439_v34 = vsel %vm5403_vm7, %v5342_v49, %v4222_v32  ;;  %v6210_v9 = vrot.slane %v6196_v44, %v20911_v54  ;;  %v7457_v18 = vcombine.low %v7449_v40, %v7456_v17  ;;  %v7474_v15 = vcombine.low %v7466_v10, %v7473_v51  ;;  %v20998_v32 = vld [vmem:[#allocation296_spill] sm:$0xff]  ;;  %v20999_v10 = vld [vmem:[#allocation486_spill] sm:$0xff] }
 0x597   :  { %v6211_v33 = vcombine.high %v6203_v50, %v6203_v50  ;;  %v5536_v43 = vsel %vm5500_vm9, %v5439_v34, %v4606_v20  ;;  %v6188_v7 = vcombine.high %v6186_v47, %v6186_v47  ;;  %4667 = vrot.lane.b32.xlu1 %v1721_v37, %s13033_s6  ;;  %v5152_v40 = vsel %vm5112_vm5, %v16429_v46, %v20998_v32  ;;  %v1624_v17 = vld [vmem:[#allocation2 + $0x269] sm:$0x3] }
 0x598   :  { %v6212_v59 = vcombine.high %v6210_v9, %v6210_v9  ;;  %v6195_v56 = vrot.slane %v5536_v43, %v20911_v54  ;;  %12860 = vmatprep.mubr.msk.f32.mxu1 %vm8311_vm10, %v7457_v18  ;;  %v5344_v51 = vsel %vm5306_vm8, %v5247_v26, %v20999_v10  ;;  %4151 = vrot.lane.b32.xlu0 %v1559_v11, %s13032_s30  ;;  %v21000_v47 = vld [vmem:[#allocation392_spill] sm:$0xff]  ;;  %v4610_v20 = vpop.permute.xlu0 %4609  ;;  %v1560_v18 = vld [vmem:[#allocation2 + $0x39] sm:$0xff] }
 0x599   :  { %v7492_v61 = vcombine.low %v6203_v50, %v6211_v33  ;;  %12861 = vmatmul.mubr.msk.f32.gmra.mrb[2].mxu1 %vm8311_vm10, %v7474_v15  ;;  %v5249_v44 = vsel %vm5209_vm6, %v5152_v40, %v21000_v47  ;;  %v5441_v49 = vsel %vm5403_vm7, %v5344_v51, %v4226_v45  ;;  %v4230_v34 = vpop.permute.xlu1 %4229  ;;  %v21001_v46 = vld [vmem:[#allocation488_spill] sm:$0xff]  ;;  %v7483_v50 = vrot.slane %v7475_v16, %v20911_v54  ;;  %v21002_v45 = vld [vmem:[#allocation222_spill] sm:$0xff] }
 0x59a   :  { %v7493_v25 = vcombine.low %v6210_v9, %v6212_v59  ;;  %v7476_v8 = vcombine.low %v6188_v7, %v6195_v56  ;;  %v5346_v6 = vsel %vm5306_vm8, %v5249_v44, %v21001_v46  ;;  %v5538_v15 = vsel %vm5500_vm9, %v5441_v49, %v4610_v20  ;;  %v21003_v59 = vld [vmem:[#allocation223_spill] sm:$0xff]  ;;  %v21004_v7 = vld [vmem:[#allocation297_spill] sm:$0xff]  ;;  %v21005_v44 = vld [vmem:[#allocation224_spill] sm:$0xff] }
 0x59b   :  { %v7500_v11 = vrot.slane %v7492_v61, %v20911_v54  ;;  %v6213_v9 = vcombine.high %v5538_v15, %v5538_v15  ;;  %v6220_v43 = vrot.slane %v5538_v15, %v20911_v54  ;;  %4281 = vrot.lane.b32.xlu1 %v1624_v17, %s13032_s30  ;;  %v16655_v37 = vsel %vm5015_vm4, %v16025_v57, %v21002_v45  ;;  %v1655_v40 = vld [vmem:[#allocation2 + $0x32] sm:$0xff] }
 0x59c   :  { %v7507_v26 = vrot.slane %v7493_v25, %v20911_v54  ;;  %v7490_v33 = vrot.slane %v7476_v8, %v20911_v54  ;;  %v16660_v16 = vsel %vm5015_vm4, %v16029_v22, %v21003_v59  ;;  %v5151_v56 = vsel %vm5112_vm5, %v16434_v48, %v21004_v7  ;;  %4153 = vrot.lane.b32.xlu0 %v1560_v18, %s13032_s30  ;;  %v4614_v57 = vpop.permute.xlu0 %4613  ;;  %v21006_v25 = vld [vmem:[#allocation225_spill] sm:$0xff] }
 0x59d   :  { %v5443_v32 = vsel %vm5403_vm7, %v5346_v6, %v4230_v34  ;;  %v6227_v10 = vrot.slane %v6213_v9, %v20911_v54  ;;  %v6228_v51 = vcombine.high %v6220_v43, %v6220_v43  ;;  %v4228_v61 = vpop.permute.xlu1 %4227  ;;  %v16671_v22 = vsel %vm5015_vm4, %v16033_v58, %v21005_v44  ;;  %v21007_v8 = vld [vmem:[#allocation393_spill] sm:$0xff]  ;;  %v21008_v58 = vld [vmem:[#allocation226_spill] sm:$0xff]  ;;  %v1720_v9 = vld [vmem:[#allocation2 + $0x26a] sm:$0x3] }
 0x59e   :  { %v7491_v17 = vcombine.low %v7483_v50, %v7490_v33  ;;  %v7508_v47 = vcombine.low %v7500_v11, %v7507_v26  ;;  %v16676_v48 = vsel %vm5015_vm4, %v16038_v21, %v21006_v25  ;;  %v5248_v49 = vsel %vm5209_vm6, %v5151_v56, %v21007_v8  ;;  %v1626_v50 = vld [vmem:[#allocation2 + $0x279] sm:$0xff]  ;;  %v21010_v26 = vld [vmem:[#allocation489_spill] sm:$0xff] }
 0x59f   :  { %v5540_v34 = vsel %vm5500_vm9, %v5443_v32, %v4614_v57  ;;  %v6229_v20 = vcombine.high %v6227_v10, %v6227_v10  ;;  %v7509_v18 = vcombine.low %v6220_v43, %v6228_v51  ;;  %4535 = vrot.lane.b32.xlu1 %v1655_v40, %s13033_s6  ;;  %v16686_v11 = vsel %vm5015_vm4, %v16045_v42, %v21008_v58  ;;  %v21009_v21 = vld [vmem:[#allocation299_spill] sm:$0xff]  ;;  %v21012_v51 = vld [vmem:[#allocation228_spill] sm:$0xff] }
 0x5a0   :  { %v6237_v46 = vcombine.high %v5540_v34, %v5540_v34  ;;  %v6244_v6 = vrot.slane %v5540_v34, %v20911_v54  ;;  %v5153_v15 = vsel %vm5112_vm5, %v16446_v29, %v21009_v21  ;;  %v5345_v33 = vsel %vm5306_vm8, %v5248_v49, %v21010_v26  ;;  %4285 = vrot.lane.b32.xlu0 %v1626_v50, %s13032_s30  ;;  %v4232_v56 = vpop.permute.xlu0 %4231  ;;  %v1656_v32 = vld [vmem:[#allocation2 + $0x3a] sm:$0xff]  ;;  %v21019_v21 = vld [vmem:[#allocation397_spill] sm:$0xff] }
 0x5a1   :  { %12863 = vmatprep.mubr.msk.f32.mxu1 %vm8311_vm10, %v7491_v17  ;;  %v7510_v43 = vcombine.low %v6227_v10, %v6229_v20  ;;  %v5442_v45 = vsel %vm5403_vm7, %v5345_v33, %v4228_v61  ;;  %v4612_v42 = vpop.permute.xlu1 %4611  ;;  %v21011_v29 = vld [vmem:[#allocation227_spill] sm:$0xff]  ;;  %v16706_v57 = vsel %vm5015_vm4, %v16054_v1, %v21012_v51  ;;  %v21015_v1 = vld [vmem:[#allocation230_spill] sm:$0xff]  ;;  %v1628_v51 = vld [vmem:[#allocation2 + $0x289] sm:$0xff] }
 0x5a2   :  { %v6251_v59 = vrot.slane %v6237_v46, %v20911_v54  ;;  %v6252_v7 = vcombine.high %v6244_v6, %v6244_v6  ;;  %12864 = vmatmul.mubr.msk.f32.gmra.mrb[4].mxu1 %vm8311_vm10, %v7508_v47  ;;  %v16701_v40 = vsel %vm5015_vm4, %v16050_v52, %v21011_v29  ;;  %v21013_v10 = vld [vmem:[#allocation395_spill] sm:$0xff]  ;;  %v5539_v17 = vsel %vm5500_vm9, %v5442_v45, %v4612_v42  ;;  %v21014_v52 = vld [vmem:[#allocation229_spill] sm:$0xff]  ;;  %v21016_v34 = vld [vmem:[#allocation66_spill] sm:$0xff] }
 0x5a3   :  { %v5250_v61 = vsel %vm5209_vm6, %v5153_v15, %v21013_v10  ;;  %v7517_v47 = vrot.slane %v7509_v18, %v20911_v54  ;;  %v7524_v44 = vrot.slane %v7510_v43, %v20911_v54  ;;  %v6236_v8 = vrot.slane %v5539_v17, %v20911_v54  ;;  %4665 = vrot.lane.b32.xlu1 %v1720_v9, %s13033_s6  ;;  %v21017_v46 = vld [vmem:[#allocation301_spill] sm:$0xff]  ;;  %v21018_v50 = vld [vmem:[#allocation491_spill] sm:$0xff] }
 0x5a4   :  { %v7527_v25 = vcombine.low %v6252_v7, %v6251_v59  ;;  %v16718_v49 = vsel %vm5015_vm4, %v16058_v35, %v21014_v52  ;;  %v16723_v20 = vsel %vm5015_vm4, %v21016_v34, %v21015_v1  ;;  %v5155_v18 = vsel %vm5112_vm5, %v16463_v31, %v21017_v46  ;;  %4537 = vrot.lane.b32.xlu0 %v1656_v32, %s13033_s6  ;;  %v4616_v9 = vpop.permute.xlu0 %4615  ;;  %v21020_v45 = vld [vmem:[#allocation493_spill] sm:$0xff]  ;;  %v1627_v52 = vld [vmem:[#allocation2 + $0x281] sm:$0x3] }
 0x5a5   :  { %v5347_v58 = vsel %vm5306_vm8, %v5250_v61, %v21018_v50  ;;  %v5252_v15 = vsel %vm5209_vm6, %v5155_v18, %v21019_v21  ;;  %v7526_v26 = vcombine.low %v6236_v8, %v6244_v6  ;;  %v4236_v33 = vpop.permute.xlu1 %4235  ;;  %v7525_v43 = vcombine.low %v7517_v47, %v7524_v44  ;;  %v1722_v6 = vld [vmem:[#allocation2 + $0x27a] sm:$0xff]  ;;  %v21022_v47 = vld [vmem:[#allocation232_spill] sm:$0xff]  ;;  %v21023_v44 = vld [vmem:[#allocation233_spill] sm:$0xff] }
 0x5a6   :  { %v5444_v35 = vsel %vm5403_vm7, %v5347_v58, %v4232_v56  ;;  %v5349_v7 = vsel %vm5306_vm8, %v5252_v15, %v21020_v45  ;;  %v7541_v42 = vrot.slane %v7527_v25, %v20911_v54  ;;  %v6253_v31 = vcombine.high %v6251_v59, %v6251_v59  ;;  %v21021_v56 = vld [vmem:[#allocation231_spill] sm:$0xff]  ;;  %v1562_v50 = vld [vmem:[#allocation2 + $0x49] sm:$0xff] }
 0x5a7   :  { %v5541_v29 = vsel %vm5500_vm9, %v5444_v35, %v4616_v9  ;;  %v7534_v32 = vrot.slane %v7526_v26, %v20911_v54  ;;  %4289 = vrot.lane.b32.xlu1 %v1628_v51, %s13032_s30  ;;  %12866 = vmatprep.mubr.msk.f32.mxu1 %vm8311_vm10, %v7525_v43  ;;  %v16745_v17 = vsel %vm5015_vm4, %v16067_v55, %v21021_v56  ;;  %v21026_v26 = vld [vmem:[#allocation298_spill] sm:$0xff] }
 0x5a8   :  { %v6254_v10 = vcombine.high %v5541_v29, %v5541_v29  ;;  %v6261_v61 = vrot.slane %v5541_v29, %v20911_v54  ;;  %v16750_v59 = vsel %vm5015_vm4, %v16072_v0, %v21022_v47  ;;  %v16755_v25 = vsel %vm5015_vm4, %v16076_v53, %v21023_v44  ;;  %4669 = vrot.lane.b32.xlu0 %v1722_v6, %s13033_s6  ;;  %v4620_v18 = vpop.permute.xlu0 %4619  ;;  %v21024_v0 = vld [vmem:[#allocation234_spill] sm:$0xff]  ;;  %v21025_v53 = vld [vmem:[#allocation235_spill] sm:$0xff]  ;;  %v21031_v47 = vld [vmem:[#allocation237_spill] sm:$0xff] }
 0x5a9   :  { %v5446_v8 = vsel %vm5403_vm7, %v5349_v7, %v4236_v33  ;;  %v4234_v46 = vpop.permute.xlu1 %4233  ;;  %v7542_v58 = vcombine.low %v7534_v32, %v7541_v42  ;;  %v16763_v21 = vsel %vm5015_vm4, %v16084_v5, %v21024_v0  ;;  %v16768_v15 = vsel %vm5015_vm4, %v16088_v3, %v21025_v53  ;;  %v21027_v9 = vld [vmem:[#allocation394_spill] sm:$0xff]  ;;  %v21028_v5 = vld [vmem:[#allocation236_spill] sm:$0xff] }
 0x5aa   :  { %v6268_v1 = vrot.slane %v6254_v10, %v20911_v54  ;;  %v6269_v34 = vcombine.high %v6261_v61, %v6261_v61  ;;  %v7543_v55 = vcombine.low %v6253_v31, %v6261_v61  ;;  %v5154_v35 = vsel %vm5112_vm5, %v16441_v36, %v21026_v26  ;;  %v21029_v31 = vld [vmem:[#allocation300_spill] sm:$0xff]  ;;  %v21030_v29 = vld [vmem:[#allocation490_spill] sm:$0xff]  ;;  %v21034_v26 = vld [vmem:[#allocation239_spill] sm:$0xff] }
 0x5ab   :  { %v5543_v33 = vsel %vm5500_vm9, %v5446_v8, %v4620_v18  ;;  %v5251_v43 = vsel %vm5209_vm6, %v5154_v35, %v21027_v9  ;;  %4287 = vrot.lane.b32.xlu1 %v1627_v52, %s13032_s30  ;;  %v16781_v3 = vsel %vm5015_vm4, %v16092_v14, %v21028_v5  ;;  %v5156_v36 = vsel %vm5112_vm5, %v16454_v28, %v21029_v31  ;;  %v21032_v44 = vld [vmem:[#allocation396_spill] sm:$0xff]  ;;  %v21033_v53 = vld [vmem:[#allocation238_spill] sm:$0xff]  ;;  %v21039_v5 = vld [vmem:[#allocation69_spill] sm:$0xff] }
 0x5ac   :  { %v7544_v45 = vcombine.low %v6269_v34, %v6268_v1  ;;  %v6278_v7 = vcombine.high %v5543_v33, %v5543_v33  ;;  %v6285_v42 = vrot.slane %v5543_v33, %v20911_v54  ;;  %v5348_v51 = vsel %vm5306_vm8, %v5251_v43, %v21030_v29  ;;  %4157 = vrot.lane.b32.xlu0 %v1562_v50, %s13032_s30  ;;  %v4238_v56 = vpop.permute.xlu0 %4237  ;;  %v21035_v33 = vld [vmem:[#allocation240_spill] sm:$0xff] }
 0x5ad   :  { %12867 = vmatmul.mubr.msk.f32.gmra.mrb[6].mxu1 %vm8311_vm10, %v7542_v58  ;;  %v7551_v32 = vrot.slane %v7543_v55, %v20911_v54  ;;  %v5445_v61 = vsel %vm5403_vm7, %v5348_v51, %v4234_v46  ;;  %v4618_v14 = vpop.permute.xlu1 %4617  ;;  %v16796_v28 = vsel %vm5015_vm4, %v16097_v19, %v21031_v47  ;;  %v5253_v8 = vsel %vm5209_vm6, %v5156_v36, %v21032_v44  ;;  %v1724_v55 = vld [vmem:[#allocation2 + $0x28a] sm:$0xff] }
 0x5ae   :  { %v7558_v10 = vrot.slane %v7544_v45, %v20911_v54  ;;  %v6293_v6 = vcombine.high %v6285_v42, %v6285_v42  ;;  %v6292_v52 = vrot.slane %v6278_v7, %v20911_v54  ;;  %v5542_v34 = vsel %vm5500_vm9, %v5445_v61, %v4618_v14  ;;  %v1629_v58 = vld [vmem:[#allocation2 + $0x291] sm:$0xff]  ;;  %v21036_v9 = vld [vmem:[#allocation492_spill] sm:$0xff]  ;;  %v1723_v45 = vld [vmem:[#allocation2 + $0x282] sm:$0x3] }
 0x5af   :  { %v6270_v50 = vcombine.high %v6268_v1, %v6268_v1  ;;  %v6277_v46 = vrot.slane %v5542_v34, %v20911_v54  ;;  %4673 = vrot.lane.b32.xlu1 %v1724_v55, %s13033_s6  ;;  %v16807_v19 = vsel %vm5015_vm4, %v16102_v39, %v21033_v53  ;;  %v16812_v35 = vsel %vm5015_vm4, %v16106_v60, %v21034_v26  ;;  %v21037_v7 = vld [vmem:[#allocation241_spill] sm:$0xff] }
 0x5b0   :  { %v7561_v18 = vcombine.low %v6285_v42, %v6293_v6  ;;  %v7559_v0 = vcombine.low %v7551_v32, %v7558_v10  ;;  %v16817_v1 = vsel %vm5015_vm4, %v16110_v24, %v21035_v33  ;;  %v5350_v43 = vsel %vm5306_vm8, %v5253_v8, %v21036_v9  ;;  %4291 = vrot.lane.b32.xlu0 %v1629_v58, %s13032_s30  ;;  %v21038_v42 = vld [vmem:[#allocation242_spill] sm:$0xff]  ;;  %v4622_v29 = vpop.permute.xlu0 %4621  ;;  %v1658_v51 = vld [vmem:[#allocation2 + $0x4a] sm:$0xff]  ;;  %v21040_v32 = vld [vmem:[#allocation243_spill] sm:$0xff] }
 0x5b1   :  { %v16825_v39 = vsel %vm5015_vm4, %v16116_v27, %v21037_v7  ;;  %v16830_v60 = vsel %vm5015_vm4, %v21039_v5, %v21038_v42  ;;  %v7560_v31 = vcombine.low %v6270_v50, %v6277_v46  ;;  %v5447_v24 = vsel %vm5403_vm7, %v5350_v43, %v4238_v56  ;;  %v4242_v36 = vpop.permute.xlu1 %4241  ;;  %v21041_v10 = vld [vmem:[#allocation70_spill] sm:$0xff]  ;;  %v21042_v27 = vld [vmem:[#allocation244_spill] sm:$0xff]  ;;  %v21043_v6 = vld [vmem:[#allocation71_spill] sm:$0xff] }
 0x5b2   :  { %12869 = vmatprep.mubr.msk.f32.mxu1 %vm8311_vm10, %v7559_v0  ;;  %v16837_v61 = vsel %vm5015_vm4, %v21041_v10, %v21040_v32  ;;  %v16842_v14 = vsel %vm5015_vm4, %v21043_v6, %v21042_v27  ;;  %v6294_v47 = vcombine.high %v6292_v52, %v6292_v52  ;;  %v5544_v44 = vsel %vm5500_vm9, %v5447_v24, %v4622_v29  ;;  %v21044_v50 = vld [vmem:[#allocation245_spill] sm:$0xff]  ;;  %v21045_v46 = vld [vmem:[#allocation72_spill] sm:$0xff]  ;;  %v21046_v0 = vld [vmem:[#allocation246_spill] sm:$0xff] }
 0x5b3   :  { %v7575_v56 = vrot.slane %v7561_v18, %v20911_v54  ;;  %v7568_v8 = vrot.slane %v7560_v31, %v20911_v54  ;;  %v6295_v34 = vcombine.high %v5544_v44, %v5544_v44  ;;  %v6302_v55 = vrot.slane %v5544_v44, %v20911_v54  ;;  %4671 = vrot.lane.b32.xlu1 %v1723_v45, %s13033_s6  ;;  %v21047_v53 = vld [vmem:[#allocation73_spill] sm:$0xff]  ;;  %v21048_v33 = vld [vmem:[#allocation247_spill] sm:$0xff]  ;;  %v21049_v9 = vld [vmem:[#allocation74_spill] sm:$0xff] }
 0x5b4   :  { %v16852_v58 = vsel %vm5015_vm4, %v21045_v46, %v21044_v50  ;;  %v16857_v26 = vsel %vm5015_vm4, %v21047_v53, %v21046_v0  ;;  %v16862_v18 = vsel %vm5015_vm4, %v21049_v9, %v21048_v33  ;;  %v21050_v43 = vld [vmem:[#allocation248_spill] sm:$0xff]  ;;  %v21051_v7 = vld [vmem:[#allocation75_spill] sm:$0xff]  ;;  %4541 = vrot.lane.b32.xlu0 %v1658_v51, %s13033_s6  ;;  %v1563_v45 = vld [vmem:[#allocation2 + $0x51] sm:$0xff]  ;;  %v4240_v27 = vpop.permute.xlu0 %4239 }
 0x5b5   :  { %v16867_v42 = vsel %vm5015_vm4, %v21051_v7, %v21050_v43  ;;  %v21052_v5 = vld [vmem:[#allocation302_spill] sm:$0xff]  ;;  %v21053_v31 = vld [vmem:[#allocation120_spill] sm:$0xff]  ;;  %v6309_v29 = vrot.slane %v6295_v34, %v20911_v54  ;;  %v6310_v32 = vcombine.high %v6302_v55, %v6302_v55  ;;  %v4244_v10 = vpop.permute.xlu1 %4243  ;;  %v7576_v6 = vcombine.low %v7568_v8, %v7575_v56  ;;  %v21054_v44 = vld [vmem:[#allocation249_spill] sm:$0xff] }
 0x5b6   :  { %v5158_v24 = vsel %vm5112_vm5, %v21053_v31, %v21052_v5  ;;  %v21055_v50 = vld [vmem:[#allocation78_spill] sm:$0xff]  ;;  %v21056_v0 = vld [vmem:[#allocation303_spill] sm:$0xff]  ;;  %v21057_v53 = vld [vmem:[#allocation121_spill] sm:$0xff]  ;;  %v7577_v43 = vcombine.low %v6292_v52, %v6294_v47 }
 0x5b7   :  { %v16877_v46 = vsel %vm5015_vm4, %v21055_v50, %v21054_v44  ;;  %v5157_v51 = vsel %vm5112_vm5, %v21057_v53, %v21056_v0  ;;  %v21058_v33 = vld [vmem:[#allocation398_spill] sm:$0xff]  ;;  %v21059_v7 = vld [vmem:[#allocation399_spill] sm:$0xff]  ;;  %v6311_v5 = vcombine.high %v6309_v29, %v6309_v29  ;;  %v7578_v31 = vcombine.low %v6302_v55, %v6310_v32  ;;  %4159 = vrot.lane.b32.xlu1 %v1563_v45, %s13032_s30  ;;  %v21063_v53 = vld [vmem:[#allocation80_spill] sm:$0xff] }
 0x5b8   :  { %v5255_v9 = vsel %vm5209_vm6, %v5158_v24, %v21058_v33  ;;  %v5254_v34 = vsel %vm5209_vm6, %v5157_v51, %v21059_v7  ;;  %v1725_v56 = vld [vmem:[#allocation2 + $0x292] sm:$0xff]  ;;  %12870 = vmatmul.mubr.msk.f32.gmra.mrb[8].mxu1 %vm8311_vm10, %v7576_v6  ;;  %v21061_v44 = vld [vmem:[#allocation79_spill] sm:$0xff] }
 0x5b9   :  { %v21060_v8 = vld [vmem:[#allocation250_spill] sm:$0xff]  ;;  %v21062_v0 = vld [vmem:[#allocation251_spill] sm:$0xff]  ;;  %4675 = vrot.lane.b32.xlu0 %v1725_v56, %s13033_s6  ;;  %v21066_v45 = vld [vmem:[#allocation305_spill] sm:$0xff]  ;;  %v7592_v33 = vrot.slane %v7578_v31, %v20911_v54 }
 0x5ba   :  { %v16891_v50 = vsel %vm5015_vm4, %v21061_v44, %v21060_v8  ;;  %v16896_v24 = vsel %vm5015_vm4, %v21063_v53, %v21062_v0  ;;  %v21064_v52 = vld [vmem:[#allocation494_spill] sm:$0xff]  ;;  %v21065_v51 = vld [vmem:[#allocation495_spill] sm:$0xff]  ;;  %v5159_v32 = vsel %vm5112_vm5, %v16496_v4, %v21066_v45  ;;  %v4624_v8 = vpop.permute.xlu1 %4623  ;;  %v4626_v44 = vpop.permute.xlu0 %4625  ;;  %v21067_v53 = vld [vmem:[#allocation401_spill] sm:$0xff]  ;;  %v7594_v4 = vcombine.low %v6309_v29, %v6311_v5 }
 0x5bb   :  { %v5352_v47 = vsel %vm5306_vm8, %v5255_v9, %v21064_v52  ;;  %v5351_v55 = vsel %vm5306_vm8, %v5254_v34, %v21065_v51  ;;  %v1561_v0 = vld [vmem:[#allocation2 + $0x41] sm:$0x3]  ;;  %v5256_v9 = vsel %vm5209_vm6, %v5159_v32, %v21067_v53  ;;  %v7585_v34 = vrot.slane %v7577_v43, %v20911_v54  ;;  %v21071_v32 = vld [vmem:[#allocation253_spill] sm:$0xff]  ;;  %v21072_v43 = vld [vmem:[#allocation82_spill] sm:$0xff] }
 0x5bc   :  { %v5449_v6 = vsel %vm5403_vm7, %v5352_v47, %v4242_v36  ;;  %v5448_v7 = vsel %vm5403_vm7, %v5351_v55, %v4240_v27  ;;  %v1631_v51 = vld [vmem:[#allocation2 + $0x2a1] sm:$0xff]  ;;  %v21069_v55 = vld [vmem:[#allocation81_spill] sm:$0xff] }
 0x5bd   :  { %v5545_v56 = vsel %vm5500_vm9, %v5448_v7, %v4624_v8  ;;  %v5546_v52 = vsel %vm5500_vm9, %v5449_v6, %v4626_v44  ;;  %4295 = vrot.lane.b32.xlu1 %v1631_v51, %s13032_s30  ;;  %v21068_v27 = vld [vmem:[#allocation252_spill] sm:$0xff]  ;;  %v16925_v7 = vsel %vm5015_vm4, %v21072_v43, %v21071_v32  ;;  %v21074_v6 = vld [vmem:[#allocation497_spill] sm:$0xff]  ;;  %4155 = vrot.lane.b32.xlu0 %v1561_v0, %s13032_s30  ;;  %v21077_v43 = vld [vmem:[#allocation255_spill] sm:$0xff] }
 0x5be   :  { %v6318_v36 = vrot.slane %v5545_v56, %v20911_v54  ;;  %v6319_v47 = vcombine.high %v5546_v52, %v5546_v52  ;;  %v6326_v31 = vrot.slane %v5546_v52, %v20911_v54  ;;  %v16920_v45 = vsel %vm5015_vm4, %v21069_v55, %v21068_v27  ;;  %21073 = vst [vmem:[#allocation125_spill] sm:$0xff] %v16925_v7  ;;  %v4248_v52 = vpop.permute.xlu1 %4247  ;;  %v4628_v51 = vpop.permute.xlu0 %4627  ;;  %v1659_v27 = vld [vmem:[#allocation2 + $0x52] sm:$0xff]  ;;  %v21081_v0 = vld [vmem:[#allocation83_spill] sm:$0xff] }
 0x5bf   :  { %21070 = vst [vmem:[#allocation4_spill] sm:$0xff] %v16920_v45  ;;  %v5353_v29 = vsel %vm5306_vm8, %v5256_v9, %v21074_v6  ;;  %v7593_v5 = vcombine.low %v7585_v34, %v7592_v33  ;;  %v21075_v55 = vld [vmem:[#allocation254_spill] sm:$0xff]  ;;  %v21076_v45 = vld [vmem:[#allocation84_spill] sm:$0xff]  ;;  %v21078_v7 = vld [vmem:[#allocation85_spill] sm:$0xff] }
 0x5c0   :  { %v5450_v8 = vsel %vm5403_vm7, %v5353_v29, %v4244_v10  ;;  %v6333_v44 = vrot.slane %v6319_v47, %v20911_v54  ;;  %v6334_v53 = vcombine.high %v6326_v31, %v6326_v31  ;;  %v7595_v56 = vcombine.low %v6318_v36, %v6326_v31  ;;  %v21080_v33 = vld [vmem:[#allocation256_spill] sm:$0xff]  ;;  %v21084_v29 = vld [vmem:[#allocation86_spill] sm:$0xff] }
 0x5c1   :  { %v16935_v32 = vsel %vm5015_vm4, %v21076_v45, %v21075_v55  ;;  %v16940_v9 = vsel %vm5015_vm4, %v21078_v7, %v21077_v43  ;;  %v16945_v10 = vsel %vm5015_vm4, %v21081_v0, %v21080_v33  ;;  %12872 = vmatprep.mubr.msk.f32.mxu1 %vm8311_vm10, %v7593_v5  ;;  %v5547_v34 = vsel %vm5500_vm9, %v5450_v8, %v4628_v51  ;;  %v1565_v36 = vld [vmem:[#allocation2 + $0x61] sm:$0xff]  ;;  %v21083_v7 = vld [vmem:[#allocation257_spill] sm:$0xff]  ;;  %v21086_v43 = vld [vmem:[#allocation258_spill] sm:$0xff] }
 0x5c2   :  { %21079 = vst [vmem:[#allocation5_spill] sm:$0xff] %v16940_v9  ;;  %21082 = vst [vmem:[#allocation126_spill] sm:$0xff] %v16945_v10  ;;  %v7602_v47 = vrot.slane %v7594_v4, %v20911_v54  ;;  %v7609_v31 = vrot.slane %v7595_v56, %v20911_v54  ;;  %v6335_v45 = vcombine.high %v6333_v44, %v6333_v44  ;;  %4163 = vrot.lane.b32.xlu1 %v1565_v36, %s13032_s30  ;;  %v21087_v33 = vld [vmem:[#allocation87_spill] sm:$0xff]  ;;  %v21090_v56 = vld [vmem:[#allocation88_spill] sm:$0xff] }
 0x5c3   :  { %v6336_v6 = vcombine.high %v5547_v34, %v5547_v34  ;;  %v16955_v55 = vsel %vm5015_vm4, %v21084_v29, %v21083_v7  ;;  %v16960_v5 = vsel %vm5112_vm5, %v21087_v33, %v21086_v43  ;;  %v7611_v8 = vcombine.low %v6334_v53, %v6333_v44  ;;  %4543 = vrot.lane.b32.xlu0 %v1659_v27, %s13033_s6  ;;  %v21089_v4 = vld [vmem:[#allocation259_spill] sm:$0xff]  ;;  %v21092_v36 = vld [vmem:[#allocation260_spill] sm:$0xff]  ;;  %v21093_v10 = vld [vmem:[#allocation89_spill] sm:$0xff]  ;;  %v4250_v33 = vpop.permute.xlu1 %4249  ;;  %v4246_v44 = vpop.permute.xlu0 %4245 }
 0x5c4   :  { %21085 = vst [vmem:[#allocation127_spill] sm:$0xff] %v16955_v55  ;;  %21088 = vst [vmem:[#allocation128_spill] sm:$0xff] %v16960_v5  ;;  %v6343_v51 = vrot.slane %v5547_v34, %v20911_v54  ;;  %v16967_v0 = vsel %vm5112_vm5, %v21090_v56, %v21089_v4  ;;  %v16972_v7 = vsel %vm5112_vm5, %v21093_v10, %v21092_v36  ;;  %v21095_v29 = vld [vmem:[#allocation304_spill] sm:$0xff]  ;;  %v1630_v53 = vld [vmem:[#allocation2 + $0x299] sm:$0x3] }
 0x5c5   :  { %21091 = vst [vmem:[#allocation129_spill] sm:$0xff] %v16967_v0  ;;  %21094 = vst [vmem:[#allocation130_spill] sm:$0xff] %v16972_v7  ;;  %v5160_v43 = vsel %vm5112_vm5, %v16484_v38, %v21095_v29  ;;  %v7610_v34 = vcombine.low %v7602_v47, %v7609_v31  ;;  %v21096_v5 = vld [vmem:[#allocation307_spill] sm:$0xff]  ;;  %v6350_v4 = vrot.slane %v6336_v6, %v20911_v54  ;;  %v1632_v55 = vld [vmem:[#allocation2 + $0x2a9] sm:$0xff] }
 0x5c6   :  { %v5161_v27 = vsel %vm5112_vm5, %v16509_v63, %v21096_v5  ;;  %v6351_v56 = vcombine.high %v6343_v51, %v6343_v51  ;;  %v7612_v0 = vcombine.low %v6335_v45, %v6343_v51  ;;  %v21097_v9 = vld [vmem:[#allocation306_spill] sm:$0xff]  ;;  %v21098_v36 = vld [vmem:[#allocation400_spill] sm:$0xff]  ;;  %v21099_v29 = vld [vmem:[#allocation403_spill] sm:$0xff]  ;;  %4297 = vrot.lane.b32.xlu1 %v1632_v55, %s13032_s30  ;;  %v7619_v6 = vrot.slane %v7611_v8, %v20911_v54 }
 0x5c7   :  { %v5162_v10 = vsel %vm5112_vm5, %v16501_v2, %v21097_v9  ;;  %v5257_v38 = vsel %vm5209_vm6, %v5160_v43, %v21098_v36  ;;  %v5258_v7 = vsel %vm5209_vm6, %v5161_v27, %v21099_v29  ;;  %12873 = vmatmul.mubr.msk.f32.gmra.mrb[10].mxu1 %vm8311_vm10, %v7610_v34  ;;  %v21100_v63 = vld [vmem:[#allocation496_spill] sm:$0xff]  ;;  %v21101_v31 = vld [vmem:[#allocation499_spill] sm:$0xff]  ;;  %4293 = vrot.lane.b32.xlu0 %v1630_v53, %s13032_s30  ;;  %v21102_v9 = vld [vmem:[#allocation261_spill] sm:$0xff]  ;;  %v4630_v36 = vpop.permute.xlu1 %4629 }
 0x5c8   :  { %v5354_v47 = vsel %vm5306_vm8, %v5257_v38, %v21100_v63  ;;  %v5355_v45 = vsel %vm5306_vm8, %v5258_v7, %v21101_v31  ;;  %v7626_v2 = vrot.slane %v7612_v0, %v20911_v54  ;;  %v21103_v5 = vld [vmem:[#allocation90_spill] sm:$0xff]  ;;  %v4632_v7 = vpop.permute.xlu0 %4631  ;;  %v1657_v38 = vld [vmem:[#allocation2 + $0x42] sm:$0x3]  ;;  %v7628_v8 = vcombine.low %v6351_v56, %v6350_v4  ;;  %v21108_v56 = vld [vmem:[#allocation308_spill] sm:$0xff] }
 0x5c9   :  { %v17000_v51 = vsel %vm5112_vm5, %v21103_v5, %v21102_v9  ;;  %v21104_v55 = vld [vmem:[#allocation402_spill] sm:$0xff]  ;;  %v5452_v34 = vsel %vm5403_vm7, %v5355_v45, %v4248_v52  ;;  %v5451_v27 = vsel %vm5403_vm7, %v5354_v47, %v4246_v44  ;;  %v1727_v29 = vld [vmem:[#allocation2 + $0x2a2] sm:$0xff]  ;;  %v6352_v31 = vcombine.high %v6350_v4, %v6350_v4 }
 0x5ca   :  { %v5259_v43 = vsel %vm5209_vm6, %v5162_v10, %v21104_v55  ;;  %v5548_v0 = vsel %vm5500_vm9, %v5451_v27, %v4630_v36  ;;  %v5549_v53 = vsel %vm5500_vm9, %v5452_v34, %v4632_v7  ;;  %v7627_v63 = vcombine.low %v7619_v6, %v7626_v2  ;;  %4679 = vrot.lane.b32.xlu1 %v1727_v29, %s13033_s6  ;;  %v21105_v52 = vld [vmem:[#allocation262_spill] sm:$0xff]  ;;  %v21106_v44 = vld [vmem:[#allocation92_spill] sm:$0xff]  ;;  %v21111_v29 = vld [vmem:[#allocation93_spill] sm:$0xff] }
 0x5cb   :  { %v6359_v9 = vrot.slane %v5548_v0, %v20911_v54  ;;  %v6360_v5 = vcombine.high %v5549_v53, %v5549_v53  ;;  %v6367_v10 = vrot.slane %v5549_v53, %v20911_v54  ;;  %v17014_v47 = vsel %vm5112_vm5, %v21106_v44, %v21105_v52  ;;  %v21109_v55 = vld [vmem:[#allocation498_spill] sm:$0xff]  ;;  %4539 = vrot.lane.b32.xlu0 %v1657_v38, %s13033_s6  ;;  %v4254_v7 = vpop.permute.xlu1 %4253  ;;  %v21110_v53 = vld [vmem:[#allocation263_spill] sm:$0xff]  ;;  %v21113_v52 = vld [vmem:[#allocation404_spill] sm:$0xff] }
 0x5cc   :  { %21107 = vst [vmem:[#allocation131_spill] sm:$0xff] %v17014_v47  ;;  %v5164_v45 = vsel %vm5112_vm5, %v16514_v12, %v21108_v56  ;;  %v5356_v6 = vsel %vm5306_vm8, %v5259_v43, %v21109_v55  ;;  %12875 = vmatprep.mubr.msk.f32.mxu1 %vm8311_vm10, %v7627_v63  ;;  %v1726_v4 = vld [vmem:[#allocation2 + $0x29a] sm:$0x3]  ;;  %v4634_v0 = vpop.permute.xlu0 %4633  ;;  %v17028_v12 = vsel %vm5112_vm5, %v21111_v29, %v21110_v53  ;;  %v1661_v44 = vld [vmem:[#allocation2 + $0x62] sm:$0xff] }
 0x5cd   :  { %v5453_v2 = vsel %vm5403_vm7, %v5356_v6, %v4250_v33  ;;  %v7629_v34 = vcombine.low %v6352_v31, %v6359_v9  ;;  %v6374_v27 = vrot.slane %v6360_v5, %v20911_v54  ;;  %v6375_v36 = vcombine.high %v6367_v10, %v6367_v10  ;;  %21112 = vst [vmem:[#allocation132_spill] sm:$0xff] %v17028_v12  ;;  %v21114_v56 = vld [vmem:[#allocation264_spill] sm:$0xff]  ;;  %v21115_v55 = vld [vmem:[#allocation95_spill] sm:$0xff]  ;;  %v21124_v47 = vld [vmem:[#allocation266_spill] sm:$0xff] }
 0x5ce   :  { %v5261_v43 = vsel %vm5209_vm6, %v5164_v45, %v21113_v52  ;;  %v7636_v38 = vrot.slane %v7628_v8, %v20911_v54  ;;  %v5550_v63 = vsel %vm5500_vm9, %v5453_v2, %v4634_v0  ;;  %4677 = vrot.lane.b32.xlu1 %v1726_v4, %s13033_s6  ;;  %v17039_v6 = vsel %vm5112_vm5, %v21115_v55, %v21114_v56  ;;  %v21117_v53 = vld [vmem:[#allocation311_spill] sm:$0xff]  ;;  %v21119_v8 = vld [vmem:[#allocation500_spill] sm:$0xff] }
 0x5cf   :  { %v7643_v33 = vrot.slane %v7629_v34, %v20911_v54  ;;  %v6376_v31 = vcombine.high %v6374_v27, %v6374_v27  ;;  %v7645_v9 = vcombine.low %v6367_v10, %v6375_v36  ;;  %v6377_v5 = vcombine.high %v5550_v63, %v5550_v63  ;;  %21116 = vst [vmem:[#allocation133_spill] sm:$0xff] %v17039_v6  ;;  %v21118_v29 = vld [vmem:[#allocation3_spill] sm:$0xff]  ;;  %v4256_v0 = vpop.permute.xlu1 %4255 }
 0x5d0   :  { %v5165_v45 = vsel %vm5112_vm5, %v21118_v29, %v21117_v53  ;;  %v5358_v2 = vsel %vm5306_vm8, %v5261_v43, %v21119_v8  ;;  %v6384_v34 = vrot.slane %v5550_v63, %v20911_v54  ;;  %4547 = vrot.lane.b32.xlu0 %v1661_v44, %s13033_s6  ;;  %v4638_v52 = vpop.permute.xlu0 %4637  ;;  %v21120_v55 = vld [vmem:[#allocation407_spill] sm:$0xff]  ;;  %v1566_v8 = vld [vmem:[#allocation2 + $0x69] sm:$0xff] }
 0x5d1   :  { %v7646_v10 = vcombine.low %v6374_v27, %v6376_v31  ;;  %v5455_v4 = vsel %vm5403_vm7, %v5358_v2, %v4254_v7  ;;  %v6391_v36 = vrot.slane %v6377_v5, %v20911_v54  ;;  %v7644_v56 = vcombine.low %v7636_v38, %v7643_v33  ;;  %v1728_v31 = vld [vmem:[#allocation2 + $0x2aa] sm:$0xff] }
 0x5d2   :  { %v5262_v6 = vsel %vm5209_vm6, %v5165_v45, %v21120_v55  ;;  %v7653_v53 = vrot.slane %v7645_v9, %v20911_v54  ;;  %v6392_v29 = vcombine.high %v6384_v34, %v6384_v34  ;;  %v5552_v43 = vsel %vm5500_vm9, %v5455_v4, %v4638_v52  ;;  %4165 = vrot.lane.b32.xlu1 %v1566_v8, %s13032_s30  ;;  %v21121_v5 = vld [vmem:[#allocation265_spill] sm:$0xff]  ;;  %v21122_v38 = vld [vmem:[#allocation96_spill] sm:$0xff]  ;;  %v21123_v45 = vld [vmem:[#allocation503_spill] sm:$0xff] }
 0x5d3   :  { %v7660_v63 = vrot.slane %v7646_v10, %v20911_v54  ;;  %v6393_v44 = vcombine.high %v6391_v36, %v6391_v36  ;;  %v6401_v27 = vcombine.high %v5552_v43, %v5552_v43  ;;  %v6408_v7 = vrot.slane %v5552_v43, %v20911_v54  ;;  %12876 = vmatmul.mubr.msk.f32.gmra.mrb[12].mxu1 %vm8311_vm10, %v7644_v56  ;;  %v4640_v55 = vpop.permute.xlu1 %4639  ;;  %v1564_v8 = vld [vmem:[#allocation2 + $0x59] sm:$0x3]  ;;  %v1662_v56 = vld [vmem:[#allocation2 + $0x6a] sm:$0xff] }
 0x5d4   :  { %v17060_v33 = vsel %vm5112_vm5, %v21122_v38, %v21121_v5  ;;  %v5359_v9 = vsel %vm5306_vm8, %v5262_v6, %v21123_v45  ;;  %v7662_v2 = vcombine.low %v6384_v34, %v6392_v29  ;;  %4681 = vrot.lane.b32.xlu0 %v1728_v31, %s13033_s6  ;;  %v4252_v43 = vpop.permute.xlu0 %4251  ;;  %v21125_v5 = vld [vmem:[#allocation97_spill] sm:$0xff]  ;;  %v21128_v34 = vld [vmem:[#allocation122_spill] sm:$0xff] }
 0x5d5   :  { %v7663_v10 = vcombine.low %v6391_v36, %v6393_v44  ;;  %v5456_v4 = vsel %vm5403_vm7, %v5359_v9, %v4256_v0  ;;  %v6415_v52 = vrot.slane %v6401_v27, %v20911_v54  ;;  %v7661_v12 = vcombine.low %v7653_v53, %v7660_v63  ;;  %v21127_v6 = vld [vmem:[#allocation309_spill] sm:$0xff]  ;;  %v21131_v45 = vld [vmem:[#allocation98_spill] sm:$0xff] }
 0x5d6   :  { %v17071_v38 = vsel %vm5112_vm5, %v21125_v5, %v21124_v47  ;;  %v5163_v29 = vsel %vm5112_vm5, %v21128_v34, %v21127_v6  ;;  %v6416_v31 = vcombine.high %v6408_v7, %v6408_v7  ;;  %v5553_v36 = vsel %vm5500_vm9, %v5456_v4, %v4640_v55  ;;  %v21129_v0 = vld [vmem:[#allocation405_spill] sm:$0xff]  ;;  %4549 = vrot.lane.b32.xlu1 %v1662_v56, %s13033_s6  ;;  %v21130_v47 = vld [vmem:[#allocation267_spill] sm:$0xff] }
 0x5d7   :  { %21126 = vst [vmem:[#allocation134_spill] sm:$0xff] %v17071_v38  ;;  %v5260_v44 = vsel %vm5209_vm6, %v5163_v29, %v21129_v0  ;;  %v7670_v27 = vrot.slane %v7662_v2, %v20911_v54  ;;  %v7677_v53 = vrot.slane %v7663_v10, %v20911_v54  ;;  %v6418_v63 = vcombine.high %v5553_v36, %v5553_v36  ;;  %v21133_v5 = vld [vmem:[#allocation501_spill] sm:$0xff]  ;;  %v4636_v34 = vpop.permute.xlu1 %4635  ;;  %v21183_v38 = vld [vmem:[#allocation112_spill] sm:$0xff] }
 0x5d8   :  { %v17085_v9 = vsel %vm5112_vm5, %v21131_v45, %v21130_v47  ;;  %v5357_v6 = vsel %vm5306_vm8, %v5260_v44, %v21133_v5  ;;  %v6425_v4 = vrot.slane %v5553_v36, %v20911_v54  ;;  %4161 = vrot.lane.b32.xlu0 %v1564_v8, %s13032_s30  ;;  %12878 = vmatprep.mubr.msk.f32.mxu1 %vm8311_vm10, %v7661_v12  ;;  %v4260_v29 = vpop.permute.xlu0 %4259  ;;  %v21134_v0 = vld [vmem:[#allocation313_spill] sm:$0xff]  ;;  %v1634_v8 = vld [vmem:[#allocation2 + $0x2b9] sm:$0xff]  ;;  %v21135_v5 = vld [vmem:[#allocation268_spill] sm:$0xff] }
 0x5d9   :  { %21132 = vst [vmem:[#allocation135_spill] sm:$0xff] %v17085_v9  ;;  %v6417_v2 = vcombine.high %v6415_v52, %v6415_v52  ;;  %v17093_v10 = vrot.slane %v6418_v63, %v20911_v54  ;;  %v5454_v55 = vsel %vm5403_vm7, %v5357_v6, %v4252_v43  ;;  %v7678_v56 = vcombine.low %v7670_v27, %v7677_v53  ;;  %v21136_v12 = vld [vmem:[#allocation99_spill] sm:$0xff]  ;;  %v21138_v63 = vld [vmem:[#allocation409_spill] sm:$0xff]  ;;  %v21142_v53 = vld [vmem:[#allocation270_spill] sm:$0xff] }
 0x5da   :  { %v5167_v47 = vsel %vm5112_vm5, %v16556_v23, %v21134_v0  ;;  %v7680_v44 = vcombine.low %v6416_v31, %v6415_v52  ;;  %v6433_v45 = vcombine.high %v6425_v4, %v6425_v4  ;;  %v5551_v36 = vsel %vm5500_vm9, %v5454_v55, %v4636_v34  ;;  %4301 = vrot.lane.b32.xlu1 %v1634_v8, %s13032_s30  ;;  %v1568_v27 = vld [vmem:[#allocation2 + $0x79] sm:$0xff]  ;;  %v21139_v23 = vld [vmem:[#allocation269_spill] sm:$0xff]  ;;  %v21140_v52 = vld [vmem:[#allocation100_spill] sm:$0xff] }
 0x5db   :  { %v17103_v9 = vsel %vm5112_vm5, %v21136_v12, %v21135_v5  ;;  %v5264_v43 = vsel %vm5209_vm6, %v5167_v47, %v21138_v63  ;;  %v6400_v6 = vrot.slane %v5551_v36, %v20911_v54  ;;  %12879 = vmatmul.mubr.msk.f32.gmra.mrb[14].mxu1 %vm8311_vm10, %v7678_v56  ;;  %v17113_v31 = vsel %vm5112_vm5, %v21140_v52, %v21139_v23  ;;  %v21143_v55 = vld [vmem:[#allocation101_spill] sm:$0xff]  ;;  %v21146_v8 = vld [vmem:[#allocation312_spill] sm:$0xff]  ;;  %v4262_v52 = vpop.permute.xlu1 %4261 }
 0x5dc   :  { %21137 = vst [vmem:[#allocation7_spill] sm:$0xff] %v17103_v9  ;;  %21141 = vst [vmem:[#allocation136_spill] sm:$0xff] %v17113_v31  ;;  %v17118_v34 = vsel %vm5112_vm5, %v21143_v55, %v21142_v53  ;;  %v21145_v0 = vld [vmem:[#allocation505_spill] sm:$0xff]  ;;  %v7697_v36 = vcombine.low %v6433_v45, %v17093_v10  ;;  %4169 = vrot.lane.b32.xlu0 %v1568_v27, %s13032_s30  ;;  %v21147_v5 = vld [vmem:[#allocation124_spill] sm:$0xff]  ;;  %v7696_v12 = vcombine.low %v6417_v2, %v6425_v4  ;;  %v4644_v31 = vpop.permute.xlu0 %4643 }
 0x5dd   :  { %21144 = vst [vmem:[#allocation6_spill] sm:$0xff] %v17118_v34  ;;  %v5361_v47 = vsel %vm5306_vm8, %v5264_v43, %v21145_v0  ;;  %v5168_v56 = vsel %vm5112_vm5, %v21147_v5, %v21146_v8  ;;  %v7679_v63 = vcombine.low %v6400_v6, %v6408_v7  ;;  %v1660_v9 = vld [vmem:[#allocation2 + $0x5a] sm:$0x3]  ;;  %v21148_v53 = vld [vmem:[#allocation271_spill] sm:$0xff]  ;;  %v21151_v43 = vld [vmem:[#allocation408_spill] sm:$0xff]  ;;  %v7694_v27 = vrot.slane %v7680_v44, %v20911_v54 }
 0x5de   :  { %v5458_v23 = vsel %vm5403_vm7, %v5361_v47, %v4260_v29  ;;  %v21149_v55 = vld [vmem:[#allocation102_spill] sm:$0xff]  ;;  %v5265_v45 = vsel %vm5209_vm6, %v5168_v56, %v21151_v43  ;;  %v7711_v7 = vrot.slane %v7697_v36, %v20911_v54  ;;  %v21152_v6 = vld [vmem:[#allocation272_spill] sm:$0xff]  ;;  %v21153_v47 = vld [vmem:[#allocation103_spill] sm:$0xff]  ;;  %v7704_v43 = vrot.slane %v7696_v12, %v20911_v54 }
 0x5df   :  { %v17131_v34 = vsel %vm5112_vm5, %v21149_v55, %v21148_v53  ;;  %v5555_v0 = vsel %vm5500_vm9, %v5458_v23, %v4644_v31  ;;  %v1664_v8 = vld [vmem:[#allocation2 + $0x7a] sm:$0xff]  ;;  %v7687_v4 = vrot.slane %v7679_v63, %v20911_v54  ;;  %v17144_v5 = vsel %vm5112_vm5, %v21153_v47, %v21152_v6  ;;  %v21155_v56 = vld [vmem:[#allocation273_spill] sm:$0xff]  ;;  %v21156_v53 = vld [vmem:[#allocation104_spill] sm:$0xff]  ;;  %v4646_v6 = vpop.permute.xlu1 %4645 }
 0x5e0   :  { %21150 = vst [vmem:[#allocation137_spill] sm:$0xff] %v17131_v34  ;;  %v6442_v2 = vcombine.high %v5555_v0, %v5555_v0  ;;  %v6449_v29 = vrot.slane %v5555_v0, %v20911_v54  ;;  %4553 = vrot.lane.b32.xlu1 %v1664_v8, %s13033_s6  ;;  %21154 = vst [vmem:[#allocation138_spill] sm:$0xff] %v17144_v5  ;;  %v17149_v44 = vsel %vm5112_vm5, %v21156_v53, %v21155_v56  ;;  %v21158_v31 = vld [vmem:[#allocation274_spill] sm:$0xff]  ;;  %v21159_v23 = vld [vmem:[#allocation105_spill] sm:$0xff]  ;;  %v4258_v47 = vpop.permute.xlu0 %4257 }
 0x5e1   :  { %21157 = vst [vmem:[#allocation139_spill] sm:$0xff] %v17149_v44  ;;  %v17154_v36 = vsel %vm5112_vm5, %v21159_v23, %v21158_v31  ;;  %v21161_v63 = vld [vmem:[#allocation504_spill] sm:$0xff]  ;;  %4545 = vrot.lane.b32.xlu0 %v1660_v9, %s13033_s6  ;;  %v7695_v56 = vcombine.low %v7687_v4, %v7694_v27  ;;  %v21162_v53 = vld [vmem:[#allocation275_spill] sm:$0xff]  ;;  %v21163_v44 = vld [vmem:[#allocation106_spill] sm:$0xff] }
 0x5e2   :  { %21160 = vst [vmem:[#allocation140_spill] sm:$0xff] %v17154_v36  ;;  %v5362_v55 = vsel %vm5306_vm8, %v5265_v45, %v21161_v63  ;;  %v6456_v8 = vrot.slane %v6442_v2, %v20911_v54  ;;  %v17165_v5 = vsel %vm5112_vm5, %v21163_v44, %v21162_v53  ;;  %v21165_v31 = vld [vmem:[#allocation276_spill] sm:$0xff]  ;;  %v21166_v23 = vld [vmem:[#allocation107_spill] sm:$0xff]  ;;  %v21168_v9 = vld [vmem:[#allocation310_spill] sm:$0xff]  ;;  %v6457_v4 = vcombine.high %v6449_v29, %v6449_v29 }
 0x5e3   :  { %v5459_v0 = vsel %vm5403_vm7, %v5362_v55, %v4262_v52  ;;  %21164 = vst [vmem:[#allocation141_spill] sm:$0xff] %v17165_v5  ;;  %v17170_v45 = vsel %vm5112_vm5, %v21166_v23, %v21165_v31  ;;  %v21169_v63 = vld [vmem:[#allocation123_spill] sm:$0xff]  ;;  %v21170_v55 = vld [vmem:[#allocation406_spill] sm:$0xff]  ;;  %v7712_v53 = vcombine.low %v7704_v43, %v7711_v7  ;;  %v21171_v5 = vld [vmem:[#allocation277_spill] sm:$0xff]  ;;  %12881 = vmatprep.mubr.msk.f32.mxu1 %vm8311_vm10, %v7695_v56 }
 0x5e4   :  { %21167 = vst [vmem:[#allocation142_spill] sm:$0xff] %v17170_v45  ;;  %v5166_v12 = vsel %vm5112_vm5, %v21169_v63, %v21168_v9  ;;  %v5556_v52 = vsel %vm5500_vm9, %v5459_v0, %v4646_v6  ;;  %v1635_v2 = vld [vmem:[#allocation2 + $0x2c1] sm:$0xff]  ;;  %v21172_v31 = vld [vmem:[#allocation109_spill] sm:$0xff]  ;;  %v21174_v45 = vld [vmem:[#allocation502_spill] sm:$0xff]  ;;  %v6458_v0 = vcombine.high %v6456_v8, %v6456_v8 }
 0x5e5   :  { %v5263_v27 = vsel %vm5209_vm6, %v5166_v12, %v21170_v55  ;;  %v6466_v36 = vrot.slane %v5556_v52, %v20911_v54  ;;  %4303 = vrot.lane.b32.xlu1 %v1635_v2, %s13032_s30  ;;  %v1730_v44 = vld [vmem:[#allocation2 + $0x2ba] sm:$0xff]  ;;  %v17183_v23 = vsel %vm5112_vm5, %v21172_v31, %v21171_v5  ;;  %12882 = vmatmul.mubr.msk.f32.gmra.mrb[16].mxu1 %vm8311_vm10, %v7712_v53  ;;  %v4266_v55 = vpop.permute.xlu0 %4265 }
 0x5e6   :  { %21173 = vst [vmem:[#allocation143_spill] sm:$0xff] %v17183_v23  ;;  %v5360_v9 = vsel %vm5306_vm8, %v5263_v27, %v21174_v45  ;;  %4685 = vrot.lane.b32.xlu0 %v1730_v44, %s13033_s6  ;;  %v21175_v6 = vld [vmem:[#allocation278_spill] sm:$0xff]  ;;  %v4642_v45 = vpop.permute.xlu1 %4641  ;;  %v1567_v27 = vld [vmem:[#allocation2 + $0x71] sm:$0x3]  ;;  %v21179_v44 = vld [vmem:[#allocation279_spill] sm:$0xff] }
 0x5e7   :  { %v21176_v63 = vld [vmem:[#allocation110_spill] sm:$0xff]  ;;  %v6474_v43 = vcombine.high %v6466_v36, %v6466_v36  ;;  %v5457_v5 = vsel %vm5403_vm7, %v5360_v9, %v4258_v47  ;;  %v21180_v31 = vld [vmem:[#allocation111_spill] sm:$0xff]  ;;  %v6434_v47 = vcombine.high %v17093_v10, %v17093_v10  ;;  %v21182_v9 = vld [vmem:[#allocation280_spill] sm:$0xff] }
 0x5e8   :  { %v17192_v12 = vsel %vm5112_vm5, %v21176_v63, %v21175_v6  ;;  %v21178_v2 = vld [vmem:[#allocation314_spill] sm:$0xff]  ;;  %v17202_v56 = vsel %vm5112_vm5, %v21180_v31, %v21179_v44  ;;  %v6459_v63 = vcombine.high %v5556_v52, %v5556_v52  ;;  %v17214_v44 = vsel %vm5112_vm5, %v21183_v38, %v21182_v9  ;;  %v21184_v31 = vld [vmem:[#allocation281_spill] sm:$0xff] }
 0x5e9   :  { %21177 = vst [vmem:[#allocation144_spill] sm:$0xff] %v17192_v12  ;;  %v5170_v7 = vsel %vm5112_vm5, %v16576_v41, %v21178_v2  ;;  %v21181_v23 = vld [vmem:[#allocation410_spill] sm:$0xff]  ;;  %v5554_v12 = vsel %vm5500_vm9, %v5457_v5, %v4642_v45  ;;  %v1569_v41 = vld [vmem:[#allocation2 + $0x81] sm:$0xff]  ;;  %v7714_v2 = vcombine.low %v6449_v29, %v6457_v4  ;;  %v7731_v34 = vcombine.low %v6466_v36, %v6474_v43 }
 0x5ea   :  { %v5267_v6 = vsel %vm5209_vm6, %v5170_v7, %v21181_v23  ;;  %v6441_v53 = vrot.slane %v5554_v12, %v20911_v54  ;;  %4171 = vrot.lane.b32.xlu1 %v1569_v41, %s13032_s30  ;;  %v21185_v23 = vld [vmem:[#allocation113_spill] sm:$0xff]  ;;  %v21186_v7 = vld [vmem:[#allocation506_spill] sm:$0xff]  ;;  %v7730_v36 = vcombine.low %v6456_v8, %v6458_v0  ;;  %4167 = vrot.lane.b32.xlu0 %v1567_v27, %s13032_s30  ;;  %v21189_v43 = vld [vmem:[#allocation283_spill] sm:$0xff]  ;;  %v4264_v9 = vpop.permute.xlu1 %4263 }
 0x5eb   :  { %v17219_v52 = vsel %vm5112_vm5, %v21185_v23, %v21184_v31  ;;  %v5364_v29 = vsel %vm5306_vm8, %v5267_v6, %v21186_v7  ;;  %v21187_v10 = vld [vmem:[#allocation282_spill] sm:$0xff]  ;;  %v21190_v5 = vld [vmem:[#allocation115_spill] sm:$0xff]  ;;  %v4650_v31 = vpop.permute.xlu0 %4649  ;;  %v1633_v23 = vld [vmem:[#allocation2 + $0x2b1] sm:$0x3]  ;;  %v6473_v27 = vrot.slane %v6459_v63, %v20911_v54  ;;  %v7745_v7 = vrot.slane %v7731_v34, %v20911_v54 }
 0x5ec   :  { %v21188_v4 = vld [vmem:[#allocation114_spill] sm:$0xff]  ;;  %v17232_v38 = vsel %vm5112_vm5, %v21190_v5, %v21189_v43  ;;  %v7713_v45 = vcombine.low %v6434_v47, %v6441_v53  ;;  %v5461_v41 = vsel %vm5403_vm7, %v5364_v29, %v4266_v55  ;;  %v21192_v6 = vld [vmem:[#allocation284_spill] sm:$0xff]  ;;  %v7728_v43 = vrot.slane %v7714_v2, %v20911_v54  ;;  %v21195_v29 = vld [vmem:[#allocation285_spill] sm:$0xff] }
 0x5ed   :  { %v17227_v12 = vsel %vm5112_vm5, %v21188_v4, %v21187_v10  ;;  %21191 = vst [vmem:[#allocation145_spill] sm:$0xff] %v17232_v38  ;;  %v21193_v8 = vld [vmem:[#allocation116_spill] sm:$0xff]  ;;  %v5558_v10 = vsel %vm5500_vm9, %v5461_v41, %v4650_v31  ;;  %v21196_v5 = vld [vmem:[#allocation117_spill] sm:$0xff]  ;;  %v21198_v63 = vld [vmem:[#allocation315_spill] sm:$0xff] }
 0x5ee   :  { %v17238_v0 = vsel %vm5112_vm5, %v21193_v8, %v21192_v6  ;;  %v1731_v4 = vld [vmem:[#allocation2 + $0x2c2] sm:$0xff]  ;;  %v7721_v47 = vrot.slane %v7713_v45, %v20911_v54  ;;  %v6483_v55 = vcombine.high %v5558_v10, %v5558_v10  ;;  %v6490_v53 = vrot.slane %v5558_v10, %v20911_v54  ;;  %4299 = vrot.lane.b32.xlu0 %v1633_v23, %s13032_s30  ;;  %v21200_v31 = vld [vmem:[#allocation317_spill] sm:$0xff]  ;;  %v21201_v10 = vld [vmem:[#allocation318_spill] sm:$0xff] }
 0x5ef   :  { %21194 = vst [vmem:[#allocation146_spill] sm:$0xff] %v17238_v0  ;;  %4687 = vrot.lane.b32.xlu1 %v1731_v4, %s13033_s6  ;;  %v17250_v6 = vsel %vm5112_vm5, %v21196_v5, %v21195_v29  ;;  %v5169_v34 = vsel %vm5112_vm5, %v16590_v62, %v21198_v63  ;;  %v21199_v41 = vld [vmem:[#allocation316_spill] sm:$0xff]  ;;  %v7738_v45 = vrot.slane %v7730_v36, %v20911_v54  ;;  %v21202_v29 = vld [vmem:[#allocation319_spill] sm:$0xff]  ;;  %v4272_v5 = vpop.permute.xlu1 %4271  ;;  %v4268_v63 = vpop.permute.xlu0 %4267 }
 0x5f0   :  { %21197 = vst [vmem:[#allocation147_spill] sm:$0xff] %v17250_v6  ;;  %v5172_v2 = vsel %vm5112_vm5, %v16595_v13, %v21199_v41  ;;  %v5171_v8 = vsel %vm5112_vm5, %v16616_v30, %v21200_v31  ;;  %v17266_v4 = vsel %vm5112_vm5, %v16655_v37, %v21201_v10  ;;  %v5173_v62 = vsel %vm5112_vm5, %v16660_v16, %v21202_v29  ;;  %v1637_v6 = vld [vmem:[#allocation2 + $0x2d1] sm:$0xff]  ;;  %v21203_v38 = vld [vmem:[#allocation320_spill] sm:$0xff]  ;;  %v21204_v37 = vld [vmem:[#allocation411_spill] sm:$0xff] }
 0x5f1   :  { %v7729_v13 = vcombine.low %v7721_v47, %v7728_v43  ;;  %v6475_v41 = vcombine.high %v6473_v27, %v6473_v27  ;;  %v6497_v36 = vrot.slane %v6483_v55, %v20911_v54  ;;  %v6498_v23 = vcombine.high %v6490_v53, %v6490_v53  ;;  %v21205_v10 = vld [vmem:[#allocation413_spill] sm:$0xff]  ;;  %v21207_v55 = vld [vmem:[#allocation507_spill] sm:$0xff] }
 0x5f2   :  { %v7746_v0 = vcombine.low %v7738_v45, %v7745_v7  ;;  %v17275_v30 = vsel %vm5112_vm5, %v16671_v22, %v21203_v38  ;;  %v5266_v31 = vsel %vm5209_vm6, %v5169_v34, %v21204_v37  ;;  %v5268_v16 = vsel %vm5209_vm6, %v5171_v8, %v21205_v10  ;;  %v1571_v43 = vld [vmem:[#allocation2 + $0x91] sm:$0xff]  ;;  %v21210_v8 = vld [vmem:[#allocation323_spill] sm:$0xff] }
 0x5f3   :  { %4307 = vrot.lane.b32.xlu1 %v1637_v6, %s13032_s30  ;;  %12884 = vmatprep.mubr.msk.f32.mxu1 %vm8311_vm10, %v7729_v13  ;;  %v21206_v47 = vld [vmem:[#allocation321_spill] sm:$0xff]  ;;  %v5363_v22 = vsel %vm5306_vm8, %v5266_v31, %v21207_v55  ;;  %v21209_v34 = vld [vmem:[#allocation322_spill] sm:$0xff]  ;;  %v4652_v37 = vpop.permute.xlu1 %4651  ;;  %v4648_v31 = vpop.permute.xlu0 %4647  ;;  %v6499_v55 = vcombine.high %v6497_v36, %v6497_v36 }
 0x5f4   :  { %v17286_v7 = vsel %vm5112_vm5, %v16676_v48, %v21206_v47  ;;  %v21208_v38 = vld [vmem:[#allocation509_spill] sm:$0xff]  ;;  %4175 = vrot.lane.b32.xlu0 %v1571_v43, %s13032_s30  ;;  %12885 = vmatmul.mubr.msk.f32.gmra.mrb[18].mxu1 %vm8311_vm10, %v7746_v0  ;;  %v17297_v6 = vsel %vm5112_vm5, %v16686_v11, %v21209_v34  ;;  %v17302_v48 = vsel %vm5112_vm5, %v16701_v40, %v21210_v8  ;;  %v1665_v11 = vld [vmem:[#allocation2 + $0x82] sm:$0xff] }
 0x5f5   :  { %v5365_v45 = vsel %vm5306_vm8, %v5268_v16, %v21208_v38  ;;  %v5460_v29 = vsel %vm5403_vm7, %v5363_v22, %v4264_v9  ;;  %v1663_v10 = vld [vmem:[#allocation2 + $0x72] sm:$0x3]  ;;  %v7747_v16 = vcombine.low %v6473_v27, %v6475_v41  ;;  %v7764_v43 = vcombine.low %v6498_v23, %v6497_v36  ;;  %v21211_v9 = vld [vmem:[#allocation324_spill] sm:$0xff]  ;;  %v21213_v23 = vld [vmem:[#allocation326_spill] sm:$0xff] }
 0x5f6   :  { %v5462_v13 = vsel %vm5403_vm7, %v5365_v45, %v4268_v63  ;;  %v5557_v47 = vsel %vm5500_vm9, %v5460_v29, %v4648_v31  ;;  %v17314_v63 = vsel %vm5112_vm5, %v16706_v57, %v21211_v9  ;;  %v21212_v27 = vld [vmem:[#allocation325_spill] sm:$0xff]  ;;  %v17324_v36 = vsel %vm5112_vm5, %v16723_v20, %v21213_v23  ;;  %v21214_v22 = vld [vmem:[#allocation415_spill] sm:$0xff]  ;;  %v21215_v8 = vld [vmem:[#allocation412_spill] sm:$0xff] }
 0x5f7   :  { %v5559_v0 = vsel %vm5500_vm9, %v5462_v13, %v4652_v37  ;;  %v6482_v40 = vrot.slane %v5557_v47, %v20911_v54  ;;  %4555 = vrot.lane.b32.xlu1 %v1665_v11, %s13033_s6  ;;  %v17319_v41 = vsel %vm5112_vm5, %v16718_v49, %v21212_v27  ;;  %v5270_v45 = vsel %vm5209_vm6, %v5173_v62, %v21214_v22  ;;  %v21216_v57 = vld [vmem:[#allocation512_spill] sm:$0xff]  ;;  %v4270_v49 = vpop.permute.xlu1 %4269  ;;  %v4656_v9 = vpop.permute.xlu0 %4655 }
 0x5f8   :  { %v6500_v38 = vcombine.high %v5559_v0, %v5559_v0  ;;  %v6507_v34 = vrot.slane %v5559_v0, %v20911_v54  ;;  %4551 = vrot.lane.b32.xlu0 %v1663_v10, %s13033_s6  ;;  %v5269_v29 = vsel %vm5209_vm6, %v5172_v2, %v21215_v8  ;;  %v5367_v13 = vsel %vm5306_vm8, %v5270_v45, %v21216_v57  ;;  %v1729_v0 = vld [vmem:[#allocation2 + $0x2b2] sm:$0x3] }
 0x5f9   :  { %v7748_v31 = vcombine.low %v6482_v40, %v6490_v53  ;;  %v7755_v47 = vrot.slane %v7747_v16, %v20911_v54  ;;  %v7772_v20 = vrot.slane %v7764_v43, %v20911_v54  ;;  %v5464_v11 = vsel %vm5403_vm7, %v5367_v13, %v4272_v5  ;;  %v1667_v10 = vld [vmem:[#allocation2 + $0x92] sm:$0xff]  ;;  %v21217_v53 = vld [vmem:[#allocation327_spill] sm:$0xff]  ;;  %v21218_v43 = vld [vmem:[#allocation508_spill] sm:$0xff] }
 0x5fa   :  { %v7765_v37 = vcombine.low %v6499_v55, %v6507_v34  ;;  %v6514_v62 = vrot.slane %v6500_v38, %v20911_v54  ;;  %v6515_v27 = vcombine.high %v6507_v34, %v6507_v34  ;;  %v5561_v55 = vsel %vm5500_vm9, %v5464_v11, %v4656_v9  ;;  %v21219_v34 = vld [vmem:[#allocation328_spill] sm:$0xff]  ;;  %v1638_v9 = vld [vmem:[#allocation2 + $0x2d9] sm:$0xff] }
 0x5fb   :  { %v7762_v23 = vrot.slane %v7748_v31, %v20911_v54  ;;  %4559 = vrot.lane.b32.xlu1 %v1667_v10, %s13033_s6  ;;  %v17344_v16 = vsel %vm5112_vm5, %v16745_v17, %v21217_v53  ;;  %v5366_v5 = vsel %vm5306_vm8, %v5269_v29, %v21218_v43  ;;  %v6524_v38 = vcombine.high %v5561_v55, %v5561_v55  ;;  %v4654_v8 = vpop.permute.xlu1 %4653  ;;  %v21220_v17 = vld [vmem:[#allocation329_spill] sm:$0xff]  ;;  %v4274_v11 = vpop.permute.xlu0 %4273  ;;  %v21224_v43 = vld [vmem:[#allocation511_spill] sm:$0xff] }
 0x5fc   :  { %v7779_v2 = vrot.slane %v7765_v37, %v20911_v54  ;;  %v6531_v40 = vrot.slane %v5561_v55, %v20911_v54  ;;  %4683 = vrot.lane.b32.xlu0 %v1729_v0, %s13033_s6  ;;  %v17353_v22 = vsel %vm5112_vm5, %v16750_v59, %v21219_v34  ;;  %v5463_v45 = vsel %vm5403_vm7, %v5366_v5, %v4270_v49  ;;  %v1733_v49 = vld [vmem:[#allocation2 + $0x2d2] sm:$0xff]  ;;  %v21225_v34 = vld [vmem:[#allocation332_spill] sm:$0xff] }
 0x5fd   :  { %v7763_v57 = vcombine.low %v7755_v47, %v7762_v23  ;;  %v17359_v37 = vsel %vm5112_vm5, %v16755_v25, %v21220_v17  ;;  %v6538_v29 = vrot.slane %v6524_v38, %v20911_v54  ;;  %v5560_v0 = vsel %vm5500_vm9, %v5463_v45, %v4654_v8  ;;  %v21221_v47 = vld [vmem:[#allocation414_spill] sm:$0xff]  ;;  %v21226_v8 = vld [vmem:[#allocation333_spill] sm:$0xff] }
 0x5fe   :  { %v7780_v13 = vcombine.low %v7772_v20, %v7779_v2  ;;  %v6539_v31 = vcombine.high %v6531_v40, %v6531_v40  ;;  %v7781_v10 = vcombine.low %v6515_v27, %v6514_v62  ;;  %v6516_v59 = vcombine.high %v6514_v62, %v6514_v62  ;;  %v21222_v23 = vld [vmem:[#allocation330_spill] sm:$0xff]  ;;  %v21223_v27 = vld [vmem:[#allocation331_spill] sm:$0xff] }
 0x5ff   :  { %v6523_v55 = vrot.slane %v5560_v0, %v20911_v54  ;;  %4309 = vrot.lane.b32.xlu1 %v1638_v9, %s13032_s30  ;;  %12887 = vmatprep.mubr.msk.f32.mxu1 %vm8311_vm10, %v7763_v57  ;;  %v5271_v25 = vsel %vm5209_vm6, %v17266_v4, %v21221_v47  ;;  %v6540_v20 = vcombine.high %v6538_v29, %v6538_v29  ;;  %v4278_v38 = vpop.permute.xlu1 %4277  ;;  %v1572_v17 = vld [vmem:[#allocation2 + $0x99] sm:$0xff] }
 0x600   :  { %v7798_v2 = vcombine.low %v6531_v40, %v6539_v31  ;;  %4691 = vrot.lane.b32.xlu0 %v1733_v49, %s13033_s6  ;;  %12888 = vmatmul.mubr.msk.f32.gmra.mrb[20].mxu1 %vm8311_vm10, %v7780_v13  ;;  %v17374_v62 = vsel %vm5112_vm5, %v16763_v21, %v21222_v23  ;;  %v17379_v53 = vsel %vm5112_vm5, %v16768_v15, %v21223_v27  ;;  %v1570_v40 = vld [vmem:[#allocation2 + $0x89] sm:$0x3]  ;;  %v4658_v13 = vpop.permute.xlu0 %4657  ;;  %v21228_v49 = vld [vmem:[#allocation334_spill] sm:$0xff] }
 0x601   :  { %v5368_v5 = vsel %vm5306_vm8, %v5271_v25, %v21224_v43  ;;  %v7782_v4 = vcombine.low %v6516_v59, %v6523_v55  ;;  %v17386_v45 = vsel %vm5112_vm5, %v16781_v3, %v21225_v34  ;;  %v17391_v21 = vsel %vm5112_vm5, %v16796_v28, %v21226_v8  ;;  %v21227_v31 = vld [vmem:[#allocation416_spill] sm:$0xff]  ;;  %v21230_v25 = vld [vmem:[#allocation513_spill] sm:$0xff]  ;;  %v1734_v34 = vld [vmem:[#allocation2 + $0x2da] sm:$0xff] }
 0x602   :  { %v7799_v57 = vcombine.low %v6538_v29, %v6540_v20  ;;  %v5465_v15 = vsel %vm5403_vm7, %v5368_v5, %v4274_v11  ;;  %v5273_v0 = vsel %vm5209_vm6, %v17275_v30, %v21227_v31  ;;  %v7789_v9 = vrot.slane %v7781_v10, %v20911_v54  ;;  %v21229_v10 = vld [vmem:[#allocation335_spill] sm:$0xff]  ;;  %v1636_v23 = vld [vmem:[#allocation2 + $0x2c9] sm:$0x3] }
 0x603   :  { %v7796_v59 = vrot.slane %v7782_v4, %v20911_v54  ;;  %v5562_v3 = vsel %vm5500_vm9, %v5465_v15, %v4658_v13  ;;  %4177 = vrot.lane.b32.xlu1 %v1572_v17, %s13032_s30  ;;  %v7806_v28 = vrot.slane %v7798_v2, %v20911_v54  ;;  %v17408_v30 = vsel %vm5112_vm5, %v16807_v19, %v21228_v49  ;;  %v4276_v2 = vpop.permute.xlu1 %4275  ;;  %v21231_v8 = vld [vmem:[#allocation336_spill] sm:$0xff] }
 0x604   :  { %v7813_v29 = vrot.slane %v7799_v57, %v20911_v54  ;;  %v6541_v55 = vcombine.high %v5562_v3, %v5562_v3  ;;  %v6548_v11 = vrot.slane %v5562_v3, %v20911_v54  ;;  %4173 = vrot.lane.b32.xlu0 %v1570_v40, %s13032_s30  ;;  %v17413_v47 = vsel %vm5112_vm5, %v16812_v35, %v21229_v10  ;;  %v4662_v40 = vpop.permute.xlu0 %4661  ;;  %v21232_v35 = vld [vmem:[#allocation417_spill] sm:$0xff] }
 0x605   :  { %v5370_v20 = vsel %vm5306_vm8, %v5273_v0, %v21230_v25  ;;  %v7797_v27 = vcombine.low %v7789_v9, %v7796_v59  ;;  %v17422_v57 = vsel %vm5112_vm5, %v16817_v1, %v21231_v8  ;;  %v5272_v15 = vsel %vm5209_vm6, %v17286_v7, %v21232_v35  ;;  %v1666_v9 = vld [vmem:[#allocation2 + $0x8a] sm:$0x3]  ;;  %v21233_v1 = vld [vmem:[#allocation337_spill] sm:$0xff]  ;;  %v21234_v7 = vld [vmem:[#allocation338_spill] sm:$0xff] }
 0x606   :  { %v5467_v43 = vsel %vm5403_vm7, %v5370_v20, %v4278_v38  ;;  %v6555_v5 = vrot.slane %v6541_v55, %v20911_v54  ;;  %v6556_v4 = vcombine.high %v6548_v11, %v6548_v11  ;;  %v7814_v19 = vcombine.low %v7806_v28, %v7813_v29  ;;  %v21235_v28 = vld [vmem:[#allocation339_spill] sm:$0xff]  ;;  %v21236_v55 = vld [vmem:[#allocation514_spill] sm:$0xff]  ;;  %v1732_v35 = vld [vmem:[#allocation2 + $0x2ca] sm:$0x3] }
 0x607   :  { %v5564_v13 = vsel %vm5500_vm9, %v5467_v43, %v4662_v40  ;;  %4693 = vrot.lane.b32.xlu1 %v1734_v34, %s13033_s6  ;;  %12890 = vmatprep.mubr.msk.f32.mxu1 %vm8311_vm10, %v7797_v27  ;;  %v17435_v59 = vsel %vm5112_vm5, %v16825_v39, %v21233_v1  ;;  %v17440_v3 = vsel %vm5112_vm5, %v16830_v60, %v21234_v7  ;;  %v4660_v49 = vpop.permute.xlu1 %4659  ;;  %v21237_v60 = vld [vmem:[#allocation340_spill] sm:$0xff]  ;;  %v21240_v34 = vld [vmem:[#allocation419_spill] sm:$0xff]  ;;  %v21244_v1 = vld [vmem:[#allocation345_spill] sm:$0xff] }
 0x608   :  { %v6557_v38 = vcombine.high %v6555_v5, %v6555_v5  ;;  %v7815_v17 = vcombine.low %v6548_v11, %v6556_v4  ;;  %v6565_v31 = vcombine.high %v5564_v13, %v5564_v13  ;;  %v6572_v0 = vrot.slane %v5564_v13, %v20911_v54  ;;  %4305 = vrot.lane.b32.xlu0 %v1636_v23, %s13032_s30  ;;  %v4280_v23 = vpop.permute.xlu0 %4279  ;;  %v21239_v4 = vld [vmem:[#allocation342_spill] sm:$0xff]  ;;  %v1640_v40 = vld [vmem:[#allocation2 + $0x2e9] sm:$0xff] }
 0x609   :  { %v17445_v29 = vsel %vm5112_vm5, %v16837_v61, %v21235_v28  ;;  %v5369_v11 = vsel %vm5306_vm8, %v5272_v15, %v21236_v55  ;;  %12891 = vmatmul.mubr.msk.f32.gmra.mrb[22].mxu1 %vm8311_vm10, %v7814_v19  ;;  %v17455_v27 = vsel %vm5112_vm5, %v16842_v14, %v21237_v60  ;;  %v21238_v61 = vld [vmem:[#allocation341_spill] sm:$0xff]  ;;  %v5274_v14 = vsel %vm5209_vm6, %v17302_v48, %v21240_v34  ;;  %v21242_v13 = vld [vmem:[#allocation344_spill] sm:$0xff] }
 0x60a   :  { %v7816_v10 = vcombine.low %v6555_v5, %v6557_v38  ;;  %v5466_v39 = vsel %vm5403_vm7, %v5369_v11, %v4276_v2  ;;  %v6579_v25 = vrot.slane %v6565_v31, %v20911_v54  ;;  %v6580_v20 = vcombine.high %v6572_v0, %v6572_v0  ;;  %v21243_v48 = vld [vmem:[#allocation516_spill] sm:$0xff] }
 0x60b   :  { %v17460_v43 = vsel %vm5112_vm5, %v16852_v58, %v21238_v61  ;;  %v17465_v5 = vsel %vm5112_vm5, %v16857_v26, %v21239_v4  ;;  %v5563_v2 = vsel %vm5500_vm9, %v5466_v39, %v4660_v49  ;;  %4557 = vrot.lane.b32.xlu1 %v1666_v9, %s13033_s6  ;;  %v7823_v19 = vrot.slane %v7815_v17, %v20911_v54  ;;  %v21241_v26 = vld [vmem:[#allocation343_spill] sm:$0xff]  ;;  %v4284_v9 = vpop.permute.xlu1 %4283  ;;  %v21245_v49 = vld [vmem:[#allocation346_spill] sm:$0xff] }
 0x60c   :  { %v7830_v8 = vrot.slane %v7816_v10, %v20911_v54  ;;  %v6564_v58 = vrot.slane %v5563_v2, %v20911_v54  ;;  %4313 = vrot.lane.b32.xlu0 %v1640_v40, %s13032_s30  ;;  %v17479_v15 = vsel %vm5112_vm5, %v16862_v18, %v21241_v26  ;;  %v17484_v38 = vsel %vm5112_vm5, %v16867_v42, %v21242_v13  ;;  %v4664_v18 = vpop.permute.xlu0 %4663  ;;  %v21246_v10 = vld [vmem:[#allocation421_spill] sm:$0xff] }
 0x60d   :  { %v5371_v17 = vsel %vm5306_vm8, %v5274_v14, %v21243_v48  ;;  %v7833_v31 = vcombine.low %v6580_v20, %v6579_v25  ;;  %v17491_v7 = vsel %vm5112_vm5, %v16877_v46, %v21244_v1  ;;  %v17497_v42 = vsel %vm5112_vm5, %v16891_v50, %v21245_v49  ;;  %v1668_v46 = vld [vmem:[#allocation2 + $0x9a] sm:$0xff]  ;;  %v21250_v40 = vld [vmem:[#allocation9_spill] sm:$0xff] }
 0x60e   :  { %v7832_v28 = vcombine.low %v6564_v58, %v6572_v0  ;;  %v5468_v55 = vsel %vm5403_vm7, %v5371_v17, %v4280_v23  ;;  %v7831_v11 = vcombine.low %v7823_v19, %v7830_v8  ;;  %v5276_v39 = vsel %vm5209_vm6, %v17319_v41, %v21246_v10  ;;  %v21247_v50 = vld [vmem:[#allocation347_spill] sm:$0xff]  ;;  %v21248_v41 = vld [vmem:[#allocation348_spill] sm:$0xff]  ;;  %v21251_v48 = vld [vmem:[#allocation349_spill] sm:$0xff] }
 0x60f   :  { %v6581_v20 = vcombine.high %v6579_v25, %v6579_v25  ;;  %v5565_v60 = vsel %vm5500_vm9, %v5468_v55, %v4664_v18  ;;  %4689 = vrot.lane.b32.xlu1 %v1732_v35, %s13033_s6  ;;  %v17511_v4 = vsel %vm5112_vm5, %v16896_v24, %v21247_v50  ;;  %v21249_v25 = vld [vmem:[#allocation4_spill] sm:$0xff]  ;;  %v5373_v34 = vsel %vm5306_vm8, %v5276_v39, %v21250_v40  ;;  %v4668_v19 = vpop.permute.xlu1 %4667  ;;  %v21252_v17 = vld [vmem:[#allocation125_spill] sm:$0xff] }
 0x610   :  { %v7840_v0 = vrot.slane %v7832_v28, %v20911_v54  ;;  %v6582_v23 = vcombine.high %v5565_v60, %v5565_v60  ;;  %v6589_v61 = vrot.slane %v5565_v60, %v20911_v54  ;;  %4561 = vrot.lane.b32.xlu0 %v1668_v46, %s13033_s6  ;;  %12893 = vmatprep.mubr.msk.f32.mxu1 %vm8311_vm10, %v7831_v11  ;;  %v4152_v24 = vpop.permute.xlu0 %4151  ;;  %v1574_v13 = vld [vmem:[#allocation2 + $0xa9] sm:$0xff]  ;;  %v21253_v28 = vld [vmem:[#allocation350_spill] sm:$0xff]  ;;  %v21254_v11 = vld [vmem:[#allocation351_spill] sm:$0xff] }
 0x611   :  { %v17516_v2 = vsel %vm5112_vm5, %v21249_v25, %v21248_v41  ;;  %v7847_v14 = vrot.slane %v7833_v31, %v20911_v54  ;;  %v5470_v8 = vsel %vm5403_vm7, %v5373_v34, %v4284_v9  ;;  %v17528_v1 = vsel %vm5112_vm5, %v21252_v17, %v21251_v48  ;;  %v1736_v9 = vld [vmem:[#allocation2 + $0x2ea] sm:$0xff]  ;;  %v21262_v25 = vld [vmem:[#allocation355_spill] sm:$0xff] }
 0x612   :  { %v17523_v58 = vrot.slane %v6582_v23, %v20911_v54  ;;  %v6597_v35 = vcombine.high %v6589_v61, %v6589_v61  ;;  %v7849_v26 = vcombine.low %v6581_v20, %v6589_v61  ;;  %v17533_v55 = vsel %vm5112_vm5, %v16935_v32, %v21253_v28  ;;  %v21255_v49 = vld [vmem:[#allocation5_spill] sm:$0xff]  ;;  %v21256_v39 = vld [vmem:[#allocation352_spill] sm:$0xff]  ;;  %v21257_v20 = vld [vmem:[#allocation126_spill] sm:$0xff] }
 0x613   :  { %v5567_v31 = vsel %vm5500_vm9, %v5470_v8, %v4668_v19  ;;  %4181 = vrot.lane.b32.xlu1 %v1574_v13, %s13032_s30  ;;  %v7848_v18 = vcombine.low %v7840_v0, %v7847_v14  ;;  %v17540_v10 = vsel %vm5112_vm5, %v21255_v49, %v21254_v11  ;;  %v17545_v60 = vsel %vm5112_vm5, %v21257_v20, %v21256_v39  ;;  %v21258_v46 = vld [vmem:[#allocation353_spill] sm:$0xff]  ;;  %v21259_v23 = vld [vmem:[#allocation127_spill] sm:$0xff]  ;;  %v21260_v0 = vld [vmem:[#allocation354_spill] sm:$0xff] }
 0x614   :  { %v17550_v32 = vsel %vm5112_vm5, %v21259_v23, %v21258_v46  ;;  %v7850_v61 = vcombine.low %v6597_v35, %v17523_v58  ;;  %4697 = vrot.lane.b32.xlu0 %v1736_v9, %s13033_s6  ;;  %v21261_v50 = vld [vmem:[#allocation128_spill] sm:$0xff]  ;;  %v21263_v40 = vld [vmem:[#allocation129_spill] sm:$0xff]  ;;  %v21265_v19 = vld [vmem:[#allocation130_spill] sm:$0xff]  ;;  %v4282_v35 = vpop.permute.xlu1 %4281  ;;  %v7857_v49 = vrot.slane %v7849_v26, %v20911_v54  ;;  %v6613_v20 = vrot.slane %v5567_v31, %v20911_v54  ;;  %v4154_v46 = vpop.permute.xlu0 %4153 }
 0x615   :  { %v5211_v41 = vsel %vm5209_vm6, %v21261_v50, %v21260_v0  ;;  %v5210_v34 = vsel %vm5209_vm6, %v21263_v40, %v21262_v25  ;;  %v21264_v14 = vld [vmem:[#allocation356_spill] sm:$0xff]  ;;  %v21266_v13 = vld [vmem:[#allocation357_spill] sm:$0xff]  ;;  %12894 = vmatmul.mubr.msk.f32.gmra.mrb[24].mxu1 %vm8311_vm10, %v7848_v18  ;;  %v1639_v17 = vld [vmem:[#allocation2 + $0x2e1] sm:$0x3] }
 0x616   :  { %v17563_v8 = vsel %vm5209_vm6, %v21265_v19, %v21264_v14  ;;  %v17568_v48 = vsel %vm5209_vm6, %v17000_v51, %v21266_v13  ;;  %v21267_v28 = vld [vmem:[#allocation358_spill] sm:$0xff]  ;;  %v21268_v9 = vld [vmem:[#allocation131_spill] sm:$0xff]  ;;  %v7864_v39 = vrot.slane %v7850_v61, %v20911_v54  ;;  %v21271_v51 = vld [vmem:[#allocation132_spill] sm:$0xff] }
 0x617   :  { %v17574_v11 = vsel %vm5209_vm6, %v21268_v9, %v21267_v28  ;;  %v1641_v23 = vld [vmem:[#allocation2 + $0x2f1] sm:$0xff]  ;;  %v21270_v0 = vld [vmem:[#allocation359_spill] sm:$0xff]  ;;  %v21272_v18 = vld [vmem:[#allocation360_spill] sm:$0xff] }
 0x618   :  { %21269 = vst [vmem:[#allocation148_spill] sm:$0xff] %v17574_v11  ;;  %v17582_v50 = vsel %vm5209_vm6, %v21271_v51, %v21270_v0  ;;  %v21273_v25 = vld [vmem:[#allocation133_spill] sm:$0xff]  ;;  %v21277_v61 = vld [vmem:[#allocation362_spill] sm:$0xff]  ;;  %4315 = vrot.lane.b32.xlu1 %v1641_v23, %s13032_s30  ;;  %v21280_v28 = vld [vmem:[#allocation363_spill] sm:$0xff]  ;;  %4311 = vrot.lane.b32.xlu0 %v1639_v17, %s13032_s30 }
 0x619   :  { %v17587_v40 = vsel %vm5209_vm6, %v21273_v25, %v21272_v18  ;;  %v21275_v14 = vld [vmem:[#allocation361_spill] sm:$0xff]  ;;  %v21278_v19 = vld [vmem:[#allocation134_spill] sm:$0xff]  ;;  %v21281_v9 = vld [vmem:[#allocation135_spill] sm:$0xff] }
 0x61a   :  { %21274 = vst [vmem:[#allocation149_spill] sm:$0xff] %v17587_v40  ;;  %v17592_v26 = vsel %vm5209_vm6, %v17060_v33, %v21275_v14  ;;  %v17597_v13 = vsel %vm5209_vm6, %v21278_v19, %v21277_v61  ;;  %v17603_v0 = vsel %vm5209_vm6, %v21281_v9, %v21280_v28  ;;  %v21283_v51 = vld [vmem:[#allocation364_spill] sm:$0xff]  ;;  %v21284_v18 = vld [vmem:[#allocation7_spill] sm:$0xff]  ;;  %v7865_v14 = vcombine.low %v7857_v49, %v7864_v39  ;;  %v21287_v19 = vld [vmem:[#allocation365_spill] sm:$0xff] }
 0x61b   :  { %21276 = vst [vmem:[#allocation150_spill] sm:$0xff] %v17592_v26  ;;  %21279 = vst [vmem:[#allocation151_spill] sm:$0xff] %v17597_v13  ;;  %v17608_v25 = vsel %vm5209_vm6, %v21284_v18, %v21283_v51  ;;  %v21286_v40 = vld [vmem:[#allocation451_spill] sm:$0xff]  ;;  %v21288_v13 = vld [vmem:[#allocation136_spill] sm:$0xff]  ;;  %v4536_v18 = vpop.permute.xlu1 %4535 }
 0x61c   :  { %21282 = vst [vmem:[#allocation152_spill] sm:$0xff] %v17603_v0  ;;  %21285 = vst [vmem:[#allocation153_spill] sm:$0xff] %v17608_v25  ;;  %v5307_v33 = vsel %vm5306_vm8, %v5210_v34, %v21286_v40  ;;  %v1573_v61 = vld [vmem:[#allocation2 + $0xa1] sm:$0x3]  ;;  %v17616_v23 = vsel %vm5209_vm6, %v21288_v13, %v21287_v19  ;;  %v21290_v26 = vld [vmem:[#allocation366_spill] sm:$0xff]  ;;  %v6606_v0 = vcombine.high %v5567_v31, %v5567_v31  ;;  %12896 = vmatprep.mubr.msk.f32.mxu1 %vm8311_vm10, %v7865_v14 }
 0x61d   :  { %21289 = vst [vmem:[#allocation154_spill] sm:$0xff] %v17616_v23  ;;  %v21291_v28 = vld [vmem:[#allocation6_spill] sm:$0xff]  ;;  %v5404_v51 = vsel %vm5403_vm7, %v5307_v33, %v4152_v24  ;;  %v21293_v25 = vld [vmem:[#allocation367_spill] sm:$0xff]  ;;  %v21294_v34 = vld [vmem:[#allocation137_spill] sm:$0xff]  ;;  %v6621_v13 = vcombine.high %v6613_v20, %v6613_v20  ;;  %4179 = vrot.lane.b32.xlu1 %v1573_v61, %s13032_s30 }
 0x61e   :  { %v17621_v9 = vsel %vm5209_vm6, %v21291_v28, %v21290_v26  ;;  %v17627_v17 = vsel %vm5209_vm6, %v21294_v34, %v21293_v25  ;;  %v21296_v49 = vld [vmem:[#allocation368_spill] sm:$0xff]  ;;  %v21297_v39 = vld [vmem:[#allocation138_spill] sm:$0xff]  ;;  %v5501_v19 = vsel %vm5500_vm9, %v5404_v51, %v4536_v18  ;;  %v4286_v26 = vpop.permute.xlu0 %4285  ;;  %v21299_v31 = vld [vmem:[#allocation369_spill] sm:$0xff] }
 0x61f   :  { %21292 = vst [vmem:[#allocation155_spill] sm:$0xff] %v17621_v9  ;;  %21295 = vst [vmem:[#allocation156_spill] sm:$0xff] %v17627_v17  ;;  %v17632_v40 = vsel %vm5209_vm6, %v21297_v39, %v21296_v49  ;;  %v21300_v28 = vld [vmem:[#allocation139_spill] sm:$0xff]  ;;  %v21302_v33 = vld [vmem:[#allocation418_spill] sm:$0xff]  ;;  %v5704_v34 = vcombine.high %v5501_v19, %v5501_v19  ;;  %v5711_v17 = vrot.slane %v5501_v19, %v20911_v54 }
 0x620   :  { %21298 = vst [vmem:[#allocation157_spill] sm:$0xff] %v17632_v40  ;;  %v17639_v24 = vsel %vm5209_vm6, %v21300_v28, %v21299_v31  ;;  %v5275_v25 = vsel %vm5209_vm6, %v17297_v6, %v21302_v33  ;;  %v1670_v49 = vld [vmem:[#allocation2 + $0xaa] sm:$0xff]  ;;  %v21303_v39 = vld [vmem:[#allocation370_spill] sm:$0xff]  ;;  %v21306_v18 = vld [vmem:[#allocation371_spill] sm:$0xff]  ;;  %v6620_v19 = vrot.slane %v6606_v0, %v20911_v54  ;;  %v7867_v23 = vcombine.low %v6613_v20, %v6621_v13 }
 0x621   :  { %21301 = vst [vmem:[#allocation158_spill] sm:$0xff] %v17639_v24  ;;  %v21304_v51 = vld [vmem:[#allocation140_spill] sm:$0xff]  ;;  %v21307_v40 = vld [vmem:[#allocation141_spill] sm:$0xff]  ;;  %v21309_v28 = vld [vmem:[#allocation450_spill] sm:$0xff]  ;;  %4565 = vrot.lane.b32.xlu0 %v1670_v49, %s13033_s6 }
 0x622   :  { %v17649_v14 = vsel %vm5209_vm6, %v21304_v51, %v21303_v39  ;;  %v17654_v31 = vsel %vm5209_vm6, %v21307_v40, %v21306_v18  ;;  %v5308_v24 = vsel %vm5306_vm8, %v5211_v41, %v21309_v28  ;;  %v21310_v6 = vld [vmem:[#allocation515_spill] sm:$0xff]  ;;  %v5718_v39 = vrot.slane %v5704_v34, %v20911_v54  ;;  %v21311_v34 = vld [vmem:[#allocation372_spill] sm:$0xff] }
 0x623   :  { %21305 = vst [vmem:[#allocation159_spill] sm:$0xff] %v17649_v14  ;;  %21308 = vst [vmem:[#allocation160_spill] sm:$0xff] %v17654_v31  ;;  %v5372_v33 = vsel %vm5306_vm8, %v5275_v25, %v21310_v6  ;;  %v1643_v61 = vld [vmem:[#allocation2 + $0x301] sm:$0xff]  ;;  %v5719_v51 = vcombine.high %v5711_v17, %v5711_v17  ;;  %v4666_v14 = vpop.permute.xlu1 %4665  ;;  %v5405_v40 = vsel %vm5403_vm7, %v5308_v24, %v4154_v46  ;;  %v4538_v25 = vpop.permute.xlu0 %4537 }
 0x624   :  { %v5469_v9 = vsel %vm5403_vm7, %v5372_v33, %v4282_v35  ;;  %v6598_v41 = vcombine.high %v17523_v58, %v17523_v58  ;;  %v5720_v28 = vcombine.high %v5718_v39, %v5718_v39  ;;  %v5502_v0 = vsel %vm5500_vm9, %v5405_v40, %v4538_v25  ;;  %4319 = vrot.lane.b32.xlu1 %v1643_v61, %s13032_s30  ;;  %v1575_v35 = vld [vmem:[#allocation2 + $0xb1] sm:$0xff]  ;;  %v21314_v46 = vld [vmem:[#allocation420_spill] sm:$0xff] }
 0x625   :  { %v5566_v18 = vsel %vm5500_vm9, %v5469_v9, %v4666_v14  ;;  %v7033_v49 = vcombine.low %v5711_v17, %v5719_v51  ;;  %v21312_v33 = vld [vmem:[#allocation142_spill] sm:$0xff]  ;;  %v5277_v9 = vsel %vm5209_vm6, %v17314_v63, %v21314_v46  ;;  %v5721_v58 = vcombine.high %v5502_v0, %v5502_v0  ;;  %4183 = vrot.lane.b32.xlu0 %v1575_v35, %s13032_s30  ;;  %v21315_v17 = vld [vmem:[#allocation8_spill] sm:$0xff] }
 0x626   :  { %v6605_v6 = vrot.slane %v5566_v18, %v20911_v54  ;;  %v17674_v20 = vsel %vm5209_vm6, %v21312_v33, %v21311_v34  ;;  %v5728_v13 = vrot.slane %v5502_v0, %v20911_v54  ;;  %v5374_v24 = vsel %vm5306_vm8, %v5277_v9, %v21315_v17  ;;  %v1735_v18 = vld [vmem:[#allocation2 + $0x2e2] sm:$0x3] }
 0x627   :  { %21313 = vst [vmem:[#allocation161_spill] sm:$0xff] %v17674_v20  ;;  %v6622_v14 = vcombine.high %v6620_v19, %v6620_v19  ;;  %v7034_v61 = vcombine.low %v5718_v39, %v5720_v28  ;;  %v4290_v40 = vpop.permute.xlu1 %4289  ;;  %v7881_v25 = vrot.slane %v7867_v23, %v20911_v54  ;;  %v5471_v34 = vsel %vm5403_vm7, %v5374_v24, %v4286_v26  ;;  %v4670_v46 = vpop.permute.xlu0 %4669  ;;  %v1737_v20 = vld [vmem:[#allocation2 + $0x2f2] sm:$0xff]  ;;  %v21320_v24 = vld [vmem:[#allocation144_spill] sm:$0xff] }
 0x628   :  { %v7866_v51 = vcombine.low %v6598_v41, %v6605_v6  ;;  %v5735_v33 = vrot.slane %v5721_v58, %v20911_v54  ;;  %v5736_v63 = vcombine.high %v5728_v13, %v5728_v13  ;;  %v7041_v0 = vrot.slane %v7033_v49, %v20911_v54  ;;  %4699 = vrot.lane.b32.xlu1 %v1737_v20, %s13033_s6  ;;  %v21316_v6 = vld [vmem:[#allocation373_spill] sm:$0xff]  ;;  %v21317_v58 = vld [vmem:[#allocation143_spill] sm:$0xff]  ;;  %v21319_v49 = vld [vmem:[#allocation374_spill] sm:$0xff] }
 0x629   :  { %v7048_v35 = vrot.slane %v7034_v61, %v20911_v54  ;;  %v5568_v39 = vsel %vm5500_vm9, %v5471_v34, %v4670_v46  ;;  %4695 = vrot.lane.b32.xlu0 %v1735_v18, %s13033_s6  ;;  %v17696_v17 = vsel %vm5209_vm6, %v21317_v58, %v21316_v6  ;;  %v17701_v61 = vsel %vm5209_vm6, %v21320_v24, %v21319_v49  ;;  %v1669_v34 = vld [vmem:[#allocation2 + $0xa2] sm:$0x3]  ;;  %v1671_v6 = vld [vmem:[#allocation2 + $0xb2] sm:$0xff] }
 0x62a   :  { %v7874_v9 = vrot.slane %v7866_v51, %v20911_v54  ;;  %v5737_v41 = vcombine.high %v5735_v33, %v5735_v33  ;;  %v7050_v28 = vcombine.low %v5728_v13, %v5736_v63  ;;  %v6623_v23 = vcombine.high %v5568_v39, %v5568_v39  ;;  %21318 = vst [vmem:[#allocation162_spill] sm:$0xff] %v17696_v17  ;;  %v21321_v13 = vld [vmem:[#allocation422_spill] sm:$0xff]  ;;  %v21322_v58 = vld [vmem:[#allocation375_spill] sm:$0xff] }
 0x62b   :  { %v6630_v26 = vrot.slane %v5568_v39, %v20911_v54  ;;  %v4288_v51 = vpop.permute.xlu1 %4287  ;;  %v7049_v20 = vcombine.low %v7041_v0, %v7048_v35  ;;  %v5279_v63 = vsel %vm5209_vm6, %v17324_v36, %v21321_v13  ;;  %v7883_v39 = vcombine.low %v6620_v19, %v6622_v14  ;;  %v17706_v11 = vpop.permute.xlu0 %4157  ;;  %v21323_v49 = vld [vmem:[#allocation10_spill] sm:$0xff]  ;;  %v21325_v0 = vld [vmem:[#allocation377_spill] sm:$0xff]  ;;  %v1577_v13 = vld [vmem:[#allocation2 + $0xc1] sm:$0xff] }
 0x62c   :  { %v7882_v46 = vcombine.low %v7874_v9, %v7881_v25  ;;  %v7051_v18 = vcombine.low %v5735_v33, %v5737_v41  ;;  %v17711_v17 = vsel %vm5209_vm6, %v17202_v56, %v21322_v58  ;;  %v5376_v24 = vsel %vm5306_vm8, %v5279_v63, %v21323_v49  ;;  %4567 = vrot.lane.b32.xlu1 %v1671_v6, %s13033_s6  ;;  %v21324_v56 = vld [vmem:[#allocation376_spill] sm:$0xff]  ;;  %v21326_v9 = vld [vmem:[#allocation423_spill] sm:$0xff]  ;;  %v21327_v63 = vld [vmem:[#allocation378_spill] sm:$0xff] }
 0x62d   :  { %v6638_v31 = vcombine.high %v6630_v26, %v6630_v26  ;;  %v6637_v25 = vrot.slane %v6623_v23, %v20911_v54  ;;  %12824 = vmatprep.mubr.msk.f32.mxu0 %vm8311_vm10, %v7049_v20  ;;  %v7058_v36 = vrot.slane %v7050_v28, %v20911_v54  ;;  %4563 = vrot.lane.b32.xlu0 %v1669_v34, %s13033_s6  ;;  %v1739_v23 = vld [vmem:[#allocation2 + $0x302] sm:$0xff] }
 0x62e   :  { %v7065_v19 = vrot.slane %v7051_v18, %v20911_v54  ;;  %12897 = vmatmul.mubr.msk.f32.gmra.mrb[26].mxu1 %vm8311_vm10, %v7882_v46  ;;  %v17725_v33 = vsel %vm5209_vm6, %v17214_v44, %v21324_v56  ;;  %v17730_v35 = vsel %vm5209_vm6, %v17219_v52, %v21325_v0  ;;  %v5278_v41 = vsel %vm5209_vm6, %v17344_v16, %v21326_v9  ;;  %v21328_v18 = vld [vmem:[#allocation379_spill] sm:$0xff]  ;;  %v21329_v16 = vld [vmem:[#allocation145_spill] sm:$0xff] }
 0x62f   :  { %v7884_v14 = vcombine.low %v6630_v26, %v6638_v31  ;;  %v5473_v31 = vsel %vm5403_vm7, %v5376_v24, %v4290_v40  ;;  %v4674_v28 = vpop.permute.xlu1 %4673  ;;  %v7891_v26 = vrot.slane %v7883_v39, %v20911_v54  ;;  %v4292_v46 = vpop.permute.xlu0 %4291  ;;  %v17742_v52 = vsel %vm5209_vm6, %v17227_v12, %v21327_v63  ;;  %v21330_v6 = vld [vmem:[#allocation11_spill] sm:$0xff]  ;;  %v21333_v0 = vld [vmem:[#allocation381_spill] sm:$0xff] }
 0x630   :  { %v7066_v34 = vcombine.low %v7058_v36, %v7065_v19  ;;  %v5570_v44 = vsel %vm5500_vm9, %v5473_v31, %v4674_v28  ;;  %v17747_v40 = vsel %vm5209_vm6, %v21329_v16, %v21328_v18  ;;  %v5375_v39 = vsel %vm5306_vm8, %v5278_v41, %v21330_v6  ;;  %4187 = vrot.lane.b32.xlu1 %v1577_v13, %s13032_s30  ;;  %v1644_v36 = vld [vmem:[#allocation2 + $0x309] sm:$0xff]  ;;  %v21334_v9 = vld [vmem:[#allocation147_spill] sm:$0xff]  ;;  %v21337_v13 = vld [vmem:[#allocation426_spill] sm:$0xff] }
 0x631   :  { %v7898_v20 = vrot.slane %v7884_v14, %v20911_v54  ;;  %v6639_v58 = vcombine.high %v6637_v25, %v6637_v25  ;;  %v6647_v49 = vcombine.high %v5570_v44, %v5570_v44  ;;  %v6654_v24 = vrot.slane %v5570_v44, %v20911_v54  ;;  %4703 = vrot.lane.b32.xlu0 %v1739_v23, %s13033_s6  ;;  %v21331_v19 = vld [vmem:[#allocation380_spill] sm:$0xff]  ;;  %v21332_v14 = vld [vmem:[#allocation146_spill] sm:$0xff]  ;;  %v21338_v18 = vld [vmem:[#allocation427_spill] sm:$0xff] }
 0x632   :  { %12825 = vmatmul.mubr.msk.f32.vlgmr.msra.gmra.mrb[30].mxu0 %vm8311_vm10, %v7066_v34  ;;  %v17758_v56 = vsel %vm5209_vm6, %v21332_v14, %v21331_v19  ;;  %v17763_v41 = vsel %vm5209_vm6, %v21334_v9, %v21333_v0  ;;  %v21335_v31 = vld [vmem:[#allocation424_spill] sm:$0xff]  ;;  %v5472_v23 = vsel %vm5403_vm7, %v5375_v39, %v4288_v51  ;;  %v17777_v63 = vsel %vm5209_vm6, %v17374_v62, %v21337_v13  ;;  %v21342_v0 = vld [vmem:[#allocation431_spill] sm:$0xff] }
 0x633   :  { %v7899_v12 = vcombine.low %v7891_v26, %v7898_v20  ;;  %v17768_v28 = vsel %vm5209_vm6, %v17353_v22, %v21335_v31  ;;  %v4672_v34 = vpop.permute.xlu1 %4671  ;;  %v1642_v26 = vld [vmem:[#allocation2 + $0x2f9] sm:$0x3]  ;;  %v21336_v20 = vld [vmem:[#allocation425_spill] sm:$0xff]  ;;  %v17782_v16 = vsel %vm5209_vm6, %v17379_v53, %v21338_v18  ;;  %v4542_v51 = vpop.permute.xlu0 %4541  ;;  %v21339_v6 = vld [vmem:[#allocation428_spill] sm:$0xff]  ;;  %v7900_v19 = vcombine.low %v6637_v25, %v6639_v58 }
 0x634   :  { %v5280_v44 = vsel %vm5209_vm6, %v17359_v37, %v21336_v20  ;;  %v5569_v22 = vsel %vm5500_vm9, %v5472_v23, %v4672_v34  ;;  %v17789_v39 = vsel %vm5209_vm6, %v17386_v45, %v21339_v6  ;;  %v21340_v37 = vld [vmem:[#allocation429_spill] sm:$0xff]  ;;  %4321 = vrot.lane.b32.xlu1 %v1644_v36, %s13032_s30  ;;  %v21341_v53 = vld [vmem:[#allocation430_spill] sm:$0xff]  ;;  %v17806_v45 = vsel %vm5209_vm6, %v17413_v47, %v21342_v0  ;;  %v21343_v25 = vld [vmem:[#allocation432_spill] sm:$0xff] }
 0x635   :  { %12899 = vmatprep.mubr.msk.f32.mxu1 %vm8311_vm10, %v7899_v12  ;;  %v17794_v62 = vsel %vm5209_vm6, %v17391_v21, %v21340_v37  ;;  %v6646_v14 = vrot.slane %v5569_v22, %v20911_v54  ;;  %v17801_v12 = vsel %vm5209_vm6, %v17408_v30, %v21341_v53  ;;  %v6661_v9 = vrot.slane %v6647_v49, %v20911_v54  ;;  %v1576_v21 = vld [vmem:[#allocation2 + $0xb9] sm:$0x3]  ;;  %v21344_v36 = vld [vmem:[#allocation433_spill] sm:$0xff]  ;;  %v21345_v23 = vld [vmem:[#allocation23_spill] sm:$0xff] }
 0x636   :  { %v6662_v31 = vcombine.high %v6654_v24, %v6654_v24  ;;  %4317 = vrot.lane.b32.xlu0 %v1642_v26, %s13032_s30  ;;  %v17813_v58 = vsel %vm5209_vm6, %v17422_v57, %v21343_v25  ;;  %v17818_v30 = vsel %vm5209_vm6, %v17435_v59, %v21344_v36  ;;  %v5377_v47 = vsel %vm5306_vm8, %v5280_v44, %v21345_v23  ;;  %v21346_v49 = vld [vmem:[#allocation434_spill] sm:$0xff]  ;;  %v21347_v13 = vld [vmem:[#allocation435_spill] sm:$0xff]  ;;  %v21348_v18 = vld [vmem:[#allocation436_spill] sm:$0xff] }
 0x637   :  { %v7901_v34 = vcombine.low %v6646_v14, %v6654_v24  ;;  %v4160_v20 = vpop.permute.xlu1 %4159  ;;  %v17825_v26 = vsel %vm5209_vm6, %v17440_v3, %v21346_v49  ;;  %v17830_v57 = vsel %vm5209_vm6, %v17445_v29, %v21347_v13  ;;  %v17835_v59 = vsel %vm5209_vm6, %v17455_v27, %v21348_v18  ;;  %v4676_v44 = vpop.permute.xlu0 %4675  ;;  %v21349_v24 = vld [vmem:[#allocation437_spill] sm:$0xff]  ;;  %v1673_v14 = vld [vmem:[#allocation2 + $0xc2] sm:$0xff]  ;;  %v21350_v27 = vld [vmem:[#allocation438_spill] sm:$0xff] }
 0x638   :  { %v5474_v22 = vsel %vm5403_vm7, %v5377_v47, %v4292_v46  ;;  %v17841_v6 = vsel %vm5209_vm6, %v17460_v43, %v21349_v24  ;;  %v7908_v3 = vrot.slane %v7900_v19, %v20911_v54  ;;  %4185 = vrot.lane.b32.xlu1 %v1576_v21, %s13032_s30  ;;  %v17852_v46 = vsel %vm5209_vm6, %v17465_v5, %v21350_v27  ;;  %v1738_v19 = vld [vmem:[#allocation2 + $0x2fa] sm:$0x3]  ;;  %v21351_v25 = vld [vmem:[#allocation439_spill] sm:$0xff]  ;;  %v21352_v21 = vld [vmem:[#allocation440_spill] sm:$0xff] }
 0x639   :  { %v7915_v37 = vrot.slane %v7901_v34, %v20911_v54  ;;  %v17846_v29 = vsel %vm5500_vm9, %v5474_v22, %v4676_v44  ;;  %v7917_v53 = vcombine.low %v6662_v31, %v6661_v9  ;;  %v6663_v0 = vcombine.high %v6661_v9, %v6661_v9  ;;  %v21353_v5 = vld [vmem:[#allocation441_spill] sm:$0xff]  ;;  %v21354_v34 = vld [vmem:[#allocation442_spill] sm:$0xff]  ;;  %v21358_v44 = vld [vmem:[#allocation444_spill] sm:$0xff] }
 0x63a   :  { %v17856_v43 = vrot.slane %v17846_v29, %v20911_v54  ;;  %4571 = vrot.lane.b32.xlu0 %v1673_v14, %s13033_s6  ;;  %v17862_v36 = vsel %vm5209_vm6, %v17479_v15, %v21351_v25  ;;  %v17867_v23 = vsel %vm5209_vm6, %v17484_v38, %v21352_v21  ;;  %v17872_v9 = vsel %vm5209_vm6, %v17491_v7, %v21353_v5  ;;  %v21356_v15 = vld [vmem:[#allocation443_spill] sm:$0xff]  ;;  %v21357_v38 = vld [vmem:[#allocation452_spill] sm:$0xff] }
 0x63b   :  { %v17874_v31 = vpop.permute.xlu1 %4295  ;;  %v7916_v47 = vcombine.low %v7908_v3, %v7915_v37  ;;  %v17879_v49 = vsel %vm5209_vm6, %v17497_v42, %v21354_v34  ;;  %v17884_v13 = vsel %vm5209_vm6, %v17511_v4, %v21356_v15  ;;  %v5310_v18 = vsel %vm5306_vm8, %v17563_v8, %v21357_v38  ;;  %v17890_v22 = vpop.permute.xlu0 %4155  ;;  %v21360_v42 = vld [vmem:[#allocation445_spill] sm:$0xff]  ;;  %v21362_v37 = vld [vmem:[#allocation446_spill] sm:$0xff]  ;;  %v21366_v25 = vld [vmem:[#allocation448_spill] sm:$0xff] }
 0x63c   :  { %21355 = vst [vmem:[#allocation163_spill] sm:$0xff] %v17879_v49  ;;  %v7918_v7 = vcombine.low %v6663_v0, %v17856_v43  ;;  %v17895_v24 = vsel %vm5209_vm6, %v17516_v2, %v21358_v44  ;;  %v17900_v3 = vsel %vm5209_vm6, %v17528_v1, %v21360_v42  ;;  %v5407_v4 = vsel %vm5403_vm7, %v5310_v18, %v17706_v11  ;;  %v1578_v8 = vld [vmem:[#allocation2 + $0xc9] sm:$0xff]  ;;  %v1672_v0 = vld [vmem:[#allocation2 + $0xba] sm:$0x3]  ;;  %v21364_v11 = vld [vmem:[#allocation447_spill] sm:$0xff] }
 0x63d   :  { %21359 = vst [vmem:[#allocation164_spill] sm:$0xff] %v17895_v24  ;;  %21361 = vst [vmem:[#allocation165_spill] sm:$0xff] %v17900_v3  ;;  %4701 = vrot.lane.b32.xlu1 %v1738_v19, %s13033_s6  ;;  %12900 = vmatmul.mubr.msk.f32.gmra.mrb[28].mxu1 %vm8311_vm10, %v7916_v47  ;;  %v17909_v14 = vsel %vm5209_vm6, %v17533_v55, %v21362_v37  ;;  %v7925_v2 = vrot.slane %v7917_v53, %v20911_v54  ;;  %v21368_v55 = vld [vmem:[#allocation449_spill] sm:$0xff]  ;;  %v21372_v38 = vld [vmem:[#allocation454_spill] sm:$0xff] }
 0x63e   :  { %21363 = vst [vmem:[#allocation166_spill] sm:$0xff] %v17909_v14  ;;  %v5504_v27 = vsel %vm5500_vm9, %v5407_v4, %v4542_v51  ;;  %v7932_v1 = vrot.slane %v7918_v7, %v20911_v54  ;;  %4189 = vrot.lane.b32.xlu0 %v1578_v8, %s13032_s30  ;;  %v17918_v19 = vsel %vm5209_vm6, %v17540_v10, %v21364_v11  ;;  %v21370_v51 = vld [vmem:[#allocation455_spill] sm:$0xff]  ;;  %v1740_v34 = vld [vmem:[#allocation2 + $0x30a] sm:$0xff]  ;;  %v21377_v37 = vld [vmem:[#allocation150_spill] sm:$0xff] }
 0x63f   :  { %21365 = vst [vmem:[#allocation167_spill] sm:$0xff] %v17918_v19  ;;  %v17923_v21 = vsel %vm5209_vm6, %v17545_v60, %v21366_v25  ;;  %v17928_v53 = vsel %vm5209_vm6, %v17550_v32, %v21368_v55  ;;  %v5311_v5 = vsel %vm5306_vm8, %v17582_v50, %v21370_v51  ;;  %v17933_v47 = vpop.permute.xlu1 %4163  ;;  %v21371_v15 = vld [vmem:[#allocation453_spill] sm:$0xff]  ;;  %v21373_v18 = vld [vmem:[#allocation148_spill] sm:$0xff]  ;;  %v4544_v32 = vpop.permute.xlu0 %4543  ;;  %v5752_v55 = vrot.slane %v5504_v27, %v20911_v54  ;;  %v21378_v51 = vld [vmem:[#allocation458_spill] sm:$0xff] }
 0x640   :  { %21367 = vst [vmem:[#allocation168_spill] sm:$0xff] %v17923_v21  ;;  %21369 = vst [vmem:[#allocation169_spill] sm:$0xff] %v17928_v53  ;;  %v5309_v10 = vsel %vm5306_vm8, %v17568_v48, %v21371_v15  ;;  %v17941_v60 = vsel %vm5306_vm8, %v21373_v18, %v21372_v38  ;;  %v5408_v7 = vsel %vm5403_vm7, %v5311_v5, %v4160_v20  ;;  %v21374_v42 = vld [vmem:[#allocation456_spill] sm:$0xff]  ;;  %v21375_v4 = vld [vmem:[#allocation149_spill] sm:$0xff] }
 0x641   :  { %v7933_v44 = vcombine.low %v7925_v2, %v7932_v1  ;;  %v17947_v50 = vsel %vm5306_vm8, %v21375_v4, %v21374_v42  ;;  %v21376_v8 = vld [vmem:[#allocation457_spill] sm:$0xff]  ;;  %v5745_v48 = vcombine.high %v5504_v27, %v5504_v27  ;;  %v5505_v25 = vsel %vm5500_vm9, %v5408_v7, %v4544_v32  ;;  %4569 = vrot.lane.b32.xlu1 %v1672_v0, %s13033_s6  ;;  %v1646_v1 = vld [vmem:[#allocation2 + $0x319] sm:$0xff]  ;;  %v21381_v18 = vld [vmem:[#allocation152_spill] sm:$0xff] }
 0x642   :  { %v17952_v11 = vsel %vm5306_vm8, %v21377_v37, %v21376_v8  ;;  %v5762_v20 = vcombine.high %v5505_v25, %v5505_v25  ;;  %v5769_v2 = vrot.slane %v5505_v25, %v20911_v54  ;;  %4705 = vrot.lane.b32.xlu0 %v1740_v34, %s13033_s6  ;;  %v21379_v5 = vld [vmem:[#allocation151_spill] sm:$0xff]  ;;  %v21382_v0 = vld [vmem:[#allocation460_spill] sm:$0xff]  ;;  %v21383_v27 = vld [vmem:[#allocation153_spill] sm:$0xff]  ;;  %v6664_v34 = vcombine.high %v17846_v29, %v17846_v29 }
 0x643   :  { %12902 = vmatprep.mubr.msk.f32.mxu1 %vm8311_vm10, %v7933_v44  ;;  %v17963_v15 = vsel %vm5306_vm8, %v21379_v5, %v21378_v51  ;;  %v21380_v38 = vld [vmem:[#allocation459_spill] sm:$0xff]  ;;  %v17973_v32 = vsel %vm5306_vm8, %v21383_v27, %v21382_v0  ;;  %v17977_v44 = vpop.permute.xlu1 %4297  ;;  %v21384_v42 = vld [vmem:[#allocation461_spill] sm:$0xff]  ;;  %v21385_v4 = vld [vmem:[#allocation154_spill] sm:$0xff]  ;;  %v4294_v21 = vpop.permute.xlu0 %4293 }
 0x644   :  { %v17968_v7 = vsel %vm5306_vm8, %v21381_v18, %v21380_v38  ;;  %v17982_v8 = vsel %vm5306_vm8, %v21385_v4, %v21384_v42  ;;  %v21386_v37 = vld [vmem:[#allocation462_spill] sm:$0xff]  ;;  %v21387_v25 = vld [vmem:[#allocation155_spill] sm:$0xff]  ;;  %v21389_v38 = vld [vmem:[#allocation156_spill] sm:$0xff]  ;;  %v18020_v49 = vrot.slane %v5762_v20, %v20911_v54 }
 0x645   :  { %v17987_v51 = vsel %vm5306_vm8, %v21387_v25, %v21386_v37  ;;  %v21388_v5 = vld [vmem:[#allocation463_spill] sm:$0xff]  ;;  %v21390_v0 = vld [vmem:[#allocation464_spill] sm:$0xff]  ;;  %v21391_v27 = vld [vmem:[#allocation157_spill] sm:$0xff]  ;;  %4325 = vrot.lane.b32.xlu1 %v1646_v1, %s13032_s30  ;;  %v6679_v1 = vcombine.high %v17856_v43, %v17856_v43 }
 0x646   :  { %v17992_v18 = vsel %vm5306_vm8, %v21389_v38, %v21388_v5  ;;  %v17997_v29 = vsel %vm5306_vm8, %v21391_v27, %v21390_v0  ;;  %v21392_v53 = vld [vmem:[#allocation465_spill] sm:$0xff]  ;;  %v21393_v14 = vld [vmem:[#allocation158_spill] sm:$0xff]  ;;  %v21396_v19 = vld [vmem:[#allocation159_spill] sm:$0xff] }
 0x647   :  { %v18002_v42 = vsel %vm5306_vm8, %v21393_v14, %v21392_v53  ;;  %v21395_v4 = vld [vmem:[#allocation466_spill] sm:$0xff]  ;;  %v21398_v25 = vld [vmem:[#allocation467_spill] sm:$0xff]  ;;  %v21399_v24 = vld [vmem:[#allocation160_spill] sm:$0xff]  ;;  %v5759_v14 = vrot.slane %v5745_v48, %v20911_v54  ;;  %v5760_v53 = vcombine.high %v5752_v55, %v5752_v55  ;;  %v4540_v43 = vpop.permute.xlu0 %4539 }
 0x648   :  { %21394 = vst [vmem:[#allocation170_spill] sm:$0xff] %v18002_v42  ;;  %v18007_v37 = vsel %vm5306_vm8, %v21396_v19, %v21395_v4  ;;  %v18012_v5 = vsel %vm5306_vm8, %v21399_v24, %v21398_v25  ;;  %v21401_v38 = vld [vmem:[#allocation35_spill] sm:$0xff]  ;;  %v1674_v27 = vld [vmem:[#allocation2 + $0xca] sm:$0xff]  ;;  %v5777_v19 = vcombine.high %v5769_v2, %v5769_v2 }
 0x649   :  { %21397 = vst [vmem:[#allocation171_spill] sm:$0xff] %v18007_v37  ;;  %21400 = vst [vmem:[#allocation172_spill] sm:$0xff] %v18012_v5  ;;  %v5379_v0 = vsel %vm5306_vm8, %v17782_v16, %v21401_v38  ;;  %4573 = vrot.lane.b32.xlu0 %v1674_v27, %s13033_s6  ;;  %v1742_v4 = vld [vmem:[#allocation2 + $0x31a] sm:$0xff]  ;;  %v21402_v3 = vld [vmem:[#allocation468_spill] sm:$0xff]  ;;  %v6678_v16 = vrot.slane %v6664_v34, %v20911_v54  ;;  %v4680_v38 = vpop.permute.xlu1 %4679 }
 0x64a   :  { %v21403_v24 = vld [vmem:[#allocation161_spill] sm:$0xff]  ;;  %v5476_v48 = vsel %vm5403_vm7, %v5379_v0, %v17874_v31  ;;  %v21406_v37 = vld [vmem:[#allocation162_spill] sm:$0xff]  ;;  %4709 = vrot.lane.b32.xlu1 %v1742_v4, %s13033_s6 }
 0x64b   :  { %v18026_v25 = vsel %vm5306_vm8, %v21403_v24, %v21402_v3  ;;  %v21405_v20 = vld [vmem:[#allocation469_spill] sm:$0xff]  ;;  %v21408_v27 = vld [vmem:[#allocation470_spill] sm:$0xff]  ;;  %v5406_v3 = vsel %vm5403_vm7, %v5309_v10, %v17890_v22  ;;  %v5573_v34 = vsel %vm5500_vm9, %v5476_v48, %v4680_v38  ;;  %v7934_v10 = vcombine.low %v6679_v1, %v6678_v16 }
 0x64c   :  { %21404 = vst [vmem:[#allocation173_spill] sm:$0xff] %v18026_v25  ;;  %v18036_v5 = vsel %vm5306_vm8, %v21406_v37, %v21405_v20  ;;  %v18041_v42 = vsel %vm5306_vm8, %v17701_v61, %v21408_v27  ;;  %v21410_v24 = vld [vmem:[#allocation22_spill] sm:$0xff]  ;;  %v6688_v0 = vcombine.high %v5573_v34, %v5573_v34  ;;  %v6695_v25 = vrot.slane %v5573_v34, %v20911_v54 }
 0x64d   :  { %21407 = vst [vmem:[#allocation174_spill] sm:$0xff] %v18036_v5  ;;  %21409 = vst [vmem:[#allocation32_spill] sm:$0xff] %v18041_v42  ;;  %v5378_v31 = vsel %vm5306_vm8, %v17768_v28, %v21410_v24  ;;  %v5503_v37 = vsel %vm5500_vm9, %v5406_v3, %v4540_v43  ;;  %v1580_v20 = vld [vmem:[#allocation2 + $0xd9] sm:$0xff]  ;;  %v7068_v61 = vcombine.low %v5760_v53, %v5759_v14  ;;  %v4678_v34 = vpop.permute.xlu1 %4677  ;;  %v1579_v24 = vld [vmem:[#allocation2 + $0xd1] sm:$0x3]  ;;  %v4548_v43 = vpop.permute.xlu0 %4547 }
 0x64e   :  { %v5761_v27 = vcombine.high %v5759_v14, %v5759_v14  ;;  %v7085_v42 = vcombine.low %v5777_v19, %v18020_v49  ;;  %v5744_v22 = vrot.slane %v5503_v37, %v20911_v54  ;;  %4193 = vrot.lane.b32.xlu0 %v1580_v20, %s13032_s30  ;;  %v5475_v48 = vsel %vm5403_vm7, %v5378_v31, %v4294_v21  ;;  %v21411_v3 = vld [vmem:[#allocation471_spill] sm:$0xff]  ;;  %v21412_v31 = vld [vmem:[#allocation34_spill] sm:$0xff] }
 0x64f   :  { %v6702_v28 = vrot.slane %v6688_v0, %v20911_v54  ;;  %v6703_v38 = vcombine.high %v6695_v25, %v6695_v25  ;;  %v18060_v4 = vsel %vm5306_vm8, %v17711_v17, %v21411_v3  ;;  %v5572_v19 = vsel %vm5500_vm9, %v5475_v48, %v4678_v34  ;;  %v1581_v37 = vld [vmem:[#allocation2 + $0xe1] sm:$0xff]  ;;  %v1645_v34 = vld [vmem:[#allocation2 + $0x311] sm:$0x3] }
 0x650   :  { %v7084_v14 = vcombine.low %v5761_v27, %v5769_v2  ;;  %v7067_v53 = vcombine.low %v5744_v22, %v5752_v55  ;;  %v6680_v5 = vcombine.high %v6678_v16, %v6678_v16  ;;  %v6687_v21 = vrot.slane %v5572_v19, %v20911_v54  ;;  %4195 = vrot.lane.b32.xlu1 %v1581_v37, %s13032_s30  ;;  %v1647_v27 = vld [vmem:[#allocation2 + $0x321] sm:$0xff]  ;;  %v1553_v37 = vld [vmem:[#allocation2 + $0x330] sm:$0xff] }
 0x651   :  { %v6704_v20 = vcombine.high %v6702_v28, %v6702_v28  ;;  %v7951_v1 = vcombine.low %v6695_v25, %v6703_v38  ;;  %v5380_v0 = vsel %vm5306_vm8, %v17777_v63, %v21412_v31  ;;  %v7082_v17 = vrot.slane %v7068_v61, %v20911_v54  ;;  %v4166_v38 = vpop.permute.xlu1 %4165  ;;  %v4682_v3 = vpop.permute.xlu0 %4681 }
 0x652   :  { %v7099_v2 = vrot.slane %v7085_v42, %v20911_v54  ;;  %v7075_v55 = vrot.slane %v7067_v53, %v20911_v54  ;;  %4191 = vrot.lane.b32.xlu0 %v1579_v24, %s13032_s30  ;;  %v7942_v25 = vrot.slane %v7934_v10, %v20911_v54  ;;  %v5410_v16 = vsel %vm5403_vm7, %v17952_v11, %v17933_v47  ;;  %v12585_v11 = vld [vmem:[%s20058_s4] ss:$0 sm:$0xff] }
 0x653   :  { %v7952_v22 = vcombine.low %v6702_v28, %v6704_v20  ;;  %v7935_v48 = vcombine.low %v6680_v5, %v6687_v21  ;;  %v7092_v63 = vrot.slane %v7084_v14, %v20911_v54  ;;  %v5477_v42 = vsel %vm5403_vm7, %v5380_v0, %v17977_v44  ;;  %v21413_v5 = vld [vmem:[#allocation472_spill] sm:$0xff]  ;;  %v21415_v20 = vld [vmem:[#allocation473_spill] sm:$0xff] }
 0x654   :  { %v5507_v61 = vsel %vm5500_vm9, %v5410_v16, %v4548_v43  ;;  %v7083_v24 = vcombine.low %v7075_v55, %v7082_v17  ;;  %v7959_v53 = vrot.slane %v7951_v1, %v20911_v54  ;;  %v5574_v47 = vsel %vm5500_vm9, %v5477_v42, %v4682_v3  ;;  %4327 = vrot.lane.b32.xlu1 %v1647_v27, %s13032_s30 }
 0x655   :  { %v7966_v10 = vrot.slane %v7952_v22, %v20911_v54  ;;  %v7949_v19 = vrot.slane %v7935_v48, %v20911_v54  ;;  %v18091_v44 = vsel %vm5306_vm8, %v17725_v33, %v21413_v5  ;;  %v6705_v28 = vcombine.high %v5574_v47, %v5574_v47  ;;  %v4550_v31 = vpop.permute.xlu1 %4549  ;;  %v21416_v22 = vld [vmem:[#allocation474_spill] sm:$0xff]  ;;  %v21418_v48 = vld [vmem:[#allocation475_spill] sm:$0xff] }
 0x656   :  { %21414 = vst [vmem:[#allocation175_spill] sm:$0xff] %v18091_v44  ;;  %v6712_v14 = vrot.slane %v5574_v47, %v20911_v54  ;;  %4323 = vrot.lane.b32.xlu0 %v1645_v34, %s13032_s30  ;;  %v7100_v43 = vcombine.low %v7092_v63, %v7099_v2  ;;  %v18098_v1 = vsel %vm5306_vm8, %v17730_v35, %v21415_v20  ;;  %v4162_v2 = vpop.permute.xlu0 %4161 }
 0x657   :  { %v5786_v21 = vcombine.high %v5507_v61, %v5507_v61  ;;  %12827 = vmatprep.mubr.msk.f32.mxu0 %vm8311_vm10, %v7083_v24  ;;  %v7950_v0 = vcombine.low %v7942_v25, %v7949_v19  ;;  %v7967_v17 = vcombine.low %v7959_v53, %v7966_v10  ;;  %v5411_v33 = vsel %vm5403_vm7, %v17947_v50, %v4166_v38  ;;  %v1676_v50 = vld [vmem:[#allocation2 + $0xda] sm:$0xff]  ;;  %v21420_v38 = vld [vmem:[#allocation476_spill] sm:$0xff] }
 0x658   :  { %v6719_v55 = vrot.slane %v6705_v28, %v20911_v54  ;;  %v6720_v27 = vcombine.high %v6712_v14, %v6712_v14  ;;  %12828 = vmatmul.mubr.msk.f32.gmra.mrb[32].mxu0 %vm8311_vm10, %v7100_v43  ;;  %v7016_v16 = vcombine.high %v12585_v11, %v12585_v11  ;;  %v18108_v35 = vsel %vm5306_vm8, %v17742_v52, %v21416_v22  ;;  %v21425_v28 = vld [vmem:[#allocation45_spill] sm:$0xff]  ;;  %v21430_v22 = vld [vmem:[#allocation63_spill] sm:$0xff] }
 0x659   :  { %21417 = vst [vmem:[#allocation33_spill] sm:$0xff] %v18108_v35  ;;  %v18113_v25 = vsel %vm5306_vm8, %v17747_v40, %v21418_v48  ;;  %v5508_v34 = vsel %vm5500_vm9, %v5411_v33, %v4550_v31  ;;  %3947 = vrot.lane.b32.xlu1 %v1553_v37, %s13031_s29  ;;  %12903 = vmatmul.mubr.msk.f32.gmra.mrb[30].mxu1 %vm8311_vm10, %v7950_v0  ;;  %v21422_v40 = vld [vmem:[#allocation477_spill] sm:$0xff]  ;;  %v4302_v19 = vpop.permute.xlu1 %4301  ;;  %v1677_v37 = vld [vmem:[#allocation2 + $0xe2] sm:$0xff]  ;;  %v21428_v0 = vld [vmem:[#allocation58_spill] sm:$0xff] }
 0x65a   :  { %21419 = vst [vmem:[#allocation176_spill] sm:$0xff] %v18113_v25  ;;  %v18121_v63 = vsel %vm5306_vm8, %v17758_v56, %v21420_v38  ;;  %v5793_v52 = vrot.slane %v5507_v61, %v20911_v54  ;;  %v6721_v42 = vcombine.high %v6719_v55, %v6719_v55  ;;  %v7968_v3 = vcombine.low %v6712_v14, %v6720_v27  ;;  %v1675_v56 = vld [vmem:[#allocation2 + $0xd2] sm:$0x3]  ;;  %v21424_v61 = vld [vmem:[#allocation44_spill] sm:$0xff]  ;;  %v4170_v43 = vpop.permute.xlu0 %4169  ;;  %v21429_v33 = vld [vmem:[#allocation59_spill] sm:$0xff] }
 0x65b   :  { %21421 = vst [vmem:[#allocation36_spill] sm:$0xff] %v18121_v63  ;;  %4577 = vrot.lane.b32.xlu0 %v1676_v50, %s13033_s6  ;;  %v18128_v24 = vsel %vm5306_vm8, %v17763_v41, %v21422_v40  ;;  %v5800_v53 = vrot.slane %v5786_v21, %v20911_v54  ;;  %v5810_v10 = vrot.slane %v5508_v34, %v20911_v54  ;;  %v21426_v21 = vld [vmem:[#allocation53_spill] sm:$0xff]  ;;  %v21427_v31 = vld [vmem:[#allocation56_spill] sm:$0xff]  ;;  %v1558_v25 = vld [vmem:[#allocation2 + $0x358] sm:$0x3] }
 0x65c   :  { %21423 = vst [vmem:[#allocation177_spill] sm:$0xff] %v18128_v24  ;;  %12905 = vmatprep.mubr.msk.f32.mxu1 %vm8311_vm10, %v7967_v17  ;;  %v18134_v47 = vrot.slane %v12585_v11, %v20911_v54  ;;  %v5382_v5 = vsel %vm5306_vm8, %v17789_v39, %v21424_v61  ;;  %v18142_v41 = vsel %vm5306_vm8, %v17794_v62, %v21425_v28  ;;  %v21431_v48 = vld [vmem:[#allocation65_spill] sm:$0xff] }
 0x65d   :  { %v7969_v14 = vcombine.low %v6719_v55, %v6721_v42  ;;  %v18145_v20 = vrot.slane %v7016_v16, %v20911_v54  ;;  %v18150_v11 = vsel %vm5306_vm8, %v17801_v12, %v21426_v21  ;;  %v18155_v39 = vsel %vm5306_vm8, %v17806_v45, %v21427_v31  ;;  %4579 = vrot.lane.b32.xlu1 %v1677_v37, %s13033_s6  ;;  %v1743_v45 = vld [vmem:[#allocation2 + $0x322] sm:$0xff]  ;;  %v4554_v38 = vpop.permute.xlu1 %4553  ;;  %v1741_v42 = vld [vmem:[#allocation2 + $0x312] sm:$0x3] }
 0x65e   :  { %v18160_v62 = vsel %vm5306_vm8, %v17813_v58, %v21428_v0  ;;  %v5818_v17 = vcombine.high %v5810_v10, %v5810_v10  ;;  %v18166_v55 = vsel %vm5306_vm8, %v17818_v30, %v21429_v33  ;;  %v5801_v12 = vcombine.high %v5793_v52, %v5793_v52  ;;  %v4546_v61 = vpop.permute.xlu0 %4545  ;;  %v21432_v31 = vld [vmem:[#allocation67_spill] sm:$0xff] }
 0x65f   :  { %v7976_v27 = vrot.slane %v7968_v3, %v20911_v54  ;;  %v7983_v16 = vrot.slane %v7969_v14, %v20911_v54  ;;  %4575 = vrot.lane.b32.xlu0 %v1675_v56, %s13033_s6  ;;  %v18174_v58 = vsel %vm5306_vm8, %v17825_v26, %v21430_v22  ;;  %v18179_v50 = vsel %vm5306_vm8, %v17830_v57, %v21431_v48 }
 0x660   :  { %v5802_v30 = vcombine.high %v5800_v53, %v5800_v53  ;;  %v18183_v3 = vcombine.high %v18134_v47, %v18134_v47  ;;  %v5803_v40 = vcombine.high %v5508_v34, %v5508_v34  ;;  %v5409_v56 = vsel %vm5403_vm7, %v17941_v60, %v4162_v2 }
 0x661   :  { %v7984_v28 = vcombine.low %v7976_v27, %v7983_v16  ;;  %v18189_v26 = vcombine.high %v18145_v20, %v18145_v20  ;;  %v7119_v14 = vcombine.low %v5810_v10, %v5818_v17  ;;  %v5413_v57 = vsel %vm5403_vm7, %v17963_v15, %v4170_v43  ;;  %4711 = vrot.lane.b32.xlu1 %v1743_v45, %s13033_s6  ;;  %v1552_v10 = vld [vmem:[#allocation2 + $0x328] sm:$0x3]  ;;  %v4304_v0 = vpop.permute.xlu1 %4303  ;;  %v1649_v17 = vld [vmem:[#allocation2 + $0x331] sm:$0xff] }
 0x662   :  { %v5778_v37 = vcombine.high %v18020_v49, %v18020_v49  ;;  %v5506_v21 = vsel %vm5500_vm9, %v5409_v56, %v4546_v61  ;;  %v7102_v34 = vcombine.low %v5793_v52, %v5801_v12  ;;  %v5510_v60 = vsel %vm5500_vm9, %v5413_v57, %v4554_v38  ;;  %v21433_v49 = vld [vmem:[#allocation68_spill] sm:$0xff]  ;;  %v4686_v45 = vpop.permute.xlu0 %4685  ;;  %v21435_v56 = vld [vmem:[#allocation77_spill] sm:$0xff]  ;;  %v1554_v57 = vld [vmem:[#allocation2 + $0x338] sm:$0xff] }
 0x663   :  { %v5785_v2 = vrot.slane %v5506_v21, %v20911_v54  ;;  %4707 = vrot.lane.b32.xlu0 %v1741_v42, %s13033_s6  ;;  %12906 = vmatmul.mubr.msk.f32.gmra.mrb[32].mxu1 %vm8311_vm10, %v7984_v28  ;;  %v18204_v15 = vsel %vm5306_vm8, %v17835_v59, %v21432_v31  ;;  %v18209_v43 = vsel %vm5306_vm8, %v17841_v6, %v21433_v49  ;;  %v21434_v42 = vld [vmem:[#allocation76_spill] sm:$0xff] }
 0x664   :  { %v7118_v52 = vcombine.low %v5800_v53, %v5802_v30  ;;  %v8257_v33 = vcombine.low %v18134_v47, %v18183_v3  ;;  %v5817_v12 = vrot.slane %v5803_v40, %v20911_v54  ;;  %v5479_v27 = vsel %vm5403_vm7, %v5382_v5, %v4302_v19 }
 0x665   :  { %v7101_v16 = vcombine.low %v5778_v37, %v5785_v2  ;;  %v8258_v59 = vcombine.low %v18145_v20, %v18189_v26  ;;  %v7133_v22 = vrot.slane %v7119_v14, %v20911_v54  ;;  %v5827_v48 = vcombine.high %v5510_v60, %v5510_v60  ;;  %3945 = vrot.lane.b32.xlu1 %v1552_v10, %s13031_s29  ;;  %v4172_v14 = vpop.permute.xlu1 %4171 }
 0x666   :  { %v18219_v6 = vrot.slane %v5510_v60, %v20911_v54  ;;  %v5576_v53 = vsel %vm5500_vm9, %v5479_v27, %v4686_v45  ;;  %v7116_v30 = vrot.slane %v7102_v34, %v20911_v54  ;;  %v18232_v40 = vsel %vm5306_vm8, %v17852_v46, %v21434_v42  ;;  %v4168_v21 = vpop.permute.xlu0 %4167  ;;  %v1583_v34 = vld [vmem:[#allocation2 + $0xf1] sm:$0xff] }
 0x667   :  { %v7109_v38 = vrot.slane %v7101_v16, %v20911_v54  ;;  %v6729_v19 = vcombine.high %v5576_v53, %v5576_v53  ;;  %v18226_v5 = vrot.slane %v5576_v53, %v20911_v54  ;;  %4331 = vrot.lane.b32.xlu0 %v1649_v17, %s13032_s30  ;;  %v18237_v61 = vsel %vm5306_vm8, %v17862_v36, %v21435_v56  ;;  %v21437_v27 = vld [vmem:[#allocation94_spill] sm:$0xff] }
 0x668   :  { %v7126_v28 = vrot.slane %v7118_v52, %v20911_v54  ;;  %v8291_v37 = vcombine.low %v18189_v26, %v18134_v47  ;;  %v8265_v2 = vrot.slane %v8257_v33, %v20911_v54  ;;  %v8275_v46 = vcombine.low %v18183_v3, %v18145_v20  ;;  %v21436_v3 = vld [vmem:[#allocation91_spill] sm:$0xff] }
 0x669   :  { %v7117_v60 = vcombine.low %v7109_v38, %v7116_v30  ;;  %v8274_v10 = vcombine.low %v18134_v47, %v18134_v47  ;;  %v5819_v36 = vcombine.high %v5817_v12, %v5817_v12  ;;  %v18248_v31 = vrot.slane %v5827_v48, %v20911_v54  ;;  %4199 = vrot.lane.b32.xlu1 %v1583_v34, %s13032_s30  ;;  %v1582_v47 = vld [vmem:[#allocation2 + $0xe9] sm:$0x3]  ;;  %v1745_v48 = vld [vmem:[#allocation2 + $0x332] sm:$0xff] }
 0x66a   :  { %v5842_v49 = vcombine.high %v18219_v6, %v18219_v6  ;;  %v7134_v26 = vcombine.low %v7126_v28, %v7133_v22  ;;  %v6743_v52 = vrot.slane %v6729_v19, %v20911_v54  ;;  %v6744_v17 = vcombine.high %v18226_v5, %v18226_v5  ;;  %v4688_v22 = vpop.permute.xlu1 %4687  ;;  %v4300_v38 = vpop.permute.xlu0 %4299  ;;  %v1648_v34 = vld [vmem:[#allocation2 + $0x329] sm:$0x3] }
 0x66b   :  { %3949 = vrot.lane.b32.xlu0 %v1554_v57, %s13031_s29  ;;  %12830 = vmatprep.mubr.msk.f32.mxu0 %vm8311_vm10, %v7117_v60  ;;  %v8272_v20 = vrot.slane %v8258_v59, %v20911_v54  ;;  %v18262_v33 = vsel %vm5306_vm8, %v17867_v23, %v21436_v3  ;;  %v18267_v16 = vsel %vm5306_vm8, %v17872_v9, %v21437_v27  ;;  %v21438_v59 = vld [vmem:[#allocation108_spill] sm:$0xff]  ;;  %v1680_v27 = vld [vmem:[#allocation2 + $0xfa] sm:$0xff] }
 0x66c   :  { %v5480_v45 = vsel %vm5403_vm7, %v18155_v39, %v4304_v0  ;;  %12831 = vmatmul.mubr.msk.f32.gmra.mrb[34].mxu0 %vm8311_vm10, %v7134_v26  ;;  %v8298_v53 = vrot.slane %v8291_v37, %v20911_v54  ;;  %v18276_v30 = vsel %vm5306_vm8, %v17884_v13, %v21438_v59  ;;  %v8289_v9 = vrot.slane %v8275_v46, %v20911_v54 }
 0x66d   :  { %v5577_v23 = vsel %vm5500_vm9, %v5480_v45, %v4688_v22  ;;  %v8282_v19 = vrot.slane %v8274_v10, %v20911_v54  ;;  %v18281_v42 = vcombine.low %v5817_v12, %v5819_v36  ;;  %v18284_v39 = vcombine.low %v5842_v49, %v18248_v31  ;;  %4197 = vrot.lane.b32.xlu1 %v1582_v47, %s13032_s30  ;;  %v12859_v22 = vpop.f32.mrb[0].mxu1 }
 0x66e   :  { %v6746_v0 = vcombine.high %v5577_v23, %v5577_v23  ;;  %v6753_v56 = vrot.slane %v5577_v23, %v20911_v54  ;;  %v18290_v57 = vcombine.low %v6744_v17, %v6743_v52  ;;  %v6745_v37 = vcombine.high %v6743_v52, %v6743_v52  ;;  %v4308_v10 = vpop.permute.xlu1 %4307  ;;  %v4176_v47 = vpop.permute.xlu0 %4175 }
 0x66f   :  { %4715 = vrot.lane.b32.xlu0 %v1745_v48, %s13033_s6  ;;  %v18293_v60 = vcombine.low %v8272_v20, %v8265_v2  ;;  %v18298_v36 = vcombine.low %v8265_v2, %v8272_v20  ;;  %v18300_v49 = vcombine.low %v8298_v53, %v8265_v2  ;;  %v18304_v17 = vcombine.low %v8289_v9, %v8298_v53  ;;  %v1584_v2 = vld [vmem:[#allocation2 + $0xf9] sm:$0xff] }
 0x670   :  { %v18296_v12 = vrot.slane %v6746_v0, %v20911_v54  ;;  %v6761_v46 = vcombine.high %v6753_v56, %v6753_v56  ;;  %v18302_v26 = vcombine.low %v6745_v37, %v6753_v56  ;;  %v18306_v52 = vcombine.low %v8272_v20, %v8282_v19  ;;  %v8636_v56 = vpop.f32.mrb[1].mxu1 }
 0x671   :  { %v18308_v3 = vcombine.low %v8282_v19, %v8289_v9  ;;  %4329 = vrot.lane.b32.xlu1 %v1648_v34, %s13032_s30  ;;  %v5843_v48 = vcombine.high %v18248_v31, %v18248_v31  ;;  %v18317_v59 = vcombine.low %v8298_v53, %v8289_v9  ;;  %v5414_v23 = vsel %vm5403_vm7, %v17982_v8, %v4172_v14 }
 0x672   :  { %v5412_v19 = vsel %vm5403_vm7, %v17968_v7, %v4168_v21  ;;  %v8642_v0 = vadd.f32 %v12859_v22, %v18293_v60  ;;  %v18328_v37 = vcombine.low %v6761_v46, %v18296_v12  ;;  %v5478_v31 = vsel %vm5403_vm7, %v18142_v41, %v4300_v38  ;;  %v4556_v14 = vpop.permute.xlu1 %4555  ;;  %v1650_v7 = vld [vmem:[#allocation2 + $0x339] sm:$0xff]  ;;  %v4552_v22 = vpop.permute.xlu0 %4551 }
 0x673   :  { %4201 = vrot.lane.b32.xlu0 %v1584_v2, %s13032_s30  ;;  %v18334_v53 = vsel %vm5403_vm7, %v18166_v55, %v4308_v10  ;;  %v8637_v8 = vadd.f32 %v8636_v56, %v18300_v49  ;;  %v5511_v46 = vsel %vm5500_vm9, %v5414_v23, %v4556_v14  ;;  %v1679_v2 = vld [vmem:[#allocation2 + $0xf2] sm:$0xff]  ;;  %v5416_v10 = vsel %vm5403_vm7, %v17992_v18, %v4176_v47  ;;  %v1678_v18 = vld [vmem:[#allocation2 + $0xea] sm:$0x3] }
 0x674   :  { %v9348_v9 = vcombine.high %v8642_v0, %v8642_v0  ;;  %v9355_v34 = vrot.slane %v8642_v0, %v20911_v54  ;;  %v5844_v55 = vcombine.high %v5511_v46, %v5511_v46  ;;  %v5851_v38 = vrot.slane %v5511_v46, %v20911_v54 }
 0x675   :  { %v9331_v28 = vcombine.high %v8637_v8, %v8637_v8  ;;  %v18342_v41 = vrot.slane %v8637_v8, %v20911_v54  ;;  %4583 = vrot.lane.b32.xlu1 %v1679_v2, %s13033_s6  ;;  %v5509_v46 = vsel %vm5500_vm9, %v5412_v19, %v4552_v22 }
 0x676   :  { %v9362_v56 = vrot.slane %v9348_v9, %v20911_v54  ;;  %v9363_v21 = vcombine.high %v9355_v34, %v9355_v34  ;;  %v18356_v14 = vrot.slane %v5844_v55, %v20911_v54  ;;  %v4560_v2 = vpop.permute.xlu1 %4559  ;;  %v10561_v9 = vmax.f32 %v9355_v34, 0.0 }
 0x677   :  { %21440 = vst [vmem:[#allocation13_spill] sm:$0xff] %v18342_v41  ;;  %4333 = vrot.lane.b32.xlu0 %v1650_v7, %s13032_s30  ;;  %v9345_v0 = vrot.slane %v9331_v28, %v20911_v54  ;;  %v9346_v8 = vcombine.high %v18342_v41, %v18342_v41  ;;  %v5859_v45 = vcombine.high %v5851_v38, %v5851_v38  ;;  %v4684_v7 = vpop.permute.xlu0 %4683 }
 0x678   :  { %v9364_v47 = vcombine.high %v9362_v56, %v9362_v56  ;;  %v10562_v20 = vmax.f32 %v9363_v21, 0.0  ;;  %v7153_v24 = vcombine.low %v5843_v48, %v5851_v38  ;;  %v5826_v22 = vrot.slane %v5509_v46, %v20911_v54  ;;  %v1746_v21 = vld [vmem:[#allocation2 + $0x33a] sm:$0xff]  ;;  %v1744_v48 = vld [vmem:[#allocation2 + $0x32a] sm:$0x3] }
 0x679   :  { %v9347_v28 = vcombine.high %v9345_v0, %v9345_v0  ;;  %v10558_v13 = vmax.f32 %v9346_v8, 0.0  ;;  %4585 = vrot.lane.b32.xlu1 %v1680_v27, %s13033_s6  ;;  %v18363_v19 = vcombine.low %v5859_v45, %v18356_v14  ;;  %v10559_v34 = vmax.f32 %v9345_v0, 0.0 }
 0x67a   :  { %v10564_v55 = vmax.f32 %v9364_v47, 0.0  ;;  %v11456_v41 = vcombine.low %v10561_v9, %v10562_v20  ;;  %v5513_v23 = vsel %vm5500_vm9, %v5416_v10, %v4560_v2  ;;  %v4310_v8 = vpop.permute.xlu1 %4309  ;;  %v10563_v38 = vmax.f32 %v9362_v56, 0.0  ;;  %v12862_v56 = vpop.f32.mrb[2].mxu1  ;;  %v1555_v2 = vld [vmem:[#allocation2 + $0x340] sm:$0x3] }
 0x67b   :  { %4581 = vrot.lane.b32.xlu0 %v1678_v18, %s13033_s6  ;;  %v10560_v63 = vmax.f32 %v9347_v28, 0.0  ;;  %v11454_v35 = vrot.slane %v10558_v13, %v20911_v54  ;;  %v7167_v20 = vrot.slane %v7153_v24, %v20911_v54  ;;  %v7136_v45 = vcombine.low %v5826_v22, %v18219_v6  ;;  %v4692_v47 = vpop.permute.xlu0 %4691  ;;  %v1556_v28 = vld [vmem:[#allocation2 + $0x348] sm:$0xff] }
 0x67c   :  { %v11470_v27 = vrot.slane %v11456_v41, %v20911_v54  ;;  %v5868_v0 = vcombine.high %v5513_v23, %v5513_v23  ;;  %v5875_v13 = vrot.slane %v5513_v23, %v20911_v54  ;;  %v5575_v10 = vsel %vm5500_vm9, %v5478_v31, %v4684_v7 }
 0x67d   :  { %v11455_v46 = vcombine.low %v10559_v34, %v10560_v63  ;;  %12483 = vst.msk [vmem:[%s20059_s5 + $0xe8] sm:$0x3] %vm12455_vm11, %v11454_v35  ;;  %4717 = vrot.lane.b32.xlu1 %v1746_v21, %s13033_s6  ;;  %v18379_v41 = vcombine.low %v10563_v38, %v10564_v55  ;;  %v7150_v63 = vrot.slane %v7136_v45, %v20911_v54  ;;  %v8646_v35 = vpop.f32.mrb[3].mxu1 }
 0x67e   :  { %v6728_v6 = vrot.slane %v5575_v10, %v20911_v54  ;;  %v5882_v31 = vrot.slane %v5868_v0, %v20911_v54  ;;  %v5883_v18 = vcombine.high %v5875_v13, %v5875_v13  ;;  %v5579_v9 = vsel %vm5500_vm9, %v18334_v53, %v4692_v47  ;;  %v4178_v7 = vpop.permute.xlu1 %4177 }
 0x67f   :  { %4713 = vrot.lane.b32.xlu0 %v1744_v48, %s13033_s6  ;;  %v11463_v23 = vrot.slane %v11455_v46, %v20911_v54  ;;  %v6770_v22 = vcombine.high %v5579_v9, %v5579_v9  ;;  %v6777_v21 = vrot.slane %v5579_v9, %v20911_v54  ;;  %v8652_v34 = vadd.f32 %v12862_v56, %v18304_v17  ;;  %v4174_v48 = vpop.permute.xlu0 %4173  ;;  %v1652_v56 = vld [vmem:[#allocation2 + $0x349] sm:$0xff] }
 0x680   :  { %v7985_v55 = vcombine.low %v6728_v6, %v18226_v5  ;;  %v5884_v45 = vcombine.high %v5882_v31, %v5882_v31  ;;  %v18393_v10 = vcombine.low %v5875_v13, %v5883_v18  ;;  %v21441_v46 = vrot.slane %v18281_v42, %v20911_v54  ;;  %v1557_v18 = vld [vmem:[#allocation2 + $0x350] sm:$0xff] }
 0x681   :  { %v11471_v38 = vcombine.low %v11463_v23, %v11470_v27  ;;  %3951 = vrot.lane.b32.xlu1 %v1555_v2, %s13031_s29  ;;  %v6784_v5 = vrot.slane %v6770_v22, %v20911_v54  ;;  %v6785_v47 = vcombine.high %v6777_v21, %v6777_v21  ;;  %v9382_v6 = vcombine.high %v8652_v34, %v8652_v34 }
 0x682   :  { %v7151_v0 = vcombine.low %v21441_v46, %v7150_v63  ;;  %v18407_v27 = vcombine.low %v5882_v31, %v5884_v45  ;;  %v7993_v42 = vrot.slane %v7985_v55, %v20911_v54  ;;  %v18411_v13 = vrot.slane %v8652_v34, %v20911_v54  ;;  %v4694_v23 = vpop.permute.xlu1 %4693  ;;  %v12865_v46 = vpop.f32.mrb[4].mxu1 }
 0x683   :  { %3953 = vrot.lane.b32.xlu0 %v1556_v28, %s13031_s29  ;;  %12484 = vst.msk [vmem:[%s20059_s5 + $0xf0] sm:$0xff] %vm5112_vm5, %v11471_v38  ;;  %v21442_v63 = vrot.slane %v18284_v39, %v20911_v54  ;;  %v6786_v9 = vcombine.high %v6784_v5, %v6784_v5  ;;  %v18417_v28 = vcombine.low %v6777_v21, %v6785_v47  ;;  %v18421_v38 = vpop.permute.xlu0 %4305 }
 0x684   :  { %12833 = vmatprep.mubr.msk.f32.mxu0 %vm8311_vm10, %v7151_v0  ;;  %v9396_v22 = vrot.slane %v9382_v6, %v20911_v54  ;;  %v8647_v31 = vadd.f32 %v8646_v35, %v18306_v52  ;;  %v5483_v34 = vsel %vm5403_vm7, %v18160_v62, %v4310_v8  ;;  %v9397_v39 = vcombine.high %v18411_v13, %v18411_v13  ;;  %v1651_v0 = vld [vmem:[#allocation2 + $0x341] sm:$0x3] }
 0x685   :  { %v7168_v2 = vcombine.low %v21442_v63, %v7167_v20  ;;  %4337 = vrot.lane.b32.xlu1 %v1652_v56, %s13032_s30  ;;  %v18433_v21 = vcombine.low %v6784_v5, %v6786_v9  ;;  %v10569_v35 = vmax.f32 %v18411_v13, 0.0  ;;  %v18440_v6 = vsel %vm5403_vm7, %v17987_v51, %v4178_v7  ;;  %v8656_v56 = vpop.f32.mrb[5].mxu1  ;;  %v1748_v51 = vld [vmem:[#allocation2 + $0x34a] sm:$0xff] }
 0x686   :  { %v10571_v45 = vmax.f32 %v9396_v22, 0.0  ;;  %v10570_v62 = vmax.f32 %v9397_v39, 0.0  ;;  %v9365_v8 = vcombine.high %v8647_v31, %v8647_v31  ;;  %v9372_v47 = vrot.slane %v8647_v31, %v20911_v54  ;;  %v18442_v63 = vpop.permute.xlu1 %4557 }
 0x687   :  { %12834 = vmatmul.mubr.msk.f32.gmra.mrb[36].mxu0 %vm8311_vm10, %v7168_v2  ;;  %3955 = vrot.lane.b32.xlu0 %v1557_v18, %s13031_s29  ;;  %v9398_v13 = vcombine.high %v9396_v22, %v9396_v22  ;;  %v18448_v2 = vsel %vm5403_vm7, %v17973_v32, %v4174_v48  ;;  %v21443_v18 = vrot.slane %v18290_v57, %v20911_v54  ;;  %v18453_v31 = vpop.permute.xlu0 %4313 }
 0x688   :  { %v9379_v7 = vrot.slane %v9365_v8, %v20911_v54  ;;  %v9380_v39 = vcombine.high %v9372_v47, %v9372_v47  ;;  %v21444_v5 = vrot.slane %v18328_v37, %v20911_v54  ;;  %v21445_v22 = vrot.slane %v18302_v26, %v20911_v54  ;;  %v1586_v8 = vld [vmem:[#allocation2 + $0x109] sm:$0xff] }
 0x689   :  { %v8001_v9 = vcombine.low %v7993_v42, %v21443_v18  ;;  %4335 = vrot.lane.b32.xlu1 %v1651_v0, %s13032_s30  ;;  %v11497_v48 = vcombine.low %v10570_v62, %v10571_v45  ;;  %v5580_v57 = vsel %vm5500_vm9, %v5483_v34, %v4694_v23  ;;  %v8662_v42 = vadd.f32 %v12865_v46, %v18298_v36  ;;  %v1653_v62 = vld [vmem:[#allocation2 + $0x351] sm:$0xff] }
 0x68a   :  { %v8018_v32 = vcombine.low %v21445_v22, %v21444_v5  ;;  %v8657_v18 = vadd.f32 %v8656_v56, %v18304_v17  ;;  %v9381_v55 = vcombine.high %v9379_v7, %v9379_v7  ;;  %v10565_v20 = vmax.f32 %v9372_v47, 0.0  ;;  %v18471_v26 = vpop.permute.xlu1 %4689 }
 0x68b   :  { %12908 = vmatprep.mubr.msk.f32.mxu1 %vm8311_vm10, %v8001_v9  ;;  %v10566_v37 = vmax.f32 %v9380_v39, 0.0  ;;  %v10567_v24 = vmax.f32 %v9379_v7, 0.0  ;;  %4205 = vrot.lane.b32.xlu0 %v1586_v8, %s13032_s30  ;;  %v6787_v45 = vcombine.high %v5580_v57, %v5580_v57  ;;  %v6794_v0 = vrot.slane %v5580_v57, %v20911_v54  ;;  %v18475_v46 = vpop.permute.xlu0 %4561  ;;  %v1747_v57 = vld [vmem:[#allocation2 + $0x342] sm:$0x3] }
 0x68c   :  { %12909 = vmatmul.mubr.msk.f32.gmra.mrb[34].mxu1 %vm8311_vm10, %v8018_v32  ;;  %v9416_v23 = vcombine.high %v8662_v42, %v8662_v42  ;;  %v9423_v34 = vrot.slane %v8662_v42, %v20911_v54  ;;  %v10568_v56 = vmax.f32 %v9381_v55, 0.0  ;;  %v9399_v9 = vcombine.high %v8657_v18, %v8657_v18 }
 0x68d   :  { %v11473_v5 = vcombine.low %v10565_v20, %v10566_v37  ;;  %v11495_v47 = vrot.slane %v10567_v24, %v20911_v54  ;;  %4721 = vrot.lane.b32.xlu1 %v1748_v51, %s13033_s6  ;;  %v6801_v7 = vrot.slane %v6787_v45, %v20911_v54  ;;  %v6802_v39 = vcombine.high %v6794_v0, %v6794_v0 }
 0x68e   :  { %v9430_v22 = vrot.slane %v9416_v23, %v20911_v54  ;;  %v9431_v32 = vcombine.high %v9423_v34, %v9423_v34  ;;  %v10572_v8 = vmax.f32 %v9398_v13, 0.0  ;;  %v11496_v53 = vcombine.low %v10568_v56, %v10569_v35  ;;  %v18488_v55 = vpop.permute.xlu1 %4181 }
 0x68f   :  { %v11487_v42 = vrot.slane %v11473_v5, %v20911_v54  ;;  %12486 = vst.msk [vmem:[%s20059_s5 + $0x100] sm:$0x3] %vm12455_vm11, %v11495_v47  ;;  %v9406_v24 = vrot.slane %v8657_v18, %v20911_v54  ;;  %4339 = vrot.lane.b32.xlu0 %v1653_v62, %s13032_s30  ;;  %v18490_v20 = vcombine.low %v6794_v0, %v6802_v39  ;;  %v10577_v37 = vmax.f32 %v9423_v34, 0.0  ;;  %v4698_v13 = vpop.permute.xlu0 %4697  ;;  %v12868_v47 = vpop.f32.mrb[6].mxu1 }
 0x690   :  { %v9432_v51 = vcombine.high %v9430_v22, %v9430_v22  ;;  %v10578_v45 = vmax.f32 %v9431_v32, 0.0  ;;  %v11511_v23 = vrot.slane %v11497_v48, %v20911_v54  ;;  %v21446_v35 = vrot.slane %v18379_v41, %v20911_v54  ;;  %v18499_v34 = vpop.f32.mrb[7].mxu1  ;;  %v1682_v32 = vld [vmem:[#allocation2 + $0x10a] sm:$0xff] }
 0x691   :  { %v11504_v5 = vrot.slane %v11496_v53, %v20911_v54  ;;  %v9413_v18 = vrot.slane %v9399_v9, %v20911_v54  ;;  %4719 = vrot.lane.b32.xlu1 %v1747_v57, %s13033_s6  ;;  %v6803_v62 = vcombine.high %v6801_v7, %v6801_v7  ;;  %v10579_v0 = vmax.f32 %v9430_v22, 0.0 }
 0x692   :  { %v11488_v56 = vcombine.low %v21446_v35, %v11487_v42  ;;  %v10580_v39 = vmax.f32 %v9432_v51, 0.0  ;;  %v11537_v44 = vcombine.low %v10577_v37, %v10578_v45  ;;  %v9414_v41 = vcombine.high %v9406_v24, %v9406_v24  ;;  %v18506_v57 = vpop.permute.xlu1 %4315 }
 0x693   :  { %v11512_v48 = vcombine.low %v11504_v5, %v11511_v23  ;;  %v9415_v53 = vcombine.high %v9413_v18, %v9413_v18  ;;  %v10573_v9 = vmax.f32 %v9406_v24, 0.0  ;;  %4589 = vrot.lane.b32.xlu0 %v1682_v32, %s13033_s6  ;;  %v8051_v22 = vrot.slane %v18490_v20, %v20911_v54  ;;  %v18513_v45 = vpop.permute.xlu0 %4311  ;;  %v1749_v23 = vld [vmem:[#allocation2 + $0x352] sm:$0xff] }
 0x694   :  { %12485 = vst.msk [vmem:[%s20059_s5 + $0xf8] sm:$0xff] %vm5112_vm5, %v11488_v56  ;;  %v5481_v42 = vsel %vm5403_vm7, %v18150_v11, %v18421_v38  ;;  %v11538_v51 = vcombine.low %v10579_v0, %v10580_v39  ;;  %v10575_v37 = vmax.f32 %v9413_v18, 0.0  ;;  %v10574_v24 = vmax.f32 %v9414_v41, 0.0  ;;  %v1654_v39 = vld [vmem:[#allocation2 + $0x359] sm:$0x3] }
 0x695   :  { %12487 = vst.msk [vmem:[%s20059_s5 + $0x108] sm:$0xff] %vm5112_vm5, %v11512_v48  ;;  %v10576_v35 = vmax.f32 %v9415_v53, 0.0  ;;  %v11513_v56 = vcombine.low %v10572_v8, %v10573_v9  ;;  %v5512_v5 = vsel %vm5500_vm9, %v18448_v2, %v18442_v63  ;;  %3957 = vrot.lane.b32.xlu1 %v1558_v25, %s13031_s29  ;;  %v18523_v11 = vcombine.low %v6801_v7, %v6803_v62 }
 0x696   :  { %v11545_v38 = vrot.slane %v11537_v44, %v20911_v54  ;;  %v11552_v18 = vrot.slane %v11538_v51, %v20911_v54  ;;  %v5867_v0 = vrot.slane %v5512_v5, %v20911_v54  ;;  %v11514_v32 = vcombine.low %v10574_v24, %v10575_v37  ;;  %v18534_v25 = vpop.permute.xlu1 %4179  ;;  %v1750_v51 = vld [vmem:[#allocation2 + $0x35a] sm:$0x3] }
 0x697   :  { %v11536_v48 = vrot.slane %v10576_v35, %v20911_v54  ;;  %v5860_v8 = vcombine.high %v18356_v14, %v18356_v14  ;;  %v5578_v63 = vsel %vm5500_vm9, %v5481_v42, %v18471_v26  ;;  %4723 = vrot.lane.b32.xlu0 %v1749_v23, %s13033_s6  ;;  %v5485_v44 = vsel %vm5403_vm7, %v18174_v58, %v18453_v31  ;;  %v18543_v41 = vpop.permute.xlu0 %4565  ;;  %v1585_v14 = vld [vmem:[#allocation2 + $0x101] sm:$0x3] }
 0x698   :  { %v11553_v2 = vcombine.low %v11545_v38, %v11552_v18  ;;  %v6769_v7 = vrot.slane %v5578_v63, %v20911_v54  ;;  %v5514_v62 = vsel %vm5500_vm9, %v18440_v6, %v18475_v46  ;;  %v11521_v26 = vrot.slane %v11513_v56, %v20911_v54 }
 0x699   :  { %v11528_v53 = vrot.slane %v11514_v32, %v20911_v54  ;;  %12489 = vst.msk [vmem:[%s20059_s5 + $0x118] sm:$0x3] %vm12455_vm11, %v11536_v48  ;;  %v5885_v9 = vcombine.high %v5514_v62, %v5514_v62  ;;  %v5892_v58 = vrot.slane %v5514_v62, %v20911_v54  ;;  %4341 = vrot.lane.b32.xlu1 %v1654_v39, %s13032_s30  ;;  %v18574_v39 = vpop.f32.mrb[8].mxu1  ;;  %v1681_v32 = vld [vmem:[#allocation2 + $0x102] sm:$0x3] }
 0x69a   :  { %v8061_v6 = vrot.slane %v18523_v11, %v20911_v54  ;;  %12490 = vst.msk [vmem:[%s20059_s5 + $0x120] sm:$0xff] %vm5112_vm5, %v11553_v2  ;;  %v7170_v31 = vcombine.low %v5860_v8, %v5867_v0  ;;  %v5582_v46 = vsel %vm5500_vm9, %v5485_v44, %v4698_v13  ;;  %v8672_v42 = vadd.f32 %v12868_v47, %v18308_v3  ;;  %v18563_v56 = vpop.permute.xlu1 %4319  ;;  %v8676_v2 = vpop.f32.mrb[9].mxu1 }
 0x69b   :  { %v11529_v37 = vcombine.low %v11521_v26, %v11528_v53  ;;  %v5899_v23 = vrot.slane %v5885_v9, %v20911_v54  ;;  %v5900_v24 = vcombine.high %v5892_v58, %v5892_v58  ;;  %v6811_v35 = vcombine.high %v5582_v46, %v5582_v46  ;;  %4203 = vrot.lane.b32.xlu0 %v1585_v14, %s13032_s30  ;;  %v18572_v0 = vpop.permute.xlu0 %4183 }
 0x69c   :  { %v21447_v5 = vcombine.high %v18296_v12, %v18296_v12  ;;  %v18569_v18 = vrot.slane %v5582_v46, %v20911_v54  ;;  %v9450_v13 = vcombine.high %v8672_v42, %v8672_v42  ;;  %v9457_v47 = vrot.slane %v8672_v42, %v20911_v54 }
 0x69d   :  { %12488 = vst.msk [vmem:[%s20059_s5 + $0x110] sm:$0xff] %vm5112_vm5, %v11529_v37  ;;  %v5901_v48 = vcombine.high %v5899_v23, %v5899_v23  ;;  %v7203_v8 = vcombine.low %v5892_v58, %v5900_v24  ;;  %v18581_v12 = vrot.slane %v6811_v35, %v20911_v54  ;;  %v8667_v63 = vadd.f32 %v18499_v34, %v18298_v36 }
 0x69e   :  { %v8019_v38 = vcombine.low %v21447_v5, %v6769_v7  ;;  %4725 = vrot.lane.b32.xlu1 %v1750_v51, %s13033_s6  ;;  %v6826_v44 = vcombine.high %v18569_v18, %v18569_v18  ;;  %v9464_v7 = vrot.slane %v9450_v13, %v20911_v54  ;;  %v9465_v62 = vcombine.high %v9457_v47, %v9457_v47  ;;  %v4700_v46 = vpop.permute.xlu1 %4699 }
 0x69f   :  { %v10585_v14 = vmax.f32 %v9457_v47, 0.0  ;;  %v7184_v26 = vrot.slane %v7170_v31, %v20911_v54  ;;  %v7204_v53 = vcombine.low %v5899_v23, %v5901_v48  ;;  %v9433_v9 = vcombine.high %v8667_v63, %v8667_v63  ;;  %4587 = vrot.lane.b32.xlu0 %v1681_v32, %s13033_s6  ;;  %v18598_v24 = vpop.permute.xlu0 %4695 }
 0x6a0   :  { %v9440_v58 = vrot.slane %v8667_v63, %v20911_v54  ;;  %v5419_v34 = vsel %vm5403_vm7, %v17997_v29, %v18488_v55  ;;  %v18596_v42 = vcombine.low %v6826_v44, %v18581_v12  ;;  %v10586_v51 = vmax.f32 %v9465_v62, 0.0 }
 0x6a1   :  { %v10587_v37 = vmax.f32 %v9464_v7, 0.0  ;;  %v8027_v31 = vrot.slane %v8019_v38, %v20911_v54  ;;  %v11577_v23 = vrot.slane %v10585_v14, %v20911_v54  ;;  %v9447_v35 = vrot.slane %v9433_v9, %v20911_v54 }
 0x6a2   :  { %v9448_v5 = vcombine.high %v9440_v58, %v9440_v58  ;;  %v7211_v13 = vrot.slane %v7203_v8, %v20911_v54  ;;  %v7218_v47 = vrot.slane %v7204_v53, %v20911_v54  ;;  %v9466_v32 = vcombine.high %v9464_v7, %v9464_v7  ;;  %v18614_v62 = vpop.permute.xlu1 %4567 }
 0x6a3   :  { %v18605_v29 = vcombine.low %v10586_v51, %v10587_v37  ;;  %12492 = vst.msk [vmem:[%s20059_s5 + $0x130] sm:$0x3] %vm12455_vm11, %v11577_v23  ;;  %v9449_v55 = vcombine.high %v9447_v35, %v9447_v35  ;;  %v10581_v48 = vmax.f32 %v9440_v58, 0.0  ;;  %v21448_v63 = vrot.slane %v18363_v19, %v20911_v54  ;;  %v18626_v51 = vpop.permute.xlu0 %4563 }
 0x6a4   :  { %v10582_v38 = vmax.f32 %v9448_v5, 0.0  ;;  %v8078_v8 = vrot.slane %v18596_v42, %v20911_v54  ;;  %v10583_v14 = vmax.f32 %v9447_v35, 0.0  ;;  %v21449_v53 = vrot.slane %v18407_v27, %v20911_v54 }
 0x6a5   :  { %v7185_v44 = vcombine.low %v21448_v63, %v7184_v26  ;;  %v11586_v7 = vrot.slane %v18605_v29, %v20911_v54  ;;  %v21450_v9 = vrot.slane %v18393_v10, %v20911_v54  ;;  %v10584_v19 = vmax.f32 %v9449_v55, 0.0 }
 0x6a6   :  { %v11554_v26 = vcombine.low %v10581_v48, %v10582_v38  ;;  %v5486_v37 = vsel %vm5403_vm7, %v18209_v43, %v18506_v57  ;;  %v21451_v23 = vrot.slane %v18417_v28, %v20911_v54  ;;  %v5484_v10 = vsel %vm5403_vm7, %v18179_v50, %v18513_v45  ;;  %v21453_v28 = vld [vmem:[#allocation170_spill] sm:$0xff]  ;;  %v18656_v20 = vpop.permute.xlu1 %4187 }
 0x6a7   :  { %v7202_v58 = vcombine.low %v21450_v9, %v21449_v53  ;;  %12836 = vmatprep.mubr.msk.f32.mxu0 %vm8311_vm10, %v7185_v44  ;;  %v21452_v27 = vrot.slane %v18433_v21, %v20911_v54  ;;  %v5516_v43 = vsel %vm5500_vm9, %v5419_v34, %v18543_v41  ;;  %v7219_v57 = vcombine.low %v7211_v13, %v7218_v47  ;;  %v18666_v13 = vpop.f32.mrb[10].mxu1 }
 0x6a8   :  { %v8035_v35 = vcombine.low %v8027_v31, %v21451_v23  ;;  %v11555_v55 = vcombine.low %v10583_v14, %v10584_v19  ;;  %v18651_v31 = vsel %vm5403_vm7, %v21453_v28, %v18534_v25  ;;  %v5909_v50 = vcombine.high %v5516_v43, %v5516_v43  ;;  %v18664_v25 = vpop.permute.xlu0 %4703  ;;  %v18675_v63 = vpop.f32.mrb[11].mxu1 }
 0x6a9   :  { %12837 = vmatmul.mubr.msk.f32.gmra.mrb[38].mxu0 %vm8311_vm10, %v7202_v58  ;;  %v8052_v5 = vcombine.low %v21452_v27, %v8051_v22  ;;  %v18654_v45 = vrot.slane %v5516_v43, %v20911_v54  ;;  %v10588_v21 = vmax.f32 %v9466_v32, 0.0  ;;  %v11562_v22 = vrot.slane %v11554_v26, %v20911_v54 }
 0x6aa   :  { %12911 = vmatprep.mubr.msk.f32.mxu1 %vm8311_vm10, %v8035_v35  ;;  %12839 = vmatprep.mubr.msk.f32.mxu0 %vm8311_vm10, %v7219_v57  ;;  %v8682_v41 = vadd.f32 %v18574_v39, %v18300_v49  ;;  %v8677_v34 = vadd.f32 %v8676_v2, %v18317_v59  ;;  %v11569_v47 = vrot.slane %v11555_v55, %v20911_v54  ;;  %v18685_v26 = vpop.permute.xlu1 %4321 }
 0x6ab   :  { %12912 = vmatmul.mubr.msk.f32.gmra.mrb[36].mxu1 %vm8311_vm10, %v8052_v5  ;;  %v18670_v48 = vrot.slane %v5909_v50, %v20911_v54  ;;  %v5924_v32 = vcombine.high %v18654_v45, %v18654_v45  ;;  %v5583_v38 = vsel %vm5500_vm9, %v5486_v37, %v4700_v46  ;;  %v5488_v58 = vsel %vm5403_vm7, %v18237_v61, %v18563_v56 }
 0x6ac   :  { %v9484_v44 = vcombine.high %v8682_v41, %v8682_v41  ;;  %v9491_v39 = vrot.slane %v8682_v41, %v20911_v54  ;;  %v9467_v2 = vcombine.high %v8677_v34, %v8677_v34  ;;  %v9474_v14 = vrot.slane %v8677_v34, %v20911_v54  ;;  %v18691_v27 = vpop.permute.xlu0 %4317 }
 0x6ad   :  { %v11570_v53 = vcombine.low %v11562_v22, %v11569_v47  ;;  %v18680_v9 = vcombine.low %v5924_v32, %v18670_v48  ;;  %v6828_v19 = vcombine.high %v5583_v38, %v5583_v38  ;;  %v6827_v35 = vcombine.high %v18581_v12, %v18581_v12 }
 0x6ae   :  { %v9498_v46 = vrot.slane %v9484_v44, %v20911_v54  ;;  %v9499_v37 = vcombine.high %v9491_v39, %v9491_v39  ;;  %v9481_v23 = vrot.slane %v9467_v2, %v20911_v54  ;;  %v10593_v5 = vmax.f32 %v9491_v39, 0.0  ;;  %v18701_v47 = vpop.permute.xlu1 %4185 }
 0x6af   :  { %12491 = vst.msk [vmem:[%s20059_s5 + $0x128] sm:$0xff] %vm5112_vm5, %v11570_v53  ;;  %v9482_v61 = vcombine.high %v9474_v14, %v9474_v14  ;;  %v10589_v56 = vmax.f32 %v9474_v14, 0.0  ;;  %v6835_v43 = vrot.slane %v5583_v38, %v20911_v54  ;;  %v18699_v12 = vrot.slane %v6828_v19, %v20911_v54 }
 0x6b0   :  { %v9500_v57 = vcombine.high %v9498_v46, %v9498_v46  ;;  %v10594_v55 = vmax.f32 %v9499_v37, 0.0  ;;  %v10595_v28 = vmax.f32 %v9498_v46, 0.0  ;;  %v9483_v50 = vcombine.high %v9481_v23, %v9481_v23  ;;  %v18704_v14 = vpop.permute.xlu0 %4571 }
 0x6b1   :  { %v10590_v22 = vmax.f32 %v9482_v61, 0.0  ;;  %v10591_v41 = vmax.f32 %v9481_v23, 0.0  ;;  %v11579_v34 = vcombine.low %v10588_v21, %v10589_v56  ;;  %v6843_v2 = vcombine.high %v6835_v43, %v6835_v43  ;;  %v21454_v21 = vld [vmem:[#allocation172_spill] sm:$0xff] }
 0x6b2   :  { %v10596_v32 = vmax.f32 %v9500_v57, 0.0  ;;  %v11618_v44 = vrot.slane %v10594_v55, %v20911_v54  ;;  %v10592_v39 = vmax.f32 %v9483_v50, 0.0  ;;  %v8071_v46 = vcombine.low %v6827_v35, %v6835_v43  ;;  %v18729_v43 = vpop.permute.xlu1 %4701 }
 0x6b3   :  { %v11593_v38 = vrot.slane %v11579_v34, %v20911_v54  ;;  %v11595_v53 = vcombine.low %v10590_v22, %v10591_v41  ;;  %v5581_v37 = vsel %vm5500_vm9, %v5484_v10, %v18598_v24  ;;  %v5420_v19 = vsel %vm5403_vm7, %v21454_v21, %v18572_v0  ;;  %v18747_v41 = vpop.f32.mrb[12].mxu1 }
 0x6b4   :  { %v18712_v23 = vcombine.low %v10595_v28, %v10596_v32  ;;  %12495 = vst.msk [vmem:[%s20059_s5 + $0x148] sm:$0x3] %vm12455_vm11, %v11618_v44  ;;  %v11596_v61 = vcombine.low %v10592_v39, %v10593_v5  ;;  %v6810_v56 = vrot.slane %v5581_v37, %v20911_v54  ;;  %v7235_v35 = vrot.slane %v18680_v9, %v20911_v54  ;;  %v18735_v50 = vpop.permute.xlu0 %4189  ;;  %v18753_v39 = vpop.f32.mrb[13].mxu1 }
 0x6b5   :  { %v11594_v24 = vcombine.low %v11586_v7, %v11593_v38  ;;  %v18725_v10 = vcombine.low %v6843_v2, %v18699_v12  ;;  %v5517_v0 = vsel %vm5500_vm9, %v5420_v19, %v18614_v62  ;;  %v11603_v57 = vrot.slane %v11595_v53, %v20911_v54 }
 0x6b6   :  { %v11610_v5 = vrot.slane %v11596_v61, %v20911_v54  ;;  %v8085_v55 = vrot.slane %v8071_v46, %v20911_v54  ;;  %v8054_v28 = vcombine.low %v6810_v56, %v18569_v18  ;;  %v5925_v29 = vcombine.high %v18670_v48, %v18670_v48 }
 0x6b7   :  { %12493 = vst.msk [vmem:[%s20059_s5 + $0x138] sm:$0xff] %vm5112_vm5, %v11594_v24  ;;  %v5926_v62 = vcombine.high %v5517_v0, %v5517_v0  ;;  %v5933_v7 = vrot.slane %v5517_v0, %v20911_v54  ;;  %v5515_v22 = vsel %vm5500_vm9, %v18651_v31, %v18626_v51  ;;  %v11627_v18 = vrot.slane %v18712_v23, %v20911_v54  ;;  %v18762_v31 = vpop.permute.xlu1 %4569 }
 0x6b8   :  { %v11611_v34 = vcombine.low %v11603_v57, %v11610_v5  ;;  %v8068_v32 = vrot.slane %v8054_v28, %v20911_v54  ;;  %v5908_v44 = vrot.slane %v5515_v22, %v20911_v54  ;;  %v5585_v51 = vsel %vm5500_vm9, %v5488_v58, %v18664_v25  ;;  %v18773_v19 = vpop.permute.xlu0 %4705  ;;  %v21455_v58 = vld [vmem:[#allocation174_spill] sm:$0xff] }
 0x6b9   :  { %v18756_v48 = vrot.slane %v5926_v62, %v20911_v54  ;;  %v5941_v2 = vcombine.high %v5933_v7, %v5933_v7  ;;  %v18758_v38 = vcombine.low %v5925_v29, %v5933_v7  ;;  %v8095_v53 = vrot.slane %v18725_v10, %v20911_v54 }
 0x6ba   :  { %12494 = vst.msk [vmem:[%s20059_s5 + $0x140] sm:$0xff] %vm5112_vm5, %v11611_v34  ;;  %v6852_v46 = vcombine.high %v5585_v51, %v5585_v51  ;;  %v6859_v37 = vrot.slane %v5585_v51, %v20911_v54  ;;  %v8692_v21 = vadd.f32 %v18666_v13, %v18306_v52  ;;  %v7220_v25 = vcombine.low %v5908_v44, %v18654_v45  ;;  %v18801_v34 = vpop.f32.mrb[14].mxu1 }
 0x6bb   :  { %v5422_v61 = vsel %vm5403_vm7, %v21455_v58, %v18656_v20  ;;  %v8687_v56 = vadd.f32 %v18675_v63, %v18293_v60  ;;  %v8069_v24 = vcombine.low %v8061_v6, %v8068_v32  ;;  %v7238_v0 = vcombine.low %v5941_v2, %v18756_v48  ;;  %v18791_v63 = vpop.permute.xlu1 %4325  ;;  %v18805_v51 = vpop.f32.mrb[15].mxu1 }
 0x6bc   :  { %v6866_v57 = vrot.slane %v6852_v46, %v20911_v54  ;;  %v6867_v13 = vcombine.high %v6859_v37, %v6859_v37  ;;  %v9518_v5 = vcombine.high %v8692_v21, %v8692_v21  ;;  %v7245_v45 = vrot.slane %v18758_v38, %v20911_v54  ;;  %v18799_v22 = vpop.permute.xlu0 %4573 }
 0x6bd   :  { %v9525_v28 = vrot.slane %v8692_v21, %v20911_v54  ;;  %v9501_v29 = vcombine.high %v8687_v56, %v8687_v56  ;;  %v9508_v20 = vrot.slane %v8687_v56, %v20911_v54  ;;  %12914 = vmatprep.mubr.msk.f32.mxu1 %vm8311_vm10, %v8069_v24  ;;  %v8086_v7 = vcombine.low %v8078_v8, %v8085_v55 }
 0x6be   :  { %v6868_v11 = vcombine.high %v6866_v57, %v6866_v57  ;;  %v18793_v6 = vcombine.low %v6859_v37, %v6867_v13  ;;  %v9532_v62 = vrot.slane %v9518_v5, %v20911_v54  ;;  %v7228_v32 = vrot.slane %v7220_v25, %v20911_v54 }
 0x6bf   :  { %v9533_v44 = vcombine.high %v9525_v28, %v9525_v28  ;;  %v9515_v2 = vrot.slane %v9501_v29, %v20911_v54  ;;  %v9516_v38 = vcombine.high %v9508_v20, %v9508_v20  ;;  %v10601_v21 = vmax.f32 %v9525_v28, 0.0  ;;  %12915 = vmatmul.mubr.msk.f32.gmra.mrb[38].mxu1 %vm8311_vm10, %v8086_v7  ;;  %v18810_v24 = vpop.permute.xlu1 %4709 }
 0x6c0   :  { %v18807_v46 = vcombine.low %v6866_v57, %v6868_v11  ;;  %v9534_v37 = vcombine.high %v9532_v62, %v9532_v62  ;;  %v10603_v58 = vmax.f32 %v9532_v62, 0.0  ;;  %v10597_v55 = vmax.f32 %v9508_v20, 0.0  ;;  %v18818_v28 = vpop.permute.xlu0 %4193 }
 0x6c1   :  { %v10602_v42 = vmax.f32 %v9533_v44, 0.0  ;;  %v9517_v8 = vcombine.high %v9515_v2, %v9515_v2  ;;  %v10598_v56 = vmax.f32 %v9516_v38, 0.0  ;;  %v7252_v25 = vrot.slane %v7238_v0, %v20911_v54 }
 0x6c2   :  { %v8119_v57 = vrot.slane %v18807_v46, %v20911_v54  ;;  %v11659_v5 = vrot.slane %v10603_v58, %v20911_v54  ;;  %v10599_v11 = vmax.f32 %v9515_v2, 0.0  ;;  %v10604_v20 = vmax.f32 %v9534_v37, 0.0 }
 0x6c3   :  { %v11637_v29 = vcombine.low %v10601_v21, %v10602_v42  ;;  %v10600_v62 = vmax.f32 %v9517_v8, 0.0  ;;  %v11620_v7 = vcombine.low %v10597_v55, %v10598_v56  ;;  %v5487_v0 = vsel %vm5403_vm7, %v18204_v15, %v18691_v27  ;;  %v18834_v42 = vpop.permute.xlu1 %4195 }
 0x6c4   :  { %12498 = vst.msk [vmem:[%s20059_s5 + $0x160] sm:$0x3] %vm12455_vm11, %v11659_v5  ;;  %v7236_v44 = vcombine.low %v7228_v32, %v7235_v35  ;;  %v5519_v38 = vsel %vm5500_vm9, %v5422_v61, %v18704_v14  ;;  %v7253_v15 = vcombine.low %v7245_v45, %v7252_v25  ;;  %v5584_v9 = vsel %vm5500_vm9, %v5487_v0, %v18729_v43  ;;  %v18842_v14 = vpop.permute.xlu0 %4191  ;;  %v21456_v25 = vld [vmem:[#allocation171_spill] sm:$0xff] }
 0x6c5   :  { %v11651_v2 = vrot.slane %v11637_v29, %v20911_v54  ;;  %v11634_v37 = vrot.slane %v11620_v7, %v20911_v54  ;;  %v11636_v21 = vcombine.low %v10599_v11, %v10600_v62  ;;  %v5950_v58 = vcombine.high %v5519_v38, %v5519_v38 }
 0x6c6   :  { %12840 = vmatmul.mubr.msk.f32.gmra.mrb[40].mxu0 %vm8311_vm10, %v7236_v44  ;;  %v5957_v8 = vrot.slane %v5519_v38, %v20911_v54  ;;  %v6844_v27 = vcombine.high %v18699_v12, %v18699_v12  ;;  %v6851_v55 = vrot.slane %v5584_v9, %v20911_v54  ;;  %v5489_v45 = vsel %vm5403_vm7, %v18232_v40, %v18685_v26  ;;  %v21457_v44 = vld [vmem:[#allocation173_spill] sm:$0xff] }
 0x6c7   :  { %v11635_v35 = vcombine.low %v11627_v18, %v11634_v37  ;;  %v11644_v61 = vrot.slane %v11636_v21, %v20911_v54  ;;  %v5964_v32 = vrot.slane %v5950_v58, %v20911_v54  ;;  %12842 = vmatprep.mubr.msk.f32.mxu0 %vm8311_vm10, %v7253_v15  ;;  %v8702_v12 = vadd.f32 %v18747_v41, %v18304_v17  ;;  %v18858_v18 = vpop.f32.mrb[16].mxu1  ;;  %v18871_v41 = vpop.permute.xlu1 %4327 }
 0x6c8   :  { %v5965_v43 = vcombine.high %v5957_v8, %v5957_v8  ;;  %v8697_v23 = vadd.f32 %v18753_v39, %v18304_v17  ;;  %v5421_v40 = vsel %vm5403_vm7, %v21456_v25, %v18701_v47  ;;  %v18867_v5 = vcombine.low %v6844_v27, %v6851_v55  ;;  %v18869_v29 = vpop.f32.mrb[17].mxu1  ;;  %v18876_v0 = vpop.permute.xlu0 %4323 }
 0x6c9   :  { %v11652_v56 = vcombine.low %v11644_v61, %v11651_v2  ;;  %12496 = vst.msk [vmem:[%s20059_s5 + $0x150] sm:$0xff] %vm5112_vm5, %v11635_v35  ;;  %v5966_v26 = vcombine.high %v5964_v32, %v5964_v32  ;;  %v9552_v11 = vcombine.high %v8702_v12, %v8702_v12  ;;  %v9559_v62 = vrot.slane %v8702_v12, %v20911_v54 }
 0x6ca   :  { %v18873_v39 = vcombine.low %v5957_v8, %v5965_v43  ;;  %v9535_v7 = vcombine.high %v8697_v23, %v8697_v23  ;;  %v5423_v38 = vsel %vm5403_vm7, %v21457_v44, %v18735_v50  ;;  %v9542_v2 = vrot.slane %v8697_v23, %v20911_v54 }
 0x6cb   :  { %12497 = vst.msk [vmem:[%s20059_s5 + $0x158] sm:$0xff] %vm5112_vm5, %v11652_v56  ;;  %v18882_v47 = vcombine.low %v5964_v32, %v5966_v26  ;;  %v5518_v37 = vsel %vm5500_vm9, %v5421_v40, %v18762_v31  ;;  %v8102_v21 = vrot.slane %v18867_v5, %v20911_v54  ;;  %v9566_v58 = vrot.slane %v9552_v11, %v20911_v54  ;;  %v18898_v61 = vpop.permute.xlu1 %3947 }
 0x6cc   :  { %v9567_v8 = vcombine.high %v9559_v62, %v9559_v62  ;;  %v5942_v15 = vcombine.high %v18756_v48, %v18756_v48  ;;  %v9549_v27 = vrot.slane %v9535_v7, %v20911_v54  ;;  %v9550_v50 = vcombine.high %v9542_v2, %v9542_v2 }
 0x6cd   :  { %v10605_v35 = vmax.f32 %v9542_v2, 0.0  ;;  %v9568_v32 = vcombine.high %v9566_v58, %v9566_v58  ;;  %v10611_v55 = vmax.f32 %v9566_v58, 0.0  ;;  %v5949_v43 = vrot.slane %v5518_v37, %v20911_v54  ;;  %v18901_v12 = vpop.permute.xlu0 %4577 }
 0x6ce   :  { %v10610_v31 = vmax.f32 %v9567_v8, 0.0  ;;  %v9551_v23 = vcombine.high %v9549_v27, %v9549_v27  ;;  %v10606_v56 = vmax.f32 %v9550_v50, 0.0  ;;  %v10607_v25 = vmax.f32 %v9549_v27, 0.0 }
 0x6cf   :  { %v11660_v48 = vcombine.low %v10604_v20, %v10605_v35  ;;  %v10609_v40 = vmax.f32 %v9559_v62, 0.0  ;;  %v10612_v26 = vmax.f32 %v9568_v32, 0.0  ;;  %v5586_v7 = vsel %vm5500_vm9, %v5489_v45, %v18773_v19  ;;  %v18915_v45 = vpop.permute.xlu1 %4579  ;;  %v18917_v35 = vpop.f32.mrb[18].mxu1 }
 0x6d0   :  { %v11678_v11 = vcombine.low %v10610_v31, %v10611_v55  ;;  %v7279_v44 = vrot.slane %v18882_v47, %v20911_v54  ;;  %v10608_v2 = vmax.f32 %v9551_v23, 0.0  ;;  %v11661_v8 = vcombine.low %v10606_v56, %v10607_v25  ;;  %v18931_v23 = vpop.f32.mrb[19].mxu1 }
 0x6d1   :  { %v6869_v58 = vcombine.high %v5586_v7, %v5586_v7  ;;  %v11700_v37 = vrot.slane %v10612_v26, %v20911_v54  ;;  %v11668_v9 = vrot.slane %v11660_v48, %v20911_v54  ;;  %v18909_v13 = vcombine.low %v5942_v15, %v5949_v43  ;;  %v18929_v43 = vpop.permute.xlu0 %4575 }
 0x6d2   :  { %v6876_v20 = vrot.slane %v5586_v7, %v20911_v54  ;;  %v11692_v62 = vrot.slane %v11678_v11, %v20911_v54  ;;  %v11675_v27 = vrot.slane %v11661_v8, %v20911_v54  ;;  %v11677_v50 = vcombine.low %v10608_v2, %v10609_v40 }
 0x6d3   :  { %v6883_v19 = vrot.slane %v6869_v58, %v20911_v54  ;;  %12501 = vst.msk [vmem:[%s20059_s5 + $0x178] sm:$0x3] %vm12455_vm11, %v11700_v37  ;;  %v5520_v32 = vsel %vm5500_vm9, %v5423_v38, %v18799_v22  ;;  %v8712_v31 = vadd.f32 %v18801_v34, %v18298_v36  ;;  %v8707_v55 = vadd.f32 %v18805_v51, %v18298_v36 }
 0x6d4   :  { %v6884_v15 = vcombine.high %v6876_v20, %v6876_v20  ;;  %v11676_v56 = vcombine.low %v11668_v9, %v11675_v27  ;;  %v11685_v25 = vrot.slane %v11677_v50, %v20911_v54  ;;  %v5967_v40 = vcombine.high %v5520_v32, %v5520_v32 }
 0x6d5   :  { %v6885_v48 = vcombine.high %v6883_v19, %v6883_v19  ;;  %v5974_v11 = vrot.slane %v5520_v32, %v20911_v54  ;;  %v9586_v22 = vcombine.high %v8712_v31, %v8712_v31  ;;  %v9593_v38 = vrot.slane %v8712_v31, %v20911_v54 }
 0x6d6   :  { %v18934_v26 = vcombine.low %v6876_v20, %v6884_v15  ;;  %v11693_v34 = vcombine.low %v11685_v25, %v11692_v62  ;;  %12499 = vst.msk [vmem:[%s20059_s5 + $0x168] sm:$0xff] %vm5112_vm5, %v11676_v56  ;;  %v5981_v9 = vrot.slane %v5967_v40, %v20911_v54  ;;  %v9569_v7 = vcombine.high %v8707_v55, %v8707_v55  ;;  %v18958_v56 = vpop.permute.xlu0 %4707 }
 0x6d7   :  { %v8122_v51 = vcombine.low %v6883_v19, %v6885_v48  ;;  %v7262_v2 = vrot.slane %v18909_v13, %v20911_v54  ;;  %v5982_v8 = vcombine.high %v5974_v11, %v5974_v11  ;;  %v9600_v58 = vrot.slane %v9586_v22, %v20911_v54  ;;  %v18956_v13 = vpop.permute.xlu1 %4711 }
 0x6d8   :  { %v9601_v37 = vcombine.high %v9593_v38, %v9593_v38  ;;  %12500 = vst.msk [vmem:[%s20059_s5 + $0x170] sm:$0xff] %vm5112_vm5, %v11693_v34  ;;  %v8129_v20 = vrot.slane %v18934_v26, %v20911_v54  ;;  %v5491_v62 = vsel %vm5403_vm7, %v18262_v33, %v18791_v63  ;;  %v5983_v27 = vcombine.high %v5981_v9, %v5981_v9 }
 0x6d9   :  { %v9576_v50 = vrot.slane %v8707_v55, %v20911_v54  ;;  %v7272_v19 = vcombine.low %v5974_v11, %v5982_v8  ;;  %v9602_v15 = vcombine.high %v9600_v58, %v9600_v58  ;;  %v10617_v32 = vmax.f32 %v9593_v38, 0.0 }
 0x6da   :  { %v10618_v31 = vmax.f32 %v9601_v37, 0.0  ;;  %v8136_v25 = vrot.slane %v8122_v51, %v20911_v54  ;;  %v10619_v48 = vmax.f32 %v9600_v58, 0.0  ;;  %v9583_v40 = vrot.slane %v9569_v7, %v20911_v54 }
 0x6db   :  { %v9584_v26 = vcombine.high %v9576_v50, %v9576_v50  ;;  %v18962_v22 = vcombine.low %v5981_v9, %v5983_v27  ;;  %v10620_v33 = vmax.f32 %v9602_v15, 0.0  ;;  %v8103_v55 = vcombine.low %v8095_v53, %v8102_v21  ;;  %v18983_v27 = vpop.permute.xlu1 %3945 }
 0x6dc   :  { %v11718_v63 = vcombine.low %v10617_v32, %v10618_v31  ;;  %v7286_v11 = vrot.slane %v7272_v19, %v20911_v54  ;;  %v9585_v38 = vcombine.high %v9583_v40, %v9583_v40  ;;  %v10613_v34 = vmax.f32 %v9576_v50, 0.0  ;;  %v18985_v50 = vpop.f32.mrb[20].mxu1 }
 0x6dd   :  { %v10614_v51 = vmax.f32 %v9584_v26, 0.0  ;;  %v11719_v8 = vcombine.low %v10619_v48, %v10620_v33  ;;  %v10615_v58 = vmax.f32 %v9583_v40, 0.0  ;;  %12917 = vmatprep.mubr.msk.f32.mxu1 %vm8311_vm10, %v8103_v55  ;;  %v21458_v9 = vrot.slane %v18793_v6, %v20911_v54  ;;  %v18997_v15 = vpop.f32.mrb[21].mxu1  ;;  %v21460_v40 = vld [vmem:[#allocation32_spill] sm:$0xff] }
 0x6de   :  { %v5588_v10 = vsel %vm5500_vm9, %v5491_v62, %v18810_v24  ;;  %v10616_v53 = vmax.f32 %v9585_v38, 0.0  ;;  %v7296_v46 = vrot.slane %v18962_v22, %v20911_v54  ;;  %v11726_v19 = vrot.slane %v11718_v63, %v20911_v54  ;;  %v18995_v62 = vpop.permute.xlu0 %4331  ;;  %v21463_v22 = vld [vmem:[#allocation176_spill] sm:$0xff] }
 0x6df   :  { %v8120_v5 = vcombine.low %v21458_v9, %v8119_v57  ;;  %v11701_v21 = vcombine.low %v10613_v34, %v10614_v51  ;;  %v6893_v7 = vcombine.high %v5588_v10, %v5588_v10  ;;  %v18981_v37 = vrot.slane %v5588_v10, %v20911_v54 }
 0x6e0   :  { %v11733_v6 = vrot.slane %v11719_v8, %v20911_v54  ;;  %v21459_v24 = vrot.slane %v18873_v39, %v20911_v54  ;;  %v11702_v32 = vcombine.low %v10615_v58, %v10616_v53  ;;  %v5425_v26 = vsel %vm5403_vm7, %v21460_v40, %v18818_v28  ;;  %v19038_v58 = vpop.permute.xlu1 %4199 }
 0x6e1   :  { %12918 = vmatmul.mubr.msk.f32.gmra.mrb[40].mxu1 %vm8311_vm10, %v8120_v5  ;;  %v19000_v31 = vrot.slane %v6893_v7, %v20911_v54  ;;  %v6908_v48 = vcombine.high %v18981_v37, %v18981_v37  ;;  %v5426_v39 = vsel %vm5403_vm7, %v18098_v1, %v18834_v42  ;;  %v8137_v63 = vcombine.low %v8129_v20, %v8136_v25 }
 0x6e2   :  { %v7270_v57 = vcombine.low %v7262_v2, %v21459_v24  ;;  %v11734_v33 = vcombine.low %v11726_v19, %v11733_v6  ;;  %v8722_v2 = vadd.f32 %v18858_v18, %v18317_v59  ;;  %v11709_v55 = vrot.slane %v11701_v21, %v20911_v54  ;;  %v19058_v21 = vpop.f32.mrb[22].mxu1 }
 0x6e3   :  { %v11716_v38 = vrot.slane %v11702_v32, %v20911_v54  ;;  %v19016_v34 = vcombine.low %v6908_v48, %v19000_v31  ;;  %v8717_v28 = vadd.f32 %v18869_v29, %v18308_v3  ;;  %v5424_v1 = vsel %vm5403_vm7, %v18060_v4, %v18842_v14  ;;  %12920 = vmatprep.mubr.msk.f32.mxu1 %vm8311_vm10, %v8137_v63  ;;  %v21461_v48 = vld [vmem:[#allocation165_spill] sm:$0xff] }
 0x6e4   :  { %12843 = vmatmul.mubr.msk.f32.gmra.mrb[42].mxu0 %vm8311_vm10, %v7270_v57  ;;  %12503 = vst.msk [vmem:[%s20059_s5 + $0x188] sm:$0xff] %vm5112_vm5, %v11734_v33  ;;  %v9620_v42 = vcombine.high %v8722_v2, %v8722_v2  ;;  %v9627_v18 = vrot.slane %v8722_v2, %v20911_v54  ;;  %v7287_v20 = vcombine.low %v7279_v44, %v7286_v11  ;;  %v19049_v44 = vpop.permute.xlu0 %3949  ;;  %v19061_v57 = vpop.f32.mrb[23].mxu1 }
 0x6e5   :  { %v11717_v25 = vcombine.low %v11709_v55, %v11716_v38  ;;  %v9603_v29 = vcombine.high %v8717_v28, %v8717_v28  ;;  %v9610_v51 = vrot.slane %v8717_v28, %v20911_v54  ;;  %v19036_v8 = vsel %vm5403_vm7, %v18276_v30, %v18871_v41  ;;  %v19078_v38 = vpop.permute.xlu1 %4197 }
 0x6e6   :  { %v8153_v4 = vrot.slane %v19016_v34, %v20911_v54  ;;  %v9634_v14 = vrot.slane %v9620_v42, %v20911_v54  ;;  %v9635_v9 = vcombine.high %v9627_v18, %v9627_v18  ;;  %v19046_v47 = vsel %vm5403_vm7, %v18267_v16, %v18876_v0  ;;  %12845 = vmatprep.mubr.msk.f32.mxu0 %vm8311_vm10, %v7287_v20 }
 0x6e7   :  { %12502 = vst.msk [vmem:[%s20059_s5 + $0x180] sm:$0xff] %vm5112_vm5, %v11717_v25  ;;  %v9617_v30 = vrot.slane %v9603_v29, %v20911_v54  ;;  %v9618_v41 = vcombine.high %v9610_v51, %v9610_v51  ;;  %v10621_v11 = vmax.f32 %v9610_v51, 0.0  ;;  %v5522_v5 = vsel %vm5500_vm9, %v5425_v26, %v18901_v12 }
 0x6e8   :  { %v9636_v10 = vcombine.high %v9634_v14, %v9634_v14  ;;  %v10626_v53 = vmax.f32 %v9635_v9, 0.0  ;;  %v10627_v16 = vmax.f32 %v9634_v14, 0.0  ;;  %v5991_v0 = vcombine.high %v5522_v5, %v5522_v5  ;;  %v19082_v20 = vpop.permute.xlu0 %4715 }
 0x6e9   :  { %v9619_v7 = vcombine.high %v9617_v30, %v9617_v30  ;;  %v10622_v19 = vmax.f32 %v9618_v41, 0.0  ;;  %v10623_v6 = vmax.f32 %v9617_v30, 0.0  ;;  %v11741_v24 = vrot.slane %v10621_v11, %v20911_v54 }
 0x6ea   :  { %v10625_v32 = vmax.f32 %v9627_v18, 0.0  ;;  %v19066_v40 = vsel %vm5306_vm8, %v21461_v48, %v18898_v61  ;;  %v5998_v12 = vrot.slane %v5522_v5, %v20911_v54  ;;  %v6005_v26 = vrot.slane %v5991_v0, %v20911_v54 }
 0x6eb   :  { %v10624_v33 = vmax.f32 %v9619_v7, 0.0  ;;  %v11742_v2 = vcombine.low %v10622_v19, %v10623_v6  ;;  %12504 = vst.msk [vmem:[%s20059_s5 + $0x190] sm:$0x3] %vm12455_vm11, %v11741_v24  ;;  %v5523_v63 = vsel %vm5500_vm9, %v5426_v39, %v18915_v45  ;;  %v5521_v55 = vsel %vm5500_vm9, %v5424_v1, %v18929_v43  ;;  %v19103_v19 = vpop.permute.xlu1 %4329 }
 0x6ec   :  { %v19080_v61 = vcombine.low %v10626_v53, %v10627_v16  ;;  %v6006_v28 = vcombine.high %v5998_v12, %v5998_v12  ;;  %v6007_v42 = vcombine.high %v6005_v26, %v6005_v26  ;;  %v6008_v18 = vcombine.high %v5523_v63, %v5523_v63 }
 0x6ed   :  { %v10628_v25 = vmax.f32 %v9636_v10, 0.0  ;;  %v11743_v29 = vcombine.low %v10624_v33, %v10625_v32  ;;  %v6015_v51 = vrot.slane %v5523_v63, %v20911_v54  ;;  %v5990_v14 = vrot.slane %v5521_v55, %v20911_v54 }
 0x6ee   :  { %v19086_v9 = vcombine.low %v6006_v28, %v6005_v26  ;;  %v19089_v45 = vrot.slane %v6008_v18, %v20911_v54  ;;  %v8732_v43 = vadd.f32 %v18917_v35, %v18293_v60  ;;  %v8727_v39 = vadd.f32 %v18931_v23, %v18300_v49  ;;  %v19110_v26 = vpop.permute.xlu0 %4201  ;;  %v19122_v18 = vpop.f32.mrb[24].mxu1 }
 0x6ef   :  { %v11750_v1 = vrot.slane %v11742_v2, %v20911_v54  ;;  %v11757_v30 = vrot.slane %v11743_v29, %v20911_v54  ;;  %v6023_v41 = vcombine.high %v6015_v51, %v6015_v51  ;;  %v7306_v11 = vcombine.low %v6007_v42, %v6015_v51 }
 0x6f0   :  { %v11767_v5 = vrot.slane %v19080_v61, %v20911_v54  ;;  %v9654_v10 = vcombine.high %v8732_v43, %v8732_v43  ;;  %v9661_v53 = vrot.slane %v8732_v43, %v20911_v54  ;;  %v9637_v16 = vcombine.high %v8727_v39, %v8727_v39  ;;  %v19124_v43 = vpop.f32.mrb[25].mxu1 }
 0x6f1   :  { %v11758_v0 = vcombine.low %v11750_v1, %v11757_v30  ;;  %v7313_v35 = vrot.slane %v19086_v9, %v20911_v54  ;;  %v7320_v7 = vrot.slane %v7306_v11, %v20911_v54  ;;  %v7289_v23 = vcombine.low %v5990_v14, %v5998_v12 }
 0x6f2   :  { %v19106_v6 = vcombine.low %v6023_v41, %v19089_v45  ;;  %v9668_v24 = vrot.slane %v9654_v10, %v20911_v54  ;;  %v9669_v32 = vcombine.high %v9661_v53, %v9661_v53  ;;  %v9644_v48 = vrot.slane %v8727_v39, %v20911_v54  ;;  %v19133_v10 = vpop.permute.xlu1 %4583 }
 0x6f3   :  { %12505 = vst.msk [vmem:[%s20059_s5 + $0x198] sm:$0xff] %vm5112_vm5, %v11758_v0  ;;  %v10633_v33 = vmax.f32 %v9661_v53, 0.0  ;;  %v9651_v12 = vrot.slane %v9637_v16, %v20911_v54  ;;  %v6909_v2 = vcombine.high %v19000_v31, %v19000_v31  ;;  %v5589_v63 = vsel %vm5500_vm9, %v19036_v8, %v18956_v13 }
 0x6f4   :  { %v9670_v55 = vcombine.high %v9668_v24, %v9668_v24  ;;  %v10634_v61 = vmax.f32 %v9669_v32, 0.0  ;;  %v10635_v28 = vmax.f32 %v9668_v24, 0.0  ;;  %v9652_v42 = vcombine.high %v9644_v48, %v9644_v48  ;;  %v19139_v32 = vpop.permute.xlu0 %4333 }
 0x6f5   :  { %v9653_v29 = vcombine.high %v9651_v12, %v9651_v12  ;;  %v10629_v51 = vmax.f32 %v9644_v48, 0.0  ;;  %v10631_v14 = vmax.f32 %v9651_v12, 0.0  ;;  %v6910_v9 = vcombine.high %v5589_v63, %v5589_v63 }
 0x6f6   :  { %v10636_v39 = vmax.f32 %v9670_v55, 0.0  ;;  %v11784_v1 = vcombine.low %v10633_v33, %v10634_v61  ;;  %v10630_v30 = vmax.f32 %v9652_v42, 0.0  ;;  %v6917_v31 = vrot.slane %v5589_v63, %v20911_v54 }
 0x6f7   :  { %v10632_v41 = vmax.f32 %v9653_v29, 0.0  ;;  %v11760_v11 = vcombine.low %v10628_v25, %v10629_v51  ;;  %v19128_v13 = vrot.slane %v6910_v9, %v20911_v54  ;;  %v5587_v8 = vsel %vm5500_vm9, %v19046_v47, %v18958_v56 }
 0x6f8   :  { %v7303_v53 = vrot.slane %v7289_v23, %v20911_v54  ;;  %v19136_v16 = vcombine.low %v10635_v28, %v10636_v39  ;;  %v11782_v0 = vrot.slane %v10630_v30, %v20911_v54  ;;  %v6925_v24 = vcombine.high %v6917_v31, %v6917_v31  ;;  %v21462_v28 = vld [vmem:[#allocation163_spill] sm:$0xff] }
 0x6f9   :  { %v11774_v25 = vrot.slane %v11760_v11, %v20911_v54  ;;  %v11783_v48 = vcombine.low %v10631_v14, %v10632_v41  ;;  %v8155_v33 = vcombine.low %v6909_v2, %v6917_v31  ;;  %v6892_v12 = vrot.slane %v5587_v8, %v20911_v54  ;;  %v19183_v31 = vpop.permute.xlu0 %4581 }
 0x6fa   :  { %v7330_v56 = vrot.slane %v19106_v6, %v20911_v54  ;;  %v11798_v47 = vrot.slane %v11784_v1, %v20911_v54  ;;  %v11808_v23 = vrot.slane %v19136_v16, %v20911_v54  ;;  %12507 = vst.msk [vmem:[%s20059_s5 + $0x1a8] sm:$0x3] %vm12455_vm11, %v11782_v0  ;;  %v8156_v63 = vcombine.low %v6925_v24, %v19128_v13  ;;  %v19173_v1 = vpop.permute.xlu1 %4585  ;;  %v21465_v24 = vld [vmem:[#allocation175_spill] sm:$0xff] }
 0x6fb   :  { %v11775_v55 = vcombine.low %v11767_v5, %v11774_v25  ;;  %v11791_v2 = vrot.slane %v11783_v48, %v20911_v54  ;;  %v8138_v61 = vcombine.low %v6892_v12, %v18981_v37  ;;  %v5396_v42 = vsel %vm5306_vm8, %v21462_v28, %v18983_v27 }
 0x6fc   :  { %v8163_v29 = vrot.slane %v8155_v33, %v20911_v54  ;;  %v8170_v51 = vrot.slane %v8156_v63, %v20911_v54  ;;  %v7304_v14 = vcombine.low %v7296_v46, %v7303_v53  ;;  %v7321_v9 = vcombine.low %v7313_v35, %v7320_v7 }
 0x6fd   :  { %v11799_v39 = vcombine.low %v11791_v2, %v11798_v47  ;;  %12506 = vst.msk [vmem:[%s20059_s5 + $0x1a0] sm:$0xff] %vm5112_vm5, %v11775_v55  ;;  %v8146_v37 = vrot.slane %v8138_v61, %v20911_v54  ;;  %v5494_v27 = vsel %vm5403_vm7, %v19066_v40, %v18995_v62  ;;  %v8742_v5 = vadd.f32 %v18985_v50, %v18304_v17  ;;  %v21464_v40 = vld [vmem:[#allocation164_spill] sm:$0xff] }
 0x6fe   :  { %12846 = vmatmul.mubr.msk.f32.gmra.mrb[44].mxu0 %vm8311_vm10, %v7304_v14  ;;  %v5428_v46 = vsel %vm5403_vm7, %v21463_v22, %v19038_v58  ;;  %v8737_v35 = vadd.f32 %v18997_v15, %v18306_v52  ;;  %v8171_v7 = vcombine.low %v8163_v29, %v8170_v51  ;;  %v5591_v30 = vsel %vm5500_vm9, %v5494_v27, %v19082_v20  ;;  %v19211_v2 = vpop.permute.xlu1 %4717  ;;  %v19215_v51 = vpop.permute.xlu0 %4713 }
 0x6ff   :  { %12508 = vst.msk [vmem:[%s20059_s5 + $0x1b0] sm:$0xff] %vm5112_vm5, %v11799_v39  ;;  %12848 = vmatprep.mubr.msk.f32.mxu0 %vm8311_vm10, %v7321_v9  ;;  %v9688_v50 = vcombine.high %v8742_v5, %v8742_v5  ;;  %v9695_v62 = vrot.slane %v8742_v5, %v20911_v54  ;;  %v8154_v15 = vcombine.low %v8146_v37, %v8153_v4 }
 0x700   :  { %v6934_v58 = vcombine.high %v5591_v30, %v5591_v30  ;;  %v19197_v20 = vsel %vm5306_vm8, %v21464_v40, %v19049_v44  ;;  %v9671_v41 = vcombine.high %v8737_v35, %v8737_v35  ;;  %v9678_v11 = vrot.slane %v8737_v35, %v20911_v54 }
 0x701   :  { %v6941_v8 = vrot.slane %v5591_v30, %v20911_v54  ;;  %v9702_v53 = vrot.slane %v9688_v50, %v20911_v54  ;;  %v9703_v0 = vcombine.high %v9695_v62, %v9695_v62  ;;  %12921 = vmatmul.mubr.msk.f32.gmra.mrb[42].mxu1 %vm8311_vm10, %v8154_v15  ;;  %v19206_v34 = vsel %vm5403_vm7, %v21465_v24, %v19078_v38  ;;  %v21466_v30 = vld [vmem:[#allocation33_spill] sm:$0xff] }
 0x702   :  { %v6948_v4 = vrot.slane %v6934_v58, %v20911_v54  ;;  %v9685_v44 = vrot.slane %v9671_v41, %v20911_v54  ;;  %v9686_v25 = vcombine.high %v9678_v11, %v9678_v11  ;;  %v10637_v48 = vmax.f32 %v9678_v11, 0.0  ;;  %12923 = vmatprep.mubr.msk.f32.mxu1 %vm8311_vm10, %v8171_v7 }
 0x703   :  { %v6949_v33 = vcombine.high %v6941_v8, %v6941_v8  ;;  %v9704_v12 = vcombine.high %v9702_v53, %v9702_v53  ;;  %v10642_v47 = vmax.f32 %v9703_v0, 0.0  ;;  %v10643_v63 = vmax.f32 %v9702_v53, 0.0  ;;  %v19247_v53 = vpop.permute.xlu1 %3951 }
 0x704   :  { %v6950_v55 = vcombine.high %v6948_v4, %v6948_v4  ;;  %v9687_v61 = vcombine.high %v9685_v44, %v9685_v44  ;;  %v10638_v28 = vmax.f32 %v9686_v25, 0.0  ;;  %v10639_v29 = vmax.f32 %v9685_v44, 0.0 }
 0x705   :  { %v19213_v38 = vcombine.low %v6941_v8, %v6949_v33  ;;  %v10641_v14 = vmax.f32 %v9695_v62, 0.0  ;;  %v10644_v9 = vmax.f32 %v9704_v12, 0.0  ;;  %v11825_v39 = vcombine.low %v10642_v47, %v10643_v63  ;;  %v19258_v12 = vpop.f32.mrb[30].mxu0 }
 0x706   :  { %v19219_v37 = vsel %vm5403_vm7, %v5396_v42, %v19103_v19  ;;  %v10640_v27 = vmax.f32 %v9687_v61, 0.0  ;;  %v11801_v5 = vcombine.low %v10637_v48, %v10638_v28  ;;  %v11823_v22 = vrot.slane %v10639_v29, %v20911_v54  ;;  %v19233_v42 = vpop.f32.mrb[26].mxu1 }
 0x707   :  { %v19222_v35 = vcombine.low %v6948_v4, %v6950_v55  ;;  %v8187_v7 = vrot.slane %v19213_v38, %v20911_v54  ;;  %v5429_v50 = vsel %vm5403_vm7, %v21466_v30, %v19110_v26  ;;  %v8752_v62 = vadd.f32 %v19058_v21, %v18298_v36  ;;  %v19243_v41 = vpop.f32.mrb[27].mxu1  ;;  %v19265_v55 = vpop.f32.mrb[31].mxu0  ;;  %v21469_v38 = vld [vmem:[#allocation36_spill] sm:$0xff] }
 0x708   :  { %v8747_v19 = vadd.f32 %v19061_v57, %v18304_v17  ;;  %v11839_v15 = vrot.slane %v11825_v39, %v20911_v54  ;;  %v11815_v58 = vrot.slane %v11801_v5, %v20911_v54  ;;  %v11824_v40 = vcombine.low %v10640_v27, %v10641_v14  ;;  %12510 = vst.msk [vmem:[%s20059_s5 + $0x1c0] sm:$0x3] %vm12455_vm11, %v11823_v22 }
 0x709   :  { %v5525_v26 = vsel %vm5500_vm9, %v5428_v46, %v19133_v10  ;;  %v9722_v21 = vcombine.high %v8752_v62, %v8752_v62  ;;  %v9729_v57 = vrot.slane %v8752_v62, %v20911_v54  ;;  %v19254_v10 = vpop.permute.xlu0 %3953 }
 0x70a   :  { %v9705_v11 = vcombine.high %v8747_v19, %v8747_v19  ;;  %v9712_v8 = vrot.slane %v8747_v19, %v20911_v54  ;;  %v11816_v0 = vcombine.low %v11808_v23, %v11815_v58  ;;  %v11832_v24 = vrot.slane %v11824_v40, %v20911_v54  ;;  %v19271_v58 = vpop.permute.xlu1 %4337 }
 0x70b   :  { %v6032_v4 = vcombine.high %v5525_v26, %v5525_v26  ;;  %v6039_v44 = vrot.slane %v5525_v26, %v20911_v54  ;;  %v9736_v46 = vrot.slane %v9722_v21, %v20911_v54  ;;  %v9737_v25 = vcombine.high %v9729_v57, %v9729_v57 }
 0x70c   :  { %v10649_v48 = vmax.f32 %v9729_v57, 0.0  ;;  %v9719_v33 = vrot.slane %v9705_v11, %v20911_v54  ;;  %v11840_v47 = vcombine.low %v11832_v24, %v11839_v15  ;;  %12509 = vst.msk [vmem:[%s20059_s5 + $0x1b8] sm:$0xff] %vm5112_vm5, %v11816_v0  ;;  %v9720_v16 = vcombine.high %v9712_v8, %v9712_v8 }
 0x70d   :  { %v10645_v23 = vmax.f32 %v9712_v8, 0.0  ;;  %v6046_v63 = vrot.slane %v6032_v4, %v20911_v54  ;;  %v9738_v61 = vcombine.high %v9736_v46, %v9736_v46  ;;  %v10650_v28 = vmax.f32 %v9737_v25, 0.0  ;;  %v19280_v11 = vpop.permute.xlu0 %3955 }
 0x70e   :  { %v10651_v29 = vmax.f32 %v9736_v46, 0.0  ;;  %v9721_v14 = vcombine.high %v9719_v33, %v9719_v33  ;;  %12511 = vst.msk [vmem:[%s20059_s5 + $0x1c8] sm:$0xff] %vm5112_vm5, %v11840_v47  ;;  %v10646_v39 = vmax.f32 %v9720_v16, 0.0  ;;  %v10647_v27 = vmax.f32 %v9719_v33, 0.0 }
 0x70f   :  { %v11841_v5 = vcombine.low %v10644_v9, %v10645_v23  ;;  %v6047_v22 = vcombine.high %v6039_v44, %v6039_v44  ;;  %v10652_v30 = vmax.f32 %v9738_v61, 0.0  ;;  %v11865_v62 = vcombine.low %v10649_v48, %v10650_v28  ;;  %v19310_v28 = vpop.permute.xlu1 %4335 }
 0x710   :  { %v10648_v19 = vmax.f32 %v9721_v14, 0.0  ;;  %v6048_v15 = vcombine.high %v6046_v63, %v6046_v63  ;;  %v8197_v40 = vrot.slane %v19222_v35, %v20911_v54  ;;  %v11842_v26 = vcombine.low %v10646_v39, %v10647_v27  ;;  %v19318_v27 = vpop.f32.mrb[28].mxu1 }
 0x711   :  { %v5495_v21 = vsel %vm5403_vm7, %v19197_v20, %v19139_v32  ;;  %v5526_v57 = vsel %vm5500_vm9, %v5429_v50, %v19173_v1  ;;  %v11866_v9 = vcombine.low %v10651_v29, %v10652_v30  ;;  %v11849_v8 = vrot.slane %v11841_v5, %v20911_v54  ;;  %v19316_v39 = vpop.permute.xlu0 %4205 }
 0x712   :  { %v11864_v0 = vrot.slane %v10648_v19, %v20911_v54  ;;  %v19284_v24 = vcombine.low %v6039_v44, %v6047_v22  ;;  %v11873_v4 = vrot.slane %v11865_v62, %v20911_v54  ;;  %v11856_v46 = vrot.slane %v11842_v26, %v20911_v54  ;;  %v19330_v22 = vpop.f32.mrb[29].mxu1 }
 0x713   :  { %v6049_v25 = vcombine.high %v5526_v57, %v5526_v57  ;;  %v6056_v48 = vrot.slane %v5526_v57, %v20911_v54  ;;  %v11880_v32 = vrot.slane %v11866_v9, %v20911_v54  ;;  %v19294_v1 = vcombine.low %v6046_v63, %v6048_v15 }
 0x714   :  { %12513 = vst.msk [vmem:[%s20059_s5 + $0x1d8] sm:$0x3] %vm12455_vm11, %v11864_v0  ;;  %v6024_v20 = vcombine.high %v19089_v45, %v19089_v45  ;;  %v5524_v50 = vsel %vm5500_vm9, %v19206_v34, %v19183_v31  ;;  %v11857_v44 = vcombine.low %v11849_v8, %v11856_v46  ;;  %v7347_v61 = vrot.slane %v19284_v24, %v20911_v54 }
 0x715   :  { %v6063_v33 = vrot.slane %v6049_v25, %v20911_v54  ;;  %v6064_v47 = vcombine.high %v6056_v48, %v6056_v48  ;;  %v6031_v16 = vrot.slane %v5524_v50, %v20911_v54  ;;  %v11881_v23 = vcombine.low %v11873_v4, %v11880_v32  ;;  %v19345_v50 = vpop.permute.xlu0 %4339 }
 0x716   :  { %v5592_v63 = vsel %vm5500_vm9, %v5495_v21, %v19211_v2  ;;  %v5590_v45 = vsel %vm5500_vm9, %v19219_v37, %v19215_v51  ;;  %12512 = vst.msk [vmem:[%s20059_s5 + $0x1d0] sm:$0xff] %vm5112_vm5, %v11857_v44  ;;  %v8762_v37 = vadd.f32 %v19122_v18, %v18308_v3  ;;  %v8757_v5 = vadd.f32 %v19124_v43, %v18298_v36 }
 0x717   :  { %v6065_v31 = vcombine.high %v6063_v33, %v6063_v33  ;;  %v7356_v34 = vcombine.low %v6056_v48, %v6064_v47  ;;  %v7323_v29 = vcombine.low %v6024_v20, %v6031_v16  ;;  %v6951_v14 = vcombine.high %v5592_v63, %v5592_v63  ;;  %12514 = vst.msk [vmem:[%s20059_s5 + $0x1e0] sm:$0xff] %vm5112_vm5, %v11881_v23  ;;  %v4722_v48 = vpop.permute.xlu1 %4721 }
 0x718   :  { %v6958_v2 = vrot.slane %v5592_v63, %v20911_v54  ;;  %v6933_v51 = vrot.slane %v5590_v45, %v20911_v54  ;;  %v7354_v30 = vrot.slane %v19294_v1, %v20911_v54  ;;  %v6926_v15 = vcombine.high %v19128_v13, %v19128_v13 }
 0x719   :  { %v7357_v62 = vcombine.low %v6063_v33, %v6065_v31  ;;  %v6965_v19 = vrot.slane %v6951_v14, %v20911_v54  ;;  %v7364_v26 = vrot.slane %v7356_v34, %v20911_v54  ;;  %v9756_v57 = vcombine.high %v8762_v37, %v8762_v37 }
 0x71a   :  { %v6966_v21 = vcombine.high %v6958_v2, %v6958_v2  ;;  %v9763_v18 = vrot.slane %v8762_v37, %v20911_v54  ;;  %v8172_v8 = vcombine.low %v6926_v15, %v6933_v51  ;;  %v9739_v43 = vcombine.high %v8757_v5, %v8757_v5  ;;  %v21467_v15 = vld [vmem:[#allocation167_spill] sm:$0xff] }
 0x71b   :  { %v6967_v9 = vcombine.high %v6965_v19, %v6965_v19  ;;  %v9746_v0 = vrot.slane %v8757_v5, %v20911_v54  ;;  %v7337_v24 = vrot.slane %v7323_v29, %v20911_v54  ;;  %v9770_v46 = vrot.slane %v9756_v57, %v20911_v54  ;;  %v21468_v57 = vld [vmem:[#allocation166_spill] sm:$0xff] }
 0x71c   :  { %v8190_v4 = vcombine.low %v6958_v2, %v6966_v21  ;;  %v9771_v25 = vcombine.high %v9763_v18, %v9763_v18  ;;  %v10657_v13 = vmax.f32 %v9763_v18, 0.0  ;;  %v9753_v1 = vrot.slane %v9739_v43, %v20911_v54 }
 0x71d   :  { %v19342_v32 = vcombine.low %v6965_v19, %v6967_v9  ;;  %v9754_v20 = vcombine.high %v9746_v0, %v9746_v0  ;;  %v7371_v44 = vrot.slane %v7357_v62, %v20911_v54  ;;  %v9772_v33 = vcombine.high %v9770_v46, %v9770_v46 }
 0x71e   :  { %v10658_v47 = vmax.f32 %v9771_v25, 0.0  ;;  %v10659_v16 = vmax.f32 %v9770_v46, 0.0  ;;  %v8204_v23 = vrot.slane %v8190_v4, %v20911_v54  ;;  %v8180_v63 = vrot.slane %v8172_v8, %v20911_v54  ;;  %v4720_v8 = vpop.permute.xlu1 %4719 }
 0x71f   :  { %v11905_v45 = vrot.slane %v10657_v13, %v20911_v54  ;;  %v9755_v31 = vcombine.high %v9753_v1, %v9753_v1  ;;  %v8214_v34 = vrot.slane %v19342_v32, %v20911_v54  ;;  %v10653_v14 = vmax.f32 %v9746_v0, 0.0 }
 0x720   :  { %v19353_v29 = vcombine.low %v10658_v47, %v10659_v16  ;;  %v10654_v2 = vmax.f32 %v9754_v20, 0.0  ;;  %v19355_v51 = vmax.f32 %v9772_v33, 0.0  ;;  %v10655_v37 = vmax.f32 %v9753_v1, 0.0 }
 0x721   :  { %12516 = vst.msk [vmem:[%s20059_s5 + $0x1f0] sm:$0x3] %vm12455_vm11, %v11905_v45  ;;  %v10656_v5 = vmax.f32 %v9755_v31, 0.0  ;;  %v7338_v62 = vcombine.low %v7330_v56, %v7337_v24  ;;  %v5399_v21 = vsel %vm5306_vm8, %v21467_v15, %v19247_v53  ;;  %v5400_v18 = vsel %vm5306_vm8, %v21468_v57, %v19254_v10  ;;  %v4590_v56 = vpop.permute.xlu0 %4589 }
 0x722   :  { %v11882_v19 = vcombine.low %v10653_v14, %v10654_v2  ;;  %v7355_v9 = vcombine.low %v7347_v61, %v7354_v30  ;;  %v11914_v43 = vrot.slane %v19353_v29, %v20911_v54  ;;  %v7372_v4 = vcombine.low %v7364_v26, %v7371_v44 }
 0x723   :  { %v11883_v0 = vcombine.low %v10655_v37, %v10656_v5  ;;  %12849 = vmatmul.mubr.msk.f32.gmra.mrb[46].mxu0 %vm8311_vm10, %v7338_v62  ;;  %v8188_v6 = vcombine.low %v8180_v63, %v8187_v7  ;;  %v5497_v10 = vsel %vm5403_vm7, %v5400_v18, %v19271_v58  ;;  %v5496_v61 = vsel %vm5403_vm7, %v5399_v21, %v19310_v28  ;;  %v21470_v63 = vld [vmem:[#allocation169_spill] sm:$0xff] }
 0x724   :  { %v11890_v53 = vrot.slane %v11882_v19, %v20911_v54  ;;  %12851 = vmatprep.mubr.msk.f32.mxu0 %vm8311_vm10, %v7355_v9  ;;  %v8205_v30 = vcombine.low %v8197_v40, %v8204_v23  ;;  %v5431_v7 = vsel %vm5403_vm7, %v21469_v38, %v19316_v39  ;;  %v5594_v24 = vsel %vm5500_vm9, %v5497_v10, %v4722_v48  ;;  %v3958_v19 = vpop.permute.xlu1 %3957 }
 0x725   :  { %v11897_v26 = vrot.slane %v11883_v0, %v20911_v54  ;;  %12924 = vmatmul.mubr.msk.f32.gmra.mrb[44].mxu1 %vm8311_vm10, %v8188_v6  ;;  %v5593_v46 = vsel %vm5500_vm9, %v5496_v61, %v4720_v8  ;;  %v6975_v58 = vcombine.high %v5594_v24, %v5594_v24  ;;  %v6982_v28 = vrot.slane %v5594_v24, %v20911_v54  ;;  %v21471_v61 = vld [vmem:[#allocation118_spill] sm:$0xff] }
 0x726   :  { %12926 = vmatprep.mubr.msk.f32.mxu1 %vm8311_vm10, %v8205_v30  ;;  %v6974_v35 = vrot.slane %v5593_v46, %v20911_v54  ;;  %v5528_v40 = vsel %vm5500_vm9, %v5431_v7, %v4590_v56  ;;  %v8772_v39 = vadd.f32 %v19233_v42, %v18300_v49  ;;  %v8767_v33 = vadd.f32 %v19243_v41, %v18317_v59 }
 0x727   :  { %v11898_v25 = vcombine.low %v11890_v53, %v11897_v26  ;;  %12852 = vmatmul.mubr.msk.f32.gmra.mrb[48].mxu0 %vm8311_vm10, %v7372_v4  ;;  %v6073_v13 = vcombine.high %v5528_v40, %v5528_v40  ;;  %v19398_v1 = vrot.slane %v5528_v40, %v20911_v54  ;;  %v6989_v48 = vrot.slane %v6975_v58, %v20911_v54  ;;  %v4724_v4 = vpop.permute.xlu0 %4723 }
 0x728   :  { %v6990_v20 = vcombine.high %v6982_v28, %v6982_v28  ;;  %v19403_v44 = vcombine.low %v6974_v35, %v6982_v28  ;;  %v9790_v23 = vcombine.high %v8772_v39, %v8772_v39  ;;  %v9797_v42 = vrot.slane %v8772_v39, %v20911_v54 }
 0x729   :  { %12515 = vst.msk [vmem:[%s20059_s5 + $0x1e8] sm:$0xff] %vm5112_vm5, %v11898_v25  ;;  %v6087_v47 = vrot.slane %v6073_v13, %v20911_v54  ;;  %v6088_v16 = vcombine.high %v19398_v1, %v19398_v1  ;;  %v5401_v45 = vsel %vm5306_vm8, %v21470_v63, %v19280_v11  ;;  %v9773_v41 = vcombine.high %v8767_v33, %v8767_v33 }
 0x72a   :  { %v19418_v31 = vcombine.low %v6990_v20, %v6989_v48  ;;  %v9780_v14 = vrot.slane %v8767_v33, %v20911_v54  ;;  %v19424_v5 = vrot.slane %v9790_v23, %v20911_v54  ;;  %v9805_v62 = vcombine.high %v9797_v42, %v9797_v42 }
 0x72b   :  { %v6089_v2 = vcombine.high %v6087_v47, %v6087_v47  ;;  %v19421_v37 = vcombine.low %v6088_v16, %v6087_v47  ;;  %v5498_v15 = vsel %vm5403_vm7, %v5401_v45, %v19345_v50  ;;  %v8221_v21 = vrot.slane %v19403_v44, %v20911_v54  ;;  %v19437_v10 = vpop.f32.mrb[32].mxu0  ;;  %v4342_v47 = vpop.permute.xlu1 %4341  ;;  %v21472_v45 = vld [vmem:[#allocation168_spill] sm:$0xff] }
 0x72c   :  { %v9787_v11 = vrot.slane %v9773_v41, %v20911_v54  ;;  %v9788_v57 = vcombine.high %v9780_v14, %v9780_v14  ;;  %v8231_v18 = vrot.slane %v19418_v31, %v20911_v54  ;;  %v9806_v9 = vcombine.high %v19424_v5, %v19424_v5  ;;  %v19444_v24 = vpop.f32.mrb[33].mxu0  ;;  %v19446_v46 = vpop.f32.mrb[30].mxu1 }
 0x72d   :  { %v10665_v8 = vmax.f32 %v9797_v42, 0.0  ;;  %v10666_v0 = vmax.f32 %v9805_v62, 0.0  ;;  %v7388_v6 = vrot.slane %v19421_v37, %v20911_v54  ;;  %v10661_v50 = vmax.f32 %v9780_v14, 0.0  ;;  %v19452_v25 = vpop.f32.mrb[31].mxu1 }
 0x72e   :  { %v9789_v56 = vcombine.high %v9787_v11, %v9787_v11  ;;  %v10662_v53 = vmax.f32 %v9788_v57, 0.0  ;;  %v19440_v30 = vcombine.low %v6089_v2, %v21471_v61  ;;  %v10667_v26 = vmax.f32 %v19424_v5, 0.0  ;;  %v4204_v2 = vpop.permute.xlu0 %4203 }
 0x72f   :  { %v11946_v38 = vrot.slane %v10666_v0, %v20911_v54  ;;  %v10663_v7 = vmax.f32 %v9787_v11, 0.0  ;;  %v19448_v58 = vmax.f32 %v9806_v9, 0.0  ;;  %v11907_v35 = vcombine.low %v19355_v51, %v10661_v50  ;;  %v4726_v61 = vpop.permute.xlu1 %4725 }
 0x730   :  { %v10664_v28 = vmax.f32 %v9789_v56, 0.0  ;;  %v5595_v40 = vsel %vm5500_vm9, %v5498_v15, %v4724_v4  ;;  %v6991_v39 = vcombine.high %v6989_v48, %v6989_v48  ;;  %v8532_v51 = vadd.f32 %v19258_v12, %v18298_v36 }
 0x731   :  { %12519 = vst.msk [vmem:[%s20059_s5 + $0x208] sm:$0x3] %vm12455_vm11, %v11946_v38  ;;  %v11923_v13 = vcombine.low %v10662_v53, %v10663_v7  ;;  %v6992_v20 = vcombine.high %v5595_v40, %v5595_v40  ;;  %v6999_v33 = vrot.slane %v5595_v40, %v20911_v54  ;;  %v11921_v16 = vrot.slane %v11907_v35, %v20911_v54 }
 0x732   :  { %v11924_v23 = vcombine.low %v10664_v28, %v10665_v8  ;;  %v8527_v42 = vadd.f32 %v19265_v55, %v18298_v36  ;;  %v5402_v41 = vsel %vm5306_vm8, %v21472_v45, %v3958_v19  ;;  %v8974_v12 = vcombine.high %v8532_v51, %v8532_v51 }
 0x733   :  { %v11931_v63 = vrot.slane %v11923_v13, %v20911_v54  ;;  %v7006_v48 = vrot.slane %v6992_v20, %v20911_v54  ;;  %v7007_v14 = vcombine.high %v6999_v33, %v6999_v33  ;;  %v11922_v62 = vcombine.low %v11914_v43, %v11921_v16  ;;  %v4588_v16 = vpop.permute.xlu0 %4587 }
 0x734   :  { %v11938_v15 = vrot.slane %v11924_v23, %v20911_v54  ;;  %v8224_v11 = vcombine.low %v6991_v39, %v6999_v33  ;;  %v8981_v55 = vrot.slane %v8532_v51, %v20911_v54  ;;  %v8957_v9 = vcombine.high %v8527_v42, %v8527_v42  ;;  %v21473_v33 = vld [vmem:[#allocation177_spill] sm:$0xff] }
 0x735   :  { %v8240_v57 = vcombine.low %v7007_v14, %v7006_v48  ;;  %v8964_v8 = vrot.slane %v8527_v42, %v20911_v54  ;;  %12517 = vst.msk [vmem:[%s20059_s5 + $0x1f8] sm:$0xff] %vm5112_vm5, %v11922_v62  ;;  %v8988_v29 = vrot.slane %v8974_v12, %v20911_v54  ;;  %v5499_v43 = vsel %vm5403_vm7, %v5402_v41, %v4342_v47 }
 0x736   :  { %v11939_v0 = vcombine.low %v11931_v63, %v11938_v15  ;;  %v8238_v19 = vrot.slane %v8224_v11, %v20911_v54  ;;  %v8989_v56 = vcombine.high %v8981_v55, %v8981_v55  ;;  %v10473_v50 = vmax.f32 %v8981_v55, 0.0  ;;  %v19487_v40 = vpop.f32.mrb[32].mxu1 }
 0x737   :  { %v8248_v4 = vrot.slane %v8240_v57, %v20911_v54  ;;  %v8971_v53 = vrot.slane %v8957_v9, %v20911_v54  ;;  %v8990_v38 = vcombine.high %v8988_v29, %v8988_v29  ;;  %v10475_v7 = vmax.f32 %v8988_v29, 0.0  ;;  %v19491_v23 = vpop.f32.mrb[33].mxu1 }
 0x738   :  { %12518 = vst.msk [vmem:[%s20059_s5 + $0x200] sm:$0xff] %vm5112_vm5, %v11939_v0  ;;  %v8972_v28 = vcombine.high %v8964_v8, %v8964_v8  ;;  %v10469_v35 = vmax.f32 %v8964_v8, 0.0  ;;  %v10474_v13 = vmax.f32 %v8989_v56, 0.0  ;;  %v5430_v47 = vsel %vm5403_vm7, %v21473_v33, %v4204_v2 }
 0x739   :  { %v8973_v39 = vcombine.high %v8971_v53, %v8971_v53  ;;  %v10471_v20 = vmax.f32 %v8971_v53, 0.0  ;;  %v10476_v51 = vmax.f32 %v8990_v38, 0.0  ;;  %v8222_v63 = vcombine.low %v8214_v34, %v8221_v21 }
 0x73a   :  { %v10470_v42 = vmax.f32 %v8972_v28, 0.0  ;;  %v5596_v45 = vsel %vm5500_vm9, %v5499_v43, %v4726_v61  ;;  %v11062_v41 = vcombine.low %v10473_v50, %v10474_v13  ;;  %v7008_v62 = vcombine.high %v7006_v48, %v7006_v48 }
 0x73b   :  { %v10472_v14 = vmax.f32 %v8973_v39, 0.0  ;;  %v7015_v15 = vrot.slane %v5596_v45, %v20911_v54  ;;  %v11063_v2 = vcombine.low %v10475_v7, %v10476_v51  ;;  %12927 = vmatmul.mubr.msk.f32.gmra.mrb[46].mxu1 %vm8311_vm10, %v8222_v63  ;;  %v5527_v12 = vsel %vm5500_vm9, %v5430_v47, %v4588_v16  ;;  %v21474_v39 = vld [vmem:[#allocation119_spill] sm:$0xff] }
 0x73c   :  { %v11045_v11 = vcombine.low %v10469_v35, %v10470_v42  ;;  %v8239_v44 = vcombine.low %v8231_v18, %v8238_v19  ;;  %v11070_v32 = vrot.slane %v11062_v41, %v20911_v54  ;;  %v6072_v57 = vrot.slane %v5527_v12, %v20911_v54 }
 0x73d   :  { %v11046_v34 = vcombine.low %v10471_v20, %v10472_v14  ;;  %v8241_v21 = vcombine.low %v7008_v62, %v7015_v15  ;;  %v11077_v48 = vrot.slane %v11063_v2, %v20911_v54  ;;  %v8782_v9 = vadd.f32 %v19318_v27, %v18306_v52 }
 0x73e   :  { %v11053_v55 = vrot.slane %v11045_v11, %v20911_v54  ;;  %12929 = vmatprep.mubr.msk.f32.mxu1 %vm8311_vm10, %v8239_v44  ;;  %v8777_v8 = vadd.f32 %v19330_v22, %v18293_v60  ;;  %v7373_v0 = vcombine.low %v6072_v57, %v19398_v1  ;;  %v7398_v19 = vrot.slane %v19440_v30, %v20911_v54 }
 0x73f   :  { %v11060_v31 = vrot.slane %v11046_v34, %v20911_v54  ;;  %v8255_v18 = vrot.slane %v8241_v21, %v20911_v54  ;;  %v11078_v29 = vcombine.low %v11070_v32, %v11077_v48  ;;  %v9824_v43 = vcombine.high %v8782_v9, %v8782_v9  ;;  %v19523_v38 = vpop.f32.mrb[34].mxu0 }
 0x740   :  { %v9831_v56 = vrot.slane %v8782_v9, %v20911_v54  ;;  %v9807_v50 = vcombine.high %v8777_v8, %v8777_v8  ;;  %v7381_v27 = vrot.slane %v7373_v0, %v20911_v54  ;;  %v9814_v61 = vrot.slane %v8777_v8, %v20911_v54  ;;  %v19531_v28 = vpop.f32.mrb[35].mxu0 }
 0x741   :  { %v11061_v53 = vcombine.low %v11053_v55, %v11060_v31  ;;  %v8256_v22 = vcombine.low %v8248_v4, %v8255_v18  ;;  %12454 = vst.msk [vmem:[%s20059_s5 + $0x8] sm:$0xff] %vm5112_vm5, %v11078_v29  ;;  %v9838_v1 = vrot.slane %v9824_v43, %v20911_v54  ;;  %v11947_v35 = vcombine.low %v10667_v26, %v19448_v58 }
 0x742   :  { %v9839_v30 = vcombine.high %v9831_v56, %v9831_v56  ;;  %v9821_v7 = vrot.slane %v9807_v50, %v20911_v54  ;;  %v9822_v4 = vcombine.high %v9814_v61, %v9814_v61  ;;  %v7389_v13 = vcombine.low %v7381_v27, %v7388_v6 }
 0x743   :  { %12453 = vst.msk [vmem:[%s20059_s5] sm:$0xff] %vm5112_vm5, %v11061_v53  ;;  %12930 = vmatmul.mubr.msk.f32.gmra.mrb[48].mxu1 %vm8311_vm10, %v8256_v22  ;;  %v21475_v20 = vrot.slane %v21474_v39, %v20911_v54  ;;  %v10673_v47 = vmax.f32 %v9831_v56, 0.0  ;;  %v10675_v5 = vmax.f32 %v9838_v1, 0.0  ;;  %v10669_v58 = vmax.f32 %v9814_v61, 0.0 }
 0x744   :  { %v10674_v16 = vmax.f32 %v9839_v30, 0.0  ;;  %v9823_v26 = vcombine.high %v9821_v7, %v9821_v7  ;;  %v10670_v51 = vmax.f32 %v9822_v4, 0.0  ;;  %12854 = vmatprep.mubr.msk.f32.mxu0 %vm8311_vm10, %v7389_v13  ;;  %v8542_v42 = vadd.f32 %v19437_v10, %v18317_v59 }
 0x745   :  { %v7406_v33 = vcombine.low %v7398_v19, %v21475_v20  ;;  %v8537_v37 = vadd.f32 %v19444_v24, %v18308_v3  ;;  %v11987_v63 = vrot.slane %v10675_v5, %v20911_v54  ;;  %v10671_v45 = vmax.f32 %v9821_v7, 0.0 }
 0x746   :  { %v11965_v6 = vcombine.low %v10673_v47, %v10674_v16  ;;  %v10672_v41 = vmax.f32 %v9823_v26, 0.0  ;;  %v11948_v14 = vcombine.low %v10669_v58, %v10670_v51  ;;  %v9008_v62 = vcombine.high %v8542_v42, %v8542_v42 }
 0x747   :  { %12855 = vmatmul.mubr.msk.f32.gmra.mrb[50].mxu0 %vm8311_vm10, %v7406_v33  ;;  %v8991_v15 = vcombine.high %v8537_v37, %v8537_v37  ;;  %v11955_v2 = vrot.slane %v11947_v35, %v20911_v54  ;;  %v9840_v11 = vcombine.high %v9838_v1, %v9838_v1  ;;  %12522 = vst.msk [vmem:[%s20059_s5 + $0x220] sm:$0x3] %vm12455_vm11, %v11987_v63 }
 0x748   :  { %v11964_v10 = vcombine.low %v10671_v45, %v10672_v41  ;;  %v8998_v24 = vrot.slane %v8537_v37, %v20911_v54  ;;  %v11979_v12 = vrot.slane %v11965_v6, %v20911_v54  ;;  %v11962_v44 = vrot.slane %v11948_v14, %v20911_v54 }
 0x749   :  { %v19563_v32 = vrot.slane %v8542_v42, %v20911_v54  ;;  %v8792_v34 = vadd.f32 %v19446_v46, %v18304_v17  ;;  %v9005_v57 = vrot.slane %v8991_v15, %v20911_v54  ;;  %v19570_v8 = vrot.slane %v9008_v62, %v20911_v54 }
 0x74a   :  { %v11972_v21 = vrot.slane %v11964_v10, %v20911_v54  ;;  %v9006_v48 = vcombine.high %v8998_v24, %v8998_v24  ;;  %v10477_v55 = vmax.f32 %v8998_v24, 0.0  ;;  %v11963_v9 = vcombine.low %v11955_v2, %v11962_v44 }
 0x74b   :  { %v9007_v18 = vcombine.high %v9005_v57, %v9005_v57  ;;  %v10479_v19 = vmax.f32 %v9005_v57, 0.0  ;;  %v10676_v29 = vmax.f32 %v9840_v11, 0.0  ;;  %v10481_v46 = vmax.f32 %v19563_v32, 0.0 }
 0x74c   :  { %v11980_v31 = vcombine.low %v11972_v21, %v11979_v12  ;;  %v10478_v0 = vmax.f32 %v9006_v48, 0.0  ;;  %12520 = vst.msk [vmem:[%s20059_s5 + $0x210] sm:$0xff] %vm5112_vm5, %v11963_v9  ;;  %v11085_v43 = vrot.slane %v10477_v55, %v20911_v54  ;;  %v9858_v56 = vcombine.high %v8792_v34, %v8792_v34 }
 0x74d   :  { %v10480_v50 = vmax.f32 %v9007_v18, 0.0  ;;  %v9865_v27 = vrot.slane %v8792_v34, %v20911_v54  ;;  %v8787_v61 = vadd.f32 %v19452_v25, %v18304_v17  ;;  %v9023_v22 = vcombine.high %v19563_v32, %v19563_v32 }
 0x74e   :  { %12521 = vst.msk [vmem:[%s20059_s5 + $0x218] sm:$0xff] %vm5112_vm5, %v11980_v31  ;;  %v11086_v53 = vcombine.low %v10478_v0, %v10479_v19  ;;  %v9024_v1 = vcombine.high %v19570_v8, %v19570_v8  ;;  %v9872_v30 = vrot.slane %v9858_v56, %v20911_v54  ;;  %v8802_v7 = vadd.f32 %v19487_v40, %v18298_v36 }
 0x74f   :  { %12456 = vst.msk [vmem:[%s20059_s5 + $0x10] sm:$0x3] %vm12455_vm11, %v11085_v43  ;;  %v11087_v35 = vcombine.low %v10480_v50, %v10481_v46  ;;  %v9873_v25 = vcombine.high %v9865_v27, %v9865_v27  ;;  %v8797_v13 = vadd.f32 %v19491_v23, %v18298_v36  ;;  %v9841_v33 = vcombine.high %v8787_v61, %v8787_v61 }
 0x750   :  { %v11094_v4 = vrot.slane %v11086_v53, %v20911_v54  ;;  %v9874_v39 = vcombine.high %v9872_v30, %v9872_v30  ;;  %v10683_v20 = vmax.f32 %v9872_v30, 0.0  ;;  %v9848_v47 = vrot.slane %v8787_v61, %v20911_v54 }
 0x751   :  { %v11101_v16 = vrot.slane %v11087_v35, %v20911_v54  ;;  %v10682_v5 = vmax.f32 %v9873_v25, 0.0  ;;  %v9892_v26 = vcombine.high %v8802_v7, %v8802_v7  ;;  %v9899_v58 = vrot.slane %v8802_v7, %v20911_v54 }
 0x752   :  { %v10684_v51 = vmax.f32 %v9874_v39, 0.0  ;;  %v9855_v40 = vrot.slane %v9841_v33, %v20911_v54  ;;  %v9856_v42 = vcombine.high %v9848_v47, %v9848_v47  ;;  %v10677_v37 = vmax.f32 %v9848_v47, 0.0 }
 0x753   :  { %v11102_v6 = vcombine.low %v11094_v4, %v11101_v16  ;;  %v10681_v63 = vmax.f32 %v9865_v27, 0.0  ;;  %v9906_v23 = vrot.slane %v9892_v26, %v20911_v54  ;;  %v9907_v45 = vcombine.high %v9899_v58, %v9899_v58 }
 0x754   :  { %v12028_v41 = vrot.slane %v10684_v51, %v20911_v54  ;;  %v9857_v14 = vcombine.high %v9855_v40, %v9855_v40  ;;  %v10678_v62 = vmax.f32 %v9856_v42, 0.0  ;;  %v10679_v15 = vmax.f32 %v9855_v40, 0.0 }
 0x755   :  { %12457 = vst.msk [vmem:[%s20059_s5 + $0x18] sm:$0xff] %vm5112_vm5, %v11102_v6  ;;  %v12006_v2 = vcombine.low %v10682_v5, %v10683_v20  ;;  %v11988_v11 = vcombine.low %v10676_v29, %v10677_v37  ;;  %v9908_v10 = vcombine.high %v9906_v23, %v9906_v23  ;;  %v10689_v24 = vmax.f32 %v9899_v58, 0.0 }
 0x756   :  { %12525 = vst.msk [vmem:[%s20059_s5 + $0x238] sm:$0x3] %vm12455_vm11, %v12028_v41  ;;  %v10680_v12 = vmax.f32 %v9857_v14, 0.0  ;;  %v11989_v44 = vcombine.low %v10678_v62, %v10679_v15  ;;  %v10690_v34 = vmax.f32 %v9907_v45, 0.0  ;;  %v10691_v21 = vmax.f32 %v9906_v23, 0.0 }
 0x757   :  { %v11996_v57 = vrot.slane %v11988_v11, %v20911_v54  ;;  %v10692_v48 = vmax.f32 %v9908_v10, 0.0  ;;  %v9875_v55 = vcombine.high %v8797_v13, %v8797_v13  ;;  %v9882_v9 = vrot.slane %v8797_v13, %v20911_v54 }
 0x758   :  { %v12003_v31 = vrot.slane %v11989_v44, %v20911_v54  ;;  %v12005_v18 = vcombine.low %v10680_v12, %v10681_v63  ;;  %v12046_v0 = vcombine.low %v10689_v24, %v10690_v34  ;;  %v8552_v19 = vadd.f32 %v19523_v38, %v18293_v60 }
 0x759   :  { %v12020_v29 = vrot.slane %v12006_v2, %v20911_v54  ;;  %v12047_v46 = vcombine.low %v10691_v21, %v10692_v48  ;;  %v9889_v43 = vrot.slane %v9875_v55, %v20911_v54  ;;  %v9890_v56 = vcombine.high %v9882_v9, %v9882_v9 }
 0x75a   :  { %v12004_v50 = vcombine.low %v11996_v57, %v12003_v31  ;;  %v12013_v53 = vrot.slane %v12005_v18, %v20911_v54  ;;  %v10685_v27 = vmax.f32 %v9882_v9, 0.0  ;;  %v9042_v61 = vcombine.high %v8552_v19, %v8552_v19  ;;  %v12835_v30 = vpop.f32.mrb[36].mxu0 }
 0x75b   :  { %v12054_v7 = vrot.slane %v12046_v0, %v20911_v54  ;;  %v12061_v35 = vrot.slane %v12047_v46, %v20911_v54  ;;  %v9891_v4 = vcombine.high %v9889_v43, %v9889_v43  ;;  %v10686_v25 = vmax.f32 %v9890_v56, 0.0  ;;  %v8556_v13 = vpop.f32.mrb[37].mxu0 }
 0x75c   :  { %v12021_v38 = vcombine.low %v12013_v53, %v12020_v29  ;;  %12523 = vst.msk [vmem:[%s20059_s5 + $0x228] sm:$0xff] %vm5112_vm5, %v12004_v50  ;;  %v10687_v39 = vmax.f32 %v9889_v43, 0.0  ;;  %v9049_v20 = vrot.slane %v8552_v19, %v20911_v54  ;;  %v8547_v33 = vadd.f32 %v19531_v28, %v18300_v49 }
 0x75d   :  { %v12062_v47 = vcombine.low %v12054_v7, %v12061_v35  ;;  %v10688_v16 = vmax.f32 %v9891_v4, 0.0  ;;  %v12029_v5 = vcombine.low %v10685_v27, %v10686_v25  ;;  %v8562_v26 = vadd.f32 %v12835_v30, %v18304_v17 }
 0x75e   :  { %v10482_v58 = vmax.f32 %v9023_v22, 0.0  ;;  %v10483_v51 = vmax.f32 %v19570_v8, 0.0  ;;  %12524 = vst.msk [vmem:[%s20059_s5 + $0x230] sm:$0xff] %vm5112_vm5, %v12021_v38  ;;  %v9056_v40 = vrot.slane %v9042_v61, %v20911_v54  ;;  %v9057_v42 = vcombine.high %v9049_v20, %v9049_v20 }
 0x75f   :  { %12527 = vst.msk [vmem:[%s20059_s5 + $0x248] sm:$0xff] %vm5112_vm5, %v12062_v47  ;;  %v12030_v28 = vcombine.low %v10687_v39, %v10688_v16  ;;  %v10489_v37 = vmax.f32 %v9049_v20, 0.0  ;;  %v9025_v6 = vcombine.high %v8547_v33, %v8547_v33  ;;  %v9032_v32 = vrot.slane %v8547_v33, %v20911_v54  ;;  %v12910_v41 = vpop.f32.mrb[34].mxu1 }
 0x760   :  { %v12037_v22 = vrot.slane %v12029_v5, %v20911_v54  ;;  %v10490_v63 = vmax.f32 %v9057_v42, 0.0  ;;  %v9076_v23 = vcombine.high %v8562_v26, %v8562_v26  ;;  %v9083_v45 = vrot.slane %v8562_v26, %v20911_v54  ;;  %v8806_v11 = vpop.f32.mrb[35].mxu1 }
 0x761   :  { %v12044_v14 = vrot.slane %v12030_v28, %v20911_v54  ;;  %v9039_v62 = vrot.slane %v9025_v6, %v20911_v54  ;;  %v9040_v15 = vcombine.high %v9032_v32, %v9032_v32  ;;  %v10485_v2 = vmax.f32 %v9032_v32, 0.0 }
 0x762   :  { %v10484_v10 = vmax.f32 %v9024_v1, 0.0  ;;  %v11103_v24 = vcombine.low %v10482_v58, %v10483_v51  ;;  %v9058_v12 = vcombine.high %v9056_v40, %v9056_v40  ;;  %v11128_v34 = vcombine.low %v10489_v37, %v10490_v63 }
 0x763   :  { %v12045_v44 = vcombine.low %v12037_v22, %v12044_v14  ;;  %v9041_v21 = vcombine.high %v9039_v62, %v9039_v62  ;;  %v10486_v57 = vmax.f32 %v9040_v15, 0.0  ;;  %v9091_v55 = vcombine.high %v9083_v45, %v9083_v45 }
 0x764   :  { %v11104_v48 = vcombine.low %v10484_v10, %v10485_v2  ;;  %v10487_v9 = vmax.f32 %v9039_v62, 0.0  ;;  %v19658_v8 = vrot.slane %v9076_v23, %v20911_v54  ;;  %v11111_v1 = vrot.slane %v11103_v24, %v20911_v54 }
 0x765   :  { %12526 = vst.msk [vmem:[%s20059_s5 + $0x240] sm:$0xff] %vm5112_vm5, %v12045_v44  ;;  %v10488_v31 = vmax.f32 %v9041_v21, 0.0  ;;  %v11126_v18 = vrot.slane %v10486_v57, %v20911_v54  ;;  %v10491_v0 = vmax.f32 %v9056_v40, 0.0  ;;  %v8557_v29 = vadd.f32 %v8556_v13, %v18306_v52 }
 0x766   :  { %v11118_v19 = vrot.slane %v11104_v48, %v20911_v54  ;;  %v10492_v46 = vmax.f32 %v9058_v12, 0.0  ;;  %v11142_v43 = vrot.slane %v11128_v34, %v20911_v54  ;;  %v8807_v50 = vadd.f32 %v8806_v11, %v18308_v3 }
 0x767   :  { %v11127_v56 = vcombine.low %v10487_v9, %v10488_v31  ;;  %12459 = vst.msk [vmem:[%s20059_s5 + $0x28] sm:$0x3] %vm12455_vm11, %v11126_v18  ;;  %v10498_v27 = vmax.f32 %v9091_v55, 0.0  ;;  %v9059_v61 = vcombine.high %v8557_v29, %v8557_v29  ;;  %v9066_v30 = vrot.slane %v8557_v29, %v20911_v54 }
 0x768   :  { %v11119_v53 = vcombine.low %v11111_v1, %v11118_v19  ;;  %v10499_v35 = vmax.f32 %v19658_v8, 0.0  ;;  %v8812_v4 = vadd.f32 %v12910_v41, %v18317_v59  ;;  %v9909_v25 = vcombine.high %v8807_v50, %v8807_v50 }
 0x769   :  { %v11135_v7 = vrot.slane %v11127_v56, %v20911_v54  ;;  %v9073_v13 = vrot.slane %v9059_v61, %v20911_v54  ;;  %v9074_v38 = vcombine.high %v9066_v30, %v9066_v30  ;;  %v11144_v39 = vcombine.low %v10491_v0, %v10492_v46 }
 0x76a   :  { %12458 = vst.msk [vmem:[%s20059_s5 + $0x20] sm:$0xff] %vm5112_vm5, %v11119_v53  ;;  %v10493_v33 = vmax.f32 %v9066_v30, 0.0  ;;  %v9916_v26 = vrot.slane %v8807_v50, %v20911_v54  ;;  %v10497_v58 = vmax.f32 %v9083_v45, 0.0  ;;  %v11169_v51 = vcombine.low %v10498_v27, %v10499_v35 }
 0x76b   :  { %v11143_v20 = vcombine.low %v11135_v7, %v11142_v43  ;;  %v9075_v47 = vcombine.high %v9073_v13, %v9073_v13  ;;  %v10494_v16 = vmax.f32 %v9074_v38, 0.0  ;;  %v10495_v5 = vmax.f32 %v9073_v13, 0.0 }
 0x76c   :  { %v19684_v40 = vrot.slane %v8812_v4, %v20911_v54  ;;  %v9923_v42 = vrot.slane %v9909_v25, %v20911_v54  ;;  %v9924_v32 = vcombine.high %v9916_v26, %v9916_v26  ;;  %v11152_v22 = vrot.slane %v11144_v39, %v20911_v54 }
 0x76d   :  { %12460 = vst.msk [vmem:[%s20059_s5 + $0x30] sm:$0xff] %vm5112_vm5, %v11143_v20  ;;  %v10496_v28 = vmax.f32 %v9075_v47, 0.0  ;;  %v11145_v37 = vcombine.low %v10493_v33, %v10494_v16  ;;  %v11167_v6 = vrot.slane %v10495_v5, %v20911_v54  ;;  %v10693_v23 = vmax.f32 %v9916_v26, 0.0 }
 0x76e   :  { %v9925_v63 = vcombine.high %v9923_v42, %v9923_v42  ;;  %v10694_v45 = vmax.f32 %v9924_v32, 0.0  ;;  %v10695_v62 = vmax.f32 %v9923_v42, 0.0  ;;  %v10697_v15 = vmax.f32 %v19684_v40, 0.0 }
 0x76f   :  { %v11159_v41 = vrot.slane %v11145_v37, %v20911_v54  ;;  %v11168_v14 = vcombine.low %v10496_v28, %v10497_v58  ;;  %12462 = vst.msk [vmem:[%s20059_s5 + $0x40] sm:$0x3] %vm12455_vm11, %v11167_v6  ;;  %v12069_v11 = vrot.slane %v10693_v23, %v20911_v54  ;;  %v11183_v10 = vrot.slane %v11169_v51, %v20911_v54 }
 0x770   :  { %v10696_v2 = vmax.f32 %v9925_v63, 0.0  ;;  %v12070_v44 = vcombine.low %v10694_v45, %v10695_v62  ;;  %v9092_v9 = vcombine.high %v19658_v8, %v19658_v8  ;;  %v9926_v18 = vcombine.high %v8812_v4, %v8812_v4 }
 0x771   :  { %v11160_v24 = vcombine.low %v11152_v22, %v11159_v41  ;;  %v11176_v12 = vrot.slane %v11168_v14, %v20911_v54  ;;  %12528 = vst.msk [vmem:[%s20059_s5 + $0x250] sm:$0x3] %vm12455_vm11, %v12069_v11  ;;  %v9941_v30 = vcombine.high %v19684_v40, %v19684_v40 }
 0x772   :  { %v12071_v34 = vcombine.low %v10696_v2, %v10697_v15  ;;  %v12078_v57 = vrot.slane %v12070_v44, %v20911_v54  ;;  %v10500_v53 = vmax.f32 %v9092_v9, 0.0  ;;  %v9940_v8 = vrot.slane %v9926_v18, %v20911_v54 }
 0x773   :  { %v11184_v21 = vcombine.low %v11176_v12, %v11183_v10  ;;  %12461 = vst.msk [vmem:[%s20059_s5 + $0x38] sm:$0xff] %vm5112_vm5, %v11160_v24  ;;  %v10698_v22 = vmax.f32 %v9941_v30, 0.0 }
 0x774   :  { %v12085_v48 = vrot.slane %v12071_v34, %v20911_v54  ;;  %v9942_v51 = vcombine.high %v9940_v8, %v9940_v8  ;;  %v10699_v63 = vmax.f32 %v9940_v8, 0.0 }
 0x775   :  { %12463 = vst.msk [vmem:[%s20059_s5 + $0x48] sm:$0xff] %vm5112_vm5, %v11184_v21 }
 0x776   :  { %v12086_v55 = vcombine.low %v12078_v57, %v12085_v48  ;;  %v10700_v15 = vmax.f32 %v9942_v51, 0.0  ;;  %v12087_v21 = vcombine.low %v10698_v22, %v10699_v63 }
 0x778   :  { %12529 = vst.msk [vmem:[%s20059_s5 + $0x258] sm:$0xff] %vm5112_vm5, %v12086_v55 }
 0x77c   :  { %v12838_v31 = vpop.f32.mrb[38].mxu0 }
 0x77d   :  { %v8572_v1 = vadd.f32 %v12838_v31, %v18298_v36  ;;  %v8566_v0 = vpop.f32.mrb[39].mxu0 }
 0x77e   :  { %v8567_v19 = vadd.f32 %v8566_v0, %v18304_v17  ;;  %v12913_v29 = vpop.f32.mrb[36].mxu1 }
 0x77f   :  { %v9110_v46 = vcombine.high %v8572_v1, %v8572_v1  ;;  %v9117_v43 = vrot.slane %v8572_v1, %v20911_v54  ;;  %v8822_v56 = vadd.f32 %v12913_v29, %v18293_v60  ;;  %v8816_v50 = vpop.f32.mrb[37].mxu1 }
 0x780   :  { %v9093_v27 = vcombine.high %v8567_v19, %v8567_v19  ;;  %v9100_v61 = vrot.slane %v8567_v19, %v20911_v54  ;;  %v8817_v47 = vadd.f32 %v8816_v50, %v18300_v49 }
 0x781   :  { %v9124_v7 = vrot.slane %v9110_v46, %v20911_v54  ;;  %v9125_v35 = vcombine.high %v9117_v43, %v9117_v43  ;;  %v9967_v38 = vrot.slane %v8822_v56, %v20911_v54  ;;  %v10505_v20 = vmax.f32 %v9117_v43, 0.0 }
 0x782   :  { %v9107_v4 = vrot.slane %v9093_v27, %v20911_v54  ;;  %v9108_v25 = vcombine.high %v9100_v61, %v9100_v61  ;;  %v10501_v13 = vmax.f32 %v9100_v61, 0.0  ;;  %v9943_v62 = vcombine.high %v8817_v47, %v8817_v47 }
 0x783   :  { %v9126_v39 = vcombine.high %v9124_v7, %v9124_v7  ;;  %v10506_v33 = vmax.f32 %v9125_v35, 0.0  ;;  %v10507_v40 = vmax.f32 %v9124_v7, 0.0  ;;  %v9975_v32 = vcombine.high %v9967_v38, %v9967_v38 }
 0x784   :  { %v9109_v16 = vcombine.high %v9107_v4, %v9107_v4  ;;  %v10502_v5 = vmax.f32 %v9108_v25, 0.0  ;;  %v10503_v26 = vmax.f32 %v9107_v4, 0.0  ;;  %v11185_v58 = vcombine.low %v10500_v53, %v10501_v13 }
 0x785   :  { %v10508_v42 = vmax.f32 %v9126_v39, 0.0  ;;  %v11209_v28 = vcombine.low %v10505_v20, %v10506_v33  ;;  %v9950_v10 = vrot.slane %v8817_v47, %v20911_v54  ;;  %v9960_v12 = vcombine.high %v8822_v56, %v8822_v56 }
 0x786   :  { %v10504_v37 = vmax.f32 %v9109_v16, 0.0  ;;  %v11186_v6 = vcombine.low %v10502_v5, %v10503_v26  ;;  %v11193_v41 = vrot.slane %v11185_v58, %v20911_v54  ;;  %v10706_v44 = vmax.f32 %v9975_v32, 0.0 }
 0x787   :  { %v11210_v23 = vcombine.low %v10507_v40, %v10508_v42  ;;  %v11217_v2 = vrot.slane %v11209_v28, %v20911_v54  ;;  %v9957_v34 = vrot.slane %v9943_v62, %v20911_v54  ;;  %v9958_v48 = vcombine.high %v9950_v10, %v9950_v10 }
 0x788   :  { %v11200_v14 = vrot.slane %v11186_v6, %v20911_v54  ;;  %v11208_v45 = vrot.slane %v10504_v37, %v20911_v54  ;;  %v10701_v55 = vmax.f32 %v9950_v10, 0.0  ;;  %v10705_v9 = vmax.f32 %v9967_v38, 0.0 }
 0x789   :  { %v11224_v11 = vrot.slane %v11210_v23, %v20911_v54  ;;  %v9959_v31 = vcombine.high %v9957_v34, %v9957_v34  ;;  %v10702_v18 = vmax.f32 %v9958_v48, 0.0  ;;  %v9974_v0 = vrot.slane %v9960_v12, %v20911_v54 }
 0x78a   :  { %v11201_v24 = vcombine.low %v11193_v41, %v11200_v14  ;;  %12465 = vst.msk [vmem:[%s20059_s5 + $0x58] sm:$0x3] %vm12455_vm11, %v11208_v45  ;;  %v12088_v1 = vcombine.low %v10700_v15, %v10701_v55  ;;  %v12112_v19 = vcombine.low %v10705_v9, %v10706_v44  ;;  %v10703_v29 = vmax.f32 %v9957_v34, 0.0 }
 0x78b   :  { %v11225_v57 = vcombine.low %v11217_v2, %v11224_v11  ;;  %v10704_v46 = vmax.f32 %v9959_v31, 0.0  ;;  %v12095_v43 = vrot.slane %v12087_v21, %v20911_v54  ;;  %v12110_v50 = vrot.slane %v10702_v18, %v20911_v54 }
 0x78c   :  { %12464 = vst.msk [vmem:[%s20059_s5 + $0x50] sm:$0xff] %vm5112_vm5, %v11201_v24  ;;  %v12102_v56 = vrot.slane %v12088_v1, %v20911_v54  ;;  %v9976_v61 = vcombine.high %v9974_v0, %v9974_v0  ;;  %v12126_v8 = vrot.slane %v12112_v19, %v20911_v54  ;;  %v10707_v33 = vmax.f32 %v9974_v0, 0.0 }
 0x78d   :  { %12466 = vst.msk [vmem:[%s20059_s5 + $0x60] sm:$0xff] %vm5112_vm5, %v11225_v57  ;;  %v12111_v53 = vcombine.low %v10703_v29, %v10704_v46 }
 0x78e   :  { %v12103_v27 = vcombine.low %v12095_v43, %v12102_v56  ;;  %12531 = vst.msk [vmem:[%s20059_s5 + $0x268] sm:$0x3] %vm12455_vm11, %v12110_v50  ;;  %v10708_v13 = vmax.f32 %v9976_v61, 0.0 }
 0x78f   :  { %v12119_v30 = vrot.slane %v12111_v53, %v20911_v54 }
 0x790   :  { %12530 = vst.msk [vmem:[%s20059_s5 + $0x260] sm:$0xff] %vm5112_vm5, %v12103_v27  ;;  %v12128_v58 = vcombine.low %v10707_v33, %v10708_v13 }
 0x791   :  { %v12127_v7 = vcombine.low %v12119_v30, %v12126_v8 }
 0x792   :  { %v12916_v35 = vpop.f32.mrb[38].mxu1  ;;  %v12136_v12 = vrot.slane %v12128_v58, %v20911_v54 }
 0x793   :  { %v8832_v4 = vadd.f32 %v12916_v35, %v18304_v17  ;;  %v8826_v25 = vpop.f32.mrb[39].mxu1  ;;  %12532 = vst.msk [vmem:[%s20059_s5 + $0x270] sm:$0xff] %vm5112_vm5, %v12127_v7 }
 0x794   :  { %v8827_v38 = vadd.f32 %v8826_v25, %v18306_v52 }
 0x795   :  { %v9994_v39 = vcombine.high %v8832_v4, %v8832_v4  ;;  %v10001_v20 = vrot.slane %v8832_v4, %v20911_v54 }
 0x796   :  { %v9977_v47 = vcombine.high %v8827_v38, %v8827_v38  ;;  %v9984_v16 = vrot.slane %v8827_v38, %v20911_v54 }
 0x797   :  { %v10008_v5 = vrot.slane %v9994_v39, %v20911_v54  ;;  %v10009_v26 = vcombine.high %v10001_v20, %v10001_v20  ;;  %v10713_v45 = vmax.f32 %v10001_v20, 0.0 }
 0x798   :  { %v9991_v51 = vrot.slane %v9977_v47, %v20911_v54  ;;  %v9992_v40 = vcombine.high %v9984_v16, %v9984_v16  ;;  %v10709_v6 = vmax.f32 %v9984_v16, 0.0 }
 0x799   :  { %v12841_v42 = vpop.f32.mrb[40].mxu0  ;;  %v10714_v28 = vmax.f32 %v10009_v26, 0.0  ;;  %v10715_v37 = vmax.f32 %v10008_v5, 0.0  ;;  %v10010_v30 = vcombine.high %v10008_v5, %v10008_v5 }
 0x79a   :  { %v8582_v32 = vadd.f32 %v12841_v42, %v18308_v3  ;;  %v8576_v22 = vpop.f32.mrb[41].mxu0  ;;  %v9993_v63 = vcombine.high %v9991_v51, %v9991_v51  ;;  %v10710_v23 = vmax.f32 %v9992_v40, 0.0  ;;  %v10711_v41 = vmax.f32 %v9991_v51, 0.0 }
 0x79b   :  { %v8577_v14 = vadd.f32 %v8576_v22, %v18298_v36  ;;  %v12153_v62 = vcombine.low %v10714_v28, %v10715_v37  ;;  %v10716_v16 = vmax.f32 %v10010_v30, 0.0 }
 0x79c   :  { %v19776_v15 = vrot.slane %v8582_v32, %v20911_v54  ;;  %v10712_v2 = vmax.f32 %v9993_v63, 0.0  ;;  %v12129_v11 = vcombine.low %v10709_v6, %v10710_v23  ;;  %v12151_v10 = vrot.slane %v10711_v41, %v20911_v54 }
 0x79d   :  { %v9127_v24 = vcombine.high %v8577_v14, %v8577_v14  ;;  %v9134_v57 = vrot.slane %v8577_v14, %v20911_v54  ;;  %v12167_v55 = vrot.slane %v12153_v62, %v20911_v54  ;;  %v9144_v35 = vcombine.high %v8582_v32, %v8582_v32 }
 0x79e   :  { %v10513_v44 = vmax.f32 %v19776_v15, 0.0  ;;  %v12143_v34 = vrot.slane %v12129_v11, %v20911_v54  ;;  %v12152_v21 = vcombine.low %v10712_v2, %v10713_v45  ;;  %12534 = vst.msk [vmem:[%s20059_s5 + $0x280] sm:$0x3] %vm12455_vm11, %v12151_v10  ;;  %v9159_v51 = vcombine.high %v19776_v15, %v19776_v15 }
 0x79f   :  { %v9141_v48 = vrot.slane %v9127_v24, %v20911_v54  ;;  %v9142_v1 = vcombine.high %v9134_v57, %v9134_v57  ;;  %v10509_v19 = vmax.f32 %v9134_v57, 0.0  ;;  %v9158_v5 = vrot.slane %v9144_v35, %v20911_v54 }
 0x7a0   :  { %v11249_v9 = vrot.slane %v10513_v44, %v20911_v54  ;;  %v12144_v31 = vcombine.low %v12136_v12, %v12143_v34  ;;  %v12160_v18 = vrot.slane %v12152_v21, %v20911_v54  ;;  %v10514_v21 = vmax.f32 %v9159_v51, 0.0 }
 0x7a1   :  { %v9143_v0 = vcombine.high %v9141_v48, %v9141_v48  ;;  %v10510_v46 = vmax.f32 %v9142_v1, 0.0  ;;  %v10511_v43 = vmax.f32 %v9141_v48, 0.0  ;;  %v9160_v12 = vcombine.high %v9158_v5, %v9158_v5 }
 0x7a2   :  { %12468 = vst.msk [vmem:[%s20059_s5 + $0x70] sm:$0x3] %vm12455_vm11, %v11249_v9  ;;  %v12168_v29 = vcombine.low %v12160_v18, %v12167_v55  ;;  %v10515_v57 = vmax.f32 %v9158_v5, 0.0 }
 0x7a3   :  { %12533 = vst.msk [vmem:[%s20059_s5 + $0x278] sm:$0xff] %vm5112_vm5, %v12144_v31  ;;  %v10512_v56 = vmax.f32 %v9143_v0, 0.0  ;;  %v11226_v50 = vcombine.low %v10509_v19, %v10510_v46 }
 0x7a4   :  { %12535 = vst.msk [vmem:[%s20059_s5 + $0x288] sm:$0xff] %vm5112_vm5, %v12168_v29 }
 0x7a5   :  { %v11227_v53 = vcombine.low %v10511_v43, %v10512_v56  ;;  %v11234_v27 = vrot.slane %v11226_v50, %v20911_v54  ;;  %v10516_v43 = vmax.f32 %v9160_v12, 0.0 }
 0x7a7   :  { %v11241_v61 = vrot.slane %v11227_v53, %v20911_v54  ;;  %v11250_v53 = vcombine.low %v10514_v21, %v10515_v57 }
 0x7a9   :  { %v11242_v8 = vcombine.low %v11234_v27, %v11241_v61 }
 0x7ab   :  { %12467 = vst.msk [vmem:[%s20059_s5 + $0x68] sm:$0xff] %vm5112_vm5, %v11242_v8 }
 0x7b4   :  { %v12919_v7 = vpop.f32.mrb[40].mxu1 }
 0x7b5   :  { %v8842_v4 = vadd.f32 %v12919_v7, %v18298_v36  ;;  %v8836_v25 = vpop.f32.mrb[41].mxu1 }
 0x7b6   :  { %v8837_v13 = vadd.f32 %v8836_v25, %v18304_v17 }
 0x7b7   :  { %v12844_v38 = vpop.f32.mrb[42].mxu0  ;;  %v10028_v39 = vcombine.high %v8842_v4, %v8842_v4  ;;  %v10035_v20 = vrot.slane %v8842_v4, %v20911_v54 }
 0x7b8   :  { %v19813_v33 = vadd.f32 %v12844_v38, %v18300_v49  ;;  %v8586_v47 = vpop.f32.mrb[43].mxu0  ;;  %v10011_v26 = vcombine.high %v8837_v13, %v8837_v13  ;;  %v10018_v58 = vrot.slane %v8837_v13, %v20911_v54  ;;  %v11258_v38 = vrot.slane %v11250_v53, %v20911_v54 }
 0x7b9   :  { %v10042_v40 = vrot.slane %v10028_v39, %v20911_v54  ;;  %v10043_v42 = vcombine.high %v10035_v20, %v10035_v20  ;;  %v10721_v63 = vmax.f32 %v10035_v20, 0.0  ;;  %v8587_v41 = vadd.f32 %v8586_v47, %v18317_v59 }
 0x7ba   :  { %v10025_v28 = vrot.slane %v10011_v26, %v20911_v54  ;;  %v10026_v37 = vcombine.high %v10018_v58, %v10018_v58  ;;  %v10717_v6 = vmax.f32 %v10018_v58, 0.0  ;;  %v9185_v32 = vrot.slane %v19813_v33, %v20911_v54 }
 0x7bb   :  { %v10044_v22 = vcombine.high %v10042_v40, %v10042_v40  ;;  %v10722_v23 = vmax.f32 %v10043_v42, 0.0  ;;  %v10723_v15 = vmax.f32 %v10042_v40, 0.0  ;;  %v9161_v1 = vcombine.high %v8587_v41, %v8587_v41 }
 0x7bc   :  { %v10027_v14 = vcombine.high %v10025_v28, %v10025_v28  ;;  %v10718_v45 = vmax.f32 %v10026_v37, 0.0  ;;  %v10719_v62 = vmax.f32 %v10025_v28, 0.0  ;;  %v12169_v2 = vcombine.low %v10716_v16, %v10717_v6 }
 0x7bd   :  { %v10724_v11 = vmax.f32 %v10044_v22, 0.0  ;;  %v12193_v10 = vcombine.low %v10721_v63, %v10722_v23  ;;  %v9193_v24 = vcombine.high %v9185_v32, %v9185_v32  ;;  %v9168_v46 = vrot.slane %v8587_v41, %v20911_v54 }
 0x7be   :  { %v10720_v44 = vmax.f32 %v10027_v14, 0.0  ;;  %v12170_v34 = vcombine.low %v10718_v45, %v10719_v62  ;;  %v12177_v9 = vrot.slane %v12169_v2, %v20911_v54  ;;  %v9175_v50 = vrot.slane %v9161_v1, %v20911_v54 }
 0x7bf   :  { %v12194_v48 = vcombine.low %v10723_v15, %v10724_v11  ;;  %v10522_v55 = vmax.f32 %v9193_v24, 0.0  ;;  %v12201_v0 = vrot.slane %v12193_v10, %v20911_v54  ;;  %v9176_v61 = vcombine.high %v9168_v46, %v9168_v46 }
 0x7c0   :  { %v12184_v31 = vrot.slane %v12170_v34, %v20911_v54  ;;  %v12192_v18 = vrot.slane %v10720_v44, %v20911_v54  ;;  %v10517_v8 = vmax.f32 %v9168_v46, 0.0  ;;  %v9177_v30 = vcombine.high %v9175_v50, %v9175_v50 }
 0x7c1   :  { %v12208_v19 = vrot.slane %v12194_v48, %v20911_v54  ;;  %v11290_v29 = vrot.slane %v10522_v55, %v20911_v54  ;;  %v10519_v7 = vmax.f32 %v9175_v50, 0.0  ;;  %v10518_v35 = vmax.f32 %v9176_v61, 0.0 }
 0x7c2   :  { %v12185_v56 = vcombine.low %v12177_v9, %v12184_v31  ;;  %12537 = vst.msk [vmem:[%s20059_s5 + $0x298] sm:$0x3] %vm12455_vm11, %v12192_v18  ;;  %v11251_v4 = vcombine.low %v10516_v43, %v10517_v8  ;;  %v10521_v25 = vmax.f32 %v9185_v32, 0.0  ;;  %v10520_v13 = vmax.f32 %v9177_v30, 0.0 }
 0x7c3   :  { %v12209_v27 = vcombine.low %v12201_v0, %v12208_v19  ;;  %12471 = vst.msk [vmem:[%s20059_s5 + $0x88] sm:$0x3] %vm12455_vm11, %v11290_v29  ;;  %v11267_v20 = vcombine.low %v10518_v35, %v10519_v7  ;;  %v9178_v47 = vcombine.high %v19813_v33, %v19813_v33 }
 0x7c4   :  { %12536 = vst.msk [vmem:[%s20059_s5 + $0x290] sm:$0xff] %vm5112_vm5, %v12185_v56  ;;  %v11265_v39 = vrot.slane %v11251_v4, %v20911_v54  ;;  %v11268_v16 = vcombine.low %v10520_v13, %v10521_v25 }
 0x7c5   :  { %12538 = vst.msk [vmem:[%s20059_s5 + $0x2a0] sm:$0xff] %vm5112_vm5, %v12209_v27  ;;  %v11275_v58 = vrot.slane %v11267_v20, %v20911_v54  ;;  %v9192_v51 = vrot.slane %v9178_v47, %v20911_v54 }
 0x7c6   :  { %v11266_v26 = vcombine.low %v11258_v38, %v11265_v39  ;;  %v11282_v5 = vrot.slane %v11268_v16, %v20911_v54 }
 0x7c7   :  { %v9194_v33 = vcombine.high %v9192_v51, %v9192_v51  ;;  %v10523_v41 = vmax.f32 %v9192_v51, 0.0 }
 0x7c8   :  { %12469 = vst.msk [vmem:[%s20059_s5 + $0x78] sm:$0xff] %vm5112_vm5, %v11266_v26  ;;  %v11283_v40 = vcombine.low %v11275_v58, %v11282_v5 }
 0x7c9   :  { %v10524_v6 = vmax.f32 %v9194_v33, 0.0 }
 0x7ca   :  { %12470 = vst.msk [vmem:[%s20059_s5 + $0x80] sm:$0xff] %vm5112_vm5, %v11283_v40 }
 0x7cb   :  { %v11291_v10 = vcombine.low %v10523_v41, %v10524_v6 }
 0x7cd   :  { %v11299_v56 = vrot.slane %v11291_v10, %v20911_v54 }
 0x7d1   :  { %v12847_v42 = vpop.f32.mrb[44].mxu0 }
 0x7d2   :  { %v8602_v28 = vadd.f32 %v12847_v42, %v18306_v52  ;;  %v8596_v37 = vpop.f32.mrb[45].mxu0 }
 0x7d3   :  { %v8597_v32 = vadd.f32 %v8596_v37, %v18293_v60 }
 0x7d4   :  { %v9212_v22 = vcombine.high %v8602_v28, %v8602_v28  ;;  %v9219_v63 = vrot.slane %v8602_v28, %v20911_v54  ;;  %v12922_v23 = vpop.f32.mrb[42].mxu1 }
 0x7d5   :  { %v9195_v14 = vcombine.high %v8597_v32, %v8597_v32  ;;  %v9202_v45 = vrot.slane %v8597_v32, %v20911_v54  ;;  %v8852_v62 = vadd.f32 %v12922_v23, %v18308_v3  ;;  %v8846_v2 = vpop.f32.mrb[43].mxu1 }
 0x7d6   :  { %v9226_v15 = vrot.slane %v9212_v22, %v20911_v54  ;;  %v9227_v11 = vcombine.high %v9219_v63, %v9219_v63  ;;  %v8847_v57 = vadd.f32 %v8846_v2, %v18298_v36  ;;  %v10529_v48 = vmax.f32 %v9219_v63, 0.0 }
 0x7d7   :  { %v9209_v24 = vrot.slane %v9195_v14, %v20911_v54  ;;  %v9210_v12 = vcombine.high %v9202_v45, %v9202_v45  ;;  %v19871_v21 = vrot.slane %v8852_v62, %v20911_v54  ;;  %v10525_v9 = vmax.f32 %v9202_v45, 0.0 }
 0x7d8   :  { %v10530_v44 = vmax.f32 %v9227_v11, 0.0  ;;  %v10531_v34 = vmax.f32 %v9226_v15, 0.0  ;;  %v10045_v43 = vcombine.high %v8847_v57, %v8847_v57  ;;  %v10052_v61 = vrot.slane %v8847_v57, %v20911_v54 }
 0x7d9   :  { %v9211_v55 = vcombine.high %v9209_v24, %v9209_v24  ;;  %v10526_v31 = vmax.f32 %v9210_v12, 0.0  ;;  %v10527_v1 = vmax.f32 %v9209_v24, 0.0  ;;  %v10729_v46 = vmax.f32 %v19871_v21, 0.0 }
 0x7da   :  { %v11331_v18 = vrot.slane %v10531_v34, %v20911_v54  ;;  %v11309_v0 = vcombine.low %v10529_v48, %v10530_v44  ;;  %v10059_v8 = vrot.slane %v10045_v43, %v20911_v54  ;;  %v10060_v4 = vcombine.high %v10052_v61, %v10052_v61 }
 0x7db   :  { %v10528_v19 = vmax.f32 %v9211_v55, 0.0  ;;  %v11292_v29 = vcombine.low %v10525_v9, %v10526_v31  ;;  %v12233_v27 = vrot.slane %v10729_v46, %v20911_v54  ;;  %v10725_v38 = vmax.f32 %v10052_v61, 0.0 }
 0x7dc   :  { %12474 = vst.msk [vmem:[%s20059_s5 + $0xa0] sm:$0x3] %vm12455_vm11, %v11331_v18  ;;  %v11323_v30 = vrot.slane %v11309_v0, %v20911_v54  ;;  %v10061_v25 = vcombine.high %v10059_v8, %v10059_v8  ;;  %v10726_v39 = vmax.f32 %v10060_v4, 0.0  ;;  %v10727_v20 = vmax.f32 %v10059_v8, 0.0 }
 0x7dd   :  { %v11306_v50 = vrot.slane %v11292_v29, %v20911_v54  ;;  %v11308_v53 = vcombine.low %v10527_v1, %v10528_v19  ;;  %12540 = vst.msk [vmem:[%s20059_s5 + $0x2b0] sm:$0x3] %vm12455_vm11, %v12233_v27  ;;  %v10062_v40 = vcombine.high %v8852_v62, %v8852_v62  ;;  %v9228_v33 = vcombine.high %v9226_v15, %v9226_v15 }
 0x7de   :  { %v10728_v47 = vmax.f32 %v10061_v25, 0.0  ;;  %v12210_v16 = vcombine.low %v10725_v38, %v10726_v39  ;;  %v10077_v45 = vcombine.high %v19871_v21, %v19871_v21 }
 0x7df   :  { %v11307_v7 = vcombine.low %v11299_v56, %v11306_v50  ;;  %v11316_v35 = vrot.slane %v11308_v53, %v20911_v54  ;;  %v19906_v28 = vrot.slane %v10062_v40, %v20911_v54  ;;  %v10532_v14 = vmax.f32 %v9228_v33, 0.0 }
 0x7e0   :  { %v12211_v26 = vcombine.low %v10727_v20, %v10728_v47  ;;  %v12218_v58 = vrot.slane %v12210_v16, %v20911_v54 }
 0x7e1   :  { %v11324_v13 = vcombine.low %v11316_v35, %v11323_v30  ;;  %12472 = vst.msk [vmem:[%s20059_s5 + $0x90] sm:$0xff] %vm5112_vm5, %v11307_v7  ;;  %v10078_v11 = vcombine.high %v19906_v28, %v19906_v28 }
 0x7e2   :  { %v12225_v5 = vrot.slane %v12211_v26, %v20911_v54 }
 0x7e3   :  { %12473 = vst.msk [vmem:[%s20059_s5 + $0x98] sm:$0xff] %vm5112_vm5, %v11324_v13 }
 0x7e4   :  { %v12226_v51 = vcombine.low %v12218_v58, %v12225_v5 }
 0x7e6   :  { %12539 = vst.msk [vmem:[%s20059_s5 + $0x2a8] sm:$0xff] %vm5112_vm5, %v12226_v51 }
 0x7f6   :  { %v12850_v42 = vpop.f32.mrb[46].mxu0 }
 0x7f7   :  { %v8612_v37 = vadd.f32 %v12850_v42, %v18304_v17  ;;  %v8606_v6 = vpop.f32.mrb[47].mxu0 }
 0x7f8   :  { %v8607_v32 = vadd.f32 %v8606_v6, %v18304_v17  ;;  %v12925_v22 = vpop.f32.mrb[44].mxu1  ;;  %v10730_v6 = vmax.f32 %v10077_v45, 0.0 }
 0x7f9   :  { %v9246_v63 = vcombine.high %v8612_v37, %v8612_v37  ;;  %v9253_v23 = vrot.slane %v8612_v37, %v20911_v54  ;;  %v8856_v41 = vpop.f32.mrb[45].mxu1  ;;  %v8862_v55 = vadd.f32 %v12925_v22, %v18300_v49 }
 0x7fa   :  { %v9229_v62 = vcombine.high %v8607_v32, %v8607_v32  ;;  %v9236_v2 = vrot.slane %v8607_v32, %v20911_v54  ;;  %v12853_v15 = vpop.f32.mrb[48].mxu0  ;;  %v8857_v35 = vadd.f32 %v8856_v41, %v18317_v59 }
 0x7fb   :  { %v9260_v10 = vrot.slane %v9246_v63, %v20911_v54  ;;  %v9261_v24 = vcombine.high %v9253_v23, %v9253_v23  ;;  %v8622_v12 = vadd.f32 %v12853_v15, %v18298_v36  ;;  %v8616_v44 = vpop.f32.mrb[49].mxu0  ;;  %v10537_v46 = vmax.f32 %v9253_v23, 0.0 }
 0x7fc   :  { %v9243_v34 = vrot.slane %v9229_v62, %v20911_v54  ;;  %v9244_v57 = vcombine.high %v9236_v2, %v9236_v2  ;;  %v10533_v48 = vmax.f32 %v9236_v2, 0.0  ;;  %v19923_v8 = vrot.slane %v8862_v55, %v20911_v54 }
 0x7fd   :  { %v9262_v21 = vcombine.high %v9260_v10, %v9260_v10  ;;  %v10538_v9 = vmax.f32 %v9261_v24, 0.0  ;;  %v10539_v31 = vmax.f32 %v9260_v10, 0.0  ;;  %v9280_v18 = vcombine.high %v8622_v12, %v8622_v12 }
 0x7fe   :  { %v9245_v1 = vcombine.high %v9243_v34, %v9243_v34  ;;  %v10534_v0 = vmax.f32 %v9244_v57, 0.0  ;;  %v10535_v19 = vmax.f32 %v9243_v34, 0.0  ;;  %v11332_v29 = vcombine.low %v10532_v14, %v10533_v48 }
 0x7ff   :  { %v10540_v43 = vmax.f32 %v9262_v21, 0.0  ;;  %v9287_v56 = vrot.slane %v8622_v12, %v20911_v54  ;;  %v9294_v50 = vrot.slane %v9280_v18, %v20911_v54  ;;  %v11350_v53 = vcombine.low %v10538_v9, %v10539_v31 }
 0x800   :  { %v10536_v27 = vmax.f32 %v9245_v1, 0.0  ;;  %v11333_v61 = vcombine.low %v10534_v0, %v10535_v19  ;;  %v11340_v4 = vrot.slane %v11332_v29, %v20911_v54  ;;  %v10111_v16 = vcombine.high %v19923_v8, %v19923_v8 }
 0x801   :  { %v11372_v49 = vrot.slane %v10540_v43, %v20911_v54  ;;  %v9295_v30 = vcombine.high %v9287_v56, %v9287_v56  ;;  %v9296_v7 = vcombine.high %v9294_v50, %v9294_v50  ;;  %v10545_v38 = vmax.f32 %v9287_v56, 0.0 }
 0x802   :  { %v11347_v25 = vrot.slane %v11333_v61, %v20911_v54  ;;  %v11349_v13 = vcombine.low %v10536_v27, %v10537_v46  ;;  %v10547_v20 = vmax.f32 %v9294_v50, 0.0  ;;  %v11364_v26 = vrot.slane %v11350_v53, %v20911_v54 }
 0x803   :  { %12477 = vst.msk [vmem:[%s20059_s5 + $0xb8] sm:$0x3] %vm12455_vm11, %v11372_v49  ;;  %v10546_v39 = vmax.f32 %v9295_v30, 0.0  ;;  %v10548_v47 = vmax.f32 %v9296_v7, 0.0  ;;  %v8617_v51 = vadd.f32 %v8616_v44, %v18298_v36  ;;  %v10096_v42 = vcombine.high %v8862_v55, %v8862_v55 }
 0x804   :  { %v11348_v58 = vcombine.low %v11340_v4, %v11347_v25  ;;  %v11357_v5 = vrot.slane %v11349_v13, %v20911_v54  ;;  %v10738_v37 = vmax.f32 %v10111_v16, 0.0  ;;  %v10731_v23 = vmax.f32 %v19906_v28, 0.0 }
 0x805   :  { %v11390_v40 = vcombine.low %v10545_v38, %v10546_v39  ;;  %v11391_v33 = vcombine.low %v10547_v20, %v10548_v47  ;;  %v9263_v22 = vcombine.high %v8617_v51, %v8617_v51  ;;  %v9270_v63 = vrot.slane %v8617_v51, %v20911_v54 }
 0x806   :  { %v11365_v32 = vcombine.low %v11357_v5, %v11364_v26  ;;  %12475 = vst.msk [vmem:[%s20059_s5 + $0xa8] sm:$0xff] %vm5112_vm5, %v11348_v58  ;;  %v12274_v14 = vrot.slane %v10738_v37, %v20911_v54  ;;  %v10079_v2 = vcombine.high %v8857_v35, %v8857_v35  ;;  %v10732_v15 = vmax.f32 %v10078_v11, 0.0 }
 0x807   :  { %v11398_v41 = vrot.slane %v11390_v40, %v20911_v54  ;;  %v11405_v36 = vrot.slane %v11391_v33, %v20911_v54  ;;  %v9277_v45 = vrot.slane %v9263_v22, %v20911_v54  ;;  %v9278_v62 = vcombine.high %v9270_v63, %v9270_v63  ;;  %v21476_v40 = vld [vmem:[#allocation13_spill] sm:$0xff] }
 0x808   :  { %12476 = vst.msk [vmem:[%s20059_s5 + $0xb0] sm:$0xff] %vm5112_vm5, %v11365_v32  ;;  %v10110_v24 = vrot.slane %v10096_v42, %v20911_v54  ;;  %v10086_v28 = vrot.slane %v8857_v35, %v20911_v54  ;;  %v10541_v44 = vmax.f32 %v9270_v63, 0.0  ;;  %v10093_v57 = vrot.slane %v10079_v2, %v20911_v54 }
 0x809   :  { %v11406_v10 = vcombine.low %v11398_v41, %v11405_v36  ;;  %12543 = vst.msk [vmem:[%s20059_s5 + $0x2c8] sm:$0x3] %vm12455_vm11, %v12274_v14  ;;  %v9279_v12 = vcombine.high %v9277_v45, %v9277_v45  ;;  %v10542_v34 = vmax.f32 %v9278_v62, 0.0  ;;  %v12234_v48 = vcombine.low %v10730_v6, %v10731_v23 }
 0x80a   :  { %v10543_v11 = vmax.f32 %v9277_v45, 0.0  ;;  %v10094_v55 = vcombine.high %v10086_v28, %v10086_v28  ;;  %v10733_v21 = vmax.f32 %v10086_v28, 0.0  ;;  %v10095_v18 = vcombine.high %v10093_v57, %v10093_v57 }
 0x80b   :  { %12479 = vst.msk [vmem:[%s20059_s5 + $0xc8] sm:$0xff] %vm5112_vm5, %v11406_v10  ;;  %v10544_v9 = vmax.f32 %v9279_v12, 0.0  ;;  %v11373_v31 = vcombine.low %v10541_v44, %v10542_v34  ;;  %v10735_v1 = vmax.f32 %v10093_v57, 0.0  ;;  %v10112_v0 = vcombine.high %v10110_v24, %v10110_v24 }
 0x80c   :  { %v10734_v19 = vmax.f32 %v10094_v55, 0.0  ;;  %v12235_v29 = vcombine.low %v10732_v15, %v10733_v21  ;;  %v10737_v46 = vmax.f32 %v19923_v8, 0.0  ;;  %v10736_v56 = vmax.f32 %v10095_v18, 0.0 }
 0x80d   :  { %v11374_v43 = vcombine.low %v10543_v11, %v10544_v9  ;;  %v12242_v50 = vrot.slane %v12234_v48, %v20911_v54  ;;  %v11381_v49 = vrot.slane %v11373_v31, %v20911_v54  ;;  %v10740_v25 = vmax.f32 %v10112_v0, 0.0 }
 0x80e   :  { %v12249_v53 = vrot.slane %v12235_v29, %v20911_v54  ;;  %v12251_v27 = vcombine.low %v10734_v19, %v10735_v1  ;;  %v12928_v61 = vpop.f32.mrb[46].mxu1  ;;  %v12252_v7 = vcombine.low %v10736_v56, %v10737_v46  ;;  %v10739_v26 = vmax.f32 %v10110_v24, 0.0 }
 0x80f   :  { %v11388_v30 = vrot.slane %v11374_v43, %v20911_v54  ;;  %v8872_v35 = vadd.f32 %v12928_v61, %v18306_v52  ;;  %v8866_v4 = vpop.f32.mrb[47].mxu1  ;;  %v10557_v33 = vmax.f32 %v21476_v40, 0.0 }
 0x810   :  { %v12250_v13 = vcombine.low %v12242_v50, %v12249_v53  ;;  %v12259_v8 = vrot.slane %v12251_v27, %v20911_v54  ;;  %v8867_v38 = vadd.f32 %v8866_v4, %v18293_v60  ;;  %v12266_v20 = vrot.slane %v12252_v7, %v20911_v54 }
 0x811   :  { %v11389_v39 = vcombine.low %v11381_v49, %v11388_v30  ;;  %v10130_v47 = vcombine.high %v8872_v35, %v8872_v35  ;;  %v10137_v16 = vrot.slane %v8872_v35, %v20911_v54  ;;  %v12275_v42 = vcombine.low %v10739_v26, %v10740_v25 }
 0x812   :  { %12541 = vst.msk [vmem:[%s20059_s5 + $0x2b8] sm:$0xff] %vm5112_vm5, %v12250_v13  ;;  %v10113_v52 = vcombine.high %v8867_v38, %v8867_v38  ;;  %v10120_v58 = vrot.slane %v8867_v38, %v20911_v54  ;;  %v12267_v60 = vcombine.low %v12259_v8, %v12266_v20 }
 0x813   :  { %12478 = vst.msk [vmem:[%s20059_s5 + $0xc0] sm:$0xff] %vm5112_vm5, %v11389_v39  ;;  %v10144_v5 = vrot.slane %v10130_v47, %v20911_v54  ;;  %v10145_v51 = vcombine.high %v10137_v16, %v10137_v16  ;;  %v10745_v32 = vmax.f32 %v10137_v16, 0.0  ;;  %v12283_v11 = vrot.slane %v12275_v42, %v20911_v54 }
 0x814   :  { %v10127_v37 = vrot.slane %v10113_v52, %v20911_v54  ;;  %v10128_v6 = vcombine.high %v10120_v58, %v10120_v58  ;;  %12542 = vst.msk [vmem:[%s20059_s5 + $0x2c0] sm:$0xff] %vm5112_vm5, %v12267_v60  ;;  %v10741_v23 = vmax.f32 %v10120_v58, 0.0 }
 0x815   :  { %v10746_v22 = vmax.f32 %v10145_v51, 0.0  ;;  %v10747_v63 = vmax.f32 %v10144_v5, 0.0  ;;  %v10146_v36 = vcombine.high %v10144_v5, %v10144_v5 }
 0x816   :  { %v12931_v41 = vpop.f32.mrb[48].mxu1  ;;  %v10129_v14 = vcombine.high %v10127_v37, %v10127_v37  ;;  %v10742_v45 = vmax.f32 %v10128_v6, 0.0  ;;  %v10743_v24 = vmax.f32 %v10127_v37, 0.0 }
 0x817   :  { %v8882_v62 = vadd.f32 %v12931_v41, %v18304_v17  ;;  %v8876_v2 = vpop.f32.mrb[49].mxu1  ;;  %v12293_v15 = vcombine.low %v10745_v32, %v10746_v22  ;;  %v12315_v10 = vrot.slane %v10747_v63, %v20911_v54  ;;  %v10748_v19 = vmax.f32 %v10146_v36, 0.0 }
 0x818   :  { %v8877_v28 = vadd.f32 %v8876_v2, %v18304_v17  ;;  %v10744_v12 = vmax.f32 %v10129_v14, 0.0  ;;  %v12276_v44 = vcombine.low %v10741_v23, %v10742_v45 }
 0x819   :  { %v10164_v34 = vcombine.high %v8882_v62, %v8882_v62  ;;  %v10171_v57 = vrot.slane %v8882_v62, %v20911_v54  ;;  %12546 = vst.msk [vmem:[%s20059_s5 + $0x2e0] sm:$0x3] %vm12455_vm11, %v12315_v10  ;;  %v12307_v56 = vrot.slane %v12293_v15, %v20911_v54 }
 0x81a   :  { %v12856_v48 = vpop.f32.mrb[50].mxu0  ;;  %v10147_v21 = vcombine.high %v8877_v28, %v8877_v28  ;;  %v10154_v9 = vrot.slane %v8877_v28, %v20911_v54  ;;  %v12290_v17 = vrot.slane %v12276_v44, %v20911_v54  ;;  %v12292_v18 = vcombine.low %v10743_v24, %v10744_v12 }
 0x81b   :  { %v8632_v55 = vadd.f32 %v12856_v48, %v18317_v59  ;;  %v8626_v31 = vpop.f32.mrb[51].mxu0  ;;  %v10178_v1 = vrot.slane %v10164_v34, %v20911_v54  ;;  %v10179_v0 = vcombine.high %v10171_v57, %v10171_v57  ;;  %v10753_v13 = vmax.f32 %v10171_v57, 0.0 }
 0x81c   :  { %v10161_v43 = vrot.slane %v10147_v21, %v20911_v54  ;;  %v12291_v50 = vcombine.low %v12283_v11, %v12290_v17  ;;  %v12300_v59 = vrot.slane %v12292_v18, %v20911_v54  ;;  %v10162_v4 = vcombine.high %v10154_v9, %v10154_v9 }
 0x81d   :  { %v9314_v29 = vcombine.high %v8632_v55, %v8632_v55  ;;  %v9321_v46 = vrot.slane %v8632_v55, %v20911_v54  ;;  %v10180_v53 = vcombine.high %v10178_v1, %v10178_v1  ;;  %v10754_v27 = vmax.f32 %v10179_v0, 0.0 }
 0x81e   :  { %v10755_v61 = vmax.f32 %v10178_v1, 0.0  ;;  %v12308_v7 = vcombine.low %v12300_v59, %v12307_v56  ;;  %12544 = vst.msk [vmem:[%s20059_s5 + $0x2d0] sm:$0xff] %vm5112_vm5, %v12291_v50  ;;  %v10163_v25 = vcombine.high %v10161_v43, %v10161_v43  ;;  %v10749_v47 = vmax.f32 %v10154_v9, 0.0 }
 0x81f   :  { %v9328_v49 = vrot.slane %v9314_v29, %v20911_v54  ;;  %v9329_v30 = vcombine.high %v9321_v46, %v9321_v46  ;;  %v10756_v35 = vmax.f32 %v10180_v53, 0.0  ;;  %v10750_v16 = vmax.f32 %v10162_v4, 0.0 }
 0x820   :  { %12545 = vst.msk [vmem:[%s20059_s5 + $0x2d8] sm:$0xff] %vm5112_vm5, %v12308_v7  ;;  %v10751_v26 = vmax.f32 %v10161_v43, 0.0  ;;  %v12334_v52 = vcombine.low %v10754_v27, %v10755_v61  ;;  %v10752_v5 = vmax.f32 %v10163_v25, 0.0  ;;  %v12316_v51 = vcombine.low %v10748_v19, %v10749_v47 }
 0x821   :  { %v9330_v8 = vcombine.high %v9328_v49, %v9328_v49  ;;  %v10554_v38 = vmax.f32 %v9329_v30, 0.0  ;;  %v10555_v39 = vmax.f32 %v9328_v49, 0.0  ;;  %v12356_v20 = vrot.slane %v10756_v35, %v20911_v54 }
 0x822   :  { %v12317_v42 = vcombine.low %v10750_v16, %v10751_v26  ;;  %v8627_v37 = vadd.f32 %v8626_v31, %v18308_v3  ;;  %v12333_v32 = vcombine.low %v10752_v5, %v10753_v13  ;;  %v12324_v22 = vrot.slane %v12316_v51, %v20911_v54 }
 0x823   :  { %v10556_v58 = vmax.f32 %v9330_v8, 0.0  ;;  %v11431_v60 = vcombine.low %v10554_v38, %v10555_v39  ;;  %12549 = vst.msk [vmem:[%s20059_s5 + $0x2f8] sm:$0x3] %vm12455_vm11, %v12356_v20  ;;  %v12348_v36 = vrot.slane %v12334_v52, %v20911_v54  ;;  %v10553_v34 = vmax.f32 %v9321_v46, 0.0 }
 0x824   :  { %v12331_v63 = vrot.slane %v12317_v42, %v20911_v54  ;;  %v9297_v23 = vcombine.high %v8627_v37, %v8627_v37  ;;  %v9304_v41 = vrot.slane %v8627_v37, %v20911_v54  ;;  %v12341_v62 = vrot.slane %v12333_v32, %v20911_v54 }
 0x825   :  { %v11432_v6 = vcombine.low %v10556_v58, %v10557_v33  ;;  %v11439_v14 = vrot.slane %v11431_v60, %v20911_v54 }
 0x826   :  { %v12332_v3 = vcombine.low %v12324_v22, %v12331_v63  ;;  %v9311_v40 = vrot.slane %v9297_v23, %v20911_v54  ;;  %v9312_v33 = vcombine.high %v9304_v41, %v9304_v41  ;;  %v10549_v2 = vmax.f32 %v9304_v41, 0.0 }
 0x827   :  { %v11446_v45 = vrot.slane %v11432_v6, %v20911_v54  ;;  %v12349_v10 = vcombine.low %v12341_v62, %v12348_v36 }
 0x828   :  { %12547 = vst.msk [vmem:[%s20059_s5 + $0x2e8] sm:$0xff] %vm5112_vm5, %v12332_v3  ;;  %v9313_v24 = vcombine.high %v9311_v40, %v9311_v40  ;;  %v10550_v28 = vmax.f32 %v9312_v33, 0.0  ;;  %v10551_v12 = vmax.f32 %v9311_v40, 0.0  ;;  %v11413_v44 = vrot.slane %v10549_v2, %v20911_v54 }
 0x829   :  { %v11447_v15 = vcombine.low %v11439_v14, %v11446_v45  ;;  %12548 = vst.msk [vmem:[%s20059_s5 + $0x2f0] sm:$0xff] %vm5112_vm5, %v12349_v10 }
 0x82a   :  { %v10552_v57 = vmax.f32 %v9313_v24, 0.0  ;;  %v11414_v48 = vcombine.low %v10550_v28, %v10551_v12  ;;  %12480 = vst.msk [vmem:[%s20059_s5 + $0xd0] sm:$0x3] %vm12455_vm11, %v11413_v44 }
 0x82b   :  { %12482 = vst.msk [vmem:[%s20059_s5 + $0xe0] sm:$0xff] %vm5112_vm5, %v11447_v15 }
 0x82c   :  { %v11415_v11 = vcombine.low %v10552_v57, %v10553_v34  ;;  %v11422_v55 = vrot.slane %v11414_v48, %v20911_v54 }
 0x82e   :  { %v11429_v21 = vrot.slane %v11415_v11, %v20911_v54 }
 0x830   :  { %v11430_v9 = vcombine.low %v11422_v55, %v11429_v21 }
 0x832   :  { %12481 = vst.msk [vmem:[%s20059_s5 + $0xd8] sm:$0xff] %vm5112_vm5, %v11430_v9 }

</bundles_post_ra>
